<compile_context>
chip_gen: v5e
topology: v5e:2x2
jax: 0.10.0
libtpu: 0.0.40
codegen_flags: <defaults>
</compile_context>

<pallas_src>
import functools

import numpy as np
import jax
import jax.numpy as jnp
from jax.experimental import pallas as pl
from jax.experimental.pallas import tpu as pltpu

_BF16 = jnp.bfloat16
_EPS = 1e-5
_EW_LANES = 128


def _vmem_limit_bytes():
    # per-generation VMEM budget (half of physical, capped) per perf review
    try:
        cap = int(pltpu.get_tpu_info().vmem_capacity_bytes)
        return min(96 * 1024 * 1024, cap // 2)
    except Exception:
        return 32 * 1024 * 1024


_VMEM_LIMIT = _vmem_limit_bytes()


def _cparams(sem):
    return pltpu.CompilerParams(dimension_semantics=sem,
                                vmem_limit_bytes=_VMEM_LIMIT)


def _pick_tile(n, candidates=(1024, 512, 256, 128, 64, 32, 16, 8)):
    for c in candidates:
        if n >= c and n % c == 0:
            return c
    return n


# ----------------------------------------------------------------------------
# shared in-kernel helpers (traced values only)
# ----------------------------------------------------------------------------

def _act_fn(y, act):
    if act == "silu":
        return y * jax.nn.sigmoid(y)
    if act == "sigmoid":
        return jax.nn.sigmoid(y)
    return y


def _gn_epilogue(y, gamma, beta, pmat, count):
    """GroupNorm (torch semantics, biased var) on a (count, O) f32 block.

    gamma/beta: (1, O) f32.  pmat: (O, O) group-averaging projection."""
    inv = 1.0 / float(count)
    s = jnp.sum(y, axis=0, keepdims=True) * inv            # per-channel mean
    q = jnp.sum(y * y, axis=0, keepdims=True) * inv        # per-channel E[x^2]
    st = jnp.concatenate([s, q], axis=0)                   # (2, O)
    gm = jnp.dot(st, pmat, preferred_element_type=jnp.float32)
    mean = gm[0:1]
    var = jnp.maximum(gm[1:2] - mean * mean, 0.0)
    scale = jax.lax.rsqrt(var + _EPS) * gamma
    shift = beta - mean * scale
    return y * scale + shift


@functools.lru_cache(maxsize=None)
def _group_proj(C, groups=32):
    cs = C // groups
    p = np.zeros((C, C), np.float32)
    for g in range(groups):
        p[g * cs:(g + 1) * cs, g * cs:(g + 1) * cs] = 1.0 / cs
    return jnp.asarray(p)


# ----------------------------------------------------------------------------
# Fused stride-1 conv (+GroupNorm) (+act) kernel, NHWC, grid over batch
# ----------------------------------------------------------------------------

@functools.lru_cache(maxsize=None)
def _conv_gn_call(N, H, W, C, O, k, pad, use_gn, act, out_dtype):
    Hp, Wp = H + 2 * pad, W + 2 * pad
    Ho, Wo = Hp - k + 1, Wp - k + 1
    HW = Ho * Wo
    is_1x1 = (k == 1)

    def compute(x, w_ref, b, gn):
        acc = jnp.zeros((HW, O), jnp.float32)
        if is_1x1:
            acc = acc + jnp.dot(x, w_ref[0], preferred_element_type=jnp.float32)
        else:
            for ki in range(k):
                for kj in range(k):
                    win = jax.lax.slice(
                        x, (ki, kj, 0), (ki + Ho, kj + Wo, C)).reshape(HW, C)
                    acc = acc + jnp.dot(win, w_ref[ki * k + kj],
                                        preferred_element_type=jnp.float32)
        y = acc + b
        if use_gn:
            gamma, beta, pmat = gn
            y = _gn_epilogue(y, gamma, beta, pmat, HW)
        return _act_fn(y, act)

    if use_gn:
        def kernel(x_ref, w_ref, b_ref, g_ref, be_ref, p_ref, o_ref):
            y = compute(x_ref[0], w_ref, b_ref[...],
                        (g_ref[...], be_ref[...], p_ref[...]))
            o_ref[0] = (y if is_1x1 else y.reshape(Ho, Wo, O)).astype(out_dtype)
    else:
        def kernel(x_ref, w_ref, b_ref, o_ref):
            y = compute(x_ref[0], w_ref, b_ref[...], None)
            o_ref[0] = (y if is_1x1 else y.reshape(Ho, Wo, O)).astype(out_dtype)

    if is_1x1:
        x_spec = pl.BlockSpec((1, H * W, C), lambda n: (n, 0, 0))
        out_shape = jax.ShapeDtypeStruct((N, H * W, O), out_dtype)
        out_spec = pl.BlockSpec((1, H * W, O), lambda n: (n, 0, 0))
    else:
        x_spec = pl.BlockSpec((1, Hp, Wp, C), lambda n: (n, 0, 0, 0))
        out_shape = jax.ShapeDtypeStruct((N, Ho, Wo, O), out_dtype)
        out_spec = pl.BlockSpec((1, Ho, Wo, O), lambda n: (n, 0, 0, 0))

    in_specs = [x_spec,
                pl.BlockSpec((k * k, C, O), lambda n: (0, 0, 0)),   # weights
                pl.BlockSpec((1, O), lambda n: (0, 0))]             # bias
    if use_gn:
        in_specs += [pl.BlockSpec((1, O), lambda n: (0, 0)),        # gamma
                     pl.BlockSpec((1, O), lambda n: (0, 0)),        # beta
                     pl.BlockSpec((O, O), lambda n: (0, 0))]        # group proj

    return pl.pallas_call(
        kernel,
        out_shape=out_shape,
        grid_spec=pltpu.PrefetchScalarGridSpec(
            num_scalar_prefetch=0, grid=(N,),
            in_specs=in_specs, out_specs=out_spec),
        compiler_params=_cparams(("parallel",)),
    )


def conv_gn_act(x, p, act="silu", use_gn=True):
    """stride-1 conv (k in {1,3,5}, pad=k//2) fused with GroupNorm(32)+act."""
    N, H, W, C = x.shape
    k, O = p["k"], p["cout"]
    pad = 0 if k == 1 else k // 2
    call = _conv_gn_call(N, H, W, C, O, k, pad, use_gn, act, _BF16)
    if k == 1:
        x_in = x.astype(_BF16).reshape(N, H * W, C)
    else:
        x_in = jnp.pad(x.astype(_BF16), ((0, 0), (pad, pad), (pad, pad), (0, 0)))
    args = [x_in, p["wk"], p["b"]]
    if use_gn:
        args += [p["gamma"], p["beta"], _group_proj(O, 32)]
    y = call(*args)
    if k == 1:
        y = y.reshape(N, H, W, O)
    return y


# ----------------------------------------------------------------------------
# Fixed-operator kernels: scharr gate and LOG gate (+add), fully fused
# ----------------------------------------------------------------------------

@functools.lru_cache(maxsize=None)
def _scharr_gate_call(N, H, W, C, out_dtype):
    Hp, Wp = H + 2, W + 2
    HW = H * W

    def kernel(x_ref, wx_ref, wy_ref, o_ref):
        x = x_ref[0]
        ax = jnp.zeros((HW, C), jnp.float32)
        ay = jnp.zeros((HW, C), jnp.float32)
        center = None
        for ki in range(3):
            for kj in range(3):
                win = jax.lax.slice(x, (ki, kj, 0),
                                    (ki + H, kj + W, C)).reshape(HW, C)
                if ki == 1 and kj == 1:
                    center = win
                ax = ax + jnp.dot(win, wx_ref[ki * 3 + kj],
                                  preferred_element_type=jnp.float32)
                ay = ay + jnp.dot(win, wy_ref[ki * 3 + kj],
                                  preferred_element_type=jnp.float32)
        g = jnp.sqrt(ax * ax + ay * ay)
        y = jax.nn.sigmoid(g) * center.astype(jnp.float32)
        o_ref[0] = y.reshape(H, W, C).astype(out_dtype)

    return pl.pallas_call(
        kernel,
        out_shape=jax.ShapeDtypeStruct((N, H, W, C), out_dtype),
        grid_spec=pltpu.PrefetchScalarGridSpec(
            num_scalar_prefetch=0, grid=(N,),
            in_specs=[pl.BlockSpec((1, Hp, Wp, C), lambda n: (n, 0, 0, 0)),
                      pl.BlockSpec((9, C, C), lambda n: (0, 0, 0)),
                      pl.BlockSpec((9, C, C), lambda n: (0, 0, 0))],
            out_specs=pl.BlockSpec((1, H, W, C), lambda n: (n, 0, 0, 0))),
        compiler_params=_cparams(("parallel",)),
    )


@functools.lru_cache(maxsize=None)
def _log_gate_call(N, H, W, C, out_dtype):
    Hp, Wp = H + 4, W + 4
    HW = H * W

    def kernel(x_ref, w_ref, o_ref):
        x = x_ref[0]
        acc = jnp.zeros((HW, C), jnp.float32)
        center = None
        for ki in range(5):
            for kj in range(5):
                win = jax.lax.slice(x, (ki, kj, 0),
                                    (ki + H, kj + W, C)).reshape(HW, C)
                if ki == 2 and kj == 2:
                    center = win
                acc = acc + jnp.dot(win, w_ref[ki * 5 + kj],
                                    preferred_element_type=jnp.float32)
        # original buggy `or` chain: both gx and gy are the same LOG response
        g = jnp.sqrt(acc * acc + acc * acc)
        xc = center.astype(jnp.float32)
        y = xc + jax.nn.sigmoid(g) * xc            # h = x + sigmoid(g) * x
        o_ref[0] = y.reshape(H, W, C).astype(out_dtype)

    return pl.pallas_call(
        kernel,
        out_shape=jax.ShapeDtypeStruct((N, H, W, C), out_dtype),
        grid_spec=pltpu.PrefetchScalarGridSpec(
            num_scalar_prefetch=0, grid=(N,),
            in_specs=[pl.BlockSpec((1, Hp, Wp, C), lambda n: (n, 0, 0, 0)),
                      pl.BlockSpec((25, C, C), lambda n: (0, 0, 0))],
            out_specs=pl.BlockSpec((1, H, W, C), lambda n: (n, 0, 0, 0))),
        compiler_params=_cparams(("parallel",)),
    )


# ----------------------------------------------------------------------------
# Stride-2 conv: NHWC im2col (XLA) + per-sample fused matmul+GN(+act) kernel
# ----------------------------------------------------------------------------

@functools.lru_cache(maxsize=None)
def _matmul_gn_call(N, M, K, O, act, out_dtype):
    def kernel(a_ref, w_ref, b_ref, g_ref, be_ref, p_ref, o_ref):
        y = jnp.dot(a_ref[0], w_ref[...],
                    preferred_element_type=jnp.float32) + b_ref[...]
        y = _gn_epilogue(y, g_ref[...], be_ref[...], p_ref[...], M)
        o_ref[0] = _act_fn(y, act).astype(out_dtype)

    return pl.pallas_call(
        kernel,
        out_shape=jax.ShapeDtypeStruct((N, M, O), out_dtype),
        grid_spec=pltpu.PrefetchScalarGridSpec(
            num_scalar_prefetch=0, grid=(N,),
            in_specs=[pl.BlockSpec((1, M, K), lambda n: (n, 0, 0)),
                      pl.BlockSpec((K, O), lambda n: (0, 0)),
                      pl.BlockSpec((1, O), lambda n: (0, 0)),
                      pl.BlockSpec((1, O), lambda n: (0, 0)),
                      pl.BlockSpec((1, O), lambda n: (0, 0)),
                      pl.BlockSpec((O, O), lambda n: (0, 0))],
            out_specs=pl.BlockSpec((1, M, O), lambda n: (n, 0, 0))),
        compiler_params=_cparams(("parallel",)),
    )


def conv_s2_gn_act(x, p, act="silu"):
    """3x3 stride-2 pad-1 conv fused with GroupNorm(32)(+act)."""
    # TODO(synk): im2col is built in XLA; at large resolutions the strided tap
    #             loads should move into the kernel.
    N, H, W, C = x.shape
    k, O, s, pad = p["k"], p["cout"], 2, p["k"] // 2
    Ho = (H + 2 * pad - k) // s + 1
    Wo = (W + 2 * pad - k) // s + 1
    xp = jnp.pad(x.astype(_BF16), ((0, 0), (pad, pad), (pad, pad), (0, 0)))
    cols = []
    for ki in range(k):
        for kj in range(k):
            cols.append(jax.lax.slice(
                xp, (0, ki, kj, 0),
                (N, ki + s * (Ho - 1) + 1, kj + s * (Wo - 1) + 1, C),
                (1, s, s, 1)))
    patches = jnp.concatenate(cols, axis=-1).reshape(N, Ho * Wo, k * k * C)
    y = _matmul_gn_call(N, Ho * Wo, k * k * C, O, act, _BF16)(
        patches, p["w2"], p["b"], p["gamma"], p["beta"], _group_proj(O, 32))
    return y.reshape(N, Ho, Wo, O)


# ----------------------------------------------------------------------------
# Standalone GroupNorm(+act) kernel (DCN block entry)
# ----------------------------------------------------------------------------

@functools.lru_cache(maxsize=None)
def _gn_act_call(N, M, C, act, out_dtype):
    def kernel(x_ref, g_ref, b_ref, p_ref, o_ref):
        y = x_ref[0].astype(jnp.float32)
        y = _gn_epilogue(y, g_ref[...], b_ref[...], p_ref[...], M)
        o_ref[0] = _act_fn(y, act).astype(out_dtype)

    return pl.pallas_call(
        kernel,
        out_shape=jax.ShapeDtypeStruct((N, M, C), out_dtype),
        grid_spec=pltpu.PrefetchScalarGridSpec(
            num_scalar_prefetch=0, grid=(N,),
            in_specs=[pl.BlockSpec((1, M, C), lambda n: (n, 0, 0)),
                      pl.BlockSpec((1, C), lambda n: (0, 0)),
                      pl.BlockSpec((1, C), lambda n: (0, 0)),
                      pl.BlockSpec((C, C), lambda n: (0, 0))],
            out_specs=pl.BlockSpec((1, M, C), lambda n: (n, 0, 0))),
        compiler_params=_cparams(("parallel",)),
    )


def groupnorm_act(x, gamma, beta, act="silu"):
    N, H, W, C = x.shape
    y = _gn_act_call(N, H * W, C, act, _BF16)(
        x.astype(_BF16).reshape(N, H * W, C), gamma, beta, _group_proj(C, 32))
    return y.reshape(N, H, W, C)


# ----------------------------------------------------------------------------
# Elementwise kernels (add / fma), no host-side padding
# ----------------------------------------------------------------------------

_EW_BODIES = {
    "add": (lambda a, b: a + b, 2),                                   # bf16 VPU
    "fma": (lambda a, b, c: a.astype(jnp.float32) * b.astype(jnp.float32)
            + c.astype(jnp.float32), 3),
}


@functools.lru_cache(maxsize=None)
def _ew_call(name, R, TR, out_dtype):
    body, n_in = _EW_BODIES[name]

    def kernel(*refs):
        refs[-1][...] = body(*[r[...] for r in refs[:-1]]).astype(out_dtype)

    return pl.pallas_call(
        kernel,
        out_shape=jax.ShapeDtypeStruct((R, _EW_LANES), out_dtype),
        grid_spec=pltpu.PrefetchScalarGridSpec(
            num_scalar_prefetch=0, grid=(R // TR,),
            in_specs=[pl.BlockSpec((TR, _EW_LANES), lambda i: (i, 0))
                      for _ in range(n_in)],
            out_specs=pl.BlockSpec((TR, _EW_LANES), lambda i: (i, 0))),
        compiler_params=_cparams(("parallel",)),
    )


def elementwise(name, *arrays):
    shp = arrays[0].shape
    size = int(np.prod(shp))
    assert size % _EW_LANES == 0
    R = size // _EW_LANES
    TR = _pick_tile(R)
    flats = [a.astype(_BF16).reshape(R, _EW_LANES) for a in arrays]
    out = _ew_call(name, R, TR, _BF16)(*flats)
    return out.reshape(shp)


# ----------------------------------------------------------------------------
# Bilinear resize (align_corners=True) as one bf16 MXU matmul per sample
# ----------------------------------------------------------------------------

def _interp_np(out_size, in_size):
    if out_size == 1:
        src = np.zeros((1,), np.float64)
    else:
        src = np.arange(out_size) * (in_size - 1) / (out_size - 1)
    lo = np.clip(np.floor(src).astype(np.int64), 0, max(in_size - 2, 0))
    hi = np.minimum(lo + 1, in_size - 1)
    whi = src - lo
    m = np.zeros((out_size, in_size), np.float64)
    idx = np.arange(out_size)
    m[idx, lo] += 1.0 - whi
    m[idx, hi] += whi
    return m


@functools.lru_cache(maxsize=None)
def _resize_mat(out_h, out_w, in_h, in_w, via):
    # combined (and optionally composed-through-`via`) interpolation matrix
    if via is None:
        mh = _interp_np(out_h, in_h)
        mw = _interp_np(out_w, in_w)
    else:
        mh = _interp_np(out_h, via) @ _interp_np(via, in_h)
        mw = _interp_np(out_w, via) @ _interp_np(via, in_w)
    return jnp.asarray(np.kron(mh, mw).astype(np.float32), _BF16)


@functools.lru_cache(maxsize=None)
def _resize_call(N, Mo, K, C, TM, out_dtype):
    def kernel(r_ref, x_ref, o_ref):
        o_ref[0] = jnp.dot(r_ref[...], x_ref[0],
                           preferred_element_type=jnp.float32).astype(out_dtype)

    return pl.pallas_call(
        kernel,
        out_shape=jax.ShapeDtypeStruct((N, Mo, C), out_dtype),
        grid_spec=pltpu.PrefetchScalarGridSpec(
            num_scalar_prefetch=0, grid=(N, Mo // TM),
            in_specs=[pl.BlockSpec((TM, K), lambda n, m: (m, 0)),
                      pl.BlockSpec((1, K, C), lambda n, m: (n, 0, 0))],
            out_specs=pl.BlockSpec((1, TM, C), lambda n, m: (n, m, 0))),
        compiler_params=_cparams(("parallel", "parallel")),
    )


def resize_bilinear(x, out_h, out_w, via=None):
    """nn.Upsample(mode='bilinear', align_corners=True); `via` exactly composes
    an intermediate resize (Seg_head's 88x88) into one matrix."""
    # TODO(synk): the dense kron matrix is only practical for small source
    #             grids; large sources would need a separable two-pass kernel.
    N, H, W, C = x.shape
    K, Mo = H * W, out_h * out_w
    R = _resize_mat(out_h, out_w, H, W, via)
    TM = _pick_tile(Mo, (2048, 1024, 512, 256, 128, 64, 32, 16, 8))
    y = _resize_call(N, Mo, K, C, TM, _BF16)(R, x.astype(_BF16).reshape(N, K, C))
    return y.reshape(N, out_h, out_w, C)


def upsample2x(x):
    return resize_bilinear(x, 2 * x.shape[1], 2 * x.shape[2])


# ----------------------------------------------------------------------------
# Parameter construction (deterministic, stored in kernel-ready layout)
# ----------------------------------------------------------------------------

_BN_SCALE = float(1.0 / np.sqrt(1.0 + 1e-5))  # eval-mode BatchNorm2d folded in


@functools.lru_cache(maxsize=None)
def _fixed_operator_weights(c):
    fx = np.array([[-3, 0, 3], [-10, 0, 10], [-3, 0, 3]], np.float32) * _BN_SCALE
    fy = np.array([[-3, 10, 3], [0, 0, 0], [3, 10, 3]], np.float32) * _BN_SCALE
    log = np.array(
        [[0, 0, -1, 0, 0], [0, -1, 2, -1, 0], [-1, -2, 16, -2, -1],
         [0, -1, 2, -1, 0], [0, 0, -1, 0, 0]], np.float32) * _BN_SCALE
    ones = np.ones((c, c), np.float32)
    wx = ones[None] * fx.reshape(9, 1, 1)
    wy = ones[None] * fy.reshape(9, 1, 1)
    wl = ones[None] * log.reshape(25, 1, 1)
    return (jnp.asarray(wx, _BF16), jnp.asarray(wy, _BF16), jnp.asarray(wl, _BF16))


class _KeyGen:
    def __init__(self, key, n=512):
        self._keys = iter(jax.random.split(key, n))

    def __call__(self):
        return next(self._keys)


def _conv_gn_params(kg, c_out, c_in, k):
    w = 0.05 * jax.random.normal(kg(), (c_out, c_in, k, k), jnp.float32)
    b = 0.05 * jax.random.normal(kg(), (c_out,), jnp.float32)
    wt = jnp.transpose(w, (2, 3, 1, 0))
    return {"wk": wt.reshape(k * k, c_in, c_out).astype(_BF16),
            "w2": wt.reshape(k * k * c_in, c_out).astype(_BF16),
            "b": b.reshape(1, c_out),
            "gamma": jnp.ones((1, c_out), jnp.float32),
            "beta": jnp.zeros((1, c_out), jnp.float32),
            "k": k, "cout": c_out}


def _operator_block_params(kg, c_in, c_out):
    wx, wy, wl = _fixed_operator_weights(c_in)
    return {"wx": wx, "wy": wy, "wl": wl,
            "block": _conv_gn_params(kg, c_out, c_in, 3)}


def _edgm_params(kg, c_in, c_out=64):  # next_add=True in the model
    return {"local": _conv_gn_params(kg, c_out, c_in, 3),
            "global": _conv_gn_params(kg, c_out, c_in, 1),
            "context": _conv_gn_params(kg, c_out, c_out, 3),
            "concat": _operator_block_params(kg, c_out * 2, c_out)}


def _sim_params(kg, c_in, c_out=64, next_add=True):
    return {"local": _conv_gn_params(kg, c_out, c_in, 3),
            "lgi": _conv_gn_params(kg, c_out, c_in, 1),
            "global": _conv_gn_params(kg, c_out, c_out if next_add else c_in, 3)}


def _dcn_params(kg, c_in, c_out):
    return {"gn_gamma": jnp.ones((1, c_in), jnp.float32),
            "gn_beta": jnp.zeros((1, c_in), jnp.float32),
            "conv": _conv_gn_params(kg, c_in, c_in, 3),
            "down": _conv_gn_params(kg, c_out, c_in, 3)}


def init_net_params(key):
    kg = _KeyGen(key)
    enc = {
        "t1a": _conv_gn_params(kg, 64, 3, 3),
        "t1b": _conv_gn_params(kg, 64, 64, 3),
        "t2": _conv_gn_params(kg, 128, 64, 3),
        "t3": _conv_gn_params(kg, 320, 128, 3),
        "t4": _conv_gn_params(kg, 512, 320, 3),
        "stem": _conv_gn_params(kg, 32, 3, 3),
        "dcn1": _dcn_params(kg, 32, 64),
        "dcn2": _dcn_params(kg, 64, 128),
        "dcn3": _dcn_params(kg, 128, 320),
        "dcn4": _dcn_params(kg, 320, 512),
    }
    head = {"ph1": _conv_gn_params(kg, 64, 64, 3),
            "ph2": _conv_gn_params(kg, 1, 64, 1)}
    return {"enc": enc,
            "edgm1": _edgm_params(kg, 64, 64),
            "edgm2": _edgm_params(kg, 128, 64),
            "sim3": _sim_params(kg, 320, 64, next_add=True),
            "sim4": _sim_params(kg, 512, 64, next_add=False),
            "head": head}


# ----------------------------------------------------------------------------
# Module forward functions (NHWC activations)
# ----------------------------------------------------------------------------

def operator_block_forward(p, x):
    N, H, W, C = x.shape
    xp = jnp.pad(x.astype(_BF16), ((0, 0), (1, 1), (1, 1), (0, 0)))
    x1 = _scharr_gate_call(N, H, W, C, _BF16)(xp, p["wx"], p["wy"])
    x1p = jnp.pad(x1, ((0, 0), (2, 2), (2, 2), (0, 0)))
    h = _log_gate_call(N, H, W, C, _BF16)(x1p, p["wl"])
    return conv_gn_act(h, p["block"], "silu")


def edgm_forward(p, x_l, x_g, x_n, need_upsample=True):
    local_feat = conv_gn_act(x_l, p["local"], "silu")
    global_feat = conv_gn_act(x_g, p["global"], "silu")       # 1x1
    context_feat = conv_gn_act(x_n, p["context"], "silu")
    out0 = jnp.concatenate([local_feat, global_feat], axis=-1)
    out0 = operator_block_forward(p["concat"], out0)
    out1 = elementwise("add", out0, context_feat)
    out2 = upsample2x(out1) if need_upsample else None
    return out1, out2


def sim_forward(p, x_l, x_g, x_n):
    local_feat = conv_gn_act(x_l, p["local"], "silu")
    global_act = conv_gn_act(x_g, p["lgi"], "sigmoid")         # 1x1
    global_feat = conv_gn_act(x_n, p["global"], "silu")
    out1 = elementwise("fma", local_feat, global_act, global_feat)
    out2 = upsample2x(out1)
    return out1, out2


def encoder_forward(p, x):
    # TODO(synk): PVT-v2 pretrained transformer backbone replaced by this
    #             deterministic conv pyramid with identical shapes/channels.
    tp = []
    t = conv_s2_gn_act(x, p["t1a"], "silu")
    t = conv_s2_gn_act(t, p["t1b"], "silu"); tp.append(t)      # 64  @ /4
    t = conv_s2_gn_act(t, p["t2"], "silu"); tp.append(t)       # 128 @ /8
    t = conv_s2_gn_act(t, p["t3"], "silu"); tp.append(t)       # 320 @ /16
    t = conv_s2_gn_act(t, p["t4"], "silu"); tp.append(t)       # 512 @ /32

    # convolution pyramid: StemLayer + DCNv3_Block (DCNv3 == identity, TODO)
    cp = []
    c = conv_s2_gn_act(x, p["stem"], "silu")                   # 32 @ /2
    for name in ("dcn1", "dcn2", "dcn3", "dcn4"):
        pb = p[name]
        h = groupnorm_act(c, pb["gn_gamma"], pb["gn_beta"], "silu")
        h = conv_gn_act(h, pb["conv"], "silu")
        c = conv_s2_gn_act(h, pb["down"], "none")
        cp.append(c)
    return tp, cp


def net_forward(params, x_nchw, size=96):
    x = jnp.transpose(x_nchw, (0, 2, 3, 1)).astype(_BF16)      # NCHW -> NHWC once
    N = x.shape[0]
    tp, cp = encoder_forward(params["enc"], x)
    x4, x44 = sim_forward(params["sim4"], tp[3], cp[3], tp[3])
    x3, x33 = sim_forward(params["sim3"], tp[2], cp[2], x44)
    x2, x22 = edgm_forward(params["edgm2"], tp[1], cp[1], x33)
    x1, _ = edgm_forward(params["edgm1"], tp[0], cp[0], x22, need_upsample=False)
    sim = [x1, x2, x3, x4]

    # Seg_head: resize to 88, suffix-sum, resize to `size`, PH.  The two
    # resizes are linear, so they are composed into one exact matrix per input
    # and the suffix sums are done at `size` resolution directly.
    t = [resize_bilinear(s, size, size, via=88) for s in sim]
    s3 = t[3]
    s2 = elementwise("add", t[2], s3)
    s1 = elementwise("add", t[1], s2)
    s0 = elementwise("add", t[0], s1)

    head = params["head"]
    stacked = jnp.concatenate([s0, s1, s2, s3], axis=0)        # (4N, size, size, 64)
    y = conv_gn_act(stacked, head["ph1"], "silu")
    y = conv_gn_act(y, head["ph2"], "none", use_gn=False)      # 1x1, 64 -> 1
    y = jnp.transpose(y, (0, 3, 1, 2)).astype(jnp.float32)     # back to NCHW
    return tuple(y[i * N:(i + 1) * N] for i in range(4))


# ----------------------------------------------------------------------------

if __name__ == "__main__":
    key = jax.random.PRNGKey(0)
    pkey, xkey = jax.random.split(key)
    params = init_net_params(pkey)

    # small image, consistent with the module (3-channel NCHW input)
    x = jax.random.normal(xkey, (2, 3, 64, 64), jnp.float32)

    outs = net_forward(params, x, size=96)
    outs = jax.block_until_ready(outs)

    for o in outs:
        assert o.shape == (2, 1, 96, 96)
        assert bool(jnp.all(jnp.isfinite(o)))
    print("KERNEL_OK")
</pallas_src>

<mosaic_0001>
module attributes {stable_mosaic.version = 11 : i64} {
  func.func @kernel(%arg0: i32, %arg1: memref<1x1024x27xbf16, #tpu.memory_space<vmem>>, %arg2: memref<27x64xbf16, #tpu.memory_space<vmem>>, %arg3: memref<1x64xf32, #tpu.memory_space<vmem>>, %arg4: memref<1x64xf32, #tpu.memory_space<vmem>>, %arg5: memref<1x64xf32, #tpu.memory_space<vmem>>, %arg6: memref<64x64xf32, #tpu.memory_space<vmem>>, %arg7: memref<1x1024x64xbf16, #tpu.memory_space<vmem>>) attributes {dimension_semantics = [#tpu.dimension_semantics<parallel>], iteration_bounds = array<i64: 2>, scalar_prefetch = 0 : i64, scratch_operands = 0 : i64, tpu.core_type = #tpu.core_type<tc>, window_params = [{transform_indices = @transform_0, window_bounds = array<i64: 1, 1024, 27>}, {pipeline_mode = #tpu.pipeline_mode<synchronous>, transform_indices = @transform_1, window_bounds = array<i64: 27, 64>}, {pipeline_mode = #tpu.pipeline_mode<synchronous>, transform_indices = @transform_2, window_bounds = array<i64: 1, 64>}, {pipeline_mode = #tpu.pipeline_mode<synchronous>, transform_indices = @transform_3, window_bounds = array<i64: 1, 64>}, {pipeline_mode = #tpu.pipeline_mode<synchronous>, transform_indices = @transform_4, window_bounds = array<i64: 1, 64>}, {pipeline_mode = #tpu.pipeline_mode<synchronous>, transform_indices = @transform_5, window_bounds = array<i64: 64, 64>}, {transform_indices = @transform_6, window_bounds = array<i64: 1, 1024, 64>}]} {
    %c0 = arith.constant 0 : index
    %c0_0 = arith.constant 0 : index
    %c0_1 = arith.constant 0 : index
    %0 = vector.load %arg1[%c0, %c0_0, %c0_1] : memref<1x1024x27xbf16, #tpu.memory_space<vmem>>, vector<1x1024x27xbf16>
    %1 = vector.shape_cast %0 : vector<1x1024x27xbf16> to vector<1024x27xbf16>
    %c0_2 = arith.constant 0 : index
    %c0_3 = arith.constant 0 : index
    %2 = vector.load %arg2[%c0_2, %c0_3] : memref<27x64xbf16, #tpu.memory_space<vmem>>, vector<27x64xbf16>
    %cst = arith.constant dense<0.000000e+00> : vector<1024x64xf32>
    %3 = tpu.matmul %1, %2, %cst {dimension_numbers = #tpu.dot_dimension_numbers<[1], [0], [0], [1], [0, 0, 1, 1], [], []>} : vector<1024x27xbf16>, vector<27x64xbf16>, vector<1024x64xf32> -> vector<1024x64xf32>
    %c0_4 = arith.constant 0 : index
    %c0_5 = arith.constant 0 : index
    %4 = vector.load %arg3[%c0_4, %c0_5] : memref<1x64xf32, #tpu.memory_space<vmem>>, vector<1x64xf32>
    %5 = vector.broadcast %4 : vector<1x64xf32> to vector<1024x64xf32>
    %6 = arith.addf %3, %5 : vector<1024x64xf32>
    %c0_6 = arith.constant 0 : index
    %c0_7 = arith.constant 0 : index
    %7 = vector.load %arg4[%c0_6, %c0_7] : memref<1x64xf32, #tpu.memory_space<vmem>>, vector<1x64xf32>
    %c0_8 = arith.constant 0 : index
    %c0_9 = arith.constant 0 : index
    %8 = vector.load %arg5[%c0_8, %c0_9] : memref<1x64xf32, #tpu.memory_space<vmem>>, vector<1x64xf32>
    %c0_10 = arith.constant 0 : index
    %c0_11 = arith.constant 0 : index
    %9 = vector.load %arg6[%c0_10, %c0_11] : memref<64x64xf32, #tpu.memory_space<vmem>>, vector<64x64xf32>
    %cst_12 = arith.constant dense<0.000000e+00> : vector<64xf32>
    %10 = vector.multi_reduction <add>, %6, %cst_12 [0] : vector<1024x64xf32> to vector<64xf32>
    %11 = vector.shape_cast %10 : vector<64xf32> to vector<1x64xf32>
    %cst_13 = arith.constant 9.765625E-4 : f32
    %12 = vector.broadcast %cst_13 : f32 to vector<1x64xf32>
    %13 = arith.mulf %11, %12 : vector<1x64xf32>
    %14 = arith.mulf %6, %6 : vector<1024x64xf32>
    %cst_14 = arith.constant dense<0.000000e+00> : vector<64xf32>
    %15 = vector.multi_reduction <add>, %14, %cst_14 [0] : vector<1024x64xf32> to vector<64xf32>
    %16 = vector.shape_cast %15 : vector<64xf32> to vector<1x64xf32>
    %cst_15 = arith.constant 9.765625E-4 : f32
    %17 = vector.broadcast %cst_15 : f32 to vector<1x64xf32>
    %18 = arith.mulf %16, %17 : vector<1x64xf32>
    %19 = tpu.concatenate %13, %18 in 0 : vector<1x64xf32>, vector<1x64xf32> -> vector<2x64xf32>
    %cst_16 = arith.constant dense<0.000000e+00> : vector<2x64xf32>
    %20 = tpu.matmul %19, %9, %cst_16 {dimension_numbers = #tpu.dot_dimension_numbers<[1], [0], [0], [1], [0, 0, 1, 1], [], []>} : vector<2x64xf32>, vector<64x64xf32>, vector<2x64xf32> -> vector<2x64xf32>
    %21 = vector.extract_strided_slice %20 {offsets = [0, 0], sizes = [1, 64], strides = [1, 1]} : vector<2x64xf32> to vector<1x64xf32>
    %22 = vector.extract_strided_slice %20 {offsets = [1, 0], sizes = [1, 64], strides = [1, 1]} : vector<2x64xf32> to vector<1x64xf32>
    %23 = arith.mulf %21, %21 : vector<1x64xf32>
    %24 = arith.subf %22, %23 : vector<1x64xf32>
    %cst_17 = arith.constant 0.000000e+00 : f32
    %25 = vector.broadcast %cst_17 : f32 to vector<1x64xf32>
    %26 = arith.maximumf %24, %25 : vector<1x64xf32>
    %cst_18 = arith.constant 9.99999974E-6 : f32
    %27 = vector.broadcast %cst_18 : f32 to vector<1x64xf32>
    %28 = arith.addf %26, %27 : vector<1x64xf32>
    %29 = math.rsqrt %28 : vector<1x64xf32>
    %30 = arith.mulf %29, %7 : vector<1x64xf32>
    %31 = arith.mulf %21, %30 : vector<1x64xf32>
    %32 = arith.subf %8, %31 : vector<1x64xf32>
    %33 = vector.broadcast %30 : vector<1x64xf32> to vector<1024x64xf32>
    %34 = arith.mulf %6, %33 : vector<1024x64xf32>
    %35 = vector.broadcast %32 : vector<1x64xf32> to vector<1024x64xf32>
    %36 = arith.addf %34, %35 : vector<1024x64xf32>
    %37 = arith.negf %36 : vector<1024x64xf32>
    %38 = math.exp %37 : vector<1024x64xf32>
    %cst_19 = arith.constant 1.000000e+00 : f32
    %39 = vector.broadcast %cst_19 : f32 to vector<1024x64xf32>
    %40 = arith.addf %39, %38 : vector<1024x64xf32>
    %41 = arith.divf %39, %40 : vector<1024x64xf32>
    %42 = arith.mulf %36, %41 : vector<1024x64xf32>
    %43 = arith.truncf %42 : vector<1024x64xf32> to vector<1024x64xbf16>
    %c0_20 = arith.constant 0 : index
    %c0_21 = arith.constant 0 : index
    %c0_22 = arith.constant 0 : index
    %44 = vector.load %arg7[%c0_20, %c0_21, %c0_22] : memref<1x1024x64xbf16, #tpu.memory_space<vmem>>, vector<1x1024x64xbf16>
    %45 = vector.shape_cast %44 : vector<1x1024x64xbf16> to vector<1024x64xbf16>
    %46 = vector.shape_cast %43 : vector<1024x64xbf16> to vector<1x1024x64xbf16>
    tpu.vector_store %arg7[%c0_20, %c0_21, %c0_22], %46 {strides = array<i32>} : memref<1x1024x64xbf16, #tpu.memory_space<vmem>>, vector<1x1024x64xbf16>,
    return
  }
  func.func @transform_0(%arg0: i32) -> (i32, i32, i32) {
    %c0_i32 = arith.constant 0 : i32
    %c0_i32_0 = arith.constant 0 : i32
    %c0_i32_1 = arith.constant 0 : i32
    return %arg0, %c0_i32, %c0_i32_0 : i32, i32, i32
  }
  func.func @transform_1(%arg0: i32) -> (i32, i32) {
    %c0_i32 = arith.constant 0 : i32
    %c0_i32_0 = arith.constant 0 : i32
    %c0_i32_1 = arith.constant 0 : i32
    return %c0_i32, %c0_i32_0 : i32, i32
  }
  func.func @transform_2(%arg0: i32) -> (i32, i32) {
    %c0_i32 = arith.constant 0 : i32
    %c0_i32_0 = arith.constant 0 : i32
    %c0_i32_1 = arith.constant 0 : i32
    return %c0_i32, %c0_i32_0 : i32, i32
  }
  func.func @transform_3(%arg0: i32) -> (i32, i32) {
    %c0_i32 = arith.constant 0 : i32
    %c0_i32_0 = arith.constant 0 : i32
    %c0_i32_1 = arith.constant 0 : i32
    return %c0_i32, %c0_i32_0 : i32, i32
  }
  func.func @transform_4(%arg0: i32) -> (i32, i32) {
    %c0_i32 = arith.constant 0 : i32
    %c0_i32_0 = arith.constant 0 : i32
    %c0_i32_1 = arith.constant 0 : i32
    return %c0_i32, %c0_i32_0 : i32, i32
  }
  func.func @transform_5(%arg0: i32) -> (i32, i32) {
    %c0_i32 = arith.constant 0 : i32
    %c0_i32_0 = arith.constant 0 : i32
    %c0_i32_1 = arith.constant 0 : i32
    return %c0_i32, %c0_i32_0 : i32, i32
  }
  func.func @transform_6(%arg0: i32) -> (i32, i32, i32) {
    %c0_i32 = arith.constant 0 : i32
    %c0_i32_0 = arith.constant 0 : i32
    %c0_i32_1 = arith.constant 0 : i32
    return %arg0, %c0_i32, %c0_i32_0 : i32, i32, i32
  }
}

</mosaic_0001>

<bundles_post_ra>
// kernel: tpu_custom_call.1
= control target key start
LH: loop header
LB: loop body
LE: loop exit
PB: predicated region body
PF: predicated region fallthrough
CT: control target
= control target key end

     0   :  { %s6207_s21 = smov 0   ;;  %s13856_s0 = inlined_call_operand.vmem [shape: bf16[2,1024,27], index: 0, kind: input, shape index: {}]   ;;  %s13857_s1 = inlined_call_operand.vmem [shape: bf16[27,64], index: 1, kind: input, shape index: {}]   ;;  %s13858_s2 = inlined_call_operand.vmem [shape: f32[1,64], index: 2, kind: input, shape index: {}]   ;;  %s13859_s3 = inlined_call_operand.vmem [shape: f32[1,64], index: 3, kind: input, shape index: {}]   ;;  %s13860_s4 = inlined_call_operand.vmem [shape: f32[1,64], index: 4, kind: input, shape index: {}]   ;;  %s13861_s5 = inlined_call_operand.vmem [shape: f32[64,64], index: 5, kind: input, shape index: {}]   ;;  %s13862_s6 = inlined_call_operand.vmem [shape: bf16[2,1024,64], index: 6, kind: output, shape index: {}]  }
   0x1 LB: > { %s5095_s22 = sadd.s32 4294967295, %s6169_s21   ;;  %p5099_p0 = scmp.ge.s32.totalorder %s6169_s21, 1  ;;  %s6169_s21 = sphi %s6207_s21, %s16_s21  }
   0x2   : > { %p212_p1 = scmp.lt.s32.totalorder %s6169_s21, 3 }
   0x4   : > { %p213_p2 = pnand %p5099_p0, %p212_p1 }
   0x6   : > { %216 = sbr.rel (%p213_p2) target bundleno = 1606 (0x646), region = 44 }
   0xb   : > { %v5366_v0 = vld [vmem:[%s13857_s1 + $0x8] sm:$0xf]  ;;  %v5630_v1 = vld [vmem:[%s13857_s1 + $0x8] sm:$0x30]  ;;  %vm913_vm0 = vcmask 1044480   ;;  %vm914_vm1 = vcmask 1045504  }
   0xc   : > { %v5367_v2 = vor.u32 %v5630_v1, %v5366_v0  ;;  %p242_p3 = scmp.lt.s32.totalorder %s5095_s22, 1  ;;  %v6171_v3 = vmov 65535   ;;  %v5629_v7 = vld [vmem:[%s13857_s1] sm:$0xff]  ;;  %vm720_vm2 = vcmask 220160   ;;  %vm1259_vm3 = vcmask 523264  }
   0xd   : > { %v915_v4 = vsel %vm913_vm0, 4294967295, %v6171_v3  ;;  %vm1912_vm4 = vcmask 1040384  }
   0xe   : > { %v916_v5 = vsel %vm914_vm1, %v915_v4, 0  ;;  %s15721_s22 = smov (!%p242_p3, %s5095_s22), 1 }
   0xf   : > { %v918_v6 = vand.u32 %v5367_v2, %v916_v5  ;;  %s5563_s27 = sshll.u32 %s15721_s22, 9 }
  0x10   : > { %s6232_s8 = scalar_lea.vmem %s13856_s0, %s5563_s27  ;;  %s12592_s14 = scalar_lea.vmem %s13862_s6, %s5563_s27 }
  0x11   : > { %926 = vmatpush.bf16.msra.mxu0 %v918_v6  ;;  %5632 = vmatpush.bf16.msra.mxu2 %v918_v6  ;;  %v5565_v8 = vld [vmem:[%s6232_s8] sm:$0xff]  ;;  %v5566_v9 = vld [vmem:[%s6232_s8 + $0x8] sm:$0xff]  ;;  %v5567_v10 = vld [vmem:[%s6232_s8 + $0x10] sm:$0xff] }
  0x12   : > { %5631 = vmatpush.bf16.msra.mxu1 %v918_v6  ;;  %5633 = vmatpush.bf16.msra.mxu3 %v918_v6  ;;  %v5568_v11 = vld [vmem:[%s6232_s8 + $0x18] sm:$0xff]  ;;  %v5569_v12 = vld [vmem:[%s6232_s8 + $0x20] sm:$0xff]  ;;  %v5595_v13 = vld [vmem:[%s6232_s8 + $0xf0] sm:$0xff] }
  0x13   : > { %v5582_v14 = vld [vmem:[%s6232_s8 + $0x88] sm:$0xff]  ;;  %v5596_v16 = vld [vmem:[%s6232_s8 + $0xf8] sm:$0xff]  ;;  %v5583_v17 = vld [vmem:[%s6232_s8 + $0x90] sm:$0xff] }
  0x14   : > { %v5570_v15 = vld [vmem:[%s6232_s8 + $0x28] sm:$0xff]  ;;  %v5571_v18 = vld [vmem:[%s6232_s8 + $0x30] sm:$0xff]  ;;  %v5597_v19 = vld [vmem:[%s6232_s8 + $0x100] sm:$0xff] }
  0x15   : > { %927 = vmatpush.bf16.msra.mxu0 %v5629_v7  ;;  %5635 = vmatpush.bf16.msra.mxu2 %v5629_v7  ;;  %v5584_v20 = vld [vmem:[%s6232_s8 + $0x98] sm:$0xff]  ;;  %v5598_v22 = vld [vmem:[%s6232_s8 + $0x108] sm:$0xff]  ;;  %v5585_v23 = vld [vmem:[%s6232_s8 + $0xa0] sm:$0xff] }
  0x16   : > { %5634 = vmatpush.bf16.msra.mxu1 %v5629_v7  ;;  %5636 = vmatpush.bf16.msra.mxu3 %v5629_v7  ;;  %v5572_v21 = vld [vmem:[%s6232_s8 + $0x38] sm:$0xff]  ;;  %v5573_v24 = vld [vmem:[%s6232_s8 + $0x40] sm:$0xff]  ;;  %v5599_v27 = vld [vmem:[%s6232_s8 + $0x110] sm:$0xff] }
  0x17   : > { %v5586_v28 = vld [vmem:[%s6232_s8 + $0xa8] sm:$0xff]  ;;  %v5612_v30 = vld [vmem:[%s6232_s8 + $0x178] sm:$0xff]  ;;  %v5587_v34 = vld [vmem:[%s6232_s8 + $0xb0] sm:$0xff] }
  0x18   : > { %5368 = vmatmul.msk.bf16.vlgmr.msra.gmra.mxu0 %vm720_vm2, %v5565_v8  ;;  %5398 = vmatmul.msk.bf16.vlgmr.msra.gmra.mxu2 %vm720_vm2, %v5595_v13  ;;  %v5574_v29 = vld [vmem:[%s6232_s8 + $0x48] sm:$0xff]  ;;  %v5600_v33 = vld [vmem:[%s6232_s8 + $0x118] sm:$0xff]  ;;  %v5575_v35 = vld [vmem:[%s6232_s8 + $0x50] sm:$0xff] }
  0x19   : > { %5385 = vmatmul.msk.bf16.vlgmr.msra.gmra.mxu1 %vm720_vm2, %v5582_v14  ;;  %5415 = vmatmul.msk.bf16.vlgmr.msra.gmra.mxu3 %vm720_vm2, %v5612_v30  ;;  %v5613_v36 = vld [vmem:[%s6232_s8 + $0x180] sm:$0xff]  ;;  %v5588_v40 = vld [vmem:[%s6232_s8 + $0xb8] sm:$0xff]  ;;  %v5614_v42 = vld [vmem:[%s6232_s8 + $0x188] sm:$0xff] }
  0x1a   : > { %v5601_v39 = vld [vmem:[%s6232_s8 + $0x120] sm:$0xff]  ;;  %v5576_v41 = vld [vmem:[%s6232_s8 + $0x58] sm:$0xff]  ;;  %v5602_v45 = vld [vmem:[%s6232_s8 + $0x128] sm:$0xff] }
  0x1b   : > { %v5589_v46 = vld [vmem:[%s6232_s8 + $0xc0] sm:$0xff]  ;;  %v5615_v48 = vld [vmem:[%s6232_s8 + $0x190] sm:$0xff]  ;;  %v5590_v53 = vld [vmem:[%s6232_s8 + $0xc8] sm:$0xff] }
  0x1c   : > { %v5577_v47 = vld [vmem:[%s6232_s8 + $0x60] sm:$0xff]  ;;  %v5603_v51 = vld [vmem:[%s6232_s8 + $0x130] sm:$0xff]  ;;  %v5578_v54 = vld [vmem:[%s6232_s8 + $0x68] sm:$0xff] }
  0x1d   : > { %v5616_v55 = vld [vmem:[%s6232_s8 + $0x198] sm:$0xff]  ;;  %v5591_v63 = vld [vmem:[%s6232_s8 + $0xd0] sm:$0xff]  ;;  %v5617_v1 = vld [vmem:[%s6232_s8 + $0x1a0] sm:$0xff] }
  0x1e   : > { %v5604_v61 = vld [vmem:[%s6232_s8 + $0x138] sm:$0xff]  ;;  %v5579_v0 = vld [vmem:[%s6232_s8 + $0x70] sm:$0xff]  ;;  %v5605_v7 = vld [vmem:[%s6232_s8 + $0x140] sm:$0xff] }
  0x28   : > { %5369 = vmatmul.msk.bf16.gmra.mxu0 %vm720_vm2, %v5566_v9  ;;  %5399 = vmatmul.msk.bf16.gmra.mxu2 %vm720_vm2, %v5596_v16  ;;  %v5592_v9 = vld [vmem:[%s6232_s8 + $0xd8] sm:$0xff] }
  0x29   : > { %5386 = vmatmul.msk.bf16.gmra.mxu1 %vm720_vm2, %v5583_v17  ;;  %5416 = vmatmul.msk.bf16.gmra.mxu3 %vm720_vm2, %v5613_v36  ;;  %v5606_v17 = vld [vmem:[%s6232_s8 + $0x148] sm:$0xff] }
  0x38   : > { %5370 = vmatmul.msk.bf16.gmra.mxu0 %vm720_vm2, %v5567_v10  ;;  %5400 = vmatmul.msk.bf16.gmra.mxu2 %vm720_vm2, %v5597_v19  ;;  %v5580_v10 = vld [vmem:[%s6232_s8 + $0x78] sm:$0xff]  ;;  %v5593_v19 = vld [vmem:[%s6232_s8 + $0xe0] sm:$0xff] }
  0x39   : > { %5387 = vmatmul.msk.bf16.gmra.mxu1 %vm720_vm2, %v5584_v20  ;;  %5417 = vmatmul.msk.bf16.gmra.mxu3 %vm720_vm2, %v5614_v42  ;;  %v5581_v20 = vld [vmem:[%s6232_s8 + $0x80] sm:$0xff] }
  0x48   : > { %5371 = vmatmul.msk.bf16.gmra.mxu0 %vm720_vm2, %v5568_v11  ;;  %5401 = vmatmul.msk.bf16.gmra.mxu2 %vm720_vm2, %v5598_v22  ;;  %v5618_v11 = vld [vmem:[%s6232_s8 + $0x1a8] sm:$0xff] }
  0x49   : > { %5388 = vmatmul.msk.bf16.gmra.mxu1 %vm720_vm2, %v5585_v23  ;;  %5418 = vmatmul.msk.bf16.gmra.mxu3 %vm720_vm2, %v5615_v48  ;;  %v5621_v48 = vld [vmem:[%s6232_s8 + $0x1c0] sm:$0xff] }
  0x58   : > { %5372 = vmatmul.msk.bf16.gmra.mxu0 %vm720_vm2, %v5569_v12  ;;  %5402 = vmatmul.msk.bf16.gmra.mxu2 %vm720_vm2, %v5599_v27 }
  0x59   : > { %5389 = vmatmul.msk.bf16.gmra.mxu1 %vm720_vm2, %v5586_v28  ;;  %5419 = vmatmul.msk.bf16.gmra.mxu3 %vm720_vm2, %v5616_v55 }
  0x68   : > { %5373 = vmatmul.msk.bf16.gmra.mxu0 %vm720_vm2, %v5570_v15  ;;  %5403 = vmatmul.msk.bf16.gmra.mxu2 %vm720_vm2, %v5600_v33  ;;  %v5594_v33 = vld [vmem:[%s6232_s8 + $0xe8] sm:$0xff] }
  0x69   : > { %5390 = vmatmul.msk.bf16.gmra.mxu1 %vm720_vm2, %v5587_v34  ;;  %5420 = vmatmul.msk.bf16.gmra.mxu3 %vm720_vm2, %v5617_v1  ;;  %v5620_v34 = vld [vmem:[%s6232_s8 + $0x1b8] sm:$0xff] }
  0x78   : > { %5374 = vmatmul.msk.bf16.gmra.mxu0 %vm720_vm2, %v5571_v18  ;;  %5404 = vmatmul.msk.bf16.gmra.mxu2 %vm720_vm2, %v5601_v39 }
  0x79   : > { %5391 = vmatmul.msk.bf16.gmra.mxu1 %vm720_vm2, %v5588_v40  ;;  %5421 = vmatmul.msk.bf16.gmra.mxu3 %vm720_vm2, %v5618_v11 }
  0x88   : > { %5375 = vmatmul.msk.bf16.gmra.mxu0 %vm720_vm2, %v5572_v21  ;;  %5405 = vmatmul.msk.bf16.gmra.mxu2 %vm720_vm2, %v5602_v45  ;;  %v5619_v21 = vld [vmem:[%s6232_s8 + $0x1b0] sm:$0xff]  ;;  %v5608_v45 = vld [vmem:[%s6232_s8 + $0x158] sm:$0xff] }
  0x89   : > { %5392 = vmatmul.msk.bf16.gmra.mxu1 %vm720_vm2, %v5589_v46  ;;  %5422 = vmatmul.msk.bf16.gmra.mxu3 %vm720_vm2, %v5619_v21  ;;  %v5610_v21 = vld [vmem:[%s6232_s8 + $0x168] sm:$0xff] }
  0x95   : > { %v6267_v25 = vpop.f32.mrf.mxu0 }
  0x96   : > { %v6321_v52 = vpop.f32.mrf.mxu1 }
  0x98   : > { %5376 = vmatmul.msk.bf16.gmra.mxu0 %vm720_vm2, %v5573_v24  ;;  %5406 = vmatmul.msk.bf16.gmra.mxu2 %vm720_vm2, %v5603_v51 }
  0x99   : > { %5393 = vmatmul.msk.bf16.gmra.mxu1 %vm720_vm2, %v5590_v53  ;;  %5423 = vmatmul.msk.bf16.gmra.mxu3 %vm720_vm2, %v5620_v34  ;;  %v5623_v34 = vld [vmem:[%s6232_s8 + $0x1d0] sm:$0xff] }
  0x9b   : > { %v6330_v57 = vpop.f32.mrf.mxu2 }
  0x9c   : > { %v6412_v39 = vpop.f32.mrf.mxu3 }
  0x9d   : > { %v6270_v26 = vpop.f32.mrf.mxu0  ;;  %14188 = vst [vmem:[#allocation4_spill] sm:$0xff] %v6412_v39 }
  0x9e   : > { %v6334_v58 = vpop.f32.mrf.mxu1 }
  0xa3   : > { %v6338_v60 = vpop.f32.mrf.mxu2 }
  0xa4   : > { %v6421_v46 = vpop.f32.mrf.mxu3 }
  0xa5   : > { %v6278_v31 = vpop.f32.mrf.mxu0  ;;  %14190 = vst [vmem:[#allocation6_spill] sm:$0xff] %v6421_v46 }
  0xa6   : > { %v6341_v62 = vpop.f32.mrf.mxu1 }
  0xa8   : > { %5377 = vmatmul.msk.bf16.gmra.mxu0 %vm720_vm2, %v5574_v29  ;;  %5407 = vmatmul.msk.bf16.gmra.mxu2 %vm720_vm2, %v5604_v61  ;;  %v5607_v29 = vld [vmem:[%s6232_s8 + $0x150] sm:$0xff] }
  0xa9   : > { %5394 = vmatmul.msk.bf16.gmra.mxu1 %vm720_vm2, %v5591_v63  ;;  %5424 = vmatmul.msk.bf16.gmra.mxu3 %vm720_vm2, %v5621_v48 }
  0xab   : > { %v6350_v3 = vpop.f32.mrf.mxu2 }
  0xad   : > { %v6282_v32 = vpop.f32.mrf.mxu0 }
  0xae   : > { %v6354_v4 = vpop.f32.mrf.mxu1 }
  0xb3   : > { %v6358_v6 = vpop.f32.mrf.mxu2 }
  0xb5   : > { %v6290_v37 = vpop.f32.mrf.mxu0 }
  0xb6   : > { %v6361_v8 = vpop.f32.mrf.mxu1 }
  0xb8   : > { %5378 = vmatmul.msk.bf16.gmra.mxu0 %vm720_vm2, %v5575_v35  ;;  %5408 = vmatmul.msk.bf16.gmra.mxu2 %vm720_vm2, %v5605_v7  ;;  %v5622_v7 = vld [vmem:[%s6232_s8 + $0x1c8] sm:$0xff] }
  0xb9   : > { %5395 = vmatmul.msk.bf16.gmra.mxu1 %vm720_vm2, %v5592_v9  ;;  %5425 = vmatmul.msk.bf16.gmra.mxu3 %vm720_vm2, %v5622_v7 }
  0xbb   : > { %v6370_v13 = vpop.f32.mrf.mxu2 }
  0xbd   : > { %v6294_v38 = vpop.f32.mrf.mxu0 }
  0xbe   : > { %v6374_v14 = vpop.f32.mrf.mxu1 }
  0xc3   : > { %v6378_v16 = vpop.f32.mrf.mxu2 }
  0xc5   : > { %v6302_v43 = vpop.f32.mrf.mxu0 }
  0xc6   : > { %v6381_v18 = vpop.f32.mrf.mxu1 }
  0xc8   : > { %5379 = vmatmul.msk.bf16.gmra.mxu0 %vm720_vm2, %v5576_v41  ;;  %5409 = vmatmul.msk.bf16.gmra.mxu2 %vm720_vm2, %v5606_v17 }
  0xc9   : > { %5396 = vmatmul.msk.bf16.gmra.mxu1 %vm720_vm2, %v5593_v19  ;;  %5426 = vmatmul.msk.bf16.gmra.mxu3 %vm720_vm2, %v5623_v34 }
  0xcb   : > { %v6390_v23 = vpop.f32.mrf.mxu2 }
  0xcd   : > { %v6306_v44 = vpop.f32.mrf.mxu0 }
  0xce   : > { %v6394_v24 = vpop.f32.mrf.mxu1 }
  0xd3   : > { %v6398_v28 = vpop.f32.mrf.mxu2 }
  0xd4   : > { %14186 = vst [vmem:[#allocation2_spill] sm:$0xff] %v6398_v28 }
  0xd5   : > { %v6314_v49 = vpop.f32.mrf.mxu0 }
  0xd6   : > { %v6401_v30 = vpop.f32.mrf.mxu1 }
  0xd8   : > { %5380 = vmatmul.msk.bf16.gmra.mxu0 %vm720_vm2, %v5577_v47  ;;  %5410 = vmatmul.msk.bf16.gmra.mxu2 %vm720_vm2, %v5607_v29 }
  0xd9   : > { %5397 = vmatmul.msk.bf16.gmra.mxu1 %vm720_vm2, %v5594_v33 }
  0xdb   : > { %v6409_v36 = vpop.f32.mrf.mxu2 }
  0xdc   : > { %14187 = vst [vmem:[#allocation3_spill] sm:$0xff] %v6409_v36 }
  0xdd   : > { %v6318_v50 = vpop.f32.mrf.mxu0 }
  0xde   : > { %v6414_v40 = vpop.f32.mrf.mxu1 }
  0xe3   : > { %v6418_v42 = vpop.f32.mrf.mxu2 }
  0xe4   : > { %14189 = vst [vmem:[#allocation5_spill] sm:$0xff] %v6418_v42 }
  0xe5   : > { %v6328_v56 = vpop.f32.mrf.mxu0 }
  0xe6   : > { %v6424_v47 = vpop.f32.mrf.mxu1 }
  0xe8   : > { %5381 = vmatmul.msk.bf16.gmra.mxu0 %vm720_vm2, %v5578_v54  ;;  %5411 = vmatmul.msk.bf16.gmra.mxu2 %vm720_vm2, %v5608_v45  ;;  %v6432_v54 = vpop.f32.mrf.mxu3  ;;  %v6468_v45 = vld [vmem:[%s13858_s2] ss:$0 sm:$0xff] }
  0xe9   : > { %14192 = vst [vmem:[#allocation8_spill] sm:$0xff] %v6432_v54  ;;  %v6477_v7 = vadd.f32 %v6468_v45, %v6270_v26  ;;  %v6493_v34 = vadd.f32 %v6468_v45, %v6282_v32  ;;  %v6509_v39 = vadd.f32 %v6468_v45, %v6290_v37  ;;  %v6533_v42 = vadd.f32 %v6468_v45, %v6302_v43 }
  0xeb   : > { %v6429_v53 = vpop.f32.mrf.mxu2  ;;  %14200 = vst [vmem:[#allocation16_spill] sm:$0xff] %v6477_v7 }
  0xec   : > { %14191 = vst [vmem:[#allocation7_spill] sm:$0xff] %v6429_v53 }
  0xed   : > { %v6336_v59 = vpop.f32.mrf.mxu0  ;;  %14204 = vst [vmem:[#allocation20_spill] sm:$0xff] %v6493_v34 }
  0xee   : > { %v6438_v63 = vpop.f32.mrf.mxu1  ;;  %14206 = vst [vmem:[#allocation22_spill] sm:$0xff] %v6509_v39 }
  0xef   : > { %14209 = vst [vmem:[#allocation25_spill] sm:$0xff] %v6533_v42 }
  0xf0   : > { %v6441_v1 = vpop.f32.mrf.mxu3 }
  0xf1   : > { %14194 = vst [vmem:[#allocation10_spill] sm:$0xff] %v6441_v1  ;;  %v1523_v1 = vmul.f32 %v6477_v7, %v6477_v7 }
  0xf3   : > { %v6436_v61 = vpop.f32.mrf.mxu2 }
  0xf4   : > { %14193 = vst [vmem:[#allocation9_spill] sm:$0xff] %v6436_v61 }
  0xf5   : > { %v6348_v2 = vpop.f32.mrf.mxu0 }
  0xf6   : > { %v6450_v11 = vpop.f32.mrf.mxu1 }
  0xf8   : > { %5382 = vmatmul.msk.bf16.gmra.mxu0 %vm720_vm2, %v5579_v0  ;;  %v5609_v0 = vld [vmem:[%s6232_s8 + $0x160] sm:$0xff]  ;;  %v6452_v17 = vpop.f32.mrf.mxu3 }
  0xf9   : > { %5412 = vmatmul.msk.bf16.gmra.mxu2 %vm720_vm2, %v5609_v0  ;;  %14196 = vst [vmem:[#allocation12_spill] sm:$0xff] %v6452_v17  ;;  %v6487_v17 = vadd.f32 %v6468_v45, %v6278_v31  ;;  %v1261_v31 = vsel %vm1259_vm3, %v6477_v7, 0.0  ;;  %v6520_v7 = vadd.f32 %v6468_v45, %v6294_v38 }
  0xfb   : > { %14203 = vst [vmem:[#allocation19_spill] sm:$0xff] %v6487_v17  ;;  %v1524_v46 = vmul.f32 %v6487_v17, %v6487_v17 }
  0xfc   : > { %14207 = vst [vmem:[#allocation23_spill] sm:$0xff] %v6520_v7 }
  0xfd   : > { %v6356_v5 = vpop.f32.mrf.mxu0 }
  0xfe   : > { %v6461_v33 = vpop.f32.mrf.mxu1 }
 0x100   : > { %v6459_v29 = vpop.f32.mrf.mxu3 }
 0x101   : > { %14198 = vst [vmem:[#allocation14_spill] sm:$0xff] %v6459_v29  ;;  %v6481_v29 = vadd.f32 %v6468_v45, %v6267_v25 }
 0x103   : > { %14201 = vst [vmem:[#allocation17_spill] sm:$0xff] %v6481_v29  ;;  %v1522_v25 = vmul.f32 %v6481_v29, %v6481_v29  ;;  %v1260_v32 = vsel %vm1259_vm3, %v6481_v29, 0.0  ;;  %v1653_v29 = vsel %vm1259_vm3, %v1524_v46, 0.0  ;;  %v1527_v46 = vmul.f32 %v6520_v7, %v6520_v7 }
 0x104   : > { %v1262_v61 = vadd.f32 %v1261_v31, %v1260_v32  ;;  %v1267_v31 = vsel %vm1259_vm3, %v6509_v39, 0.0  ;;  %v6543_v32 = vadd.f32 %v6468_v45, %v6306_v44 }
 0x105   : > { %v6368_v12 = vpop.f32.mrf.mxu0  ;;  %v1650_v37 = vsel %vm1259_vm3, %v1522_v25, 0.0 }
 0x106   : > { %v6495_v26 = vpop.f32.mrf.mxu1  ;;  %14210 = vst [vmem:[#allocation26_spill] sm:$0xff] %v6543_v32 }
 0x108   : > { %5383 = vmatmul.msk.bf16.gmra.mxu0 %vm720_vm2, %v5580_v10  ;;  %v6447_v10 = vpop.f32.mrf.mxu2 }
 0x109   : > { %14195 = vst [vmem:[#allocation11_spill] sm:$0xff] %v6447_v10  ;;  %5413 = vmatmul.msk.bf16.gmra.mxu2 %vm720_vm2, %v5610_v21  ;;  %v6483_v21 = vpop.f32.mrf.mxu3  ;;  %v5611_v10 = vld [vmem:[%s6232_s8 + $0x170] sm:$0xff] }
 0x10a   : > { %14202 = vst [vmem:[#allocation18_spill] sm:$0xff] %v6483_v21 }
 0x10d   : > { %v6376_v15 = vpop.f32.mrf.mxu0 }
 0x111   : > { %v6524_v53 = vpop.f32.mrf.mxu3 }
 0x112   : > { %14208 = vst [vmem:[#allocation24_spill] sm:$0xff] %v6524_v53 }
 0x115   : > { %v6388_v22 = vpop.f32.mrf.mxu0 }
 0x118   : > { %5384 = vmatmul.msk.bf16.gmra.mxu0 %vm720_vm2, %v5581_v20  ;;  %v6456_v20 = vpop.f32.mrf.mxu2 }
 0x119   : > { %14197 = vst [vmem:[#allocation13_spill] sm:$0xff] %v6456_v20  ;;  %v1263_v20 = vsel %vm1259_vm3, %v6487_v17, 0.0  ;;  %v1526_v17 = vmul.f32 %v6509_v39, %v6509_v39  ;;  %5414 = vmatmul.msk.bf16.gmra.mxu2 %vm720_vm2, %v5611_v10  ;;  %v6571_v39 = vpop.f32.mrf.mxu3 }
 0x11a   : > { %v1264_v36 = vadd.f32 %v1263_v20, %v1262_v61  ;;  %v1269_v20 = vsel %vm1259_vm3, %v6520_v7, 0.0 }
 0x11b   : > { %v1657_v61 = vsel %vm1259_vm3, %v1526_v17, 0.0  ;;  %v1271_v17 = vsel %vm1259_vm3, %v6533_v42, 0.0 }
 0x11d   : > { %v6396_v27 = vpop.f32.mrf.mxu0 }
 0x120   : > { %v6472_v0 = vpop.f32.mrf.mxu2 }
 0x121   : > { %14199 = vst [vmem:[#allocation15_spill] sm:$0xff] %v6472_v0  ;;  %v1651_v0 = vsel %vm1259_vm3, %v1523_v1, 0.0  ;;  %v1265_v1 = vsel %vm1259_vm3, %v6493_v34, 0.0 }
 0x122   : > { %v1652_v38 = vadd.f32 %v1651_v0, %v1650_v37  ;;  %v1266_v43 = vadd.f32 %v1265_v1, %v1264_v36  ;;  %v1528_v0 = vmul.f32 %v6533_v42, %v6533_v42  ;;  %v1659_v37 = vsel %vm1259_vm3, %v1527_v46, 0.0 }
 0x123   : > { %v1529_v1 = vmul.f32 %v6543_v32, %v6543_v32 }
 0x124   : > { %v1654_v53 = vadd.f32 %v1653_v29, %v1652_v38  ;;  %v1268_v36 = vadd.f32 %v1267_v31, %v1266_v43  ;;  %v6560_v29 = vpop.f32.mrf.mxu1  ;;  %v6569_v38 = vadd.f32 %v6468_v45, %v6318_v50  ;;  %v6580_v31 = vadd.f32 %v6468_v45, %v6328_v56 }
 0x125   : > { %v6407_v35 = vpop.f32.mrf.mxu0  ;;  %v1663_v50 = vsel %vm1259_vm3, %v1529_v1, 0.0 }
 0x126   : > { %14212 = vst [vmem:[#allocation28_spill] sm:$0xff] %v6569_v38  ;;  %v1270_v7 = vadd.f32 %v1269_v20, %v1268_v36  ;;  %v1531_v20 = vmul.f32 %v6569_v38, %v6569_v38 }
 0x127   : > { %14213 = vst [vmem:[#allocation29_spill] sm:$0xff] %v6580_v31 }
 0x128   : > { %v6501_v21 = vpop.f32.mrf.mxu2  ;;  %v1272_v43 = vadd.f32 %v1271_v17, %v1270_v7  ;;  %v1277_v7 = vsel %vm1259_vm3, %v6569_v38, 0.0  ;;  %v6600_v17 = vadd.f32 %v6468_v45, %v6348_v2 }
 0x129   : > { %14205 = vst [vmem:[#allocation21_spill] sm:$0xff] %v6501_v21  ;;  %v1525_v21 = vmul.f32 %v6493_v34, %v6493_v34  ;;  %v5624_v34 = vld [vmem:[%s6232_s8 + $0x1d8] sm:$0xff] }
 0x12a   : > { %5427 = vmatmul.msk.bf16.gmra.mxu3 %vm720_vm2, %v5624_v34  ;;  %v1273_v34 = vsel %vm1259_vm3, %v6543_v32, 0.0  ;;  %14215 = vst [vmem:[#allocation31_spill] sm:$0xff] %v6600_v17 }
 0x12b   : > { %v1655_v25 = vsel %vm1259_vm3, %v1525_v21, 0.0  ;;  %v6557_v21 = vadd.f32 %v6468_v45, %v6314_v49  ;;  %v1274_v36 = vadd.f32 %v1273_v34, %v1272_v43  ;;  %v1279_v34 = vsel %vm1259_vm3, %v6580_v31, 0.0 }
 0x12c   : > { %v1656_v44 = vadd.f32 %v1655_v25, %v1654_v53  ;;  %v1661_v53 = vsel %vm1259_vm3, %v1528_v0, 0.0  ;;  %v6589_v0 = vadd.f32 %v6468_v45, %v6336_v59  ;;  %v6613_v38 = vpop.f32.mrf.mxu1 }
 0x12d   : > { %v6416_v41 = vpop.f32.mrf.mxu0  ;;  %14211 = vst [vmem:[#allocation27_spill] sm:$0xff] %v6557_v21  ;;  %v1530_v25 = vmul.f32 %v6557_v21, %v6557_v21 }
 0x12e   : > { %v1658_v49 = vadd.f32 %v1657_v61, %v1656_v44  ;;  %v1275_v61 = vsel %vm1259_vm3, %v6557_v21, 0.0  ;;  %14214 = vst [vmem:[#allocation30_spill] sm:$0xff] %v6589_v0 }
 0x12f   : > { %v1665_v56 = vsel %vm1259_vm3, %v1530_v25, 0.0  ;;  %v1533_v25 = vmul.f32 %v6589_v0, %v6589_v0 }
 0x130   : > { %v6548_v10 = vpop.f32.mrf.mxu2  ;;  %v1660_v46 = vadd.f32 %v1659_v37, %v1658_v49  ;;  %v1532_v37 = vmul.f32 %v6580_v31, %v6580_v31  ;;  %v1276_v49 = vadd.f32 %v1275_v61, %v1274_v36  ;;  %v6624_v36 = vadd.f32 %v6468_v45, %v6368_v12 }
 0x132   : > { %v1662_v44 = vadd.f32 %v1661_v53, %v1660_v46  ;;  %v1667_v53 = vsel %vm1259_vm3, %v1531_v20, 0.0  ;;  %v6611_v46 = vadd.f32 %v6468_v45, %v6356_v5  ;;  %v1278_v2 = vadd.f32 %v1277_v7, %v1276_v49  ;;  %14217 = vst [vmem:[#allocation33_spill] sm:$0xff] %v6624_v36  ;;  %v5625_v49 = vld [vmem:[%s6232_s8 + $0x1e0] sm:$0xff] }
 0x133   : > { %v1669_v61 = vsel %vm1259_vm3, %v1532_v37, 0.0  ;;  %v1281_v20 = vsel %vm1259_vm3, %v6589_v0, 0.0  ;;  %v1283_v7 = vsel %vm1259_vm3, %v6600_v17, 0.0 }
 0x134   : > { %v1664_v1 = vadd.f32 %v1663_v50, %v1662_v44  ;;  %14216 = vst [vmem:[#allocation32_spill] sm:$0xff] %v6611_v46  ;;  %v6615_v50 = vpop.f32.mrf.mxu3  ;;  %v1534_v44 = vmul.f32 %v6600_v17, %v6600_v17  ;;  %v1280_v31 = vadd.f32 %v1279_v34, %v1278_v2  ;;  %v1535_v37 = vmul.f32 %v6611_v46, %v6611_v46 }
 0x135   : > { %v6427_v51 = vpop.f32.mrf.mxu0  ;;  %v1536_v34 = vmul.f32 %v6624_v36, %v6624_v36  ;;  %v1287_v2 = vsel %vm1259_vm3, %v6624_v36, 0.0 }
 0x136   : > { %v1666_v43 = vadd.f32 %v1665_v56, %v1664_v1  ;;  %v1671_v56 = vsel %vm1259_vm3, %v1533_v25, 0.0  ;;  %v6633_v1 = vadd.f32 %v6468_v45, %v6376_v15  ;;  %v1282_v21 = vadd.f32 %v1281_v20, %v1280_v31 }
 0x137   : > { %v1673_v12 = vsel %vm1259_vm3, %v1534_v44, 0.0  ;;  %v6645_v25 = vadd.f32 %v6468_v45, %v6388_v22  ;;  %v1675_v31 = vsel %vm1259_vm3, %v1535_v37, 0.0  ;;  %v6655_v20 = vadd.f32 %v6468_v45, %v6396_v27 }
 0x138   : > { %v6602_v59 = vpop.f32.mrf.mxu2  ;;  %v1668_v5 = vadd.f32 %v1667_v53, %v1666_v43  ;;  %14218 = vst [vmem:[#allocation34_spill] sm:$0xff] %v6633_v1  ;;  %v1285_v53 = vsel %vm1259_vm3, %v6611_v46, 0.0  ;;  %v1284_v43 = vadd.f32 %v1283_v7, %v1282_v21  ;;  %v1677_v21 = vsel %vm1259_vm3, %v1536_v34, 0.0 }
 0x139   : > { %14219 = vst [vmem:[#allocation35_spill] sm:$0xff] %v6645_v25  ;;  %v6668_v7 = vadd.f32 %v6468_v45, %v6407_v35  ;;  %v1539_v34 = vmul.f32 %v6655_v20, %v6655_v20 }
 0x13a   : > { %v1670_v0 = vadd.f32 %v1669_v61, %v1668_v5  ;;  %5428 = vmatmul.msk.bf16.gmra.mxu3 %vm720_vm2, %v5625_v49  ;;  %v1537_v61 = vmul.f32 %v6633_v1, %v6633_v1  ;;  %14220 = vst [vmem:[#allocation36_spill] sm:$0xff] %v6655_v20  ;;  %v1286_v5 = vadd.f32 %v1285_v53, %v1284_v43  ;;  %v6670_v49 = vpop.f32.mrf.mxu1  ;;  %v1291_v53 = vsel %vm1259_vm3, %v6645_v25, 0.0 }
 0x13b   : > { %14221 = vst [vmem:[#allocation37_spill] sm:$0xff] %v6668_v7 }
 0x13c   : > { %v1672_v15 = vadd.f32 %v1671_v56, %v1670_v0  ;;  %v6659_v46 = vpop.f32.mrf.mxu3  ;;  %v1289_v0 = vsel %vm1259_vm3, %v6633_v1, 0.0  ;;  %v1538_v56 = vmul.f32 %v6645_v25, %v6645_v25  ;;  %v1288_v37 = vadd.f32 %v1287_v2, %v1286_v5 }
 0x13d   : > { %v6434_v55 = vpop.f32.mrf.mxu0  ;;  %v1293_v2 = vsel %vm1259_vm3, %v6655_v20, 0.0 }
 0x13e   : > { %v1674_v44 = vadd.f32 %v1673_v12, %v1672_v15  ;;  %v1679_v12 = vsel %vm1259_vm3, %v1537_v61, 0.0  ;;  %v6679_v15 = vadd.f32 %v6468_v45, %v6416_v41  ;;  %v1290_v1 = vadd.f32 %v1289_v0, %v1288_v37 }
 0x13f   : > { %v1540_v61 = vmul.f32 %v6668_v7, %v6668_v7  ;;  %v1683_v41 = vsel %vm1259_vm3, %v1539_v34, 0.0 }
 0x140   : > { %v6657_v22 = vpop.f32.mrf.mxu2  ;;  %v1676_v27 = vadd.f32 %v1675_v31, %v1674_v44  ;;  %14222 = vst [vmem:[#allocation38_spill] sm:$0xff] %v6679_v15  ;;  %v1681_v31 = vsel %vm1259_vm3, %v1538_v56, 0.0  ;;  %v6690_v44 = vadd.f32 %v6468_v45, %v6427_v51  ;;  %v1292_v25 = vadd.f32 %v1291_v53, %v1290_v1 }
 0x141   : > { %v1541_v0 = vmul.f32 %v6679_v15, %v6679_v15  ;;  %v6699_v56 = vadd.f32 %v6468_v45, %v6434_v55  ;;  %v1685_v51 = vsel %vm1259_vm3, %v1540_v61, 0.0  ;;  %v1297_v1 = vsel %vm1259_vm3, %v6679_v15, 0.0 }
 0x142   : > { %v1678_v43 = vadd.f32 %v1677_v21, %v1676_v27  ;;  %14223 = vst [vmem:[#allocation39_spill] sm:$0xff] %v6690_v44  ;;  %v1295_v21 = vsel %vm1259_vm3, %v6668_v7, 0.0  ;;  %v1294_v37 = vadd.f32 %v1293_v2, %v1292_v25 }
 0x143   : > { %14224 = vst [vmem:[#allocation40_spill] sm:$0xff] %v6699_v56  ;;  %v1687_v25 = vsel %vm1259_vm3, %v1541_v0, 0.0  ;;  %v1543_v2 = vmul.f32 %v6699_v56, %v6699_v56  ;;  %v1301_v0 = vsel %vm1259_vm3, %v6699_v56, 0.0 }
 0x144   : > { %v1680_v5 = vadd.f32 %v1679_v12, %v1678_v43  ;;  %v6701_v20 = vpop.f32.mrf.mxu3  ;;  %v1542_v12 = vmul.f32 %v6690_v44, %v6690_v44  ;;  %v1296_v43 = vadd.f32 %v1295_v21, %v1294_v37 }
 0x145   : > { %v6445_v9 = vpop.f32.mrf.mxu0 }
 0x146   : > { %v1682_v27 = vadd.f32 %v1681_v31, %v1680_v5  ;;  %v6710_v53 = vadd.f32 %v6468_v45, %v6445_v9  ;;  %v1299_v31 = vsel %vm1259_vm3, %v6690_v44, 0.0  ;;  %v5626_v5 = vld [vmem:[%s6232_s8 + $0x1e8] sm:$0xff]  ;;  %v1298_v9 = vadd.f32 %v1297_v1, %v1296_v43 }
 0x147   : > { %v1689_v21 = vsel %vm1259_vm3, %v1542_v12, 0.0  ;;  %v1691_v1 = vsel %vm1259_vm3, %v1543_v2, 0.0 }
 0x148   : > { %14225 = vst [vmem:[#allocation41_spill] sm:$0xff] %v6710_v53  ;;  %v1684_v34 = vadd.f32 %v1683_v41, %v1682_v27  ;;  %v6712_v55 = vpop.f32.mrf.mxu2  ;;  %v6724_v41 = vpop.f32.mrf.mxu1  ;;  %v1544_v27 = vmul.f32 %v6710_v53, %v6710_v53 }
 0x14a   : > { %v1686_v15 = vadd.f32 %v1685_v51, %v1684_v34  ;;  %5429 = vmatmul.msk.bf16.gmra.mxu3 %vm720_vm2, %v5626_v5  ;;  %v1300_v51 = vadd.f32 %v1299_v31, %v1298_v9  ;;  %v1303_v34 = vsel %vm1259_vm3, %v6710_v53, 0.0  ;;  %v1693_v5 = vsel %vm1259_vm3, %v1544_v27, 0.0 }
 0x14c   : > { %v1302_v44 = vadd.f32 %v1301_v0, %v1300_v51 }
 0x14d   : > { %v6454_v19 = vpop.f32.mrf.mxu0 }
 0x14e   : > { %v6721_v61 = vadd.f32 %v6468_v45, %v6454_v19  ;;  %v1688_v19 = vadd.f32 %v1687_v25, %v1686_v15  ;;  %v1304_v9 = vadd.f32 %v1303_v34, %v1302_v44 }
 0x150   : > { %14226 = vst [vmem:[#allocation42_spill] sm:$0xff] %v6721_v61  ;;  %v1545_v12 = vmul.f32 %v6721_v61, %v6721_v61  ;;  %v1690_v56 = vadd.f32 %v1689_v21, %v1688_v19  ;;  %v1305_v15 = vsel %vm1259_vm3, %v6721_v61, 0.0  ;;  %v6765_v53 = vpop.f32.mrf.mxu2 }
 0x151   : > { %v1306_v51 = vadd.f32 %v1305_v15, %v1304_v9 }
 0x152   : > { %v1692_v2 = vadd.f32 %v1691_v1, %v1690_v56 }
 0x154   : > { %v1694_v19 = vadd.f32 %v1693_v5, %v1692_v2 }
 0x155   : > { %v6470_v48 = vpop.f32.mrf.mxu0 }
 0x156   : > { %v6733_v37 = vadd.f32 %v6468_v45, %v6470_v48  ;;  %v6745_v48 = vpop.f32.mrf.mxu3 }
 0x158   : > { %14227 = vst [vmem:[#allocation43_spill] sm:$0xff] %v6733_v37  ;;  %v1546_v25 = vmul.f32 %v6733_v37, %v6733_v37  ;;  %v1307_v21 = vsel %vm1259_vm3, %v6733_v37, 0.0 }
 0x15d   : > { %v6499_v54 = vpop.f32.mrf.mxu0 }
 0x15e   : > { %v6743_v43 = vadd.f32 %v6468_v45, %v6499_v54  ;;  %v1695_v54 = vsel %vm1259_vm3, %v1545_v12, 0.0  ;;  %v6776_v12 = vpop.f32.mrf.mxu1 }
 0x15f   : > { %v1696_v34 = vadd.f32 %v1695_v54, %v1694_v19 }
 0x160   : > { %14228 = vst [vmem:[#allocation44_spill] sm:$0xff] %v6743_v43  ;;  %v1547_v0 = vmul.f32 %v6743_v43, %v6743_v43  ;;  %v1309_v44 = vsel %vm1259_vm3, %v6743_v43, 0.0  ;;  %v6787_v43 = vpop.f32.mrf.mxu3 }
 0x162   : > { %v1699_v5 = vsel %vm1259_vm3, %v1547_v0, 0.0 }
 0x165   : > { %v6546_v28 = vpop.f32.mrf.mxu0 }
 0x166   : > { %v6754_v31 = vadd.f32 %v6468_v45, %v6546_v28  ;;  %v1697_v28 = vsel %vm1259_vm3, %v1546_v25, 0.0 }
 0x167   : > { %v1698_v9 = vadd.f32 %v1697_v28, %v1696_v34  ;;  %v5627_v34 = vld [vmem:[%s6232_s8 + $0x1f0] sm:$0xff] }
 0x168   : > { %14229 = vst [vmem:[#allocation45_spill] sm:$0xff] %v6754_v31  ;;  %v1548_v56 = vmul.f32 %v6754_v31, %v6754_v31  ;;  %v1311_v15 = vsel %vm1259_vm3, %v6754_v31, 0.0  ;;  %5430 = vmatmul.msk.bf16.gmra.mxu3 %vm720_vm2, %v5627_v34  ;;  %v6825_v34 = vpop.f32.mrf.mxu1 }
 0x16a   : > { %v1701_v54 = vsel %vm1259_vm3, %v1548_v56, 0.0 }
 0x16d   : > { %v6591_v32 = vpop.f32.mrf.mxu0 }
 0x16e   : > { %v6763_v27 = vadd.f32 %v6468_v45, %v6591_v32  ;;  %v1308_v32 = vadd.f32 %v1307_v21, %v1306_v51  ;;  %v1700_v51 = vadd.f32 %v1699_v5, %v1698_v9 }
 0x170   : > { %14230 = vst [vmem:[#allocation46_spill] sm:$0xff] %v6763_v27  ;;  %v1549_v25 = vmul.f32 %v6763_v27, %v6763_v27  ;;  %v1313_v21 = vsel %vm1259_vm3, %v6763_v27, 0.0 }
 0x175   : > { %v6636_v42 = vpop.f32.mrf.mxu0 }
 0x176   : > { %v6774_v1 = vadd.f32 %v6468_v45, %v6636_v42  ;;  %v1310_v42 = vadd.f32 %v1309_v44, %v1308_v32  ;;  %v1702_v32 = vadd.f32 %v1701_v54, %v1700_v51 }
 0x178   : > { %14231 = vst [vmem:[#allocation47_spill] sm:$0xff] %v6774_v1  ;;  %v1550_v0 = vmul.f32 %v6774_v1, %v6774_v1  ;;  %v1312_v31 = vadd.f32 %v1311_v15, %v1310_v42  ;;  %v1315_v28 = vsel %vm1259_vm3, %v6774_v1, 0.0  ;;  %v6818_v42 = vpop.f32.mrf.mxu2 }
 0x17a   : > { %v1314_v27 = vadd.f32 %v1313_v21, %v1312_v31  ;;  %v1258_v31 = vld [vmem:[%s13861_s5 + $0x38] sm:$0xff] }
 0x17b   : > { %1925 = vmatpush.msrb.mxu1 %v1258_v31  ;;  %v6843_v31 = vadd.f32 %v6468_v45, %v6334_v58 }
 0x17d   : > { %v6681_v35 = vpop.f32.mrf.mxu0  ;;  %14237 = vst [vmem:[#allocation53_spill] sm:$0xff] %v6843_v31 }
 0x17e   : > { %v6785_v2 = vadd.f32 %v6468_v45, %v6681_v35  ;;  %v1703_v35 = vsel %vm1259_vm3, %v1549_v25, 0.0 }
 0x17f   : > { %v1704_v9 = vadd.f32 %v1703_v35, %v1702_v32 }
 0x180   : > { %14232 = vst [vmem:[#allocation48_spill] sm:$0xff] %v6785_v2  ;;  %v1551_v44 = vmul.f32 %v6785_v2, %v6785_v2  ;;  %v1317_v5 = vsel %vm1259_vm3, %v6785_v2, 0.0  ;;  %v6836_v2 = vadd.f32 %v6468_v45, %v6321_v52 }
 0x182   : > { %v1707_v54 = vsel %vm1259_vm3, %v1551_v44, 0.0  ;;  %14236 = vst [vmem:[#allocation52_spill] sm:$0xff] %v6836_v2 }
 0x185   : > { %v1004_v7 = vpop.f32.mrf.mxu0 }
 0x186   : > { %v6795_v19 = vadd.f32 %v6468_v45, %v1004_v7  ;;  %v1705_v7 = vsel %vm1259_vm3, %v1550_v0, 0.0 }
 0x188   : > { %14233 = vst [vmem:[#allocation49_spill] sm:$0xff] %v6795_v19  ;;  %v1552_v15 = vmul.f32 %v6795_v19, %v6795_v19  ;;  %v1319_v21 = vsel %vm1259_vm3, %v6795_v19, 0.0 }
 0x18a   : > { %v1709_v35 = vsel %vm1259_vm3, %v1552_v15, 0.0 }
 0x18d   : > { %v1006_v61 = vpop.f32.mrf.mxu0 }
 0x18e   : > { %v6803_v56 = vadd.f32 %v6468_v45, %v1006_v61  ;;  %v1316_v61 = vadd.f32 %v1315_v28, %v1314_v27  ;;  %v6827_v27 = vpop.f32.mrf.mxu3 }
 0x190   : > { %14234 = vst [vmem:[#allocation50_spill] sm:$0xff] %v6803_v56  ;;  %v1553_v0 = vmul.f32 %v6803_v56, %v6803_v56  ;;  %v1318_v51 = vadd.f32 %v1317_v5, %v1316_v61  ;;  %v1321_v28 = vsel %vm1259_vm3, %v6803_v56, 0.0 }
 0x192   : > { %v1320_v19 = vadd.f32 %v1319_v21, %v1318_v51 }
 0x194   : > { %v1322_v61 = vadd.f32 %v1321_v28, %v1320_v19  ;;  %v6859_v28 = vpop.f32.mrf.mxu2 }
 0x195   : > { %v1009_v37 = vpop.f32.mrf.mxu0 }
 0x196   : > { %v6812_v25 = vadd.f32 %v6468_v45, %v1009_v37  ;;  %v1706_v37 = vadd.f32 %v1705_v7, %v1704_v9  ;;  %v1711_v7 = vsel %vm1259_vm3, %v1553_v0, 0.0  ;;  %v1556_v0 = vmul.f32 %v6836_v2, %v6836_v2 }
 0x198   : > { %14235 = vst [vmem:[#allocation51_spill] sm:$0xff] %v6812_v25  ;;  %v1554_v44 = vmul.f32 %v6812_v25, %v6812_v25  ;;  %v1708_v32 = vadd.f32 %v1707_v54, %v1706_v37  ;;  %v1323_v5 = vsel %vm1259_vm3, %v6812_v25, 0.0  ;;  %v6853_v37 = vadd.f32 %v6468_v45, %v6341_v62 }
 0x199   : > { %v1324_v52 = vadd.f32 %v1323_v5, %v1322_v61  ;;  %v1557_v62 = vmul.f32 %v6843_v31, %v6843_v31 }
 0x19a   : > { %v1710_v9 = vadd.f32 %v1709_v35, %v1708_v32  ;;  %v1713_v56 = vsel %vm1259_vm3, %v1554_v44, 0.0  ;;  %14239 = vst [vmem:[#allocation55_spill] sm:$0xff] %v6853_v37  ;;  %v6861_v44 = vpop.f32.mrf.mxu3  ;;  %v1327_v32 = vsel %vm1259_vm3, %v6836_v2, 0.0 }
 0x19c   : > { %v1712_v21 = vadd.f32 %v1711_v7, %v1710_v9  ;;  %v6869_v7 = vadd.f32 %v6468_v45, %v6354_v4  ;;  %v5628_v4 = vld [vmem:[%s6232_s8 + $0x1f8] sm:$0xff] }
 0x19d   : > { %v1011_v15 = vpop.f32.mrf.mxu0  ;;  %5431 = vmatmul.msk.bf16.gmra.mxu3 %vm720_vm2, %v5628_v4 }
 0x19e   : > { %v6847_v54 = vadd.f32 %v6468_v45, %v1011_v15  ;;  %v1714_v51 = vadd.f32 %v1713_v56, %v1712_v21  ;;  %14240 = vst [vmem:[#allocation56_spill] sm:$0xff] %v6869_v7  ;;  %v6872_v56 = vpop.f32.mrf.mxu1  ;;  %v1717_v15 = vsel %vm1259_vm3, %v1556_v0, 0.0  ;;  %v1329_v21 = vsel %vm1259_vm3, %v6843_v31, 0.0 }
 0x19f   : > { %v1559_v0 = vmul.f32 %v6869_v7, %v6869_v7 }
 0x1a0   : > { %14238 = vst [vmem:[#allocation54_spill] sm:$0xff] %v6847_v54  ;;  %v1325_v19 = vsel %vm1259_vm3, %v6847_v54, 0.0  ;;  %v1555_v58 = vmul.f32 %v6847_v54, %v6847_v54 }
 0x1a1   : > { %v1326_v35 = vadd.f32 %v1325_v19, %v1324_v52  ;;  %v1558_v52 = vmul.f32 %v6853_v37, %v6853_v37  ;;  %v6881_v19 = vadd.f32 %v6468_v45, %v6361_v8  ;;  %v1723_v4 = vsel %vm1259_vm3, %v1559_v0, 0.0 }
 0x1a2   : > { %v1715_v5 = vsel %vm1259_vm3, %v1555_v58, 0.0  ;;  %v1719_v58 = vsel %vm1259_vm3, %v1557_v62, 0.0 }
 0x1a3   : > { %v1328_v9 = vadd.f32 %v1327_v32, %v1326_v35  ;;  %v1716_v61 = vadd.f32 %v1715_v5, %v1714_v51  ;;  %14241 = vst [vmem:[#allocation57_spill] sm:$0xff] %v6881_v19  ;;  %v1331_v51 = vsel %vm1259_vm3, %v6853_v37, 0.0  ;;  %v6891_v35 = vadd.f32 %v6468_v45, %v6374_v14  ;;  %v6903_v14 = vpop.f32.mrf.mxu3 }
 0x1a4   : > { %v1721_v5 = vsel %vm1259_vm3, %v1558_v52, 0.0  ;;  %v1560_v62 = vmul.f32 %v6881_v19, %v6881_v19  ;;  %v6912_v52 = vadd.f32 %v6468_v45, %v6394_v24 }
 0x1a5   : > { %v1330_v2 = vadd.f32 %v1329_v21, %v1328_v9  ;;  %v1718_v54 = vadd.f32 %v1717_v15, %v1716_v61  ;;  %14242 = vst [vmem:[#allocation58_spill] sm:$0xff] %v6891_v35  ;;  %v1333_v9 = vsel %vm1259_vm3, %v6869_v7, 0.0  ;;  %v6901_v61 = vadd.f32 %v6468_v45, %v6381_v18  ;;  %v6914_v18 = vpop.f32.mrf.mxu2 }
 0x1a6   : > { %14244 = vst [vmem:[#allocation60_spill] sm:$0xff] %v6912_v52  ;;  %v6925_v24 = vpop.f32.mrf.mxu1 }
 0x1a7   : > { %v1332_v32 = vadd.f32 %v1331_v51, %v1330_v2  ;;  %v1720_v8 = vadd.f32 %v1719_v58, %v1718_v54  ;;  %14243 = vst [vmem:[#allocation59_spill] sm:$0xff] %v6901_v61  ;;  %v1335_v2 = vsel %vm1259_vm3, %v6881_v19, 0.0  ;;  %v1561_v54 = vmul.f32 %v6891_v35, %v6891_v35 }
 0x1a8   : > { %v1562_v0 = vmul.f32 %v6901_v61, %v6901_v61 }
 0x1a9   : > { %v1334_v15 = vadd.f32 %v1333_v9, %v1332_v32  ;;  %v1722_v21 = vadd.f32 %v1721_v5, %v1720_v8  ;;  %v1725_v32 = vsel %vm1259_vm3, %v1560_v62, 0.0  ;;  %v1337_v8 = vsel %vm1259_vm3, %v6891_v35, 0.0 }
 0x1aa   : > { %v6923_v5 = vadd.f32 %v6468_v45, %v6401_v30  ;;  %v1563_v62 = vmul.f32 %v6912_v52, %v6912_v52  ;;  %v1729_v30 = vsel %vm1259_vm3, %v1562_v0, 0.0  ;;  %v6952_v0 = vadd.f32 %v6468_v45, %v6438_v63 }
 0x1ab   : > { %v1336_v58 = vadd.f32 %v1335_v2, %v1334_v15  ;;  %v1724_v51 = vadd.f32 %v1723_v4, %v1722_v21  ;;  %v1727_v15 = vsel %vm1259_vm3, %v1561_v54, 0.0  ;;  %v1339_v21 = vsel %vm1259_vm3, %v6901_v61, 0.0 }
 0x1ac   : > { %14245 = vst [vmem:[#allocation61_spill] sm:$0xff] %v6923_v5  ;;  %v6934_v4 = vadd.f32 %v6468_v45, %v6414_v40  ;;  %v1564_v54 = vmul.f32 %v6923_v5, %v6923_v5  ;;  %v1731_v61 = vsel %vm1259_vm3, %v1563_v62, 0.0  ;;  %v1343_v40 = vsel %vm1259_vm3, %v6923_v5, 0.0 }
 0x1ad   : > { %v1338_v9 = vadd.f32 %v1337_v8, %v1336_v58  ;;  %v1726_v19 = vadd.f32 %v1725_v32, %v1724_v51  ;;  %v1341_v58 = vsel %vm1259_vm3, %v6912_v52, 0.0  ;;  %v6943_v51 = vadd.f32 %v6468_v45, %v6424_v47  ;;  %14248 = vst [vmem:[#allocation64_spill] sm:$0xff] %v6952_v0  ;;  %v1257_v47 = vld [vmem:[%s13861_s5 + $0x30] sm:$0xff] }
 0x1ae   : > { %14246 = vst [vmem:[#allocation62_spill] sm:$0xff] %v6934_v4  ;;  %v1345_v62 = vsel %vm1259_vm3, %v6934_v4, 0.0  ;;  %v6966_v63 = vadd.f32 %v6468_v45, %v6450_v11  ;;  %1926 = vmatpush.msrb.mxu1 %v1257_v47  ;;  %v6979_v5 = vpop.f32.mrf.mxu1  ;;  %v6988_v47 = vadd.f32 %v6468_v45, %v6495_v26 }
 0x1af   : > { %v1340_v2 = vadd.f32 %v1339_v21, %v1338_v9  ;;  %v1728_v35 = vadd.f32 %v1727_v15, %v1726_v19  ;;  %14247 = vst [vmem:[#allocation63_spill] sm:$0xff] %v6943_v51  ;;  %v1565_v19 = vmul.f32 %v6934_v4, %v6934_v4  ;;  %v6957_v21 = vpop.f32.mrf.mxu3 }
 0x1b0   : > { %14249 = vst [vmem:[#allocation65_spill] sm:$0xff] %v6966_v63 }
 0x1b1   : > { %v1342_v32 = vadd.f32 %v1341_v58, %v1340_v2  ;;  %v1730_v8 = vadd.f32 %v1729_v30, %v1728_v35  ;;  %v1733_v35 = vsel %vm1259_vm3, %v1564_v54, 0.0  ;;  %v1566_v2 = vmul.f32 %v6943_v51, %v6943_v51  ;;  %v6968_v58 = vpop.f32.mrf.mxu2  ;;  %14251 = vst [vmem:[#allocation67_spill] sm:$0xff] %v6988_v47 }
 0x1b2   : > { %v1347_v54 = vsel %vm1259_vm3, %v6943_v51, 0.0 }
 0x1b3   : > { %v1344_v9 = vadd.f32 %v1343_v40, %v1342_v32  ;;  %v1732_v15 = vadd.f32 %v1731_v61, %v1730_v8  ;;  %v1735_v32 = vsel %vm1259_vm3, %v1565_v19, 0.0  ;;  %v1567_v8 = vmul.f32 %v6952_v0, %v6952_v0 }
 0x1b4   : > { %v6977_v40 = vadd.f32 %v6468_v45, %v6461_v33  ;;  %v1568_v19 = vmul.f32 %v6966_v63, %v6966_v63 }
 0x1b5   : > { %v1346_v61 = vadd.f32 %v1345_v62, %v1344_v9  ;;  %v1734_v30 = vadd.f32 %v1733_v35, %v1732_v15  ;;  %v1737_v9 = vsel %vm1259_vm3, %v1566_v2, 0.0  ;;  %v1349_v15 = vsel %vm1259_vm3, %v6952_v0, 0.0 }
 0x1b6   : > { %14250 = vst [vmem:[#allocation66_spill] sm:$0xff] %v6977_v40  ;;  %v1739_v33 = vsel %vm1259_vm3, %v1567_v8, 0.0  ;;  %v1569_v2 = vmul.f32 %v6977_v40, %v6977_v40  ;;  %v1741_v0 = vsel %vm1259_vm3, %v1568_v19, 0.0  ;;  %v1353_v26 = vsel %vm1259_vm3, %v6977_v40, 0.0 }
 0x1b7   : > { %v1736_v4 = vadd.f32 %v1735_v32, %v1734_v30  ;;  %v1348_v11 = vadd.f32 %v1347_v54, %v1346_v61  ;;  %v1351_v61 = vsel %vm1259_vm3, %v6966_v63, 0.0  ;;  %v6997_v30 = vadd.f32 %v6468_v45, %v6560_v29 }
 0x1b8   : > { %v7006_v8 = vadd.f32 %v6468_v45, %v6613_v38  ;;  %v1743_v29 = vsel %vm1259_vm3, %v1569_v2, 0.0 }
 0x1b9   : > { %v1350_v35 = vadd.f32 %v1349_v15, %v1348_v11  ;;  %v1738_v62 = vadd.f32 %v1737_v9, %v1736_v4  ;;  %14252 = vst [vmem:[#allocation68_spill] sm:$0xff] %v6997_v30  ;;  %v1570_v4 = vmul.f32 %v6988_v47, %v6988_v47  ;;  %v7008_v15 = vpop.f32.mrf.mxu3  ;;  %v1571_v19 = vmul.f32 %v6997_v30, %v6997_v30  ;;  %v7019_v38 = vpop.f32.mrf.mxu2 }
 0x1ba   : > { %14253 = vst [vmem:[#allocation69_spill] sm:$0xff] %v7006_v8  ;;  %v1572_v2 = vmul.f32 %v7006_v8, %v7006_v8 }
 0x1bb   : > { %v1352_v32 = vadd.f32 %v1351_v61, %v1350_v35  ;;  %v1740_v54 = vadd.f32 %v1739_v33, %v1738_v62  ;;  %v1355_v35 = vsel %vm1259_vm3, %v6988_v47, 0.0  ;;  %v7017_v62 = vadd.f32 %v6468_v45, %v6670_v49  ;;  %v1074_v49 = vpop.f32.mrf.mxu1 }
 0x1bd   : > { %v1354_v11 = vadd.f32 %v1353_v26, %v1352_v32  ;;  %v1742_v9 = vadd.f32 %v1741_v0, %v1740_v54  ;;  %14254 = vst [vmem:[#allocation70_spill] sm:$0xff] %v7017_v62  ;;  %v1745_v0 = vsel %vm1259_vm3, %v1570_v4, 0.0  ;;  %v1357_v32 = vsel %vm1259_vm3, %v6997_v30, 0.0 }
 0x1be   : > { %v7028_v54 = vadd.f32 %v6468_v45, %v6724_v41  ;;  %v1573_v4 = vmul.f32 %v7017_v62, %v7017_v62  ;;  %v1749_v41 = vsel %vm1259_vm3, %v1572_v2, 0.0  ;;  %v7055_v2 = vadd.f32 %v6468_v45, %v6872_v56 }
 0x1bf   : > { %v1356_v33 = vadd.f32 %v1355_v35, %v1354_v11  ;;  %v1744_v61 = vadd.f32 %v1743_v29, %v1742_v9  ;;  %v1747_v11 = vsel %vm1259_vm3, %v1571_v19, 0.0  ;;  %v1359_v9 = vsel %vm1259_vm3, %v7006_v8, 0.0 }
 0x1c0   : > { %14255 = vst [vmem:[#allocation71_spill] sm:$0xff] %v7028_v54  ;;  %v7037_v29 = vadd.f32 %v6468_v45, %v6776_v12  ;;  %v1574_v19 = vmul.f32 %v7028_v54, %v7028_v54  ;;  %v1751_v8 = vsel %vm1259_vm3, %v1573_v4, 0.0  ;;  %v1363_v12 = vsel %vm1259_vm3, %v7028_v54, 0.0 }
 0x1c1   : > { %v1358_v26 = vadd.f32 %v1357_v32, %v1356_v33  ;;  %v1746_v47 = vadd.f32 %v1745_v0, %v1744_v61  ;;  %v1361_v33 = vsel %vm1259_vm3, %v7017_v62, 0.0  ;;  %v7046_v61 = vadd.f32 %v6468_v45, %v6825_v34  ;;  %14258 = vst [vmem:[#allocation74_spill] sm:$0xff] %v7055_v2  ;;  %v7068_v56 = vpop.f32.mrf.mxu2 }
 0x1c2   : > { %14256 = vst [vmem:[#allocation72_spill] sm:$0xff] %v7037_v29  ;;  %v1753_v34 = vsel %vm1259_vm3, %v1574_v19, 0.0  ;;  %v1577_v19 = vmul.f32 %v7055_v2, %v7055_v2 }
 0x1c3   : > { %v1360_v35 = vadd.f32 %v1359_v9, %v1358_v26  ;;  %v1748_v30 = vadd.f32 %v1747_v11, %v1746_v47  ;;  %14257 = vst [vmem:[#allocation73_spill] sm:$0xff] %v7046_v61  ;;  %v1575_v47 = vmul.f32 %v7037_v29, %v7037_v29  ;;  %v7057_v9 = vpop.f32.mrf.mxu3  ;;  %v1576_v4 = vmul.f32 %v7046_v61, %v7046_v61 }
 0x1c4   : > { %v1759_v54 = vsel %vm1259_vm3, %v1577_v19, 0.0 }
 0x1c5   : > { %v1362_v0 = vadd.f32 %v1361_v33, %v1360_v35  ;;  %v1750_v32 = vadd.f32 %v1749_v41, %v1748_v30  ;;  %v1365_v30 = vsel %vm1259_vm3, %v7037_v29, 0.0  ;;  %v7066_v35 = vadd.f32 %v6468_v45, %v6925_v24  ;;  %v1076_v24 = vpop.f32.mrf.mxu1 }
 0x1c7   : > { %v1364_v26 = vadd.f32 %v1363_v12, %v1362_v0  ;;  %v1752_v11 = vadd.f32 %v1751_v8, %v1750_v32  ;;  %14259 = vst [vmem:[#allocation75_spill] sm:$0xff] %v7066_v35  ;;  %v1755_v8 = vsel %vm1259_vm3, %v1575_v47, 0.0  ;;  %v1367_v0 = vsel %vm1259_vm3, %v7046_v61, 0.0 }
 0x1c8   : > { %v7077_v32 = vadd.f32 %v6468_v45, %v6979_v5  ;;  %v1578_v47 = vmul.f32 %v7066_v35, %v7066_v35  ;;  %v1371_v5 = vsel %vm1259_vm3, %v7066_v35, 0.0 }
 0x1c9   : > { %v1366_v41 = vadd.f32 %v1365_v30, %v1364_v26  ;;  %v1754_v33 = vadd.f32 %v1753_v34, %v1752_v11  ;;  %v1757_v26 = vsel %vm1259_vm3, %v1576_v4, 0.0  ;;  %v1369_v11 = vsel %vm1259_vm3, %v7055_v2, 0.0 }
 0x1ca   : > { %14260 = vst [vmem:[#allocation76_spill] sm:$0xff] %v7077_v32  ;;  %v7085_v34 = vadd.f32 %v6468_v45, %v1074_v49  ;;  %v7093_v4 = vadd.f32 %v6468_v45, %v1076_v24  ;;  %v1761_v49 = vsel %vm1259_vm3, %v1578_v47, 0.0 }
 0x1cb   : > { %v1368_v12 = vadd.f32 %v1367_v0, %v1366_v41  ;;  %v1756_v29 = vadd.f32 %v1755_v8, %v1754_v33  ;;  %v1579_v41 = vmul.f32 %v7077_v32, %v7077_v32  ;;  %v7097_v0 = vadd.f32 %v6468_v45, %v6330_v57 }
 0x1cc   : > { %14261 = vst [vmem:[#allocation77_spill] sm:$0xff] %v7085_v34  ;;  %v1580_v19 = vmul.f32 %v7085_v34, %v7085_v34  ;;  %v1375_v57 = vsel %vm1259_vm3, %v7085_v34, 0.0  ;;  %v1581_v24 = vmul.f32 %v7093_v4, %v7093_v4 }
 0x1cd   : > { %v1758_v30 = vadd.f32 %v1757_v26, %v1756_v29  ;;  %v1370_v61 = vadd.f32 %v1369_v11, %v1368_v12  ;;  %14262 = vst [vmem:[#allocation78_spill] sm:$0xff] %v7093_v4  ;;  %v1373_v29 = vsel %vm1259_vm3, %v7077_v32, 0.0  ;;  %v7104_v11 = vpop.f32.mrf.mxu3 }
 0x1ce   : > { %14263 = vst [vmem:[#allocation79_spill] sm:$0xff] %v7097_v0 }
 0x1cf   : > { %v1760_v33 = vadd.f32 %v1759_v54, %v1758_v30  ;;  %v1372_v8 = vadd.f32 %v1371_v5, %v1370_v61  ;;  %v7108_v54 = vadd.f32 %v6468_v45, %v6338_v60  ;;  %v1763_v61 = vsel %vm1259_vm3, %v1579_v41, 0.0  ;;  %v7115_v5 = vpop.f32.mrf.mxu2 }
 0x1d0   : > { %v1765_v60 = vsel %vm1259_vm3, %v1580_v19, 0.0  ;;  %v1377_v41 = vsel %vm1259_vm3, %v7093_v4, 0.0 }
 0x1d1   : > { %v1762_v12 = vadd.f32 %v1761_v49, %v1760_v33  ;;  %v1374_v26 = vadd.f32 %v1373_v29, %v1372_v8  ;;  %14264 = vst [vmem:[#allocation80_spill] sm:$0xff] %v7108_v54  ;;  %v1582_v33 = vmul.f32 %v7097_v0, %v7097_v0  ;;  %v7121_v8 = vadd.f32 %v6468_v45, %v6350_v3 }
 0x1d2   : > { %v1767_v3 = vsel %vm1259_vm3, %v1581_v24, 0.0 }
 0x1d3   : > { %v1764_v47 = vadd.f32 %v1763_v61, %v1762_v12  ;;  %v1376_v30 = vadd.f32 %v1375_v57, %v1374_v26  ;;  %14265 = vst [vmem:[#allocation81_spill] sm:$0xff] %v7121_v8  ;;  %v1379_v12 = vsel %vm1259_vm3, %v7097_v0, 0.0  ;;  %v1583_v26 = vmul.f32 %v7108_v54, %v7108_v54 }
 0x1d4   : > { %v7132_v61 = vadd.f32 %v6468_v45, %v6358_v6  ;;  %v1769_v19 = vsel %vm1259_vm3, %v1582_v33, 0.0  ;;  %v1383_v24 = vsel %vm1259_vm3, %v7121_v8, 0.0 }
 0x1d5   : > { %v1766_v49 = vadd.f32 %v1765_v60, %v1764_v47  ;;  %v1378_v29 = vadd.f32 %v1377_v41, %v1376_v30  ;;  %v1381_v47 = vsel %vm1259_vm3, %v7108_v54, 0.0  ;;  %v1584_v30 = vmul.f32 %v7121_v8, %v7121_v8 }
 0x1d6   : > { %v7142_v60 = vadd.f32 %v6468_v45, %v6370_v13  ;;  %v1771_v6 = vsel %vm1259_vm3, %v1583_v26, 0.0  ;;  %v1585_v33 = vmul.f32 %v7132_v61, %v7132_v61 }
 0x1d7   : > { %v1380_v57 = vadd.f32 %v1379_v12, %v1378_v29  ;;  %v1768_v34 = vadd.f32 %v1767_v3, %v1766_v49  ;;  %v7151_v49 = vadd.f32 %v6468_v45, %v6378_v16  ;;  %v7153_v3 = vpop.f32.mrf.mxu3  ;;  %v1773_v13 = vsel %vm1259_vm3, %v1584_v30, 0.0  ;;  %v7164_v16 = vpop.f32.mrf.mxu2 }
 0x1d8   : > { %v1586_v26 = vmul.f32 %v7142_v60, %v7142_v60 }
 0x1d9   : > { %v1382_v41 = vadd.f32 %v1381_v47, %v1380_v57  ;;  %v1770_v0 = vadd.f32 %v1769_v19, %v1768_v34  ;;  %v1385_v34 = vsel %vm1259_vm3, %v7132_v61, 0.0  ;;  %v7162_v57 = vadd.f32 %v6468_v45, %v6390_v23 }
 0x1da   : > { %v1587_v30 = vmul.f32 %v7151_v49, %v7151_v49  ;;  %v1777_v23 = vsel %vm1259_vm3, %v1586_v26, 0.0 }
 0x1db   : > { %v1384_v29 = vadd.f32 %v1383_v24, %v1382_v41  ;;  %v1772_v12 = vadd.f32 %v1771_v6, %v1770_v0  ;;  %v1775_v0 = vsel %vm1259_vm3, %v1585_v33, 0.0  ;;  %v1387_v41 = vsel %vm1259_vm3, %v7142_v60, 0.0  ;;  %v14266_v6 = vld [vmem:[#allocation2_spill] sm:$0xff] }
 0x1dc   : > { %v7173_v24 = vadd.f32 %v6468_v45, %v14266_v6  ;;  %v1588_v33 = vmul.f32 %v7162_v57, %v7162_v57  ;;  %v1779_v32 = vsel %vm1259_vm3, %v1587_v30, 0.0  ;;  %v14269_v30 = vld [vmem:[#allocation7_spill] sm:$0xff] }
 0x1dd   : > { %v1386_v19 = vadd.f32 %v1385_v34, %v1384_v29  ;;  %v1774_v47 = vadd.f32 %v1773_v13, %v1772_v12  ;;  %v1389_v29 = vsel %vm1259_vm3, %v7151_v49, 0.0  ;;  %v14267_v12 = vld [vmem:[#allocation3_spill] sm:$0xff] }
 0x1de   : > { %v7182_v13 = vadd.f32 %v6468_v45, %v14267_v12  ;;  %v1589_v26 = vmul.f32 %v7173_v24, %v7173_v24  ;;  %v1781_v35 = vsel %vm1259_vm3, %v1588_v33, 0.0  ;;  %v14270_v33 = vld [vmem:[#allocation9_spill] sm:$0xff] }
 0x1df   : > { %v1388_v8 = vadd.f32 %v1387_v41, %v1386_v19  ;;  %v1776_v54 = vadd.f32 %v1775_v0, %v1774_v47  ;;  %v1391_v19 = vsel %vm1259_vm3, %v7162_v57, 0.0  ;;  %v14268_v47 = vld [vmem:[#allocation5_spill] sm:$0xff]  ;;  %v7202_v2 = vpop.f32.mrf.mxu3 }
 0x1e0   : > { %v7191_v0 = vadd.f32 %v6468_v45, %v14268_v47  ;;  %v1783_v47 = vsel %vm1259_vm3, %v1589_v26, 0.0 }
 0x1e1   : > { %v1390_v34 = vadd.f32 %v1389_v29, %v1388_v8  ;;  %v1778_v4 = vadd.f32 %v1777_v23, %v1776_v54  ;;  %v1393_v8 = vsel %vm1259_vm3, %v7173_v24, 0.0  ;;  %v1590_v54 = vmul.f32 %v7182_v13, %v7182_v13 }
 0x1e2   : > { %v7200_v23 = vadd.f32 %v6468_v45, %v14269_v30  ;;  %v7213_v30 = vpop.f32.mrf.mxu2 }
 0x1e3   : > { %v1392_v41 = vadd.f32 %v1391_v19, %v1390_v34  ;;  %v1780_v6 = vadd.f32 %v1779_v32, %v1778_v4  ;;  %v1395_v32 = vsel %vm1259_vm3, %v7182_v13, 0.0  ;;  %v1591_v4 = vmul.f32 %v7191_v0, %v7191_v0 }
 0x1e4   : > { %v7211_v34 = vadd.f32 %v6468_v45, %v14270_v33  ;;  %v1592_v26 = vmul.f32 %v7200_v23, %v7200_v23 }
 0x1e5   : > { %v1394_v29 = vadd.f32 %v1393_v8, %v1392_v41  ;;  %v1782_v12 = vadd.f32 %v1781_v35, %v1780_v6  ;;  %v1785_v35 = vsel %vm1259_vm3, %v1590_v54, 0.0  ;;  %v1397_v41 = vsel %vm1259_vm3, %v7191_v0, 0.0  ;;  %v14271_v6 = vld [vmem:[#allocation11_spill] sm:$0xff] }
 0x1e6   : > { %v7222_v8 = vadd.f32 %v6468_v45, %v14271_v6  ;;  %v1787_v33 = vsel %vm1259_vm3, %v1591_v4, 0.0  ;;  %v1593_v54 = vmul.f32 %v7211_v34, %v7211_v34  ;;  %v1256_v6 = vld [vmem:[%s13861_s5 + $0x28] sm:$0xff]  ;;  %v1401_v4 = vsel %vm1259_vm3, %v7211_v34, 0.0 }
 0x1e7   : > { %v1396_v19 = vadd.f32 %v1395_v32, %v1394_v29  ;;  %v1784_v62 = vadd.f32 %v1783_v47, %v1782_v12  ;;  %v1399_v29 = vsel %vm1259_vm3, %v7200_v23, 0.0  ;;  %v14272_v12 = vld [vmem:[#allocation13_spill] sm:$0xff]  ;;  %1927 = vmatpush.msrb.mxu1 %v1256_v6  ;;  %v7254_v31 = vpop.f32.mrf.mxu3 }
 0x1e8   : > { %v7231_v47 = vadd.f32 %v6468_v45, %v14272_v12 }
 0x1e9   : > { %v1398_v40 = vadd.f32 %v1397_v41, %v1396_v19  ;;  %v1786_v63 = vadd.f32 %v1785_v35, %v1784_v62  ;;  %v1789_v62 = vsel %vm1259_vm3, %v1592_v26, 0.0  ;;  %v1594_v19 = vmul.f32 %v7222_v8, %v7222_v8  ;;  %v14273_v35 = vld [vmem:[#allocation15_spill] sm:$0xff] }
 0x1ea   : > { %v7243_v41 = vadd.f32 %v6468_v45, %v14273_v35  ;;  %v1595_v26 = vmul.f32 %v7231_v47, %v7231_v47  ;;  %v7270_v35 = vpop.f32.mrf.mxu2 }
 0x1eb   : > { %v1400_v32 = vadd.f32 %v1399_v29, %v1398_v40  ;;  %v1788_v51 = vadd.f32 %v1787_v33, %v1786_v63  ;;  %v1791_v63 = vsel %vm1259_vm3, %v1593_v54, 0.0  ;;  %v1403_v33 = vsel %vm1259_vm3, %v7222_v8, 0.0  ;;  %v14274_v29 = vld [vmem:[#allocation21_spill] sm:$0xff] }
 0x1ec   : > { %v7252_v52 = vadd.f32 %v6468_v45, %v14274_v29  ;;  %v1793_v6 = vsel %vm1259_vm3, %v1594_v19, 0.0  ;;  %v1596_v54 = vmul.f32 %v7243_v41, %v7243_v41  ;;  %v1795_v19 = vsel %vm1259_vm3, %v1595_v26, 0.0 }
 0x1ed   : > { %v1402_v12 = vadd.f32 %v1401_v4, %v1400_v32  ;;  %v1790_v40 = vadd.f32 %v1789_v62, %v1788_v51  ;;  %v1405_v51 = vsel %vm1259_vm3, %v7231_v47, 0.0  ;;  %v7264_v32 = vld [vmem:[%s13858_s2] ss:$0 sm:$0xff] }
 0x1ee   : > { %v7268_v45 = vadd.f32 %v7264_v32, %v6548_v10  ;;  %v1255_v10 = vld [vmem:[%s13861_s5 + $0x20] sm:$0xff] }
 0x1ef   : > { %v1792_v7 = vadd.f32 %v1791_v63, %v1790_v40  ;;  %v1404_v37 = vadd.f32 %v1403_v33, %v1402_v12  ;;  %v1407_v12 = vsel %vm1259_vm3, %v7243_v41, 0.0  ;;  %v1597_v40 = vmul.f32 %v7252_v52, %v7252_v52  ;;  %1928 = vmatpush.msrb.mxu1 %v1255_v10 }
 0x1f0   : > { %v7279_v63 = vadd.f32 %v7264_v32, %v6602_v59  ;;  %v1598_v26 = vmul.f32 %v7268_v45, %v7268_v45 }
 0x1f1   : > { %v1406_v62 = vadd.f32 %v1405_v51, %v1404_v37  ;;  %v1794_v4 = vadd.f32 %v1793_v6, %v1792_v7  ;;  %v1797_v37 = vsel %vm1259_vm3, %v1596_v54, 0.0  ;;  %v1409_v7 = vsel %vm1259_vm3, %v7252_v52, 0.0 }
 0x1f2   : > { %v7291_v6 = vadd.f32 %v7264_v32, %v6657_v22  ;;  %v1599_v54 = vmul.f32 %v7279_v63, %v7279_v63  ;;  %v1801_v22 = vsel %vm1259_vm3, %v1598_v26, 0.0 }
 0x1f3   : > { %v1408_v33 = vadd.f32 %v1407_v12, %v1406_v62  ;;  %v1796_v29 = vadd.f32 %v1795_v19, %v1794_v4  ;;  %v1799_v62 = vsel %vm1259_vm3, %v1597_v40, 0.0  ;;  %v1411_v4 = vsel %vm1259_vm3, %v7268_v45, 0.0 }
 0x1f4   : > { %v7300_v19 = vadd.f32 %v7264_v32, %v6712_v55  ;;  %v1600_v40 = vmul.f32 %v7291_v6, %v7291_v6  ;;  %v1254_v55 = vld [vmem:[%s13861_s5 + $0x18] sm:$0xff]  ;;  %v1803_v26 = vsel %vm1259_vm3, %v1599_v54, 0.0 }
 0x1f5   : > { %v1410_v59 = vadd.f32 %v1409_v7, %v1408_v33  ;;  %v1798_v51 = vadd.f32 %v1797_v37, %v1796_v29  ;;  %v1413_v33 = vsel %vm1259_vm3, %v7279_v63, 0.0  ;;  %v7309_v29 = vadd.f32 %v7264_v32, %v6765_v53  ;;  %v7314_v7 = vpop.f32.mrf.mxu3  ;;  %1929 = vmatpush.msrb.mxu1 %v1254_v55 }
 0x1f6   : > { %v7323_v53 = vadd.f32 %v7264_v32, %v6818_v42 }
 0x1f7   : > { %v1412_v12 = vadd.f32 %v1411_v4, %v1410_v59  ;;  %v1800_v25 = vadd.f32 %v1799_v62, %v1798_v51  ;;  %v1415_v59 = vsel %vm1259_vm3, %v7291_v6, 0.0  ;;  %v1601_v51 = vmul.f32 %v7300_v19, %v7300_v19  ;;  %v1156_v4 = vpop.f32.mrf.mxu2 }
 0x1f8   : > { %v1602_v54 = vmul.f32 %v7309_v29, %v7309_v29 }
 0x1f9   : > { %v1414_v10 = vadd.f32 %v1413_v33, %v1412_v12  ;;  %v1802_v37 = vadd.f32 %v1801_v22, %v1800_v25  ;;  %v1805_v12 = vsel %vm1259_vm3, %v1600_v40, 0.0  ;;  %v1417_v22 = vsel %vm1259_vm3, %v7300_v19, 0.0 }
 0x1fa   : > { %v7332_v33 = vadd.f32 %v7264_v32, %v6859_v28  ;;  %v1807_v42 = vsel %vm1259_vm3, %v1601_v51, 0.0  ;;  %v1603_v40 = vmul.f32 %v7323_v53, %v7323_v53  ;;  %v1421_v28 = vsel %vm1259_vm3, %v7323_v53, 0.0 }
 0x1fb   : > { %v1416_v25 = vadd.f32 %v1415_v59, %v1414_v10  ;;  %v1804_v62 = vadd.f32 %v1803_v26, %v1802_v37  ;;  %v1419_v10 = vsel %vm1259_vm3, %v7309_v29, 0.0  ;;  %v7341_v37 = vadd.f32 %v7264_v32, %v6914_v18 }
 0x1fc   : > { %v1809_v59 = vsel %vm1259_vm3, %v1602_v54, 0.0  ;;  %v1604_v51 = vmul.f32 %v7332_v33, %v7332_v33  ;;  %v7359_v18 = vadd.f32 %v7264_v32, %v7019_v38 }
 0x1fd   : > { %v1418_v1 = vadd.f32 %v1417_v22, %v1416_v25  ;;  %v1806_v36 = vadd.f32 %v1805_v12, %v1804_v62  ;;  %v7350_v25 = vadd.f32 %v7264_v32, %v6968_v58  ;;  %v1811_v22 = vsel %vm1259_vm3, %v1603_v40, 0.0 }
 0x1fe   : > { %v1813_v58 = vsel %vm1259_vm3, %v1604_v51, 0.0  ;;  %v1607_v51 = vmul.f32 %v7359_v18, %v7359_v18 }
 0x1ff   : > { %v1420_v55 = vadd.f32 %v1419_v10, %v1418_v1  ;;  %v1808_v26 = vadd.f32 %v1807_v42, %v1806_v36  ;;  %14275 = vst [vmem:[#allocation2_spill] sm:$0xff] %v7350_v25  ;;  %v1423_v1 = vsel %vm1259_vm3, %v7332_v33, 0.0  ;;  %v1605_v36 = vmul.f32 %v7341_v37, %v7341_v37  ;;  %v7361_v10 = vpop.f32.mrf.mxu3  ;;  %v1159_v38 = vpop.f32.mrf.mxu2 }
 0x200   : > { %v1606_v40 = vmul.f32 %v7350_v25, %v7350_v25 }
 0x201   : > { %v1422_v62 = vadd.f32 %v1421_v28, %v1420_v55  ;;  %v1810_v12 = vadd.f32 %v1809_v59, %v1808_v26  ;;  %v1425_v55 = vsel %vm1259_vm3, %v7341_v37, 0.0  ;;  %v7370_v26 = vadd.f32 %v7264_v32, %v7068_v56 }
 0x202   : > { %v1817_v56 = vsel %vm1259_vm3, %v1606_v40, 0.0 }
 0x203   : > { %v1424_v54 = vadd.f32 %v1423_v1, %v1422_v62  ;;  %v1812_v42 = vadd.f32 %v1811_v22, %v1810_v12  ;;  %v1815_v62 = vsel %vm1259_vm3, %v1605_v36, 0.0  ;;  %v1427_v12 = vsel %vm1259_vm3, %v7350_v25, 0.0 }
 0x204   : > { %v7379_v22 = vadd.f32 %v7264_v32, %v7115_v5  ;;  %v1608_v36 = vmul.f32 %v7370_v26, %v7370_v26  ;;  %v1819_v25 = vsel %vm1259_vm3, %v1607_v51, 0.0  ;;  %v1431_v5 = vsel %vm1259_vm3, %v7370_v26, 0.0 }
 0x205   : > { %v1426_v59 = vadd.f32 %v1425_v55, %v1424_v54  ;;  %v1814_v28 = vadd.f32 %v1813_v58, %v1812_v42  ;;  %v1429_v54 = vsel %vm1259_vm3, %v7359_v18, 0.0  ;;  %v7388_v42 = vadd.f32 %v7264_v32, %v7164_v16 }
 0x206   : > { %14276 = vst [vmem:[#allocation3_spill] sm:$0xff] %v7379_v22  ;;  %v1609_v40 = vmul.f32 %v7379_v22, %v7379_v22  ;;  %v1433_v16 = vsel %vm1259_vm3, %v7379_v22, 0.0  ;;  %v7406_v51 = vadd.f32 %v7264_v32, %v7270_v35 }
 0x207   : > { %v1428_v1 = vadd.f32 %v1427_v12, %v1426_v59  ;;  %v1816_v17 = vadd.f32 %v1815_v62, %v1814_v28  ;;  %14277 = vst [vmem:[#allocation5_spill] sm:$0xff] %v7388_v42  ;;  %v7397_v59 = vadd.f32 %v7264_v32, %v7213_v30  ;;  %v1821_v12 = vsel %vm1259_vm3, %v1608_v36, 0.0  ;;  %v1161_v22 = vpop.f32.mrf.mxu2 }
 0x208   : > { %14279 = vst [vmem:[#allocation9_spill] sm:$0xff] %v7406_v51  ;;  %v1823_v30 = vsel %vm1259_vm3, %v1609_v40, 0.0  ;;  %v1612_v40 = vmul.f32 %v7406_v51, %v7406_v51 }
 0x209   : > { %v1430_v58 = vadd.f32 %v1429_v54, %v1428_v1  ;;  %v1818_v55 = vadd.f32 %v1817_v56, %v1816_v17  ;;  %14278 = vst [vmem:[#allocation7_spill] sm:$0xff] %v7397_v59  ;;  %v1610_v17 = vmul.f32 %v7388_v42, %v7388_v42  ;;  %v7408_v54 = vpop.f32.mrf.mxu3  ;;  %v1611_v36 = vmul.f32 %v7397_v59, %v7397_v59 }
 0x20b   : > { %v1820_v28 = vadd.f32 %v1819_v25, %v1818_v55  ;;  %v1432_v62 = vadd.f32 %v1431_v5, %v1430_v58  ;;  %v1435_v25 = vsel %vm1259_vm3, %v7388_v42, 0.0  ;;  %v7416_v58 = vadd.f32 %v7264_v32, %v1156_v4 }
 0x20c   : > { %v1825_v35 = vsel %vm1259_vm3, %v1610_v17, 0.0  ;;  %v1827_v42 = vsel %vm1259_vm3, %v1611_v36, 0.0  ;;  %v1439_v4 = vsel %vm1259_vm3, %v7406_v51, 0.0  ;;  %v7432_v17 = vadd.f32 %v7264_v32, %v1161_v22 }
 0x20d   : > { %v1822_v1 = vadd.f32 %v1821_v12, %v1820_v28  ;;  %v1434_v56 = vadd.f32 %v1433_v16, %v1432_v62  ;;  %14280 = vst [vmem:[#allocation11_spill] sm:$0xff] %v7416_v58  ;;  %v1437_v28 = vsel %vm1259_vm3, %v7397_v59, 0.0  ;;  %v7424_v62 = vadd.f32 %v7264_v32, %v1159_v38 }
 0x20e   : > { %14282 = vst [vmem:[#allocation15_spill] sm:$0xff] %v7432_v17  ;;  %v1829_v38 = vsel %vm1259_vm3, %v1612_v40, 0.0  ;;  %v1441_v36 = vsel %vm1259_vm3, %v7416_v58, 0.0  ;;  %v1615_v40 = vmul.f32 %v7432_v17, %v7432_v17 }
 0x20f   : > { %v1824_v55 = vadd.f32 %v1823_v30, %v1822_v1  ;;  %v1436_v5 = vadd.f32 %v1435_v25, %v1434_v56  ;;  %14281 = vst [vmem:[#allocation13_spill] sm:$0xff] %v7424_v62  ;;  %v1613_v1 = vmul.f32 %v7416_v58, %v7416_v58  ;;  %v14283_v25 = vld [vmem:[#allocation4_spill] sm:$0xff] }
 0x210   : > { %v7436_v59 = vadd.f32 %v7264_v32, %v14283_v25 }
 0x211   : > { %v1826_v12 = vadd.f32 %v1825_v35, %v1824_v55  ;;  %v1438_v16 = vadd.f32 %v1437_v28, %v1436_v5  ;;  %v1614_v55 = vmul.f32 %v7424_v62, %v7424_v62  ;;  %v14285_v28 = vld [vmem:[#allocation6_spill] sm:$0xff]  ;;  %v7452_v25 = vpop.f32.mrf.mxu3 }
 0x212   : > { %14284 = vst [vmem:[#allocation21_spill] sm:$0xff] %v7436_v59  ;;  %v7445_v22 = vadd.f32 %v7264_v32, %v14285_v28 }
 0x213   : > { %v1828_v56 = vadd.f32 %v1827_v42, %v1826_v12  ;;  %v1440_v30 = vadd.f32 %v1439_v4, %v1438_v16  ;;  %v1831_v42 = vsel %vm1259_vm3, %v1613_v1, 0.0  ;;  %v1443_v12 = vsel %vm1259_vm3, %v7424_v62, 0.0 }
 0x214   : > { %14286 = vst [vmem:[#allocation4_spill] sm:$0xff] %v7445_v22  ;;  %v1445_v1 = vsel %vm1259_vm3, %v7432_v17, 0.0 }
 0x215   : > { %v1830_v5 = vadd.f32 %v1829_v38, %v1828_v56  ;;  %v1442_v35 = vadd.f32 %v1441_v36, %v1440_v30  ;;  %v1616_v56 = vmul.f32 %v7436_v59, %v7436_v59  ;;  %v14287_v30 = vld [vmem:[#allocation8_spill] sm:$0xff]  ;;  %v1833_v36 = vsel %vm1259_vm3, %v1614_v55, 0.0 }
 0x216   : > { %v7458_v38 = vadd.f32 %v7264_v32, %v14287_v30  ;;  %v1835_v30 = vsel %vm1259_vm3, %v1615_v40, 0.0 }
 0x217   : > { %v1832_v16 = vadd.f32 %v1831_v42, %v1830_v5  ;;  %v1444_v4 = vadd.f32 %v1443_v12, %v1442_v35  ;;  %v1447_v5 = vsel %vm1259_vm3, %v7436_v59, 0.0  ;;  %v1617_v35 = vmul.f32 %v7445_v22, %v7445_v22  ;;  %v14289_v42 = vld [vmem:[#allocation10_spill] sm:$0xff] }
 0x218   : > { %14288 = vst [vmem:[#allocation6_spill] sm:$0xff] %v7458_v38  ;;  %v7469_v12 = vadd.f32 %v7264_v32, %v14289_v42  ;;  %v1837_v55 = vsel %vm1259_vm3, %v1616_v56, 0.0  ;;  %v14293_v56 = vld [vmem:[#allocation14_spill] sm:$0xff] }
 0x219   : > { %v1834_v28 = vadd.f32 %v1833_v36, %v1832_v16  ;;  %v1446_v62 = vadd.f32 %v1445_v1, %v1444_v4  ;;  %v1449_v16 = vsel %vm1259_vm3, %v7445_v22, 0.0  ;;  %v1618_v4 = vmul.f32 %v7458_v38, %v7458_v38  ;;  %v14291_v36 = vld [vmem:[#allocation12_spill] sm:$0xff] }
 0x21a   : > { %14290 = vst [vmem:[#allocation8_spill] sm:$0xff] %v7469_v12  ;;  %v7479_v1 = vadd.f32 %v7264_v32, %v14291_v36  ;;  %v1839_v42 = vsel %vm1259_vm3, %v1617_v35, 0.0  ;;  %v1619_v40 = vmul.f32 %v7469_v12, %v7469_v12  ;;  %v14294_v35 = vld [vmem:[#allocation18_spill] sm:$0xff] }
 0x21b   : > { %v1448_v58 = vadd.f32 %v1447_v5, %v1446_v62  ;;  %v1836_v51 = vadd.f32 %v1835_v30, %v1834_v28  ;;  %v1451_v62 = vsel %vm1259_vm3, %v7458_v38, 0.0  ;;  %v7488_v28 = vadd.f32 %v7264_v32, %v14293_v56  ;;  %v7499_v38 = vpop.f32.mrf.mxu3 }
 0x21c   : > { %14292 = vst [vmem:[#allocation10_spill] sm:$0xff] %v7479_v1  ;;  %v1841_v22 = vsel %vm1259_vm3, %v1618_v4, 0.0  ;;  %v1843_v56 = vsel %vm1259_vm3, %v1619_v40, 0.0  ;;  %v14295_v4 = vld [vmem:[#allocation24_spill] sm:$0xff] }
 0x21d   : > { %v1450_v59 = vadd.f32 %v1449_v16, %v1448_v58  ;;  %v1838_v17 = vadd.f32 %v1837_v55, %v1836_v51  ;;  %v1453_v58 = vsel %vm1259_vm3, %v7469_v12, 0.0  ;;  %v1620_v51 = vmul.f32 %v7479_v1, %v7479_v1 }
 0x21e   : > { %v7497_v55 = vadd.f32 %v7264_v32, %v14294_v35 }
 0x21f   : > { %v1452_v5 = vadd.f32 %v1451_v62, %v1450_v59  ;;  %v1840_v30 = vadd.f32 %v1839_v42, %v1838_v17  ;;  %v1455_v59 = vsel %vm1259_vm3, %v7479_v1, 0.0  ;;  %v1621_v17 = vmul.f32 %v7488_v28, %v7488_v28 }
 0x220   : > { %v7508_v42 = vadd.f32 %v7264_v32, %v14295_v4  ;;  %v1845_v35 = vsel %vm1259_vm3, %v1620_v51, 0.0  ;;  %v1622_v40 = vmul.f32 %v7497_v55, %v7497_v55 }
 0x221   : > { %v1454_v16 = vadd.f32 %v1453_v58, %v1452_v5  ;;  %v1842_v36 = vadd.f32 %v1841_v22, %v1840_v30  ;;  %v1457_v22 = vsel %vm1259_vm3, %v7488_v28, 0.0  ;;  %v7517_v5 = vadd.f32 %v7264_v32, %v6571_v39 }
 0x222   : > { %v1847_v1 = vsel %vm1259_vm3, %v1621_v17, 0.0  ;;  %v1623_v51 = vmul.f32 %v7508_v42, %v7508_v42  ;;  %v1849_v4 = vsel %vm1259_vm3, %v1622_v40, 0.0  ;;  %v1461_v39 = vsel %vm1259_vm3, %v7508_v42, 0.0 }
 0x223   : > { %v1456_v62 = vadd.f32 %v1455_v59, %v1454_v16  ;;  %v1844_v12 = vadd.f32 %v1843_v56, %v1842_v36  ;;  %v1459_v16 = vsel %vm1259_vm3, %v7497_v55, 0.0  ;;  %v7526_v36 = vadd.f32 %v7264_v32, %v6615_v50 }
 0x224   : > { %v7535_v17 = vadd.f32 %v7264_v32, %v6659_v46  ;;  %v1463_v50 = vsel %vm1259_vm3, %v7517_v5, 0.0  ;;  %v7544_v40 = vadd.f32 %v7264_v32, %v6701_v20 }
 0x225   : > { %v1458_v30 = vadd.f32 %v1457_v22, %v1456_v62  ;;  %v1846_v58 = vadd.f32 %v1845_v35, %v1844_v12  ;;  %14296 = vst [vmem:[#allocation12_spill] sm:$0xff] %v7526_v36  ;;  %v1624_v12 = vmul.f32 %v7517_v5, %v7517_v5  ;;  %v1851_v22 = vsel %vm1259_vm3, %v1623_v51, 0.0 }
 0x226   : > { %v1626_v51 = vmul.f32 %v7535_v17, %v7535_v17 }
 0x227   : > { %v1460_v56 = vadd.f32 %v1459_v16, %v1458_v30  ;;  %v1848_v59 = vadd.f32 %v1847_v1, %v1846_v58  ;;  %v1625_v1 = vmul.f32 %v7526_v36, %v7526_v36  ;;  %v7546_v16 = vpop.f32.mrf.mxu3  ;;  %v1853_v46 = vsel %vm1259_vm3, %v1624_v12, 0.0 }
 0x228   : > { %v1627_v12 = vmul.f32 %v7544_v40, %v7544_v40 }
 0x229   : > { %v1462_v62 = vadd.f32 %v1461_v39, %v1460_v56  ;;  %v1850_v35 = vadd.f32 %v1849_v4, %v1848_v59  ;;  %v1465_v56 = vsel %vm1259_vm3, %v7526_v36, 0.0  ;;  %v7555_v59 = vadd.f32 %v7264_v32, %v6745_v48 }
 0x22a   : > { %v1855_v20 = vsel %vm1259_vm3, %v1625_v1, 0.0  ;;  %v1857_v36 = vsel %vm1259_vm3, %v1626_v51, 0.0  ;;  %v1469_v48 = vsel %vm1259_vm3, %v7544_v40, 0.0 }
 0x22b   : > { %v1464_v30 = vadd.f32 %v1463_v50, %v1462_v62  ;;  %v1852_v58 = vadd.f32 %v1851_v22, %v1850_v35  ;;  %v1467_v62 = vsel %vm1259_vm3, %v7535_v17, 0.0  ;;  %v7564_v35 = vadd.f32 %v7264_v32, %v6787_v43 }
 0x22c   : > { %v1628_v1 = vmul.f32 %v7555_v59, %v7555_v59  ;;  %v1471_v43 = vsel %vm1259_vm3, %v7555_v59, 0.0 }
 0x22d   : > { %v1466_v4 = vadd.f32 %v1465_v56, %v1464_v30  ;;  %v1854_v39 = vadd.f32 %v1853_v46, %v1852_v58  ;;  %v7573_v30 = vadd.f32 %v7264_v32, %v6827_v27  ;;  %v1859_v56 = vsel %vm1259_vm3, %v1627_v12, 0.0  ;;  %v1253_v27 = vld [vmem:[%s13861_s5 + $0x10] sm:$0xff] }
 0x22e   : > { %v1629_v51 = vmul.f32 %v7564_v35, %v7564_v35  ;;  %1930 = vmatpush.msrb.mxu1 %v1253_v27 }
 0x22f   : > { %v1468_v22 = vadd.f32 %v1467_v62, %v1466_v4  ;;  %v1856_v50 = vadd.f32 %v1855_v20, %v1854_v39  ;;  %v7582_v4 = vadd.f32 %v7264_v32, %v6861_v44  ;;  %v1473_v62 = vsel %vm1259_vm3, %v7564_v35, 0.0 }
 0x230   : > { %v1630_v12 = vmul.f32 %v7573_v30, %v7573_v30 }
 0x231   : > { %v1470_v58 = vadd.f32 %v1469_v48, %v1468_v22  ;;  %v1858_v46 = vadd.f32 %v1857_v36, %v1856_v50  ;;  %v1861_v36 = vsel %vm1259_vm3, %v1628_v1, 0.0  ;;  %v7594_v22 = vadd.f32 %v7264_v32, %v6903_v14  ;;  %v7596_v48 = vpop.f32.mrf.mxu3 }
 0x232   : > { %v1475_v1 = vsel %vm1259_vm3, %v7573_v30, 0.0  ;;  %v1865_v27 = vsel %vm1259_vm3, %v1630_v12, 0.0 }
 0x233   : > { %v1860_v39 = vadd.f32 %v1859_v56, %v1858_v46  ;;  %v1472_v20 = vadd.f32 %v1471_v43, %v1470_v58  ;;  %14297 = vst [vmem:[#allocation14_spill] sm:$0xff] %v7594_v22  ;;  %v1863_v58 = vsel %vm1259_vm3, %v1629_v51, 0.0  ;;  %v1631_v46 = vmul.f32 %v7582_v4, %v7582_v4 }
 0x234   : > { %v7605_v56 = vadd.f32 %v7264_v32, %v6957_v21  ;;  %v1632_v51 = vmul.f32 %v7594_v22, %v7594_v22  ;;  %v1252_v21 = vld [vmem:[%s13861_s5 + $0x8] sm:$0xff]  ;;  %v1479_v12 = vsel %vm1259_vm3, %v7594_v22, 0.0 }
 0x235   : > { %v1474_v44 = vadd.f32 %v1473_v62, %v1472_v20  ;;  %v1862_v50 = vadd.f32 %v1861_v36, %v1860_v39  ;;  %v1477_v39 = vsel %vm1259_vm3, %v7582_v4, 0.0  ;;  %v7614_v20 = vadd.f32 %v7264_v32, %v7008_v15  ;;  %1931 = vmatpush.msrb.mxu1 %v1252_v21 }
 0x237   : > { %v1476_v43 = vadd.f32 %v1475_v1, %v1474_v44  ;;  %v1864_v14 = vadd.f32 %v1863_v58, %v1862_v50  ;;  %v1867_v44 = vsel %vm1259_vm3, %v1631_v46, 0.0  ;;  %v1633_v50 = vmul.f32 %v7605_v56, %v7605_v56 }
 0x238   : > { %v7626_v58 = vadd.f32 %v7264_v32, %v7057_v9  ;;  %v1634_v46 = vmul.f32 %v7614_v20, %v7614_v20 }
 0x239   : > { %v1478_v36 = vadd.f32 %v1477_v39, %v1476_v43  ;;  %v1866_v62 = vadd.f32 %v1865_v27, %v1864_v14  ;;  %v1869_v43 = vsel %vm1259_vm3, %v1632_v51, 0.0  ;;  %v1481_v14 = vsel %vm1259_vm3, %v7605_v56, 0.0 }
 0x23a   : > { %14298 = vst [vmem:[#allocation18_spill] sm:$0xff] %v7626_v58  ;;  %v7635_v27 = vadd.f32 %v7264_v32, %v7104_v11  ;;  %v1871_v9 = vsel %vm1259_vm3, %v1633_v50, 0.0  ;;  %v1635_v51 = vmul.f32 %v7626_v58, %v7626_v58  ;;  %v1873_v11 = vsel %vm1259_vm3, %v1634_v46, 0.0 }
 0x23b   : > { %v1480_v15 = vadd.f32 %v1479_v12, %v1478_v36  ;;  %v1868_v1 = vadd.f32 %v1867_v44, %v1866_v62  ;;  %v1483_v36 = vsel %vm1259_vm3, %v7614_v20, 0.0  ;;  %v7644_v62 = vadd.f32 %v7264_v32, %v7153_v3  ;;  %v1241_v12 = vpop.f32.mrf.mxu3 }
 0x23c   : > { %v1636_v50 = vmul.f32 %v7635_v27, %v7635_v27  ;;  %v1875_v3 = vsel %vm1259_vm3, %v1635_v51, 0.0 }
 0x23d   : > { %v1482_v39 = vadd.f32 %v1481_v14, %v1480_v15  ;;  %v1870_v22 = vadd.f32 %v1869_v43, %v1868_v1  ;;  %v1485_v15 = vsel %vm1259_vm3, %v7626_v58, 0.0  ;;  %v7653_v1 = vadd.f32 %v7264_v32, %v7202_v2 }
 0x23e   : > { %v1637_v46 = vmul.f32 %v7644_v62, %v7644_v62  ;;  %v1877_v58 = vsel %vm1259_vm3, %v1636_v50, 0.0  ;;  %v1489_v2 = vsel %vm1259_vm3, %v7644_v62, 0.0 }
 0x23f   : > { %v1484_v21 = vadd.f32 %v1483_v36, %v1482_v39  ;;  %v1872_v44 = vadd.f32 %v1871_v9, %v1870_v22  ;;  %v1487_v22 = vsel %vm1259_vm3, %v7635_v27, 0.0  ;;  %v7662_v39 = vadd.f32 %v7264_v32, %v7254_v31 }
 0x240   : > { %v1638_v51 = vmul.f32 %v7653_v1, %v7653_v1  ;;  %v1491_v31 = vsel %vm1259_vm3, %v7653_v1, 0.0 }
 0x241   : > { %v1486_v43 = vadd.f32 %v1485_v15, %v1484_v21  ;;  %v1874_v14 = vadd.f32 %v1873_v11, %v1872_v44  ;;  %14299 = vst [vmem:[#allocation24_spill] sm:$0xff] %v7662_v39  ;;  %v7671_v21 = vadd.f32 %v7264_v32, %v7314_v7  ;;  %v1879_v15 = vsel %vm1259_vm3, %v1637_v46, 0.0  ;;  %v1251_v7 = vld [vmem:[%s13861_s5] sm:$0xff] }
 0x242   : > { %v1639_v50 = vmul.f32 %v7662_v39, %v7662_v39  ;;  %1932 = vmatpush.msrb.mxu1 %v1251_v7 }
 0x243   : > { %v1488_v9 = vadd.f32 %v1487_v22, %v1486_v43  ;;  %v1876_v36 = vadd.f32 %v1875_v3, %v1874_v14  ;;  %v7680_v43 = vadd.f32 %v7264_v32, %v7361_v10  ;;  %v1493_v22 = vsel %vm1259_vm3, %v7662_v39, 0.0 }
 0x244   : > { %v1640_v46 = vmul.f32 %v7671_v21, %v7671_v21 }
 0x245   : > { %v1490_v44 = vadd.f32 %v1489_v2, %v1488_v9  ;;  %v1878_v11 = vadd.f32 %v1877_v58, %v1876_v36  ;;  %v1881_v58 = vsel %vm1259_vm3, %v1638_v51, 0.0  ;;  %v7692_v9 = vadd.f32 %v7264_v32, %v7408_v54  ;;  %v1244_v2 = vpop.f32.mrf.mxu3 }
 0x246   : > { %v1641_v51 = vmul.f32 %v7680_v43, %v7680_v43  ;;  %v1885_v54 = vsel %vm1259_vm3, %v1640_v46, 0.0 }
 0x247   : > { %v1492_v14 = vadd.f32 %v1491_v31, %v1490_v44  ;;  %v1880_v3 = vadd.f32 %v1879_v15, %v1878_v11  ;;  %v1883_v44 = vsel %vm1259_vm3, %v1639_v50, 0.0  ;;  %v1495_v11 = vsel %vm1259_vm3, %v7671_v21, 0.0 }
 0x248   : > { %v7701_v15 = vadd.f32 %v7264_v32, %v7452_v25  ;;  %v1642_v50 = vmul.f32 %v7692_v9, %v7692_v9  ;;  %v1499_v25 = vsel %vm1259_vm3, %v7692_v9, 0.0 }
 0x249   : > { %v1494_v10 = vadd.f32 %v1493_v22, %v1492_v14  ;;  %v1882_v36 = vadd.f32 %v1881_v58, %v1880_v3  ;;  %v1497_v14 = vsel %vm1259_vm3, %v7680_v43, 0.0  ;;  %v7710_v3 = vadd.f32 %v7264_v32, %v7499_v38 }
 0x24a   : > { %14300 = vst [vmem:[#allocation82_spill] sm:$0xff] %v7701_v15  ;;  %v1887_v22 = vsel %vm1259_vm3, %v1641_v51, 0.0  ;;  %v1643_v46 = vmul.f32 %v7701_v15, %v7701_v15  ;;  %v1501_v38 = vsel %vm1259_vm3, %v7701_v15, 0.0  ;;  %v7728_v51 = vadd.f32 %v7264_v32, %v7596_v48 }
 0x24b   : > { %v1496_v31 = vadd.f32 %v1495_v11, %v1494_v10  ;;  %v1884_v39 = vadd.f32 %v1883_v44, %v1882_v36  ;;  %14301 = vst [vmem:[#allocation83_spill] sm:$0xff] %v7710_v3  ;;  %v7719_v10 = vadd.f32 %v7264_v32, %v7546_v16  ;;  %v1889_v11 = vsel %vm1259_vm3, %v1642_v50, 0.0 }
 0x24c   : > { %14303 = vst [vmem:[#allocation85_spill] sm:$0xff] %v7728_v51  ;;  %v1503_v16 = vsel %vm1259_vm3, %v7710_v3, 0.0 }
 0x24d   : > { %v1498_v7 = vadd.f32 %v1497_v14, %v1496_v31  ;;  %v1886_v58 = vadd.f32 %v1885_v54, %v1884_v39  ;;  %14302 = vst [vmem:[#allocation84_spill] sm:$0xff] %v7719_v10  ;;  %v1644_v39 = vmul.f32 %v7710_v3, %v7710_v3  ;;  %v1891_v14 = vsel %vm1259_vm3, %v1643_v46, 0.0 }
 0x24e   : > { %v1645_v50 = vmul.f32 %v7719_v10, %v7719_v10  ;;  %v1505_v48 = vsel %vm1259_vm3, %v7719_v10, 0.0  ;;  %v1646_v46 = vmul.f32 %v7728_v51, %v7728_v51 }
 0x24f   : > { %v1888_v36 = vadd.f32 %v1887_v22, %v1886_v58  ;;  %v1500_v44 = vadd.f32 %v1499_v25, %v1498_v7  ;;  %v7736_v7 = vadd.f32 %v7264_v32, %v1241_v12  ;;  %v1246_v25 = vpop.f32.mrf.mxu3  ;;  %v1893_v15 = vsel %vm1259_vm3, %v1644_v39, 0.0 }
 0x250   : > { %v1507_v12 = vsel %vm1259_vm3, %v7728_v51, 0.0  ;;  %v7752_v39 = vadd.f32 %v7264_v32, %v1246_v25 }
 0x251   : > { %v1890_v31 = vadd.f32 %v1889_v11, %v1888_v36  ;;  %v1502_v54 = vadd.f32 %v1501_v38, %v1500_v44  ;;  %14304 = vst [vmem:[#allocation86_spill] sm:$0xff] %v7736_v7  ;;  %v7744_v36 = vadd.f32 %v7264_v32, %v1244_v2  ;;  %v1895_v38 = vsel %vm1259_vm3, %v1645_v50, 0.0 }
 0x252   : > { %14306 = vst [vmem:[#allocation88_spill] sm:$0xff] %v7752_v39  ;;  %v1509_v2 = vsel %vm1259_vm3, %v7736_v7, 0.0  ;;  %v1649_v32 = vmul.f32 %v7752_v39, %v7752_v39 }
 0x253   : > { %v1892_v58 = vadd.f32 %v1891_v14, %v1890_v31  ;;  %v1504_v22 = vadd.f32 %v1503_v16, %v1502_v54  ;;  %14305 = vst [vmem:[#allocation87_spill] sm:$0xff] %v7744_v36  ;;  %v1647_v31 = vmul.f32 %v7736_v7, %v7736_v7  ;;  %v1897_v16 = vsel %vm1259_vm3, %v1646_v46, 0.0 }
 0x255   : > { %v1894_v44 = vadd.f32 %v1893_v15, %v1892_v58  ;;  %v1506_v11 = vadd.f32 %v1505_v48, %v1504_v22  ;;  %v1648_v15 = vmul.f32 %v7744_v36, %v7744_v36  ;;  %v1899_v22 = vsel %vm1259_vm3, %v1647_v31, 0.0 }
 0x256   : > { %v1511_v48 = vsel %vm1259_vm3, %v7744_v36, 0.0 }
 0x257   : > { %v1896_v54 = vadd.f32 %v1895_v38, %v1894_v44  ;;  %v1508_v14 = vadd.f32 %v1507_v12, %v1506_v11  ;;  %v1901_v46 = vsel %vm1259_vm3, %v1648_v15, 0.0  ;;  %v1513_v11 = vsel %vm1259_vm3, %v7752_v39, 0.0 }
 0x259   : > { %v1898_v50 = vadd.f32 %v1897_v16, %v1896_v54  ;;  %v1510_v58 = vadd.f32 %v1509_v2, %v1508_v14  ;;  %v1903_v54 = vsel %vm1259_vm3, %v1649_v32, 0.0 }
 0x25b   : > { %v1900_v25 = vadd.f32 %v1899_v22, %v1898_v50  ;;  %v1512_v44 = vadd.f32 %v1511_v48, %v1510_v58 }
 0x25d   : > { %v1902_v38 = vadd.f32 %v1901_v46, %v1900_v25  ;;  %v1514_v12 = vadd.f32 %v1513_v11, %v1512_v44 }
 0x25f   : > { %v1515_v14 = vrot.slane %v1514_v12, 4  ;;  %v1904_v16 = vadd.f32 %v1903_v54, %v1902_v38 }
 0x261   : > { %v1516_v31 = vadd.f32 %v1515_v14, %v1514_v12  ;;  %v1905_v2 = vrot.slane %v1904_v16, 4 }
 0x263   : > { %v1517_v7 = vrot.slane %v1516_v31, 2  ;;  %v1906_v36 = vadd.f32 %v1905_v2, %v1904_v16 }
 0x265   : > { %v1518_v51 = vadd.f32 %v1517_v7, %v1516_v31  ;;  %v1907_v10 = vrot.slane %v1906_v36, 2 }
 0x267   : > { %v1519_v3 = vrot.slane %v1518_v51, 1  ;;  %v1908_v50 = vadd.f32 %v1907_v10, %v1906_v36  ;;  %v5647_v36 = vld [vmem:[%s13859_s3] ss:$0 sm:$0xff] }
 0x269   : > { %v1520_v58 = vadd.f32 %v1519_v3, %v1518_v51  ;;  %v1909_v22 = vrot.slane %v1908_v50, 1 }
 0x26b   : > { %v1910_v15 = vadd.f32 %v1909_v22, %v1908_v50  ;;  %v1521_v48 = vmul.f32 0.0009765625, %v1520_v58  ;;  %v1250_v58 = vld [vmem:[%s13860_s4] sm:$0x1] }
 0x26d   : > { %v1911_v39 = vmul.f32 0.0009765625, %v1910_v15 }
 0x26f   : > { %v1913_v25 = vsel %vm1912_vm4, %v1521_v48, %v1911_v39 }
 0x270   : > { %5432 = vmatmul.msk.f32.vlgmr.msrb.gmra.mxu1 %vm1259_vm3, %v1913_v25 }
 0x2ed   : > { %v1934_v32 = vpop.f32.mrf.mxu1 }
 0x2ee   : > { %v1937_v44 = vmul.f32 %v1934_v32, %v1934_v32 }
 0x2f0   : > { %v1939_v46 = vrot.slane %v1937_v44, 7 }
 0x2f2   : > { %v1941_v11 = vsub.f32 %v1934_v32, %v1939_v46  ;;  %v14307_v46 = vld [vmem:[#allocation2_spill] sm:$0xff] }
 0x2f4   : > { %v1942_v38 = vmax.f32 %v1941_v11, 0.0  ;;  %v14308_v11 = vld [vmem:[#allocation3_spill] sm:$0xff] }
 0x2f6   : > { %v1943_v12 = vadd.f32 1e-05, %v1942_v38  ;;  %v14309_v38 = vld [vmem:[#allocation5_spill] sm:$0xff] }
 0x2f8   : > { %5648 = vrsqrt.f32 %v1943_v12  ;;  %vm1950_vm6 = vweird.f32 %v1943_v12 }
 0x2fe   : > { %v5649_v7 = vpop.eup %5648 }
 0x2ff   : > { %v1945_v54 = vmul.f32 %v5649_v7, %v1943_v12  ;;  %vm1951_vm5 = vweird.f32 %v5649_v7  ;;  %v14310_v12 = vld [vmem:[#allocation7_spill] sm:$0xff] }
 0x300   : > { %vm1952_vm7 = vmor %vm1950_vm6, %vm1951_vm5 }
 0x301   : > { %v1946_v14 = vmul.f32 %v5649_v7, %v1945_v54  ;;  %v14311_v54 = vld [vmem:[#allocation9_spill] sm:$0xff] }
 0x303   : > { %v1947_v10 = vmul.f32 0.5, %v1946_v14  ;;  %v14312_v14 = vld [vmem:[#allocation11_spill] sm:$0xff] }
 0x305   : > { %v1948_v3 = vsub.f32 1.5, %v1947_v10  ;;  %v14313_v10 = vld [vmem:[#allocation13_spill] sm:$0xff] }
 0x307   : > { %v1949_v51 = vmul.f32 %v5649_v7, %v1948_v3 }
 0x309   : > { %v1953_v39 = vsel %vm1952_vm7, %v5649_v7, %v1949_v51  ;;  %v14314_v51 = vld [vmem:[#allocation15_spill] sm:$0xff] }
 0x30a   : > { %v1957_v16 = vmul.f32 %v5647_v36, %v1953_v39  ;;  %v14315_v39 = vld [vmem:[#allocation21_spill] sm:$0xff] }
 0x30c   : > { %v1959_v31 = vrot.slane %v1957_v16, 1  ;;  %v7772_v50 = vperm.slane %v1957_v16, 1 }
 0x30e   : > { %v1961_v2 = vmul.f32 %v1959_v31, %v1934_v32  ;;  %v7779_v15 = vmul.f32 %v7772_v50, %v7132_v61  ;;  %v7783_v48 = vmul.f32 %v7772_v50, %v7142_v60  ;;  %v7787_v25 = vmul.f32 %v7772_v50, %v7151_v49  ;;  %v14316_v31 = vld [vmem:[#allocation4_spill] sm:$0xff] }
 0x30f   : > { %v7791_v32 = vmul.f32 %v7772_v50, %v7162_v57  ;;  %v7795_v44 = vmul.f32 %v7772_v50, %v7173_v24  ;;  %v7799_v61 = vmul.f32 %v7772_v50, %v7182_v13  ;;  %v7803_v60 = vmul.f32 %v7772_v50, %v7191_v0 }
 0x310   : > { %v1962_v22 = vsub.f32 %v1250_v58, %v1961_v2  ;;  %v7807_v49 = vmul.f32 %v7772_v50, %v7200_v23  ;;  %v7811_v57 = vmul.f32 %v7772_v50, %v7211_v34  ;;  %v7815_v24 = vmul.f32 %v7772_v50, %v7222_v8  ;;  %v14317_v58 = vld [vmem:[#allocation6_spill] sm:$0xff] }
 0x311   : > { %v7819_v13 = vmul.f32 %v7772_v50, %v7231_v47  ;;  %v7823_v0 = vmul.f32 %v7772_v50, %v7243_v41  ;;  %v7827_v23 = vmul.f32 %v7772_v50, %v7252_v52  ;;  %v7831_v34 = vmul.f32 %v7772_v50, %v7268_v45 }
 0x312   : > { %v7835_v8 = vmul.f32 %v7772_v50, %v7279_v63  ;;  %v7839_v47 = vmul.f32 %v7772_v50, %v7291_v6  ;;  %v7843_v41 = vmul.f32 %v7772_v50, %v7300_v19  ;;  %v7847_v52 = vmul.f32 %v7772_v50, %v7309_v29 }
 0x313   : > { %v7851_v45 = vmul.f32 %v7772_v50, %v7323_v53  ;;  %v7855_v63 = vmul.f32 %v7772_v50, %v7332_v33  ;;  %v7859_v6 = vmul.f32 %v7772_v50, %v7341_v37  ;;  %v7863_v19 = vmul.f32 %v7772_v50, %v14307_v46 }
 0x314   : > { %v7867_v29 = vmul.f32 %v7772_v50, %v7359_v18  ;;  %v7871_v53 = vmul.f32 %v7772_v50, %v7370_v26  ;;  %v7875_v33 = vmul.f32 %v7772_v50, %v14308_v11  ;;  %v7879_v37 = vmul.f32 %v7772_v50, %v14309_v38  ;;  %v14318_v11 = vld [vmem:[#allocation8_spill] sm:$0xff] }
 0x315   : > { %v7883_v7 = vmul.f32 %v7772_v50, %v14310_v12  ;;  %v7887_v18 = vmul.f32 %v7772_v50, %v14311_v54  ;;  %v7891_v26 = vmul.f32 %v7772_v50, %v14312_v14  ;;  %v7895_v3 = vmul.f32 %v7772_v50, %v14313_v10  ;;  %v14319_v12 = vld [vmem:[#allocation10_spill] sm:$0xff] }
 0x316   : > { %v7899_v36 = vmul.f32 %v7772_v50, %v14314_v51  ;;  %v7903_v16 = vmul.f32 %v7772_v50, %v14315_v39  ;;  %v7907_v2 = vmul.f32 %v7772_v50, %v14316_v31  ;;  %v7911_v46 = vmul.f32 %v7772_v50, %v14317_v58  ;;  %v14320_v31 = vld [vmem:[#allocation12_spill] sm:$0xff] }
 0x317   : > { %v7915_v38 = vmul.f32 %v7772_v50, %v14318_v11  ;;  %v7919_v54 = vmul.f32 %v7772_v50, %v14319_v12  ;;  %v7923_v14 = vmul.f32 %v7772_v50, %v7488_v28  ;;  %v7927_v10 = vmul.f32 %v7772_v50, %v7497_v55  ;;  %v14322_v12 = vld [vmem:[#allocation14_spill] sm:$0xff] }
 0x318   : > { %v7931_v51 = vmul.f32 %v7772_v50, %v7508_v42  ;;  %v7935_v39 = vmul.f32 %v7772_v50, %v7517_v5  ;;  %v7939_v58 = vmul.f32 %v7772_v50, %v14320_v31  ;;  %v7943_v28 = vmul.f32 %v7772_v50, %v7535_v17 }
 0x319   : > { %v7947_v55 = vmul.f32 %v7772_v50, %v7544_v40  ;;  %v7951_v42 = vmul.f32 %v7772_v50, %v7555_v59  ;;  %v7955_v5 = vmul.f32 %v7772_v50, %v7564_v35  ;;  %v7959_v11 = vmul.f32 %v7772_v50, %v7573_v30  ;;  %v14323_v30 = vld [vmem:[#allocation18_spill] sm:$0xff] }
 0x31a   : > { %v7963_v17 = vmul.f32 %v7772_v50, %v7582_v4  ;;  %v7967_v40 = vmul.f32 %v7772_v50, %v14322_v12  ;;  %v7971_v59 = vmul.f32 %v7772_v50, %v7605_v56  ;;  %v7975_v35 = vmul.f32 %v7772_v50, %v7614_v20  ;;  %v14326_v20 = vld [vmem:[#allocation24_spill] sm:$0xff] }
 0x31b   : > { %14321 = vst [vmem:[#allocation2_spill] sm:$0xff] %v7959_v11  ;;  %v7977_v31 = vperm.slane %v1962_v22, 0  ;;  %v7981_v11 = vmul.f32 %v7772_v50, %v14323_v30  ;;  %v7985_v4 = vmul.f32 %v7772_v50, %v7635_v27  ;;  %v7989_v12 = vmul.f32 %v7772_v50, %v7644_v62 }
 0x31c   : > { %v7993_v56 = vmul.f32 %v7772_v50, %v7653_v1  ;;  %v7997_v22 = vmul.f32 %v7772_v50, %v14326_v20  ;;  %v8001_v30 = vmul.f32 %v7772_v50, %v7671_v21  ;;  %v8005_v27 = vmul.f32 %v7772_v50, %v7680_v43 }
 0x31d   : > { %14324 = vst [vmem:[#allocation3_spill] sm:$0xff] %v7989_v12  ;;  %v8009_v62 = vmul.f32 %v7772_v50, %v7692_v9  ;;  %v14331_v12 = vld [vmem:[#allocation82_spill] sm:$0xff] }
 0x31e   : > { %14325 = vst [vmem:[#allocation5_spill] sm:$0xff] %v7993_v56  ;;  %v8013_v1 = vmul.f32 %v7772_v50, %v14331_v12  ;;  %v14333_v56 = vld [vmem:[#allocation83_spill] sm:$0xff] }
 0x31f   : > { %14327 = vst [vmem:[#allocation7_spill] sm:$0xff] %v7997_v22  ;;  %v8017_v20 = vmul.f32 %v7772_v50, %v14333_v56  ;;  %v14334_v22 = vld [vmem:[#allocation84_spill] sm:$0xff] }
 0x320   : > { %14328 = vst [vmem:[#allocation9_spill] sm:$0xff] %v8001_v30  ;;  %v8021_v21 = vmul.f32 %v7772_v50, %v14334_v22  ;;  %v14335_v30 = vld [vmem:[#allocation85_spill] sm:$0xff]  ;;  %v8041_v22 = vadd.f32 %v7977_v31, %v7779_v15  ;;  %v8061_v15 = vadd.f32 %v7977_v31, %v7799_v61  ;;  %v8081_v61 = vadd.f32 %v7977_v31, %v7819_v13 }
 0x321   : > { %14329 = vst [vmem:[#allocation11_spill] sm:$0xff] %v8005_v27  ;;  %v8025_v43 = vmul.f32 %v7772_v50, %v14335_v30  ;;  %v14336_v27 = vld [vmem:[#allocation86_spill] sm:$0xff]  ;;  %v8045_v30 = vadd.f32 %v7977_v31, %v7783_v48  ;;  %v8065_v48 = vadd.f32 %v7977_v31, %v7803_v60  ;;  %v8085_v60 = vadd.f32 %v7977_v31, %v7823_v0 }
 0x322   : > { %14330 = vst [vmem:[#allocation13_spill] sm:$0xff] %v8009_v62  ;;  %v8029_v9 = vmul.f32 %v7772_v50, %v14336_v27  ;;  %v14337_v62 = vld [vmem:[#allocation87_spill] sm:$0xff]  ;;  %v8049_v27 = vadd.f32 %v7977_v31, %v7787_v25  ;;  %v8069_v25 = vadd.f32 %v7977_v31, %v7807_v49  ;;  %v8089_v49 = vadd.f32 %v7977_v31, %v7827_v23 }
 0x323   : > { %14332 = vst [vmem:[#allocation15_spill] sm:$0xff] %v8013_v1  ;;  %v8033_v12 = vmul.f32 %v7772_v50, %v14337_v62  ;;  %v14338_v1 = vld [vmem:[#allocation88_spill] sm:$0xff]  ;;  %v8053_v62 = vadd.f32 %v7977_v31, %v7791_v32  ;;  %v8073_v32 = vadd.f32 %v7977_v31, %v7811_v57  ;;  %v8093_v57 = vadd.f32 %v7977_v31, %v7831_v34 }
 0x324   : > { %v8037_v56 = vmul.f32 %v7772_v50, %v14338_v1  ;;  %14339 = vst [vmem:[#allocation21_spill] sm:$0xff] %v8041_v22  ;;  %v8057_v1 = vadd.f32 %v7977_v31, %v7795_v44  ;;  %v8077_v44 = vadd.f32 %v7977_v31, %v7815_v24  ;;  %v8097_v24 = vadd.f32 %v7977_v31, %v7835_v8 }
 0x325   : > { %14340 = vst [vmem:[#allocation4_spill] sm:$0xff] %v8045_v30  ;;  %v8101_v13 = vadd.f32 %v7977_v31, %v7839_v47  ;;  %v8105_v0 = vadd.f32 %v7977_v31, %v7843_v41  ;;  %v8109_v23 = vadd.f32 %v7977_v31, %v7847_v52  ;;  %v8113_v34 = vadd.f32 %v7977_v31, %v7851_v45 }
 0x326   : > { %14341 = vst [vmem:[#allocation6_spill] sm:$0xff] %v8049_v27  ;;  %v8117_v8 = vadd.f32 %v7977_v31, %v7855_v63  ;;  %v8121_v47 = vadd.f32 %v7977_v31, %v7859_v6  ;;  %v8125_v41 = vadd.f32 %v7977_v31, %v7863_v19  ;;  %v8129_v52 = vadd.f32 %v7977_v31, %v7867_v29 }
 0x327   : > { %14342 = vst [vmem:[#allocation8_spill] sm:$0xff] %v8053_v62  ;;  %v8133_v45 = vadd.f32 %v7977_v31, %v7871_v53  ;;  %v8137_v63 = vadd.f32 %v7977_v31, %v7875_v33  ;;  %v8141_v6 = vadd.f32 %v7977_v31, %v7879_v37  ;;  %v8145_v19 = vadd.f32 %v7977_v31, %v7883_v7 }
 0x328   : > { %14343 = vst [vmem:[#allocation10_spill] sm:$0xff] %v8057_v1  ;;  %v8149_v29 = vadd.f32 %v7977_v31, %v7887_v18  ;;  %v8153_v53 = vadd.f32 %v7977_v31, %v7891_v26  ;;  %v8157_v33 = vadd.f32 %v7977_v31, %v7895_v3  ;;  %v8161_v37 = vadd.f32 %v7977_v31, %v7899_v36 }
 0x329   : > { %14344 = vst [vmem:[#allocation12_spill] sm:$0xff] %v8061_v15  ;;  %v8165_v7 = vadd.f32 %v7977_v31, %v7903_v16  ;;  %v8169_v18 = vadd.f32 %v7977_v31, %v7907_v2  ;;  %v8173_v26 = vadd.f32 %v7977_v31, %v7911_v46  ;;  %v8177_v3 = vadd.f32 %v7977_v31, %v7915_v38 }
 0x32a   : > { %14345 = vst [vmem:[#allocation14_spill] sm:$0xff] %v8065_v48  ;;  %v8181_v36 = vadd.f32 %v7977_v31, %v7919_v54  ;;  %v8185_v16 = vadd.f32 %v7977_v31, %v7923_v14  ;;  %v8189_v2 = vadd.f32 %v7977_v31, %v7927_v10  ;;  %v8193_v46 = vadd.f32 %v7977_v31, %v7931_v51 }
 0x32b   : > { %14346 = vst [vmem:[#allocation18_spill] sm:$0xff] %v8069_v25  ;;  %v8197_v38 = vadd.f32 %v7977_v31, %v7935_v39  ;;  %v8201_v54 = vadd.f32 %v7977_v31, %v7939_v58  ;;  %v8205_v14 = vadd.f32 %v7977_v31, %v7943_v28  ;;  %v8209_v10 = vadd.f32 %v7977_v31, %v7947_v55 }
 0x32c   : > { %14347 = vst [vmem:[#allocation24_spill] sm:$0xff] %v8073_v32  ;;  %v8213_v51 = vadd.f32 %v7977_v31, %v7951_v42  ;;  %v8217_v39 = vadd.f32 %v7977_v31, %v7955_v5  ;;  %v8225_v28 = vadd.f32 %v7977_v31, %v7963_v17  ;;  %v8229_v55 = vadd.f32 %v7977_v31, %v7967_v40 }
 0x32d   : > { %14348 = vst [vmem:[#allocation82_spill] sm:$0xff] %v8077_v44  ;;  %v8233_v42 = vadd.f32 %v7977_v31, %v7971_v59  ;;  %v8237_v5 = vadd.f32 %v7977_v31, %v7975_v35  ;;  %v8245_v17 = vadd.f32 %v7977_v31, %v7985_v4 }
 0x32e   : > { %14349 = vst [vmem:[#allocation83_spill] sm:$0xff] %v8081_v61 }
 0x32f   : > { %14350 = vst [vmem:[#allocation84_spill] sm:$0xff] %v8085_v60 }
 0x330   : > { %14351 = vst [vmem:[#allocation85_spill] sm:$0xff] %v8089_v49 }
 0x331   : > { %14352 = vst [vmem:[#allocation86_spill] sm:$0xff] %v8093_v57 }
 0x332   : > { %14353 = vst [vmem:[#allocation87_spill] sm:$0xff] %v8097_v24 }
 0x333   : > { %14354 = vst [vmem:[#allocation88_spill] sm:$0xff] %v8101_v13 }
 0x334   : > { %14355 = vst [vmem:[#allocation89_spill] sm:$0xff] %v8105_v0 }
 0x335   : > { %14356 = vst [vmem:[#allocation90_spill] sm:$0xff] %v8109_v23 }
 0x336   : > { %14357 = vst [vmem:[#allocation91_spill] sm:$0xff] %v8113_v34 }
 0x337   : > { %14358 = vst [vmem:[#allocation92_spill] sm:$0xff] %v8117_v8 }
 0x338   : > { %14359 = vst [vmem:[#allocation93_spill] sm:$0xff] %v8121_v47 }
 0x339   : > { %14360 = vst [vmem:[#allocation94_spill] sm:$0xff] %v8125_v41 }
 0x33a   : > { %14361 = vst [vmem:[#allocation95_spill] sm:$0xff] %v8129_v52 }
 0x33b   : > { %14362 = vst [vmem:[#allocation96_spill] sm:$0xff] %v8133_v45 }
 0x33c   : > { %14363 = vst [vmem:[#allocation97_spill] sm:$0xff] %v8137_v63 }
 0x33d   : > { %14364 = vst [vmem:[#allocation98_spill] sm:$0xff] %v8141_v6 }
 0x33e   : > { %14365 = vst [vmem:[#allocation99_spill] sm:$0xff] %v8145_v19 }
 0x33f   : > { %14366 = vst [vmem:[#allocation100_spill] sm:$0xff] %v8149_v29 }
 0x340   : > { %14367 = vst [vmem:[#allocation101_spill] sm:$0xff] %v8153_v53 }
 0x341   : > { %14368 = vst [vmem:[#allocation102_spill] sm:$0xff] %v8157_v33 }
 0x342   : > { %14369 = vst [vmem:[#allocation103_spill] sm:$0xff] %v8161_v37 }
 0x343   : > { %14370 = vst [vmem:[#allocation104_spill] sm:$0xff] %v8165_v7 }
 0x344   : > { %14371 = vst [vmem:[#allocation105_spill] sm:$0xff] %v8169_v18 }
 0x345   : > { %14372 = vst [vmem:[#allocation106_spill] sm:$0xff] %v8173_v26 }
 0x346   : > { %14373 = vst [vmem:[#allocation107_spill] sm:$0xff] %v8177_v3 }
 0x347   : > { %14374 = vst [vmem:[#allocation108_spill] sm:$0xff] %v8181_v36 }
 0x348   : > { %14375 = vst [vmem:[#allocation109_spill] sm:$0xff] %v8185_v16 }
 0x349   : > { %14376 = vst [vmem:[#allocation110_spill] sm:$0xff] %v8189_v2 }
 0x34a   : > { %14377 = vst [vmem:[#allocation111_spill] sm:$0xff] %v8193_v46 }
 0x34b   : > { %14378 = vst [vmem:[#allocation112_spill] sm:$0xff] %v8197_v38  ;;  %v14384_v38 = vld [vmem:[#allocation2_spill] sm:$0xff] }
 0x34c   : > { %14379 = vst [vmem:[#allocation113_spill] sm:$0xff] %v8201_v54  ;;  %v8221_v58 = vadd.f32 %v7977_v31, %v14384_v38  ;;  %v8241_v38 = vadd.f32 %v7977_v31, %v7981_v11 }
 0x34d   : > { %14380 = vst [vmem:[#allocation114_spill] sm:$0xff] %v8205_v14 }
 0x34e   : > { %14381 = vst [vmem:[#allocation115_spill] sm:$0xff] %v8209_v10 }
 0x34f   : > { %14382 = vst [vmem:[#allocation116_spill] sm:$0xff] %v8213_v51 }
 0x350   : > { %14383 = vst [vmem:[#allocation117_spill] sm:$0xff] %v8217_v39 }
 0x351   : > { %14385 = vst [vmem:[#allocation2_spill] sm:$0xff] %v8221_v58 }
 0x352   : > { %14386 = vst [vmem:[#allocation118_spill] sm:$0xff] %v8225_v28  ;;  %v14392_v28 = vld [vmem:[#allocation3_spill] sm:$0xff] }
 0x353   : > { %14387 = vst [vmem:[#allocation119_spill] sm:$0xff] %v8229_v55  ;;  %v8249_v40 = vadd.f32 %v7977_v31, %v14392_v28  ;;  %v14394_v55 = vld [vmem:[#allocation5_spill] sm:$0xff] }
 0x354   : > { %14388 = vst [vmem:[#allocation120_spill] sm:$0xff] %v8233_v42  ;;  %v8253_v59 = vadd.f32 %v7977_v31, %v14394_v55  ;;  %v14396_v42 = vld [vmem:[#allocation7_spill] sm:$0xff] }
 0x355   : > { %14389 = vst [vmem:[#allocation121_spill] sm:$0xff] %v8237_v5  ;;  %v8257_v35 = vadd.f32 %v7977_v31, %v14396_v42  ;;  %v14398_v5 = vld [vmem:[#allocation9_spill] sm:$0xff]  ;;  %v8277_v42 = vadd.f32 %v7977_v31, %v8017_v20  ;;  %v8297_v20 = vadd.f32 %v7977_v31, %v8037_v56  ;;  %v14418_v56 = vld [vmem:[#allocation22_spill] sm:$0xff] }
 0x356   : > { %14390 = vst [vmem:[#allocation122_spill] sm:$0xff] %v8241_v38  ;;  %v8261_v11 = vadd.f32 %v7977_v31, %v14398_v5  ;;  %v14400_v38 = vld [vmem:[#allocation11_spill] sm:$0xff]  ;;  %v8281_v5 = vadd.f32 %v7977_v31, %v8021_v21 }
 0x357   : > { %14391 = vst [vmem:[#allocation123_spill] sm:$0xff] %v8245_v17  ;;  %v8265_v4 = vadd.f32 %v7977_v31, %v14400_v38  ;;  %v14402_v17 = vld [vmem:[#allocation13_spill] sm:$0xff]  ;;  %v8285_v38 = vadd.f32 %v7977_v31, %v8025_v43  ;;  %v14414_v43 = vld [vmem:[#allocation19_spill] sm:$0xff] }
 0x358   : > { %14393 = vst [vmem:[#allocation3_spill] sm:$0xff] %v8249_v40  ;;  %v8269_v28 = vadd.f32 %v7977_v31, %v14402_v17  ;;  %v14404_v40 = vld [vmem:[#allocation15_spill] sm:$0xff]  ;;  %v8289_v17 = vadd.f32 %v7977_v31, %v8029_v9 }
 0x359   : > { %14395 = vst [vmem:[#allocation5_spill] sm:$0xff] %v8253_v59  ;;  %v8273_v55 = vadd.f32 %v7977_v31, %v14404_v40  ;;  %v8293_v40 = vadd.f32 %v7977_v31, %v8033_v12 }
 0x35a   : > { %14397 = vst [vmem:[#allocation7_spill] sm:$0xff] %v8257_v35 }
 0x35b   : > { %14399 = vst [vmem:[#allocation9_spill] sm:$0xff] %v8261_v11  ;;  %v14424_v11 = vld [vmem:[#allocation26_spill] sm:$0xff] }
 0x35c   : > { %14401 = vst [vmem:[#allocation11_spill] sm:$0xff] %v8265_v4 }
 0x35d   : > { %14403 = vst [vmem:[#allocation13_spill] sm:$0xff] %v8269_v28  ;;  %v14420_v28 = vld [vmem:[#allocation23_spill] sm:$0xff] }
 0x35e   : > { %14405 = vst [vmem:[#allocation15_spill] sm:$0xff] %v8273_v55 }
 0x35f   : > { %14406 = vst [vmem:[#allocation124_spill] sm:$0xff] %v8277_v42  ;;  %v14412_v42 = vld [vmem:[#allocation17_spill] sm:$0xff] }
 0x360   : > { %14407 = vst [vmem:[#allocation125_spill] sm:$0xff] %v8281_v5  ;;  %v1964_v21 = vmul.f32 %v7772_v50, %v14412_v42  ;;  %v14413_v5 = vld [vmem:[#allocation16_spill] sm:$0xff] }
 0x361   : > { %14408 = vst [vmem:[#allocation126_spill] sm:$0xff] %v8285_v38  ;;  %v1965_v55 = vmul.f32 %v7772_v50, %v14413_v5  ;;  %v1966_v38 = vmul.f32 %v7772_v50, %v14414_v43  ;;  %v1969_v5 = vmul.f32 %v7772_v50, %v14420_v28  ;;  %v14426_v28 = vld [vmem:[#allocation27_spill] sm:$0xff] }
 0x362   : > { %14409 = vst [vmem:[#allocation127_spill] sm:$0xff] %v8289_v17  ;;  %v8306_v9 = vadd.f32 %v7977_v31, %v1964_v21  ;;  %v14416_v17 = vld [vmem:[#allocation20_spill] sm:$0xff]  ;;  %v14422_v21 = vld [vmem:[#allocation25_spill] sm:$0xff] }
 0x363   : > { %14410 = vst [vmem:[#allocation128_spill] sm:$0xff] %v8293_v40  ;;  %v1967_v12 = vmul.f32 %v7772_v50, %v14416_v17  ;;  %v8311_v40 = vadd.f32 %v7977_v31, %v1965_v55  ;;  %v8316_v42 = vadd.f32 %v7977_v31, %v1966_v38  ;;  %v1970_v4 = vmul.f32 %v7772_v50, %v14422_v21 }
 0x364   : > { %14411 = vst [vmem:[#allocation129_spill] sm:$0xff] %v8297_v20  ;;  %v1968_v20 = vmul.f32 %v7772_v50, %v14418_v56  ;;  %v5433_v55 = vmul.f32 -1.442695, %v8306_v9  ;;  %v1971_v56 = vmul.f32 %v7772_v50, %v14424_v11  ;;  %v8332_v38 = vadd.f32 %v7977_v31, %v1969_v5  ;;  %v14430_v5 = vld [vmem:[#allocation29_spill] sm:$0xff] }
 0x365   : > { %14415 = vst [vmem:[#allocation17_spill] sm:$0xff] %v8306_v9  ;;  %v8321_v43 = vadd.f32 %v7977_v31, %v1967_v12  ;;  %v5434_v35 = vmul.f32 -1.442695, %v8311_v40  ;;  %v1972_v12 = vmul.f32 %v7772_v50, %v14426_v28  ;;  %v8338_v59 = vadd.f32 %v7977_v31, %v1970_v4  ;;  %v14432_v28 = vld [vmem:[#allocation30_spill] sm:$0xff] }
 0x366   : > { %14417 = vst [vmem:[#allocation16_spill] sm:$0xff] %v8311_v40  ;;  %v8326_v17 = vadd.f32 %v7977_v31, %v1968_v20  ;;  %v5435_v21 = vmul.f32 -1.442695, %v8316_v42  ;;  %v14428_v20 = vld [vmem:[#allocation28_spill] sm:$0xff]  ;;  %v8344_v9 = vadd.f32 %v7977_v31, %v1971_v56  ;;  %v1974_v39 = vmul.f32 %v7772_v50, %v14430_v5 }
 0x367   : > { %14419 = vst [vmem:[#allocation19_spill] sm:$0xff] %v8316_v42  ;;  %v1973_v58 = vmul.f32 %v7772_v50, %v14428_v20  ;;  %v5436_v11 = vmul.f32 -1.442695, %v8321_v43  ;;  %v8350_v40 = vadd.f32 %v7977_v31, %v1972_v12  ;;  %5650 = vpow2.f32 %v5433_v55  ;;  %v14434_v20 = vld [vmem:[#allocation31_spill] sm:$0xff]  ;;  %v14436_v12 = vld [vmem:[#allocation32_spill] sm:$0xff] }
 0x368   : > { %14421 = vst [vmem:[#allocation20_spill] sm:$0xff] %v8321_v43  ;;  %v5437_v4 = vmul.f32 -1.442695, %v8326_v17  ;;  %v1975_v42 = vmul.f32 %v7772_v50, %v14432_v28  ;;  %5652 = vpow2.f32 %v5434_v35  ;;  %v5438_v56 = vmul.f32 -1.442695, %v8332_v38  ;;  %v14438_v35 = vld [vmem:[#allocation33_spill] sm:$0xff] }
 0x369   : > { %14423 = vst [vmem:[#allocation22_spill] sm:$0xff] %v8326_v17  ;;  %v8356_v51 = vadd.f32 %v7977_v31, %v1973_v58  ;;  %v1976_v43 = vmul.f32 %v7772_v50, %v14434_v20  ;;  %v8362_v5 = vadd.f32 %v7977_v31, %v1974_v39  ;;  %5654 = vpow2.f32 %v5435_v21  ;;  %v14440_v21 = vld [vmem:[#allocation34_spill] sm:$0xff] }
 0x36a   : > { %14425 = vst [vmem:[#allocation23_spill] sm:$0xff] %v8332_v38  ;;  %v5439_v55 = vmul.f32 -1.442695, %v8338_v59  ;;  %v1977_v17 = vmul.f32 %v7772_v50, %v14436_v12  ;;  %v8368_v28 = vadd.f32 %v7977_v31, %v1975_v42  ;;  %5656 = vpow2.f32 %v5436_v11 }
 0x36b   : > { %14427 = vst [vmem:[#allocation25_spill] sm:$0xff] %v8338_v59  ;;  %v5440_v58 = vmul.f32 -1.442695, %v8344_v9  ;;  %v1978_v38 = vmul.f32 %v7772_v50, %v14438_v35  ;;  %v8374_v20 = vadd.f32 %v7977_v31, %v1976_v43  ;;  %5658 = vpow2.f32 %v5437_v4 }
 0x36c   : > { %14429 = vst [vmem:[#allocation26_spill] sm:$0xff] %v8344_v9  ;;  %v5441_v39 = vmul.f32 -1.442695, %v8350_v40  ;;  %v1979_v59 = vmul.f32 %v7772_v50, %v14440_v21  ;;  %v8380_v12 = vadd.f32 %v7977_v31, %v1977_v17  ;;  %5660 = vpow2.f32 %v5438_v56  ;;  %v14443_v9 = vld [vmem:[#allocation35_spill] sm:$0xff]  ;;  %v14446_v21 = vld [vmem:[#allocation36_spill] sm:$0xff] }
 0x36d   : > { %14431 = vst [vmem:[#allocation27_spill] sm:$0xff] %v8350_v40  ;;  %v5442_v42 = vmul.f32 -1.442695, %v8356_v51  ;;  %v8383_v11 = vpop.eup %5650  ;;  %v1980_v35 = vmul.f32 %v7772_v50, %v14443_v9  ;;  %v8388_v43 = vadd.f32 %v7977_v31, %v1978_v38  ;;  %5662 = vpow2.f32 %v5439_v55  ;;  %v14449_v9 = vld [vmem:[#allocation37_spill] sm:$0xff] }
 0x36e   : > { %14433 = vst [vmem:[#allocation28_spill] sm:$0xff] %v8356_v51  ;;  %v5443_v4 = vmul.f32 -1.442695, %v8362_v5  ;;  %v8391_v40 = vpop.eup %5652  ;;  %v1981_v17 = vmul.f32 %v7772_v50, %v14446_v21  ;;  %v8396_v56 = vadd.f32 %v7977_v31, %v1979_v59  ;;  %5664 = vpow2.f32 %v5440_v58  ;;  %v14452_v21 = vld [vmem:[#allocation38_spill] sm:$0xff] }
 0x36f   : > { %14435 = vst [vmem:[#allocation29_spill] sm:$0xff] %v8362_v5  ;;  %v5444_v51 = vmul.f32 -1.442695, %v8368_v28  ;;  %v1982_v38 = vmul.f32 %v7772_v50, %v14449_v9  ;;  %v8404_v55 = vadd.f32 %v7977_v31, %v1980_v35  ;;  %5666 = vpow2.f32 %v5441_v39  ;;  %v14455_v9 = vld [vmem:[#allocation39_spill] sm:$0xff] }
 0x370   : > { %14437 = vst [vmem:[#allocation30_spill] sm:$0xff] %v8368_v28  ;;  %v5445_v5 = vmul.f32 -1.442695, %v8374_v20  ;;  %v1983_v59 = vmul.f32 %v7772_v50, %v14452_v21  ;;  %v8412_v58 = vadd.f32 %v7977_v31, %v1981_v17  ;;  %5668 = vpow2.f32 %v5442_v42  ;;  %v14458_v21 = vld [vmem:[#allocation40_spill] sm:$0xff] }
 0x371   : > { %14439 = vst [vmem:[#allocation31_spill] sm:$0xff] %v8374_v20  ;;  %v5446_v28 = vmul.f32 -1.442695, %v8380_v12  ;;  %v1984_v35 = vmul.f32 %v7772_v50, %v14455_v9  ;;  %v8420_v39 = vadd.f32 %v7977_v31, %v1982_v38  ;;  %5670 = vpow2.f32 %v5443_v4  ;;  %v14461_v9 = vld [vmem:[#allocation41_spill] sm:$0xff] }
 0x372   : > { %14441 = vst [vmem:[#allocation32_spill] sm:$0xff] %v8380_v12  ;;  %v5447_v20 = vmul.f32 -1.442695, %v8388_v43  ;;  %v1985_v17 = vmul.f32 %v7772_v50, %v14458_v21  ;;  %v8428_v42 = vadd.f32 %v7977_v31, %v1983_v59  ;;  %5672 = vpow2.f32 %v5444_v51  ;;  %v14464_v21 = vld [vmem:[#allocation42_spill] sm:$0xff] }
 0x373   : > { %14442 = vst [vmem:[#allocation33_spill] sm:$0xff] %v8383_v11  ;;  %v8399_v11 = vpop.eup %5654  ;;  %v5448_v12 = vmul.f32 -1.442695, %v8396_v56  ;;  %v1986_v38 = vmul.f32 %v7772_v50, %v14461_v9  ;;  %v8436_v4 = vadd.f32 %v7977_v31, %v1984_v35  ;;  %5674 = vpow2.f32 %v5445_v5  ;;  %v14467_v9 = vld [vmem:[#allocation43_spill] sm:$0xff] }
 0x374   : > { %14444 = vst [vmem:[#allocation34_spill] sm:$0xff] %v8388_v43  ;;  %v5449_v43 = vmul.f32 -1.442695, %v8404_v55  ;;  %v1987_v59 = vmul.f32 %v7772_v50, %v14464_v21  ;;  %v8444_v51 = vadd.f32 %v7977_v31, %v1985_v17  ;;  %5676 = vpow2.f32 %v5446_v28  ;;  %v14470_v21 = vld [vmem:[#allocation44_spill] sm:$0xff] }
 0x375   : > { %14445 = vst [vmem:[#allocation35_spill] sm:$0xff] %v8391_v40  ;;  %v8407_v40 = vpop.eup %5656  ;;  %v1988_v35 = vmul.f32 %v7772_v50, %v14467_v9  ;;  %v8452_v5 = vadd.f32 %v7977_v31, %v1986_v38  ;;  %5678 = vpow2.f32 %v5447_v20  ;;  %v1989_v17 = vmul.f32 %v7772_v50, %v14470_v21  ;;  %v14473_v9 = vld [vmem:[#allocation45_spill] sm:$0xff]  ;;  %v14476_v21 = vld [vmem:[#allocation46_spill] sm:$0xff] }
 0x376   : > { %14447 = vst [vmem:[#allocation36_spill] sm:$0xff] %v8396_v56  ;;  %v5450_v56 = vmul.f32 -1.442695, %v8412_v58  ;;  %v8460_v28 = vadd.f32 %v7977_v31, %v1987_v59  ;;  %5680 = vpow2.f32 %v5448_v12  ;;  %v1990_v38 = vmul.f32 %v7772_v50, %v14473_v9  ;;  %v14479_v9 = vld [vmem:[#allocation47_spill] sm:$0xff] }
 0x377   : > { %14448 = vst [vmem:[#allocation130_spill] sm:$0xff] %v8399_v11  ;;  %v8415_v11 = vpop.eup %5658  ;;  %v8468_v20 = vadd.f32 %v7977_v31, %v1988_v35  ;;  %5682 = vpow2.f32 %v5449_v43  ;;  %v1991_v59 = vmul.f32 %v7772_v50, %v14476_v21  ;;  %v8476_v12 = vadd.f32 %v7977_v31, %v1989_v17  ;;  %v14482_v21 = vld [vmem:[#allocation48_spill] sm:$0xff] }
 0x378   : > { %14450 = vst [vmem:[#allocation37_spill] sm:$0xff] %v8404_v55  ;;  %v5451_v55 = vmul.f32 -1.442695, %v8420_v39  ;;  %5684 = vpow2.f32 %v5450_v56  ;;  %v1992_v35 = vmul.f32 %v7772_v50, %v14479_v9  ;;  %v8484_v43 = vadd.f32 %v7977_v31, %v1990_v38  ;;  %v14485_v9 = vld [vmem:[#allocation49_spill] sm:$0xff] }
 0x379   : > { %14451 = vst [vmem:[#allocation131_spill] sm:$0xff] %v8407_v40  ;;  %v8423_v40 = vpop.eup %5660  ;;  %v1993_v17 = vmul.f32 %v7772_v50, %v14482_v21  ;;  %v8492_v56 = vadd.f32 %v7977_v31, %v1991_v59  ;;  %v1994_v38 = vmul.f32 %v7772_v50, %v14485_v9  ;;  %v14488_v21 = vld [vmem:[#allocation50_spill] sm:$0xff]  ;;  %v14491_v9 = vld [vmem:[#allocation51_spill] sm:$0xff] }
 0x37a   : > { %14453 = vst [vmem:[#allocation38_spill] sm:$0xff] %v8412_v58  ;;  %v5452_v58 = vmul.f32 -1.442695, %v8428_v42  ;;  %5686 = vpow2.f32 %v5451_v55  ;;  %v8500_v55 = vadd.f32 %v7977_v31, %v1992_v35  ;;  %v1995_v59 = vmul.f32 %v7772_v50, %v14488_v21  ;;  %v14494_v21 = vld [vmem:[#allocation54_spill] sm:$0xff] }
 0x37b   : > { %14454 = vst [vmem:[#allocation132_spill] sm:$0xff] %v8415_v11  ;;  %v8431_v11 = vpop.eup %5662  ;;  %v1996_v35 = vmul.f32 %v7772_v50, %v14491_v9  ;;  %v14497_v9 = vld [vmem:[#allocation52_spill] sm:$0xff] }
 0x37c   : > { %14456 = vst [vmem:[#allocation39_spill] sm:$0xff] %v8420_v39  ;;  %v5453_v39 = vmul.f32 -1.442695, %v8436_v4  ;;  %5688 = vpow2.f32 %v5452_v58  ;;  %v8508_v58 = vadd.f32 %v7977_v31, %v1993_v17  ;;  %v1997_v17 = vmul.f32 %v7772_v50, %v14494_v21  ;;  %v14500_v21 = vld [vmem:[#allocation53_spill] sm:$0xff] }
 0x37d   : > { %14457 = vst [vmem:[#allocation133_spill] sm:$0xff] %v8423_v40  ;;  %v8439_v40 = vpop.eup %5664 }
 0x37e   : > { %14459 = vst [vmem:[#allocation40_spill] sm:$0xff] %v8428_v42  ;;  %v5454_v42 = vmul.f32 -1.442695, %v8444_v51  ;;  %5690 = vpow2.f32 %v5453_v39  ;;  %v8516_v39 = vadd.f32 %v7977_v31, %v1994_v38  ;;  %v1998_v38 = vmul.f32 %v7772_v50, %v14497_v9  ;;  %v14503_v9 = vld [vmem:[#allocation55_spill] sm:$0xff] }
 0x37f   : > { %14460 = vst [vmem:[#allocation134_spill] sm:$0xff] %v8431_v11  ;;  %v8447_v11 = vpop.eup %5666 }
 0x380   : > { %14462 = vst [vmem:[#allocation41_spill] sm:$0xff] %v8436_v4  ;;  %v5455_v4 = vmul.f32 -1.442695, %v8452_v5  ;;  %5692 = vpow2.f32 %v5454_v42  ;;  %v8524_v42 = vadd.f32 %v7977_v31, %v1995_v59  ;;  %v1999_v59 = vmul.f32 %v7772_v50, %v14500_v21  ;;  %v14506_v21 = vld [vmem:[#allocation56_spill] sm:$0xff] }
 0x381   : > { %14463 = vst [vmem:[#allocation135_spill] sm:$0xff] %v8439_v40  ;;  %v8455_v40 = vpop.eup %5668 }
 0x382   : > { %14465 = vst [vmem:[#allocation42_spill] sm:$0xff] %v8444_v51  ;;  %v5456_v51 = vmul.f32 -1.442695, %v8460_v28  ;;  %5694 = vpow2.f32 %v5455_v4  ;;  %v8532_v4 = vadd.f32 %v7977_v31, %v1996_v35  ;;  %v2000_v35 = vmul.f32 %v7772_v50, %v14503_v9  ;;  %v14509_v9 = vld [vmem:[#allocation57_spill] sm:$0xff] }
 0x383   : > { %14466 = vst [vmem:[#allocation136_spill] sm:$0xff] %v8447_v11  ;;  %v8463_v11 = vpop.eup %5670 }
 0x384   : > { %14468 = vst [vmem:[#allocation43_spill] sm:$0xff] %v8452_v5  ;;  %v5457_v5 = vmul.f32 -1.442695, %v8468_v20  ;;  %5696 = vpow2.f32 %v5456_v51  ;;  %v8540_v51 = vadd.f32 %v7977_v31, %v1997_v17  ;;  %v2001_v17 = vmul.f32 %v7772_v50, %v14506_v21  ;;  %v14512_v21 = vld [vmem:[#allocation58_spill] sm:$0xff] }
 0x385   : > { %14469 = vst [vmem:[#allocation137_spill] sm:$0xff] %v8455_v40  ;;  %v8471_v40 = vpop.eup %5672 }
 0x386   : > { %14471 = vst [vmem:[#allocation44_spill] sm:$0xff] %v8460_v28  ;;  %v5458_v28 = vmul.f32 -1.442695, %v8476_v12  ;;  %5698 = vpow2.f32 %v5457_v5  ;;  %v8548_v5 = vadd.f32 %v7977_v31, %v1998_v38  ;;  %v2002_v38 = vmul.f32 %v7772_v50, %v14509_v9  ;;  %v14515_v9 = vld [vmem:[#allocation59_spill] sm:$0xff] }
 0x387   : > { %14472 = vst [vmem:[#allocation138_spill] sm:$0xff] %v8463_v11  ;;  %v8479_v11 = vpop.eup %5674 }
 0x388   : > { %14474 = vst [vmem:[#allocation45_spill] sm:$0xff] %v8468_v20  ;;  %v5459_v20 = vmul.f32 -1.442695, %v8484_v43  ;;  %5700 = vpow2.f32 %v5458_v28  ;;  %v8556_v28 = vadd.f32 %v7977_v31, %v1999_v59  ;;  %v2003_v59 = vmul.f32 %v7772_v50, %v14512_v21  ;;  %v14518_v21 = vld [vmem:[#allocation60_spill] sm:$0xff] }
 0x389   : > { %14475 = vst [vmem:[#allocation139_spill] sm:$0xff] %v8471_v40  ;;  %v8487_v40 = vpop.eup %5676 }
 0x38a   : > { %14477 = vst [vmem:[#allocation46_spill] sm:$0xff] %v8476_v12  ;;  %v5460_v12 = vmul.f32 -1.442695, %v8492_v56  ;;  %5702 = vpow2.f32 %v5459_v20  ;;  %v8564_v20 = vadd.f32 %v7977_v31, %v2000_v35  ;;  %v2004_v35 = vmul.f32 %v7772_v50, %v14515_v9  ;;  %v14521_v9 = vld [vmem:[#allocation61_spill] sm:$0xff] }
 0x38b   : > { %14478 = vst [vmem:[#allocation140_spill] sm:$0xff] %v8479_v11  ;;  %v8495_v11 = vpop.eup %5678 }
 0x38c   : > { %14480 = vst [vmem:[#allocation47_spill] sm:$0xff] %v8484_v43  ;;  %v5461_v43 = vmul.f32 -1.442695, %v8500_v55  ;;  %5704 = vpow2.f32 %v5460_v12  ;;  %v8572_v12 = vadd.f32 %v7977_v31, %v2001_v17  ;;  %v2005_v17 = vmul.f32 %v7772_v50, %v14518_v21  ;;  %v14524_v21 = vld [vmem:[#allocation62_spill] sm:$0xff] }
 0x38d   : > { %14481 = vst [vmem:[#allocation141_spill] sm:$0xff] %v8487_v40  ;;  %v8503_v40 = vpop.eup %5680 }
 0x38e   : > { %14483 = vst [vmem:[#allocation48_spill] sm:$0xff] %v8492_v56  ;;  %v5462_v56 = vmul.f32 -1.442695, %v8508_v58  ;;  %5706 = vpow2.f32 %v5461_v43  ;;  %v8580_v43 = vadd.f32 %v7977_v31, %v2002_v38  ;;  %v2006_v38 = vmul.f32 %v7772_v50, %v14521_v9  ;;  %v14527_v9 = vld [vmem:[#allocation63_spill] sm:$0xff] }
 0x38f   : > { %14484 = vst [vmem:[#allocation142_spill] sm:$0xff] %v8495_v11  ;;  %v8511_v11 = vpop.eup %5682 }
 0x390   : > { %14486 = vst [vmem:[#allocation49_spill] sm:$0xff] %v8500_v55  ;;  %v5463_v55 = vmul.f32 -1.442695, %v8516_v39  ;;  %5708 = vpow2.f32 %v5462_v56  ;;  %v8588_v56 = vadd.f32 %v7977_v31, %v2003_v59  ;;  %v2007_v59 = vmul.f32 %v7772_v50, %v14524_v21  ;;  %v14530_v21 = vld [vmem:[#allocation64_spill] sm:$0xff] }
 0x391   : > { %14487 = vst [vmem:[#allocation143_spill] sm:$0xff] %v8503_v40  ;;  %v8519_v40 = vpop.eup %5684 }
 0x392   : > { %14489 = vst [vmem:[#allocation50_spill] sm:$0xff] %v8508_v58  ;;  %v5464_v58 = vmul.f32 -1.442695, %v8524_v42  ;;  %5710 = vpow2.f32 %v5463_v55  ;;  %v8596_v55 = vadd.f32 %v7977_v31, %v2004_v35  ;;  %v2008_v35 = vmul.f32 %v7772_v50, %v14527_v9  ;;  %v14533_v9 = vld [vmem:[#allocation65_spill] sm:$0xff] }
 0x393   : > { %14490 = vst [vmem:[#allocation144_spill] sm:$0xff] %v8511_v11  ;;  %v8527_v11 = vpop.eup %5686 }
 0x394   : > { %14492 = vst [vmem:[#allocation51_spill] sm:$0xff] %v8516_v39  ;;  %v5465_v39 = vmul.f32 -1.442695, %v8532_v4  ;;  %5712 = vpow2.f32 %v5464_v58  ;;  %v8604_v58 = vadd.f32 %v7977_v31, %v2005_v17  ;;  %v2009_v17 = vmul.f32 %v7772_v50, %v14530_v21  ;;  %v14536_v21 = vld [vmem:[#allocation66_spill] sm:$0xff] }
 0x395   : > { %14493 = vst [vmem:[#allocation145_spill] sm:$0xff] %v8519_v40  ;;  %v8535_v40 = vpop.eup %5688 }
 0x396   : > { %14495 = vst [vmem:[#allocation54_spill] sm:$0xff] %v8524_v42  ;;  %v5466_v42 = vmul.f32 -1.442695, %v8540_v51  ;;  %5714 = vpow2.f32 %v5465_v39  ;;  %v8612_v39 = vadd.f32 %v7977_v31, %v2006_v38  ;;  %v2010_v38 = vmul.f32 %v7772_v50, %v14533_v9  ;;  %v14539_v9 = vld [vmem:[#allocation67_spill] sm:$0xff] }
 0x397   : > { %14496 = vst [vmem:[#allocation146_spill] sm:$0xff] %v8527_v11  ;;  %v8543_v11 = vpop.eup %5690 }
 0x398   : > { %14498 = vst [vmem:[#allocation52_spill] sm:$0xff] %v8532_v4  ;;  %v5467_v4 = vmul.f32 -1.442695, %v8548_v5  ;;  %5716 = vpow2.f32 %v5466_v42  ;;  %v8620_v42 = vadd.f32 %v7977_v31, %v2007_v59  ;;  %v2011_v59 = vmul.f32 %v7772_v50, %v14536_v21  ;;  %v14542_v21 = vld [vmem:[#allocation68_spill] sm:$0xff] }
 0x399   : > { %14499 = vst [vmem:[#allocation147_spill] sm:$0xff] %v8535_v40  ;;  %v8551_v40 = vpop.eup %5692 }
 0x39a   : > { %14501 = vst [vmem:[#allocation53_spill] sm:$0xff] %v8540_v51  ;;  %v5468_v51 = vmul.f32 -1.442695, %v8556_v28  ;;  %5718 = vpow2.f32 %v5467_v4  ;;  %v8628_v4 = vadd.f32 %v7977_v31, %v2008_v35  ;;  %v2012_v35 = vmul.f32 %v7772_v50, %v14539_v9  ;;  %v14545_v9 = vld [vmem:[#allocation69_spill] sm:$0xff] }
 0x39b   : > { %14502 = vst [vmem:[#allocation148_spill] sm:$0xff] %v8543_v11  ;;  %v8559_v11 = vpop.eup %5694 }
 0x39c   : > { %14504 = vst [vmem:[#allocation55_spill] sm:$0xff] %v8548_v5  ;;  %v5469_v5 = vmul.f32 -1.442695, %v8564_v20  ;;  %5720 = vpow2.f32 %v5468_v51  ;;  %v8636_v51 = vadd.f32 %v7977_v31, %v2009_v17  ;;  %v2013_v17 = vmul.f32 %v7772_v50, %v14542_v21  ;;  %v14548_v21 = vld [vmem:[#allocation70_spill] sm:$0xff] }
 0x39d   : > { %14505 = vst [vmem:[#allocation149_spill] sm:$0xff] %v8551_v40  ;;  %v8567_v40 = vpop.eup %5696 }
 0x39e   : > { %14507 = vst [vmem:[#allocation56_spill] sm:$0xff] %v8556_v28  ;;  %v5470_v28 = vmul.f32 -1.442695, %v8572_v12  ;;  %5722 = vpow2.f32 %v5469_v5  ;;  %v8644_v5 = vadd.f32 %v7977_v31, %v2010_v38  ;;  %v2014_v38 = vmul.f32 %v7772_v50, %v14545_v9  ;;  %v14551_v9 = vld [vmem:[#allocation71_spill] sm:$0xff] }
 0x39f   : > { %14508 = vst [vmem:[#allocation150_spill] sm:$0xff] %v8559_v11  ;;  %v8575_v11 = vpop.eup %5698 }
 0x3a0   : > { %14510 = vst [vmem:[#allocation57_spill] sm:$0xff] %v8564_v20  ;;  %v5471_v20 = vmul.f32 -1.442695, %v8580_v43  ;;  %5724 = vpow2.f32 %v5470_v28  ;;  %v8652_v28 = vadd.f32 %v7977_v31, %v2011_v59  ;;  %v2015_v59 = vmul.f32 %v7772_v50, %v14548_v21  ;;  %v14554_v21 = vld [vmem:[#allocation72_spill] sm:$0xff] }
 0x3a1   : > { %14511 = vst [vmem:[#allocation151_spill] sm:$0xff] %v8567_v40  ;;  %v8583_v40 = vpop.eup %5700 }
 0x3a2   : > { %14513 = vst [vmem:[#allocation58_spill] sm:$0xff] %v8572_v12  ;;  %v5472_v12 = vmul.f32 -1.442695, %v8588_v56  ;;  %5726 = vpow2.f32 %v5471_v20  ;;  %v8660_v20 = vadd.f32 %v7977_v31, %v2012_v35  ;;  %v2016_v35 = vmul.f32 %v7772_v50, %v14551_v9  ;;  %v14557_v9 = vld [vmem:[#allocation73_spill] sm:$0xff] }
 0x3a3   : > { %14514 = vst [vmem:[#allocation152_spill] sm:$0xff] %v8575_v11  ;;  %v8591_v11 = vpop.eup %5702 }
 0x3a4   : > { %14516 = vst [vmem:[#allocation59_spill] sm:$0xff] %v8580_v43  ;;  %v5473_v43 = vmul.f32 -1.442695, %v8596_v55  ;;  %5728 = vpow2.f32 %v5472_v12  ;;  %v8668_v12 = vadd.f32 %v7977_v31, %v2013_v17  ;;  %v2017_v17 = vmul.f32 %v7772_v50, %v14554_v21  ;;  %v14560_v21 = vld [vmem:[#allocation74_spill] sm:$0xff] }
 0x3a5   : > { %14517 = vst [vmem:[#allocation153_spill] sm:$0xff] %v8583_v40  ;;  %v8599_v40 = vpop.eup %5704 }
 0x3a6   : > { %14519 = vst [vmem:[#allocation60_spill] sm:$0xff] %v8588_v56  ;;  %v5474_v56 = vmul.f32 -1.442695, %v8604_v58  ;;  %5730 = vpow2.f32 %v5473_v43  ;;  %v8676_v43 = vadd.f32 %v7977_v31, %v2014_v38  ;;  %v2018_v38 = vmul.f32 %v7772_v50, %v14557_v9  ;;  %v14563_v9 = vld [vmem:[#allocation75_spill] sm:$0xff] }
 0x3a7   : > { %14520 = vst [vmem:[#allocation154_spill] sm:$0xff] %v8591_v11  ;;  %v8607_v11 = vpop.eup %5706 }
 0x3a8   : > { %14522 = vst [vmem:[#allocation61_spill] sm:$0xff] %v8596_v55  ;;  %v5475_v55 = vmul.f32 -1.442695, %v8612_v39  ;;  %5732 = vpow2.f32 %v5474_v56  ;;  %v8684_v56 = vadd.f32 %v7977_v31, %v2015_v59  ;;  %v2019_v59 = vmul.f32 %v7772_v50, %v14560_v21  ;;  %v14566_v21 = vld [vmem:[#allocation76_spill] sm:$0xff] }
 0x3a9   : > { %14523 = vst [vmem:[#allocation155_spill] sm:$0xff] %v8599_v40  ;;  %v8615_v40 = vpop.eup %5708 }
 0x3aa   : > { %14525 = vst [vmem:[#allocation62_spill] sm:$0xff] %v8604_v58  ;;  %v5476_v58 = vmul.f32 -1.442695, %v8620_v42  ;;  %5734 = vpow2.f32 %v5475_v55  ;;  %v8692_v55 = vadd.f32 %v7977_v31, %v2016_v35  ;;  %v2020_v35 = vmul.f32 %v7772_v50, %v14563_v9  ;;  %v14569_v9 = vld [vmem:[#allocation77_spill] sm:$0xff] }
 0x3ab   : > { %14526 = vst [vmem:[#allocation156_spill] sm:$0xff] %v8607_v11  ;;  %v8623_v11 = vpop.eup %5710 }
 0x3ac   : > { %14528 = vst [vmem:[#allocation63_spill] sm:$0xff] %v8612_v39  ;;  %v5477_v39 = vmul.f32 -1.442695, %v8628_v4  ;;  %5736 = vpow2.f32 %v5476_v58  ;;  %v8700_v58 = vadd.f32 %v7977_v31, %v2017_v17  ;;  %v2021_v17 = vmul.f32 %v7772_v50, %v14566_v21  ;;  %v14572_v21 = vld [vmem:[#allocation78_spill] sm:$0xff] }
 0x3ad   : > { %14529 = vst [vmem:[#allocation157_spill] sm:$0xff] %v8615_v40  ;;  %v8631_v40 = vpop.eup %5712 }
 0x3ae   : > { %14531 = vst [vmem:[#allocation64_spill] sm:$0xff] %v8620_v42  ;;  %v5478_v42 = vmul.f32 -1.442695, %v8636_v51  ;;  %5738 = vpow2.f32 %v5477_v39  ;;  %v8708_v39 = vadd.f32 %v7977_v31, %v2018_v38  ;;  %v2022_v38 = vmul.f32 %v7772_v50, %v14569_v9  ;;  %v14575_v9 = vld [vmem:[#allocation79_spill] sm:$0xff] }
 0x3af   : > { %14532 = vst [vmem:[#allocation158_spill] sm:$0xff] %v8623_v11  ;;  %v8639_v11 = vpop.eup %5714 }
 0x3b0   : > { %14534 = vst [vmem:[#allocation65_spill] sm:$0xff] %v8628_v4  ;;  %v5479_v4 = vmul.f32 -1.442695, %v8644_v5  ;;  %5740 = vpow2.f32 %v5478_v42  ;;  %v8716_v42 = vadd.f32 %v7977_v31, %v2019_v59  ;;  %v2023_v59 = vmul.f32 %v7772_v50, %v14572_v21  ;;  %v14578_v21 = vld [vmem:[#allocation80_spill] sm:$0xff] }
 0x3b1   : > { %14535 = vst [vmem:[#allocation159_spill] sm:$0xff] %v8631_v40  ;;  %v8647_v40 = vpop.eup %5716 }
 0x3b2   : > { %14537 = vst [vmem:[#allocation66_spill] sm:$0xff] %v8636_v51  ;;  %v5480_v51 = vmul.f32 -1.442695, %v8652_v28  ;;  %5742 = vpow2.f32 %v5479_v4  ;;  %v8724_v4 = vadd.f32 %v7977_v31, %v2020_v35  ;;  %v2024_v35 = vmul.f32 %v7772_v50, %v14575_v9  ;;  %v14580_v9 = vld [vmem:[#allocation81_spill] sm:$0xff] }
 0x3b3   : > { %14538 = vst [vmem:[#allocation160_spill] sm:$0xff] %v8639_v11  ;;  %v8655_v11 = vpop.eup %5718 }
 0x3b4   : > { %14540 = vst [vmem:[#allocation67_spill] sm:$0xff] %v8644_v5  ;;  %v5481_v5 = vmul.f32 -1.442695, %v8660_v20  ;;  %5744 = vpow2.f32 %v5480_v51  ;;  %v8732_v51 = vadd.f32 %v7977_v31, %v2021_v17  ;;  %v2025_v17 = vmul.f32 %v7772_v50, %v14578_v21 }
 0x3b5   : > { %14541 = vst [vmem:[#allocation161_spill] sm:$0xff] %v8647_v40  ;;  %v8663_v40 = vpop.eup %5720 }
 0x3b6   : > { %14543 = vst [vmem:[#allocation68_spill] sm:$0xff] %v8652_v28  ;;  %v5482_v28 = vmul.f32 -1.442695, %v8668_v12  ;;  %5746 = vpow2.f32 %v5481_v5  ;;  %v8740_v5 = vadd.f32 %v7977_v31, %v2022_v38  ;;  %v2026_v38 = vmul.f32 %v7772_v50, %v14580_v9 }
 0x3b7   : > { %14544 = vst [vmem:[#allocation162_spill] sm:$0xff] %v8655_v11  ;;  %v8671_v11 = vpop.eup %5722  ;;  %v8762_v21 = vadd.f32 %v7977_v31, %v2025_v17 }
 0x3b8   : > { %14546 = vst [vmem:[#allocation69_spill] sm:$0xff] %v8660_v20  ;;  %v5483_v20 = vmul.f32 -1.442695, %v8676_v43  ;;  %5748 = vpow2.f32 %v5482_v28  ;;  %v8748_v28 = vadd.f32 %v7977_v31, %v2023_v59  ;;  %v5491_v50 = vmul.f32 -1.442695, %v8740_v5 }
 0x3b9   : > { %14547 = vst [vmem:[#allocation163_spill] sm:$0xff] %v8663_v40  ;;  %v8679_v40 = vpop.eup %5724 }
 0x3ba   : > { %14549 = vst [vmem:[#allocation70_spill] sm:$0xff] %v8668_v12  ;;  %v5484_v12 = vmul.f32 -1.442695, %v8684_v56  ;;  %5750 = vpow2.f32 %v5483_v20  ;;  %v8756_v20 = vadd.f32 %v7977_v31, %v2024_v35 }
 0x3bb   : > { %14550 = vst [vmem:[#allocation164_spill] sm:$0xff] %v8671_v11  ;;  %v8687_v11 = vpop.eup %5726 }
 0x3bc   : > { %14552 = vst [vmem:[#allocation71_spill] sm:$0xff] %v8676_v43  ;;  %v5485_v43 = vmul.f32 -1.442695, %v8692_v55  ;;  %5752 = vpow2.f32 %v5484_v12  ;;  %v5490_v12 = vmul.f32 -1.442695, %v8732_v51 }
 0x3bd   : > { %14553 = vst [vmem:[#allocation165_spill] sm:$0xff] %v8679_v40  ;;  %v8695_v40 = vpop.eup %5728 }
 0x3be   : > { %14555 = vst [vmem:[#allocation72_spill] sm:$0xff] %v8684_v56  ;;  %v5486_v56 = vmul.f32 -1.442695, %v8700_v58  ;;  %5754 = vpow2.f32 %v5485_v43  ;;  %v5492_v43 = vmul.f32 -1.442695, %v8748_v28 }
 0x3bf   : > { %14556 = vst [vmem:[#allocation166_spill] sm:$0xff] %v8687_v11  ;;  %v8703_v11 = vpop.eup %5730 }
 0x3c0   : > { %14558 = vst [vmem:[#allocation73_spill] sm:$0xff] %v8692_v55  ;;  %v5487_v55 = vmul.f32 -1.442695, %v8708_v39  ;;  %5756 = vpow2.f32 %v5486_v56  ;;  %v5493_v56 = vmul.f32 -1.442695, %v8756_v20 }
 0x3c1   : > { %14559 = vst [vmem:[#allocation167_spill] sm:$0xff] %v8695_v40  ;;  %v8711_v40 = vpop.eup %5732 }
 0x3c2   : > { %14561 = vst [vmem:[#allocation74_spill] sm:$0xff] %v8700_v58  ;;  %v5488_v58 = vmul.f32 -1.442695, %v8716_v42  ;;  %5758 = vpow2.f32 %v5487_v55 }
 0x3c3   : > { %14562 = vst [vmem:[#allocation168_spill] sm:$0xff] %v8703_v11  ;;  %v8719_v11 = vpop.eup %5734 }
 0x3c4   : > { %14564 = vst [vmem:[#allocation75_spill] sm:$0xff] %v8708_v39  ;;  %v5489_v39 = vmul.f32 -1.442695, %v8724_v4  ;;  %5760 = vpow2.f32 %v5488_v58  ;;  %v5496_v58 = vmul.f32 -1.442695, %v8041_v22 }
 0x3c5   : > { %14565 = vst [vmem:[#allocation169_spill] sm:$0xff] %v8711_v40  ;;  %v8727_v40 = vpop.eup %5736 }
 0x3c6   : > { %14567 = vst [vmem:[#allocation76_spill] sm:$0xff] %v8716_v42  ;;  %v8768_v42 = vadd.f32 %v7977_v31, %v2026_v38  ;;  %5762 = vpow2.f32 %v5489_v39  ;;  %v5497_v39 = vmul.f32 -1.442695, %v8045_v30 }
 0x3c7   : > { %14568 = vst [vmem:[#allocation170_spill] sm:$0xff] %v8719_v11  ;;  %v8735_v11 = vpop.eup %5738  ;;  %5764 = vpow2.f32 %v5490_v12  ;;  %v5498_v12 = vmul.f32 -1.442695, %v8049_v27 }
 0x3c8   : > { %14570 = vst [vmem:[#allocation77_spill] sm:$0xff] %v8724_v4  ;;  %5766 = vpow2.f32 %v5491_v50  ;;  %v5495_v55 = vmul.f32 -1.442695, %v8768_v42  ;;  %v5499_v50 = vmul.f32 -1.442695, %v8053_v62 }
 0x3c9   : > { %14571 = vst [vmem:[#allocation171_spill] sm:$0xff] %v8727_v40  ;;  %v8743_v40 = vpop.eup %5740  ;;  %5768 = vpow2.f32 %v5492_v43  ;;  %v5500_v43 = vmul.f32 -1.442695, %v8057_v1 }
 0x3ca   : > { %14573 = vst [vmem:[#allocation78_spill] sm:$0xff] %v8732_v51  ;;  %v5494_v51 = vmul.f32 -1.442695, %v8762_v21  ;;  %5770 = vpow2.f32 %v5493_v56  ;;  %v5501_v56 = vmul.f32 -1.442695, %v8061_v15 }
 0x3cb   : > { %14574 = vst [vmem:[#allocation172_spill] sm:$0xff] %v8735_v11  ;;  %v8751_v11 = vpop.eup %5742 }
 0x3cc   : > { %14576 = vst [vmem:[#allocation79_spill] sm:$0xff] %v8740_v5  ;;  %5772 = vpow2.f32 %v5494_v51  ;;  %v5502_v51 = vmul.f32 -1.442695, %v8065_v48 }
 0x3cd   : > { %14577 = vst [vmem:[#allocation173_spill] sm:$0xff] %v8743_v40  ;;  %v8759_v40 = vpop.eup %5744  ;;  %5774 = vpow2.f32 %v5495_v55  ;;  %v5503_v55 = vmul.f32 -1.442695, %v8069_v25 }
 0x3ce   : > { %14579 = vst [vmem:[#allocation80_spill] sm:$0xff] %v8748_v28  ;;  %v8765_v59 = vpop.eup %5746  ;;  %5776 = vpow2.f32 %v5496_v58  ;;  %v5504_v58 = vmul.f32 -1.442695, %v8073_v32 }
 0x3cf   : > { %14581 = vst [vmem:[#allocation81_spill] sm:$0xff] %v8756_v20  ;;  %v8771_v35 = vpop.eup %5748  ;;  %5778 = vpow2.f32 %v5497_v39  ;;  %v5505_v39 = vmul.f32 -1.442695, %v8077_v44 }
 0x3d0   : > { %14582 = vst [vmem:[#allocation174_spill] sm:$0xff] %v8762_v21  ;;  %v8774_v9 = vpop.eup %5750  ;;  %5780 = vpow2.f32 %v5498_v12  ;;  %v5506_v12 = vmul.f32 -1.442695, %v8081_v61 }
 0x3d1   : > { %14583 = vst [vmem:[#allocation175_spill] sm:$0xff] %v8768_v42  ;;  %v8777_v17 = vpop.eup %5752  ;;  %5782 = vpow2.f32 %v5499_v50  ;;  %v5507_v50 = vmul.f32 -1.442695, %v8085_v60 }
 0x3d2   : > { %v8780_v31 = vpop.eup %5754  ;;  %5784 = vpow2.f32 %v5500_v43  ;;  %v5508_v43 = vmul.f32 -1.442695, %v8089_v49 }
 0x3d3   : > { %v8783_v38 = vpop.eup %5756  ;;  %5786 = vpow2.f32 %v5501_v56  ;;  %v5509_v56 = vmul.f32 -1.442695, %v8093_v57 }
 0x3d4   : > { %v8786_v28 = vpop.eup %5758  ;;  %5788 = vpow2.f32 %v5502_v51  ;;  %v5510_v51 = vmul.f32 -1.442695, %v8097_v24 }
 0x3d5   : > { %v8789_v20 = vpop.eup %5760  ;;  %5790 = vpow2.f32 %v5503_v55  ;;  %v5511_v55 = vmul.f32 -1.442695, %v8101_v13 }
 0x3d6   : > { %v8792_v21 = vpop.eup %5762  ;;  %5792 = vpow2.f32 %v5504_v58  ;;  %v5512_v58 = vmul.f32 -1.442695, %v8105_v0 }
 0x3d7   : > { %v8795_v42 = vpop.eup %5764  ;;  %5794 = vpow2.f32 %v5505_v39  ;;  %v5513_v39 = vmul.f32 -1.442695, %v8109_v23 }
 0x3d8   : > { %v8798_v22 = vpop.eup %5766  ;;  %5796 = vpow2.f32 %v5506_v12  ;;  %v5514_v12 = vmul.f32 -1.442695, %v8113_v34 }
 0x3d9   : > { %v8801_v30 = vpop.eup %5768  ;;  %5798 = vpow2.f32 %v5507_v50  ;;  %v5515_v50 = vmul.f32 -1.442695, %v8117_v8 }
 0x3da   : > { %v8804_v27 = vpop.eup %5770  ;;  %5800 = vpow2.f32 %v5508_v43  ;;  %v5516_v43 = vmul.f32 -1.442695, %v8121_v47 }
 0x3db   : > { %v8807_v62 = vpop.eup %5772  ;;  %5802 = vpow2.f32 %v5509_v56  ;;  %v5517_v56 = vmul.f32 -1.442695, %v8125_v41 }
 0x3dc   : > { %v8810_v1 = vpop.eup %5774  ;;  %5804 = vpow2.f32 %v5510_v51  ;;  %v5518_v51 = vmul.f32 -1.442695, %v8129_v52 }
 0x3dd   : > { %v8813_v15 = vpop.eup %5776  ;;  %5806 = vpow2.f32 %v5511_v55  ;;  %v5519_v55 = vmul.f32 -1.442695, %v8133_v45 }
 0x3de   : > { %v8816_v48 = vpop.eup %5778  ;;  %5808 = vpow2.f32 %v5512_v58  ;;  %v5520_v58 = vmul.f32 -1.442695, %v8137_v63 }
 0x3df   : > { %v8819_v25 = vpop.eup %5780  ;;  %5810 = vpow2.f32 %v5513_v39  ;;  %v5521_v39 = vmul.f32 -1.442695, %v8141_v6  ;;  %v5526_v6 = vmul.f32 -1.442695, %v8161_v37  ;;  %v14597_v37 = vld [vmem:[#allocation112_spill] sm:$0xff] }
 0x3e0   : > { %v8822_v32 = vpop.eup %5782  ;;  %5812 = vpow2.f32 %v5514_v12  ;;  %v5522_v12 = vmul.f32 -1.442695, %v8145_v19  ;;  %v5527_v19 = vmul.f32 -1.442695, %v8165_v7  ;;  %v5534_v7 = vmul.f32 -1.442695, %v8193_v46 }
 0x3e1   : > { %v8825_v44 = vpop.eup %5784  ;;  %5814 = vpow2.f32 %v5515_v50  ;;  %v5523_v50 = vmul.f32 -1.442695, %v8149_v29  ;;  %v5529_v29 = vmul.f32 -1.442695, %v8173_v26  ;;  %v14602_v46 = vld [vmem:[#allocation2_spill] sm:$0xff] }
 0x3e2   : > { %v8828_v61 = vpop.eup %5786  ;;  %5816 = vpow2.f32 %v5516_v43  ;;  %v5524_v43 = vmul.f32 -1.442695, %v8153_v53 }
 0x3e3   : > { %v8831_v60 = vpop.eup %5788  ;;  %5818 = vpow2.f32 %v5517_v56  ;;  %v5525_v56 = vmul.f32 -1.442695, %v8157_v33  ;;  %v5532_v33 = vmul.f32 -1.442695, %v8185_v16  ;;  %v14600_v16 = vld [vmem:[#allocation116_spill] sm:$0xff] }
 0x3e4   : > { %v8834_v49 = vpop.eup %5790  ;;  %5820 = vpow2.f32 %v5518_v51 }
 0x3e5   : > { %v8837_v57 = vpop.eup %5792  ;;  %5822 = vpow2.f32 %v5519_v55  ;;  %v5528_v55 = vmul.f32 -1.442695, %v8169_v18  ;;  %v5535_v18 = vmul.f32 -1.442695, %v14597_v37  ;;  %v8903_v37 = vmul.f32 -1.442695, %v14602_v46 }
 0x3e6   : > { %v8840_v24 = vpop.eup %5794  ;;  %5824 = vpow2.f32 %v5520_v58  ;;  %v5530_v58 = vmul.f32 -1.442695, %v8177_v3  ;;  %v5537_v3 = vmul.f32 -1.442695, %v8205_v14  ;;  %v14605_v14 = vld [vmem:[#allocation119_spill] sm:$0xff]  ;;  %v14609_v46 = vld [vmem:[#allocation122_spill] sm:$0xff] }
 0x3e7   : > { %v8843_v13 = vpop.eup %5796  ;;  %5826 = vpow2.f32 %v5521_v39  ;;  %v5531_v39 = vmul.f32 -1.442695, %v8181_v36  ;;  %v5538_v36 = vmul.f32 -1.442695, %v8209_v10  ;;  %v8911_v10 = vmul.f32 -1.442695, %v14605_v14 }
 0x3e8   : > { %14584 = vst [vmem:[#allocation176_spill] sm:$0xff] %v8843_v13  ;;  %v8846_v0 = vpop.eup %5798  ;;  %5828 = vpow2.f32 %v5522_v12  ;;  %v5533_v12 = vmul.f32 -1.442695, %v8189_v2  ;;  %v14601_v2 = vld [vmem:[#allocation117_spill] sm:$0xff]  ;;  %v14612_v14 = vld [vmem:[#allocation3_spill] sm:$0xff] }
 0x3e9   : > { %14585 = vst [vmem:[#allocation177_spill] sm:$0xff] %v8846_v0  ;;  %v8849_v23 = vpop.eup %5800  ;;  %5830 = vpow2.f32 %v5523_v50  ;;  %v5536_v50 = vmul.f32 -1.442695, %v8201_v54 }
 0x3ea   : > { %14586 = vst [vmem:[#allocation178_spill] sm:$0xff] %v8849_v23  ;;  %v8852_v34 = vpop.eup %5802  ;;  %5832 = vpow2.f32 %v5524_v43  ;;  %v8897_v43 = vmul.f32 -1.442695, %v14600_v16 }
 0x3eb   : > { %14587 = vst [vmem:[#allocation179_spill] sm:$0xff] %v8852_v34  ;;  %v8855_v8 = vpop.eup %5804  ;;  %5834 = vpow2.f32 %v5525_v56  ;;  %v14604_v56 = vld [vmem:[#allocation118_spill] sm:$0xff] }
 0x3ec   : > { %14588 = vst [vmem:[#allocation180_spill] sm:$0xff] %v8855_v8  ;;  %v8858_v47 = vpop.eup %5806  ;;  %5836 = vpow2.f32 %v5526_v6  ;;  %v8908_v54 = vmul.f32 -1.442695, %v14604_v56 }
 0x3ed   : > { %14589 = vst [vmem:[#allocation181_spill] sm:$0xff] %v8858_v47  ;;  %v8861_v41 = vpop.eup %5808  ;;  %5838 = vpow2.f32 %v5527_v19 }
 0x3ee   : > { %14590 = vst [vmem:[#allocation182_spill] sm:$0xff] %v8861_v41  ;;  %v8864_v52 = vpop.eup %5810  ;;  %5840 = vpow2.f32 %v5528_v55 }
 0x3ef   : > { %14591 = vst [vmem:[#allocation183_spill] sm:$0xff] %v8864_v52  ;;  %v8867_v45 = vpop.eup %5812  ;;  %5842 = vpow2.f32 %v5529_v29 }
 0x3f0   : > { %14592 = vst [vmem:[#allocation184_spill] sm:$0xff] %v8867_v45  ;;  %v8870_v63 = vpop.eup %5814  ;;  %5844 = vpow2.f32 %v5530_v58 }
 0x3f1   : > { %14593 = vst [vmem:[#allocation185_spill] sm:$0xff] %v8870_v63  ;;  %v8874_v51 = vpop.eup %5816  ;;  %v8930_v63 = vmul.f32 -1.442695, %v14612_v14  ;;  %5846 = vpow2.f32 %v5531_v39 }
 0x3f2   : > { %14594 = vst [vmem:[#allocation186_spill] sm:$0xff] %v8874_v51  ;;  %v8879_v5 = vpop.eup %5818  ;;  %v8922_v51 = vmul.f32 -1.442695, %v14609_v46  ;;  %v14616_v46 = vld [vmem:[#allocation9_spill] sm:$0xff]  ;;  %5848 = vpow2.f32 %v5532_v33 }
 0x3f3   : > { %14595 = vst [vmem:[#allocation187_spill] sm:$0xff] %v8879_v5  ;;  %v8884_v53 = vpop.eup %5820  ;;  %v8941_v52 = vmul.f32 -1.442695, %v14616_v46  ;;  %5850 = vpow2.f32 %v5533_v12 }
 0x3f4   : > { %14596 = vst [vmem:[#allocation188_spill] sm:$0xff] %v8884_v53  ;;  %v8889_v4 = vpop.eup %5822  ;;  %v8900_v53 = vmul.f32 -1.442695, %v14601_v2  ;;  %v14608_v2 = vld [vmem:[#allocation121_spill] sm:$0xff]  ;;  %5852 = vpow2.f32 %v5534_v7 }
 0x3f5   : > { %14598 = vst [vmem:[#allocation189_spill] sm:$0xff] %v8889_v4  ;;  %v8894_v26 = vpop.eup %5824  ;;  %v8919_v5 = vmul.f32 -1.442695, %v14608_v2  ;;  %5854 = vpow2.f32 %v5535_v18 }
 0x3f6   : > { %14599 = vst [vmem:[#allocation190_spill] sm:$0xff] %v8894_v26  ;;  %v8905_v4 = vpop.eup %5826  ;;  %v14606_v26 = vld [vmem:[#allocation120_spill] sm:$0xff]  ;;  %5856 = vpow2.f32 %v5536_v50 }
 0x3f7   : > { %14603 = vst [vmem:[#allocation191_spill] sm:$0xff] %v8905_v4  ;;  %v8914_v6 = vmul.f32 -1.442695, %v14606_v26  ;;  %v8916_v16 = vpop.eup %5828  ;;  %v14610_v4 = vld [vmem:[#allocation123_spill] sm:$0xff]  ;;  %v14613_v26 = vld [vmem:[#allocation5_spill] sm:$0xff]  ;;  %5858 = vpow2.f32 %v5537_v3 }
 0x3f8   : > { %14607 = vst [vmem:[#allocation192_spill] sm:$0xff] %v8916_v16  ;;  %v8925_v19 = vmul.f32 -1.442695, %v14610_v4  ;;  %v8927_v56 = vpop.eup %5830  ;;  %v8933_v45 = vmul.f32 -1.442695, %v14613_v26  ;;  %v14614_v16 = vld [vmem:[#allocation7_spill] sm:$0xff]  ;;  %5860 = vpow2.f32 %v5538_v36 }
 0x3f9   : > { %14611 = vst [vmem:[#allocation193_spill] sm:$0xff] %v8927_v56  ;;  %v8936_v55 = vmul.f32 -1.442695, %v14614_v16  ;;  %v8938_v2 = vpop.eup %5832  ;;  %v14617_v4 = vld [vmem:[#allocation11_spill] sm:$0xff]  ;;  %v14618_v56 = vld [vmem:[#allocation13_spill] sm:$0xff]  ;;  %v14621_v16 = vld [vmem:[#allocation124_spill] sm:$0xff]  ;;  %5862 = vpow2.f32 %v8897_v43 }
 0x3fa   : > { %14615 = vst [vmem:[#allocation194_spill] sm:$0xff] %v8938_v2  ;;  %v8944_v41 = vmul.f32 -1.442695, %v14617_v4  ;;  %v8947_v29 = vmul.f32 -1.442695, %v14618_v56  ;;  %v8949_v14 = vpop.eup %5834  ;;  %v14620_v26 = vld [vmem:[#allocation15_spill] sm:$0xff]  ;;  %5864 = vpow2.f32 %v8900_v53 }
 0x3fb   : > { %14619 = vst [vmem:[#allocation195_spill] sm:$0xff] %v8949_v14  ;;  %v8952_v47 = vmul.f32 -1.442695, %v14620_v26  ;;  %v8955_v8 = vmul.f32 -1.442695, %v14621_v16  ;;  %v14622_v2 = vld [vmem:[#allocation125_spill] sm:$0xff]  ;;  %v8960_v46 = vpop.eup %5836  ;;  %5866 = vpow2.f32 %v8903_v37 }
 0x3fc   : > { %v8958_v58 = vmul.f32 -1.442695, %v14622_v2  ;;  %14623 = vst [vmem:[#allocation196_spill] sm:$0xff] %v8960_v46  ;;  %v14624_v4 = vld [vmem:[#allocation126_spill] sm:$0xff]  ;;  %v14625_v56 = vld [vmem:[#allocation127_spill] sm:$0xff]  ;;  %v14627_v14 = vld [vmem:[#allocation128_spill] sm:$0xff]  ;;  %v8971_v26 = vpop.eup %5838  ;;  %5868 = vpow2.f32 %v8908_v54 }
 0x3fd   : > { %v8963_v34 = vmul.f32 -1.442695, %v14624_v4  ;;  %v8966_v23 = vmul.f32 -1.442695, %v14625_v56  ;;  %v8969_v39 = vmul.f32 -1.442695, %v14627_v14  ;;  %v8982_v4 = vpop.eup %5840  ;;  %5870 = vpow2.f32 %v8911_v10 }
 0x3fe   : > { %14629 = vst [vmem:[#allocation199_spill] sm:$0xff] %v8971_v26  ;;  %v14630_v16 = vld [vmem:[#allocation129_spill] sm:$0xff]  ;;  %v14633_v46 = vld [vmem:[#allocation35_spill] sm:$0xff]  ;;  %v14636_v56 = vld [vmem:[#allocation130_spill] sm:$0xff]  ;;  %5872 = vpow2.f32 %v8914_v6 }
 0x3ff   : > { %14626 = vst [vmem:[#allocation197_spill] sm:$0xff] %v8966_v23  ;;  %v8974_v0 = vmul.f32 -1.442695, %v14630_v16  ;;  %v14631_v2 = vld [vmem:[#allocation33_spill] sm:$0xff]  ;;  %v8980_v33 = vadd.f32 1.0, %v14633_v46  ;;  %v8985_v23 = vadd.f32 1.0, %v14636_v56  ;;  %v8993_v16 = vpop.eup %5842  ;;  %5874 = vpow2.f32 %v8919_v5 }
 0x400   : > { %14628 = vst [vmem:[#allocation198_spill] sm:$0xff] %v8969_v39  ;;  %v8977_v13 = vadd.f32 1.0, %v14631_v2  ;;  %v14637_v14 = vld [vmem:[#allocation131_spill] sm:$0xff]  ;;  %v14639_v26 = vld [vmem:[#allocation132_spill] sm:$0xff]  ;;  %v14642_v2 = vld [vmem:[#allocation133_spill] sm:$0xff]  ;;  %v9004_v56 = vpop.eup %5844  ;;  %5876 = vpow2.f32 %v8922_v51 }
 0x401   : > { %14634 = vst [vmem:[#allocation35_spill] sm:$0xff] %v8980_v33  ;;  %v8988_v39 = vadd.f32 1.0, %v14637_v14  ;;  %v8991_v12 = vadd.f32 1.0, %v14639_v26  ;;  %v14644_v46 = vld [vmem:[#allocation134_spill] sm:$0xff]  ;;  %v14648_v14 = vld [vmem:[#allocation136_spill] sm:$0xff]  ;;  %v14650_v26 = vld [vmem:[#allocation137_spill] sm:$0xff]  ;;  %vm2770_vm10 = vweird.f32 %v8985_v23 }
 0x402   : > { %14632 = vst [vmem:[#allocation33_spill] sm:$0xff] %v8977_v13  ;;  %v8996_v13 = vadd.f32 1.0, %v14642_v2  ;;  %v8999_v33 = vadd.f32 1.0, %v14644_v46  ;;  %v9015_v2 = vpop.eup %5846  ;;  %v14654_v46 = vld [vmem:[#allocation139_spill] sm:$0xff]  ;;  %v14676_v43 = vld [vmem:[#allocation150_spill] sm:$0xff]  ;;  %v14682_v53 = vld [vmem:[#allocation153_spill] sm:$0xff]  ;;  %5878 = vpow2.f32 %v8925_v19 }
 0x403   : > { %14635 = vst [vmem:[#allocation200_spill] sm:$0xff] %v8982_v4  ;;  %v14646_v4 = vld [vmem:[#allocation135_spill] sm:$0xff]  ;;  %v14688_v37 = vld [vmem:[#allocation156_spill] sm:$0xff]  ;;  %v14700_v10 = vld [vmem:[#allocation162_spill] sm:$0xff]  ;;  %v9155_v19 = vadd.f32 1.0, %v8751_v11  ;;  %v9173_v11 = vadd.f32 1.0, %v8774_v9 }
 0x404   : > { %14638 = vst [vmem:[#allocation130_spill] sm:$0xff] %v8988_v39  ;;  %v9002_v7 = vadd.f32 1.0, %v14646_v4  ;;  %v9007_v39 = vadd.f32 1.0, %v14648_v14  ;;  %v14656_v4 = vld [vmem:[#allocation140_spill] sm:$0xff]  ;;  %v9026_v14 = vpop.eup %5848  ;;  %v14670_v36 = vld [vmem:[#allocation147_spill] sm:$0xff]  ;;  %v14706_v6 = vld [vmem:[#allocation165_spill] sm:$0xff]  ;;  %5880 = vpow2.f32 %v8930_v63 }
 0x405   : > { %14640 = vst [vmem:[#allocation131_spill] sm:$0xff] %v8991_v12  ;;  %v9010_v12 = vadd.f32 1.0, %v14650_v26  ;;  %v14660_v26 = vld [vmem:[#allocation142_spill] sm:$0xff]  ;;  %v14694_v54 = vld [vmem:[#allocation159_spill] sm:$0xff]  ;;  %v14711_v5 = vld [vmem:[#allocation168_spill] sm:$0xff]  ;;  %v9167_v63 = vadd.f32 1.0, %v8771_v35 }
 0x406   : > { %14641 = vst [vmem:[#allocation132_spill] sm:$0xff] %v8993_v16  ;;  %v14652_v16 = vld [vmem:[#allocation138_spill] sm:$0xff]  ;;  %v14715_v51 = vld [vmem:[#allocation171_spill] sm:$0xff]  ;;  %v9188_v35 = vadd.f32 1.0, %v8786_v28  ;;  %v9209_v28 = vadd.f32 1.0, %v8801_v30 }
 0x407   : > { %14643 = vst [vmem:[#allocation133_spill] sm:$0xff] %v8996_v13  ;;  %v9013_v18 = vadd.f32 1.0, %v14652_v16  ;;  %v14658_v13 = vld [vmem:[#allocation141_spill] sm:$0xff]  ;;  %v14662_v16 = vld [vmem:[#allocation143_spill] sm:$0xff] }
 0x408   : > { %14645 = vst [vmem:[#allocation134_spill] sm:$0xff] %v8999_v33  ;;  %v9018_v33 = vadd.f32 1.0, %v14654_v46  ;;  %v9024_v50 = vadd.f32 1.0, %v14658_v13  ;;  %v9037_v46 = vpop.eup %5850  ;;  %v14668_v13 = vld [vmem:[#allocation146_spill] sm:$0xff]  ;;  %5882 = vpow2.f32 %v8933_v45  ;;  %v9179_v45 = vadd.f32 1.0, %v8780_v31 }
 0x409   : > { %14647 = vst [vmem:[#allocation135_spill] sm:$0xff] %v9002_v7  ;;  %v9021_v7 = vadd.f32 1.0, %v14656_v4  ;;  %v14666_v4 = vld [vmem:[#allocation145_spill] sm:$0xff]  ;;  %v9200_v31 = vadd.f32 1.0, %v8795_v42  ;;  %v9224_v42 = vadd.f32 1.0, %v8813_v15  ;;  %v9245_v15 = vadd.f32 1.0, %v8828_v61 }
 0x40a   : > { %14649 = vst [vmem:[#allocation136_spill] sm:$0xff] %v9007_v39  ;;  %v14664_v39 = vld [vmem:[#allocation144_spill] sm:$0xff] }
 0x40b   : > { %14651 = vst [vmem:[#allocation137_spill] sm:$0xff] %v9010_v12  ;;  %v9029_v12 = vadd.f32 1.0, %v14660_v26  ;;  %v9035_v3 = vadd.f32 1.0, %v14664_v39  ;;  %v9049_v26 = vpop.eup %5852  ;;  %5884 = vpow2.f32 %v8936_v55  ;;  %v9191_v55 = vadd.f32 1.0, %v8789_v20 }
 0x40c   : > { %14653 = vst [vmem:[#allocation138_spill] sm:$0xff] %v9013_v18  ;;  %v9032_v18 = vadd.f32 1.0, %v14662_v16  ;;  %v14672_v16 = vld [vmem:[#allocation148_spill] sm:$0xff]  ;;  %v9212_v20 = vadd.f32 1.0, %v8804_v27  ;;  %v9233_v27 = vadd.f32 1.0, %v8819_v25 }
 0x40d   : > { %14655 = vst [vmem:[#allocation139_spill] sm:$0xff] %v9018_v33  ;;  %v9047_v33 = vadd.f32 1.0, %v14670_v36  ;;  %v9053_v39 = vadd.f32 1.0, %v14672_v16 }
 0x40e   : > { %14657 = vst [vmem:[#allocation140_spill] sm:$0xff] %v9021_v7  ;;  %v9041_v7 = vadd.f32 1.0, %v14666_v4  ;;  %v9061_v4 = vpop.eup %5854  ;;  %5886 = vpow2.f32 %v8941_v52  ;;  %v9203_v52 = vadd.f32 1.0, %v8798_v22  ;;  %v9221_v22 = vadd.f32 1.0, %v8810_v1 }
 0x40f   : > { %14659 = vst [vmem:[#allocation141_spill] sm:$0xff] %v9024_v50  ;;  %v9044_v50 = vadd.f32 1.0, %v14668_v13  ;;  %v14678_v13 = vld [vmem:[#allocation151_spill] sm:$0xff]  ;;  %v9073_v16 = vpop.eup %5856  ;;  %5888 = vpow2.f32 %v8944_v41  ;;  %v9215_v41 = vadd.f32 1.0, %v8807_v62  ;;  %v9236_v62 = vadd.f32 1.0, %v8822_v32 }
 0x410   : > { %14661 = vst [vmem:[#allocation142_spill] sm:$0xff] %v9029_v12  ;;  %v9059_v12 = vadd.f32 1.0, %v14676_v43  ;;  %v9065_v36 = vadd.f32 1.0, %v14678_v13  ;;  %v9085_v13 = vpop.eup %5858  ;;  %5890 = vpow2.f32 %v8947_v29  ;;  %v9227_v29 = vadd.f32 1.0, %v8816_v48 }
 0x411   : > { %14663 = vst [vmem:[#allocation143_spill] sm:$0xff] %v9032_v18  ;;  %v9248_v48 = vadd.f32 1.0, %v8831_v60  ;;  %v9257_v32 = vadd.f32 1.0, %v8837_v57  ;;  %v14734_v60 = vld [vmem:[#allocation197_spill] sm:$0xff] }
 0x412   : > { %14665 = vst [vmem:[#allocation144_spill] sm:$0xff] %v9035_v3  ;;  %v14674_v3 = vld [vmem:[#allocation149_spill] sm:$0xff] }
 0x413   : > { %14667 = vst [vmem:[#allocation145_spill] sm:$0xff] %v9041_v7  ;;  %v9056_v18 = vadd.f32 1.0, %v14674_v3  ;;  %v9071_v7 = vadd.f32 1.0, %v14682_v53  ;;  %v14684_v3 = vld [vmem:[#allocation154_spill] sm:$0xff] }
 0x414   : > { %14669 = vst [vmem:[#allocation146_spill] sm:$0xff] %v9044_v50  ;;  %v9077_v43 = vadd.f32 1.0, %v14684_v3  ;;  %v9097_v3 = vpop.eup %5860  ;;  %5892 = vpow2.f32 %v8952_v47  ;;  %v9239_v47 = vadd.f32 1.0, %v8825_v44  ;;  %v9260_v44 = vadd.f32 1.0, %v8840_v24  ;;  %v14741_v24 = vld [vmem:[#allocation198_spill] sm:$0xff] }
 0x415   : > { %14671 = vst [vmem:[#allocation147_spill] sm:$0xff] %v9047_v33  ;;  %v14680_v33 = vld [vmem:[#allocation152_spill] sm:$0xff] }
 0x416   : > { %14673 = vst [vmem:[#allocation148_spill] sm:$0xff] %v9053_v39  ;;  %v9068_v50 = vadd.f32 1.0, %v14680_v33  ;;  %v9083_v39 = vadd.f32 1.0, %v14688_v37  ;;  %v14690_v33 = vld [vmem:[#allocation157_spill] sm:$0xff] }
 0x417   : > { %14675 = vst [vmem:[#allocation149_spill] sm:$0xff] %v9056_v18  ;;  %v9089_v53 = vadd.f32 1.0, %v14690_v33  ;;  %v9109_v33 = vpop.eup %5862  ;;  %5894 = vpow2.f32 %v8955_v8  ;;  %v9251_v8 = vadd.f32 1.0, %v8834_v49 }
 0x418   : > { %14677 = vst [vmem:[#allocation150_spill] sm:$0xff] %v9059_v12  ;;  %v14686_v12 = vld [vmem:[#allocation155_spill] sm:$0xff] }
 0x419   : > { %14679 = vst [vmem:[#allocation151_spill] sm:$0xff] %v9065_v36  ;;  %v9080_v18 = vadd.f32 1.0, %v14686_v12  ;;  %v9095_v36 = vadd.f32 1.0, %v14694_v54  ;;  %v14696_v12 = vld [vmem:[#allocation160_spill] sm:$0xff] }
 0x41a   : > { %14681 = vst [vmem:[#allocation152_spill] sm:$0xff] %v9068_v50  ;;  %v9101_v37 = vadd.f32 1.0, %v14696_v12  ;;  %v9121_v12 = vpop.eup %5864  ;;  %5896 = vpow2.f32 %v8958_v58  ;;  %v14732_v58 = vld [vmem:[#allocation176_spill] sm:$0xff] }
 0x41b   : > { %14683 = vst [vmem:[#allocation153_spill] sm:$0xff] %v9071_v7  ;;  %v14692_v7 = vld [vmem:[#allocation158_spill] sm:$0xff] }
 0x41c   : > { %14685 = vst [vmem:[#allocation154_spill] sm:$0xff] %v9077_v43  ;;  %v9092_v50 = vadd.f32 1.0, %v14692_v7  ;;  %v9107_v43 = vadd.f32 1.0, %v14700_v10  ;;  %v14702_v7 = vld [vmem:[#allocation163_spill] sm:$0xff] }
 0x41d   : > { %14687 = vst [vmem:[#allocation155_spill] sm:$0xff] %v9080_v18  ;;  %v9113_v54 = vadd.f32 1.0, %v14702_v7  ;;  %v9133_v7 = vpop.eup %5866  ;;  %5898 = vpow2.f32 %v8963_v34  ;;  %v14739_v34 = vld [vmem:[#allocation179_spill] sm:$0xff] }
 0x41e   : > { %14689 = vst [vmem:[#allocation156_spill] sm:$0xff] %v9083_v39  ;;  %v14698_v39 = vld [vmem:[#allocation161_spill] sm:$0xff] }
 0x41f   : > { %14691 = vst [vmem:[#allocation157_spill] sm:$0xff] %v9089_v53  ;;  %v9104_v18 = vadd.f32 1.0, %v14698_v39  ;;  %v9119_v53 = vadd.f32 1.0, %v14706_v6  ;;  %v14708_v39 = vld [vmem:[#allocation166_spill] sm:$0xff] }
 0x420   : > { %14693 = vst [vmem:[#allocation158_spill] sm:$0xff] %v9092_v50  ;;  %v9125_v10 = vadd.f32 1.0, %v14708_v39  ;;  %v9145_v39 = vpop.eup %5868  ;;  %5900 = vpow2.f32 %v14734_v60  ;;  %v14746_v60 = vld [vmem:[#allocation182_spill] sm:$0xff] }
 0x421   : > { %14695 = vst [vmem:[#allocation159_spill] sm:$0xff] %v9095_v36  ;;  %v14704_v36 = vld [vmem:[#allocation164_spill] sm:$0xff] }
 0x422   : > { %14697 = vst [vmem:[#allocation160_spill] sm:$0xff] %v9101_v37  ;;  %v9116_v50 = vadd.f32 1.0, %v14704_v36  ;;  %v9131_v37 = vadd.f32 1.0, %v14711_v5  ;;  %v14713_v36 = vld [vmem:[#allocation169_spill] sm:$0xff] }
 0x423   : > { %14699 = vst [vmem:[#allocation161_spill] sm:$0xff] %v9104_v18  ;;  %v9137_v6 = vadd.f32 1.0, %v14713_v36  ;;  %v9157_v36 = vpop.eup %5870  ;;  %5902 = vpow2.f32 %v14741_v24 }
 0x424   : > { %14701 = vst [vmem:[#allocation162_spill] sm:$0xff] %v9107_v43  ;;  %v14709_v43 = vld [vmem:[#allocation167_spill] sm:$0xff] }
 0x425   : > { %14703 = vst [vmem:[#allocation163_spill] sm:$0xff] %v9113_v54  ;;  %v9128_v18 = vadd.f32 1.0, %v14709_v43  ;;  %v9143_v54 = vadd.f32 1.0, %v14715_v51  ;;  %v14716_v43 = vld [vmem:[#allocation172_spill] sm:$0xff]  ;;  %v9164_v51 = vadd.f32 1.0, %v8765_v59  ;;  %v9185_v59 = vadd.f32 1.0, %v8783_v38 }
 0x426   : > { %14705 = vst [vmem:[#allocation164_spill] sm:$0xff] %v9116_v50  ;;  %v9149_v5 = vadd.f32 1.0, %v14716_v43  ;;  %v9169_v43 = vpop.eup %5872  ;;  %5904 = vpow2.f32 %v8974_v0  ;;  %v14760_v0 = vld [vmem:[#allocation33_spill] sm:$0xff] }
 0x427   : > { %14707 = vst [vmem:[#allocation165_spill] sm:$0xff] %v9119_v53  ;;  %v14714_v53 = vld [vmem:[#allocation170_spill] sm:$0xff]  ;;  %vm2740_vm8 = vweird.f32 %v14760_v0 }
 0x428   : > { %14710 = vst [vmem:[#allocation166_spill] sm:$0xff] %v9128_v18  ;;  %v9140_v50 = vadd.f32 1.0, %v14714_v53  ;;  %v9161_v53 = vadd.f32 1.0, %v8759_v40  ;;  %v9181_v40 = vpop.eup %5874  ;;  %5906 = vrcp.f32 %v14760_v0 }
 0x429   : > { %14712 = vst [vmem:[#allocation167_spill] sm:$0xff] %v9131_v37  ;;  %v14717_v37 = vld [vmem:[#allocation173_spill] sm:$0xff]  ;;  %v9193_v9 = vpop.eup %5876 }
 0x42a   : > { %v9152_v18 = vadd.f32 1.0, %v14717_v37  ;;  %v9176_v37 = vadd.f32 1.0, %v8777_v17  ;;  %v9197_v17 = vadd.f32 1.0, %v8792_v21  ;;  %v9205_v38 = vpop.eup %5878  ;;  %14718 = vst [vmem:[#allocation168_spill] sm:$0xff] %v9209_v28  ;;  %v9346_v28 = vadd.f32 1.0, %v9004_v56 }
 0x42b   : > { %14719 = vst [vmem:[#allocation169_spill] sm:$0xff] %v9212_v20  ;;  %v9217_v21 = vpop.eup %5880  ;;  %v9364_v56 = vadd.f32 1.0, %v9061_v4  ;;  %v9384_v4 = vadd.f32 1.0, %v9133_v7  ;;  %v9404_v7 = vadd.f32 1.0, %v9193_v9 }
 0x42c   : > { %14720 = vst [vmem:[#allocation170_spill] sm:$0xff] %v9215_v41  ;;  %v9229_v30 = vpop.eup %5882 }
 0x42d   : > { %14721 = vst [vmem:[#allocation171_spill] sm:$0xff] %v9221_v22  ;;  %v9241_v1 = vpop.eup %5884  ;;  %v14772_v22 = vld [vmem:[#allocation194_spill] sm:$0xff] }
 0x42e   : > { %14722 = vst [vmem:[#allocation172_spill] sm:$0xff] %v9224_v42  ;;  %v9253_v25 = vpop.eup %5886  ;;  %v9326_v41 = vadd.f32 1.0, %v14772_v22  ;;  %v14783_v22 = vld [vmem:[#allocation132_spill] sm:$0xff] }
 0x42f   : > { %14723 = vst [vmem:[#allocation173_spill] sm:$0xff] %v9227_v29  ;;  %v9265_v61 = vpop.eup %5888 }
 0x430   : > { %14724 = vst [vmem:[#allocation201_spill] sm:$0xff] %v9233_v27  ;;  %v9277_v57 = vpop.eup %5890  ;;  %v9287_v27 = vadd.f32 1.0, %v14746_v60  ;;  %v14758_v60 = vld [vmem:[#allocation188_spill] sm:$0xff]  ;;  %v9425_v9 = vadd.f32 1.0, %v9265_v61 }
 0x431   : > { %14725 = vst [vmem:[#allocation202_spill] sm:$0xff] %v9236_v62  ;;  %v9275_v62 = vadd.f32 1.0, %v14739_v34  ;;  %v14750_v34 = vld [vmem:[#allocation184_spill] sm:$0xff] }
 0x432   : > { %14726 = vst [vmem:[#allocation203_spill] sm:$0xff] %v9239_v47  ;;  %v9263_v47 = vadd.f32 1.0, %v14732_v58 }
 0x433   : > { %14727 = vst [vmem:[#allocation204_spill] sm:$0xff] %v9245_v15 }
 0x434   : > { %14728 = vst [vmem:[#allocation205_spill] sm:$0xff] %v9248_v48  ;;  %v14735_v48 = vld [vmem:[#allocation177_spill] sm:$0xff] }
 0x435   : > { %14729 = vst [vmem:[#allocation206_spill] sm:$0xff] %v9251_v8  ;;  %v9269_v49 = vadd.f32 1.0, %v14735_v48  ;;  %v14737_v8 = vld [vmem:[#allocation178_spill] sm:$0xff]  ;;  %v5893_v48 = vpop.eup %5892 }
 0x436   : > { %14730 = vst [vmem:[#allocation207_spill] sm:$0xff] %v9257_v32  ;;  %v9272_v15 = vadd.f32 1.0, %v14737_v8  ;;  %v14748_v8 = vld [vmem:[#allocation183_spill] sm:$0xff] }
 0x437   : > { %14731 = vst [vmem:[#allocation208_spill] sm:$0xff] %v9260_v44  ;;  %v14742_v44 = vld [vmem:[#allocation180_spill] sm:$0xff] }
 0x438   : > { %14733 = vst [vmem:[#allocation176_spill] sm:$0xff] %v9263_v47  ;;  %v9281_v58 = vadd.f32 1.0, %v14742_v44  ;;  %v14744_v47 = vld [vmem:[#allocation181_spill] sm:$0xff]  ;;  %v5895_v44 = vpop.eup %5894 }
 0x439   : > { %14736 = vst [vmem:[#allocation197_spill] sm:$0xff] %v9269_v49  ;;  %v9284_v32 = vadd.f32 1.0, %v14744_v47  ;;  %v14752_v49 = vld [vmem:[#allocation185_spill] sm:$0xff]  ;;  %v14756_v47 = vld [vmem:[#allocation187_spill] sm:$0xff] }
 0x43a   : > { %14738 = vst [vmem:[#allocation177_spill] sm:$0xff] %v9272_v15  ;;  %v9291_v15 = vadd.f32 1.0, %v14748_v8  ;;  %v9297_v24 = vadd.f32 1.0, %v14752_v49  ;;  %v5897_v8 = vpop.eup %5896  ;;  %v14765_v49 = vld [vmem:[#allocation191_spill] sm:$0xff] }
 0x43b   : > { %14740 = vst [vmem:[#allocation178_spill] sm:$0xff] %v9275_v62  ;;  %v9294_v62 = vadd.f32 1.0, %v14750_v34  ;;  %v14763_v34 = vld [vmem:[#allocation190_spill] sm:$0xff] }
 0x43c   : > { %14743 = vst [vmem:[#allocation179_spill] sm:$0xff] %v9281_v58  ;;  %v14754_v58 = vld [vmem:[#allocation186_spill] sm:$0xff] }
 0x43d   : > { %14745 = vst [vmem:[#allocation198_spill] sm:$0xff] %v9284_v32  ;;  %v9300_v29 = vadd.f32 1.0, %v14754_v58  ;;  %v9303_v32 = vadd.f32 1.0, %v14756_v47  ;;  %v14767_v58 = vld [vmem:[#allocation35_spill] sm:$0xff]  ;;  %v14768_v47 = vld [vmem:[#allocation192_spill] sm:$0xff] }
 0x43e   : > { %14747 = vst [vmem:[#allocation180_spill] sm:$0xff] %v9287_v27  ;;  %v9306_v27 = vadd.f32 1.0, %v14758_v60  ;;  %5908 = vrcp.f32 %v14767_v58  ;;  %v14770_v60 = vld [vmem:[#allocation193_spill] sm:$0xff]  ;;  %vm2755_vm9 = vweird.f32 %v14767_v58 }
 0x43f   : > { %14749 = vst [vmem:[#allocation181_spill] sm:$0xff] %v9291_v15  ;;  %v14761_v15 = vld [vmem:[#allocation189_spill] sm:$0xff]  ;;  %5910 = vrcp.f32 %v8985_v23 }
 0x440   : > { %14751 = vst [vmem:[#allocation182_spill] sm:$0xff] %v9294_v62  ;;  %v9310_v42 = vadd.f32 1.0, %v14761_v15  ;;  %v9313_v62 = vadd.f32 1.0, %v14763_v34  ;;  %v14774_v34 = vld [vmem:[#allocation195_spill] sm:$0xff] }
 0x441   : > { %14753 = vst [vmem:[#allocation183_spill] sm:$0xff] %v9297_v24  ;;  %v9316_v24 = vadd.f32 1.0, %v14765_v49  ;;  %v14776_v49 = vld [vmem:[#allocation196_spill] sm:$0xff] }
 0x442   : > { %14755 = vst [vmem:[#allocation184_spill] sm:$0xff] %v9300_v29  ;;  %v5899_v29 = vpop.eup %5898 }
 0x443   : > { %14757 = vst [vmem:[#allocation185_spill] sm:$0xff] %v9303_v32  ;;  %v9320_v32 = vadd.f32 1.0, %v14768_v47  ;;  %v5901_v15 = vpop.eup %5900  ;;  %v14780_v47 = vld [vmem:[#allocation130_spill] sm:$0xff] }
 0x444   : > { %14759 = vst [vmem:[#allocation186_spill] sm:$0xff] %v9306_v27  ;;  %v9323_v27 = vadd.f32 1.0, %v14770_v60  ;;  %5912 = vrcp.f32 %v14780_v47  ;;  %v14781_v60 = vld [vmem:[#allocation200_spill] sm:$0xff]  ;;  %vm2785_vm11 = vweird.f32 %v14780_v47 }
 0x445   : > { %14762 = vst [vmem:[#allocation187_spill] sm:$0xff] %v9310_v42  ;;  %v14778_v42 = vld [vmem:[#allocation199_spill] sm:$0xff] }
 0x446   : > { %14764 = vst [vmem:[#allocation188_spill] sm:$0xff] %v9313_v62  ;;  %v9330_v62 = vadd.f32 1.0, %v14774_v34  ;;  %v9336_v20 = vadd.f32 1.0, %v14778_v42  ;;  %v14786_v34 = vld [vmem:[#allocation131_spill] sm:$0xff]  ;;  %v9353_v42 = vadd.f32 1.0, %v9026_v14  ;;  %v9373_v14 = vadd.f32 1.0, %v9097_v3 }
 0x447   : > { %14766 = vst [vmem:[#allocation33_spill] sm:$0xff] %v9316_v24  ;;  %v9333_v24 = vadd.f32 1.0, %v14776_v49  ;;  %5914 = vrcp.f32 %v14786_v34  ;;  %v9350_v49 = vadd.f32 1.0, %v9015_v2  ;;  %v9370_v2 = vadd.f32 1.0, %v9085_v13 }
 0x448   : > { %14769 = vst [vmem:[#allocation189_spill] sm:$0xff] %v9320_v32  ;;  %v5903_v32 = vpop.eup %5902  ;;  %v9392_v13 = vadd.f32 1.0, %v9157_v36  ;;  %v9395_v3 = vadd.f32 1.0, %v9169_v43  ;;  %v14806_v36 = vld [vmem:[#allocation134_spill] sm:$0xff]  ;;  %vm2800_vm12 = vweird.f32 %v14786_v34 }
 0x449   : > { %14771 = vst [vmem:[#allocation190_spill] sm:$0xff] %v9323_v27  ;;  %v9340_v27 = vadd.f32 1.0, %v14781_v60  ;;  %v9359_v60 = vadd.f32 1.0, %v9049_v26  ;;  %v9381_v26 = vadd.f32 1.0, %v9121_v12 }
 0x44a   : > { %14773 = vst [vmem:[#allocation191_spill] sm:$0xff] %v9326_v41  ;;  %v9343_v41 = vadd.f32 1.0, %v14783_v22 }
 0x44b   : > { %14775 = vst [vmem:[#allocation35_spill] sm:$0xff] %v9330_v62  ;;  %v5905_v62 = vpop.eup %5904 }
 0x44c   : > { %14777 = vst [vmem:[#allocation192_spill] sm:$0xff] %v9333_v24  ;;  %v9361_v22 = vpop.eup %5906 }
 0x44d   : > { %14779 = vst [vmem:[#allocation193_spill] sm:$0xff] %v9336_v20  ;;  %v9356_v20 = vadd.f32 1.0, %v9037_v46  ;;  %v9378_v46 = vadd.f32 1.0, %v9109_v33  ;;  %v9398_v33 = vadd.f32 1.0, %v9181_v40  ;;  %v9416_v40 = vadd.f32 1.0, %v9229_v30 }
 0x44e   : > { %14782 = vst [vmem:[#allocation194_spill] sm:$0xff] %v9340_v27  ;;  %v2746_v30 = vand.u32 2147483648, %v14760_v0  ;;  %vm2741_vm13 = vweird.f32 %v9361_v22  ;;  %v14844_v27 = vld [vmem:[#allocation140_spill] sm:$0xff] }
 0x44f   : > { %14784 = vst [vmem:[#allocation195_spill] sm:$0xff] %v9343_v41  ;;  %vm9521_vm6 = vmor %vm2740_vm8, %vm2741_vm13  ;;  %v14839_v41 = vld [vmem:[#allocation139_spill] sm:$0xff] }
 0x450   : > { %14785 = vst [vmem:[#allocation196_spill] sm:$0xff] %v9346_v28  ;;  %v9367_v28 = vadd.f32 1.0, %v9073_v16  ;;  %v9387_v16 = vadd.f32 1.0, %v9145_v39  ;;  %v9407_v39 = vadd.f32 1.0, %v9205_v38  ;;  %v9428_v38 = vadd.f32 1.0, %v9277_v57 }
 0x451   : > { %14787 = vst [vmem:[#allocation199_spill] sm:$0xff] %v9350_v49  ;;  %v9443_v57 = vadd.f32 1.0, %v5897_v8  ;;  %v14836_v49 = vld [vmem:[#allocation138_spill] sm:$0xff] }
 0x452   : > { %14788 = vst [vmem:[#allocation130_spill] sm:$0xff] %v9353_v42  ;;  %v9375_v42 = vpop.eup %5908 }
 0x453   : > { %14789 = vst [vmem:[#allocation200_spill] sm:$0xff] %v9356_v20  ;;  %vm2756_vm15 = vweird.f32 %v9375_v42 }
 0x454   : > { %14790 = vst [vmem:[#allocation132_spill] sm:$0xff] %v9359_v60  ;;  %v14833_v60 = vld [vmem:[#allocation137_spill] sm:$0xff]  ;;  %vm9533_vm7 = vmor %vm2755_vm9, %vm2756_vm15 }
 0x455   : > { %14791 = vst [vmem:[#allocation131_spill] sm:$0xff] %v9364_v56 }
 0x456   : > { %14792 = vst [vmem:[#allocation209_spill] sm:$0xff] %v9367_v28  ;;  %v9389_v28 = vpop.eup %5910 }
 0x457   : > { %14793 = vst [vmem:[#allocation210_spill] sm:$0xff] %v9370_v2  ;;  %v9401_v12 = vpop.eup %5912  ;;  %vm2771_vm1 = vweird.f32 %v9389_v28 }
 0x458   : > { %14794 = vst [vmem:[#allocation211_spill] sm:$0xff] %v9373_v14  ;;  %v9413_v43 = vpop.eup %5914  ;;  %v2781_v61 = vmul.f32 %v9401_v12, %v14780_v47  ;;  %vm2786_vm3 = vweird.f32 %v9401_v12  ;;  %vm9547_vm13 = vmor %vm2770_vm10, %vm2771_vm1 }
 0x459   : > { %14795 = vst [vmem:[#allocation212_spill] sm:$0xff] %v9378_v46  ;;  %v14802_v46 = vld [vmem:[#allocation133_spill] sm:$0xff]  ;;  %vm2801_vm8 = vweird.f32 %v9413_v43  ;;  %vm9561_vm15 = vmor %vm2785_vm11, %vm2786_vm3 }
 0x45a   : > { %14796 = vst [vmem:[#allocation213_spill] sm:$0xff] %v9381_v26  ;;  %5916 = vrcp.f32 %v14802_v46  ;;  %v14819_v26 = vld [vmem:[#allocation135_spill] sm:$0xff]  ;;  %vm2815_vm9 = vweird.f32 %v14802_v46  ;;  %vm9586_vm11 = vmor %vm2800_vm12, %vm2801_vm8  ;;  %vm2830_vm12 = vweird.f32 %v14806_v36 }
 0x45b   : > { %14797 = vst [vmem:[#allocation214_spill] sm:$0xff] %v9384_v4  ;;  %5918 = vrcp.f32 %v14806_v36 }
 0x45c   : > { %14798 = vst [vmem:[#allocation215_spill] sm:$0xff] %v9387_v16  ;;  %v9410_v16 = vadd.f32 1.0, %v9217_v21  ;;  %v9430_v21 = vadd.f32 1.0, %v5893_v48  ;;  %v9445_v48 = vadd.f32 1.0, %v5899_v29  ;;  %v2744_v29 = vand.u32 2147483647, %v14760_v0 }
 0x45d   : > { %14799 = vst [vmem:[#allocation216_spill] sm:$0xff] %v9392_v13  ;;  %5920 = vrcp.f32 %v14819_v26 }
 0x45e   : > { %14800 = vst [vmem:[#allocation217_spill] sm:$0xff] %v9395_v3  ;;  %v9422_v3 = vadd.f32 1.0, %v9253_v25  ;;  %v2766_v25 = vmul.f32 %v9389_v28, %v8985_v23  ;;  %vm9489_vm14 = vcmp.eq.f32.partialorder %v2744_v29, 8.507059e+37 }
 0x45f   : > { %14801 = vst [vmem:[#allocation218_spill] sm:$0xff] %v9398_v33  ;;  %v9419_v33 = vadd.f32 1.0, %v9241_v1  ;;  %v2751_v1 = vmul.f32 %v9375_v42, %v14767_v58 }
 0x460   : > { %14803 = vst [vmem:[#allocation133_spill] sm:$0xff] %v9404_v7 }
 0x461   : > { %14804 = vst [vmem:[#allocation219_spill] sm:$0xff] %v9407_v39  ;;  %v2752_v7 = vsub.f32 1.0, %v2751_v1  ;;  %v2789_v1 = vand.u32 2147483647, %v14780_v47 }
 0x462   : > { %14805 = vst [vmem:[#allocation220_spill] sm:$0xff] %v9410_v16  ;;  %v2736_v16 = vmul.f32 %v9361_v22, %v14760_v0 }
 0x463   : > { %14807 = vst [vmem:[#allocation134_spill] sm:$0xff] %v9416_v40  ;;  %v9435_v40 = vadd.f32 1.0, %v5895_v44  ;;  %v9450_v44 = vpop.eup %5916  ;;  %v2753_v13 = vmul.f32 %v9375_v42, %v2752_v7  ;;  %vm9507_vm4 = vcmp.eq.f32.partialorder %v2789_v1, 8.507059e+37 }
 0x464   : > { %14808 = vst [vmem:[#allocation221_spill] sm:$0xff] %v9419_v33  ;;  %v2776_v33 = vand.u32 2147483648, %v8985_v23  ;;  %v9459_v39 = vpop.eup %5918  ;;  %v2737_v8 = vsub.f32 1.0, %v2736_v16  ;;  %v2791_v16 = vand.u32 2147483648, %v14780_v47  ;;  %vm2816_vm10 = vweird.f32 %v9450_v44 }
 0x465   : > { %14809 = vst [vmem:[#allocation222_spill] sm:$0xff] %v9422_v3  ;;  %v9456_v3 = vadd.f32 1.0, %v5905_v62  ;;  %v2774_v62 = vand.u32 2147483647, %v8985_v23  ;;  %v2754_v1 = vadd.f32 %v9375_v42, %v2753_v13  ;;  %vm2831_vm3 = vweird.f32 %v9459_v39 }
 0x466   : > { %14810 = vst [vmem:[#allocation223_spill] sm:$0xff] %v9425_v9  ;;  %v9454_v9 = vadd.f32 1.0, %v5903_v32  ;;  %v2767_v32 = vsub.f32 1.0, %v2766_v25  ;;  %v2826_v25 = vmul.f32 %v9459_v39, %v14806_v36 }
 0x467   : > { %14811 = vst [vmem:[#allocation224_spill] sm:$0xff] %v9428_v38  ;;  %v2796_v38 = vmul.f32 %v9413_v43, %v14786_v34  ;;  %vm9500_vm2 = vcmp.eq.f32.partialorder %v2774_v62, 8.507059e+37  ;;  %v2819_v62 = vand.u32 2147483647, %v14802_v46 }
 0x468   : > { %14812 = vst [vmem:[#allocation225_spill] sm:$0xff] %v9430_v21  ;;  %v2761_v21 = vand.u32 2147483648, %v14767_v58  ;;  %v2827_v29 = vsub.f32 1.0, %v2826_v25 }
 0x469   : > { %14813 = vst [vmem:[#allocation226_spill] sm:$0xff] %v9435_v40  ;;  %v9452_v40 = vadd.f32 1.0, %v5901_v15  ;;  %v2782_v15 = vsub.f32 1.0, %v2781_v61  ;;  %v2804_v61 = vand.u32 2147483647, %v14786_v34  ;;  %vm9566_vm1 = vcmp.eq.f32.partialorder %v2819_v62, 8.507059e+37 }
 0x46a   : > { %14814 = vst [vmem:[#allocation227_spill] sm:$0xff] %v9443_v57  ;;  %v2759_v57 = vand.u32 2147483647, %v14767_v58 }
 0x46b   : > { %14815 = vst [vmem:[#allocation228_spill] sm:$0xff] %v9445_v48  ;;  %v9463_v48 = vor.u32 1.1754944e-38, %v2746_v30  ;;  %v2811_v30 = vmul.f32 %v9450_v44, %v14802_v46  ;;  %v2783_v4 = vmul.f32 %v9401_v12, %v2782_v15  ;;  %v14826_v15 = vld [vmem:[#allocation136_spill] sm:$0xff]  ;;  %vm9511_vm5 = vcmp.eq.f32.partialorder %v2804_v61, 8.507059e+37 }
 0x46c   : > { %14816 = vst [vmem:[#allocation229_spill] sm:$0xff] %v9452_v40  ;;  %v9474_v40 = vor.u32 1.1754944e-38, %v2776_v33  ;;  %v2768_v33 = vmul.f32 %v9389_v28, %v2767_v32  ;;  %vm9495_vm0 = vcmp.eq.f32.partialorder %v2759_v57, 8.507059e+37  ;;  %5922 = vrcp.f32 %v14826_v15 }
 0x46d   : > { %14817 = vst [vmem:[#allocation230_spill] sm:$0xff] %v9454_v9  ;;  %v2797_v9 = vsub.f32 1.0, %v2796_v38  ;;  %v2806_v38 = vand.u32 2147483648, %v14786_v34  ;;  %v2812_v56 = vsub.f32 1.0, %v2811_v30  ;;  %v2821_v30 = vand.u32 2147483648, %v14802_v46 }
 0x46e   : > { %14818 = vst [vmem:[#allocation231_spill] sm:$0xff] %v9456_v3  ;;  %v9468_v3 = vor.u32 1.1754944e-38, %v2761_v21  ;;  %v2738_v21 = vmul.f32 %v9361_v22, %v2737_v8  ;;  %v2792_v8 = vor.u32 1.1754944e-38, %v2791_v16  ;;  %v2784_v61 = vadd.f32 %v9401_v12, %v2783_v4 }
 0x46f   : > { %v2798_v2 = vmul.f32 %v9413_v43, %v2797_v9  ;;  %5924 = vrcp.f32 %v14833_v60  ;;  %v2813_v13 = vmul.f32 %v9450_v44, %v2812_v56  ;;  %v2807_v4 = vor.u32 1.1754944e-38, %v2806_v38 }
 0x470   : > { %v2739_v16 = vadd.f32 %v9361_v22, %v2738_v21  ;;  %v2769_v21 = vadd.f32 %v9389_v28, %v2768_v33  ;;  %5926 = vrcp.f32 %v14836_v49  ;;  %v9541_v33 = vpop.eup %5920  ;;  %v2851_v32 = vand.u32 2147483648, %v14819_v26 }
 0x471   : > { %v2799_v0 = vadd.f32 %v9413_v43, %v2798_v2  ;;  %v2828_v2 = vmul.f32 %v9459_v39, %v2827_v29  ;;  %5928 = vrcp.f32 %v14839_v41  ;;  %v2822_v29 = vor.u32 1.1754944e-38, %v2821_v30 }
 0x472   : > { %v2743_v56 = vsel %vm9521_vm6, %v9361_v22, %v2739_v16  ;;  %5930 = vrcp.f32 %v14844_v27  ;;  %v9571_v24 = vpop.eup %5922  ;;  %v2758_v22 = vsel %vm9533_vm7, %v9375_v42, %v2754_v1  ;;  %v2773_v47 = vsel %vm9547_vm13, %v9389_v28, %v2769_v21 }
 0x473   : > { %v2788_v16 = vsel %vm9561_vm15, %v9401_v12, %v2784_v61  ;;  %v2834_v30 = vand.u32 2147483647, %v14806_v36  ;;  %v2803_v20 = vsel %vm9586_vm11, %v9413_v43, %v2799_v0  ;;  %v2814_v28 = vadd.f32 %v9450_v44, %v2813_v13 }
 0x474   : > { %v2836_v42 = vand.u32 2147483648, %v14806_v36  ;;  %v2841_v12 = vmul.f32 %v9541_v33, %v14819_v26  ;;  %v9603_v34 = vsel %vm9489_vm14, %v9463_v48, %v2743_v56  ;;  %v2829_v1 = vadd.f32 %v9459_v39, %v2828_v2  ;;  %v14850_v48 = vld [vmem:[#allocation141_spill] sm:$0xff]  ;;  %vm9637_vm14 = vmor %vm2815_vm9, %vm2816_vm10 }
 0x475   : > { %v9598_v25 = vpop.eup %5924  ;;  %14847 = vst [vmem:[#allocation135_spill] sm:$0xff] %v9603_v34  ;;  %v9613_v21 = vsel %vm9495_vm0, %v9468_v3, %v2758_v22  ;;  %v9618_v61 = vsel %vm9500_vm2, %v9474_v40, %v2773_v47  ;;  %v2856_v14 = vmul.f32 %v9571_v24, %v14826_v15  ;;  %5932 = vrcp.f32 %v14850_v48  ;;  %vm9653_vm2 = vmor %vm2830_vm12, %vm2831_vm3 }
 0x476   : > { %v9608_v43 = vpop.eup %5926  ;;  %14848 = vst [vmem:[#allocation136_spill] sm:$0xff] %v9613_v21  ;;  %v9627_v13 = vsel %vm9507_vm4, %v2792_v8, %v2788_v16  ;;  %v9631_v3 = vsel %vm9511_vm5, %v2807_v4, %v2803_v20  ;;  %vm9641_vm0 = vcmp.eq.f32.partialorder %v2834_v30, 8.507059e+37  ;;  %v2818_v9 = vsel %vm9637_vm14, %v9450_v44, %v2814_v28  ;;  %v14859_v16 = vld [vmem:[#allocation142_spill] sm:$0xff] }
 0x477   : > { %14849 = vst [vmem:[#allocation137_spill] sm:$0xff] %v9618_v61  ;;  %v9623_v0 = vpop.eup %5928  ;;  %v2837_v57 = vor.u32 1.1754944e-38, %v2836_v42  ;;  %v2842_v58 = vsub.f32 1.0, %v2841_v12  ;;  %v2849_v4 = vand.u32 2147483647, %v14819_v26  ;;  %v2833_v2 = vsel %vm9653_vm2, %v9459_v39, %v2829_v1  ;;  %v14872_v61 = vld [vmem:[#allocation145_spill] sm:$0xff] }
 0x478   : > { %14851 = vst [vmem:[#allocation138_spill] sm:$0xff] %v9627_v13  ;;  %v9646_v8 = vpop.eup %5930  ;;  %v2866_v56 = vand.u32 2147483648, %v14826_v15  ;;  %v2871_v23 = vmul.f32 %v9598_v25, %v14833_v60  ;;  %v2886_v36 = vmul.f32 %v9608_v43, %v14836_v49  ;;  %vm2845_vm4 = vweird.f32 %v14819_v26 }
 0x479   : > { %14852 = vst [vmem:[#allocation139_spill] sm:$0xff] %v9631_v3  ;;  %v2857_v44 = vsub.f32 1.0, %v2856_v14  ;;  %v2881_v22 = vand.u32 2147483648, %v14833_v60  ;;  %v2901_v47 = vmul.f32 %v9623_v0, %v14839_v41  ;;  %5934 = vrcp.f32 %v14859_v16 }
 0x47a   : > { %v9673_v39 = vsel %vm9566_vm1, %v2822_v29, %v2818_v9  ;;  %v9675_v62 = vor.u32 1.1754944e-38, %v2851_v32  ;;  %v2864_v30 = vand.u32 2147483647, %v14826_v15  ;;  %v2916_v20 = vmul.f32 %v9646_v8, %v14844_v27 }
 0x47b   : > { %14860 = vst [vmem:[#allocation140_spill] sm:$0xff] %v9673_v39  ;;  %v9680_v28 = vpop.eup %5932  ;;  %v9684_v42 = vsel %vm9641_vm0, %v2837_v57, %v2833_v2  ;;  %v2843_v12 = vmul.f32 %v9541_v33, %v2842_v58  ;;  %vm2860_vm5 = vweird.f32 %v14826_v15  ;;  %v2879_v38 = vand.u32 2147483647, %v14833_v60 }
 0x47c   : > { %14861 = vst [vmem:[#allocation141_spill] sm:$0xff] %v9684_v42  ;;  %v2896_v29 = vand.u32 2147483648, %v14836_v49  ;;  %vm2846_vm6 = vweird.f32 %v9541_v33  ;;  %v9691_v1 = vor.u32 1.1754944e-38, %v2866_v56  ;;  %v2872_v14 = vsub.f32 1.0, %v2871_v23  ;;  %v14864_v23 = vld [vmem:[#allocation143_spill] sm:$0xff] }
 0x47d   : > { %v2887_v40 = vsub.f32 1.0, %v2886_v36  ;;  %v2858_v32 = vmul.f32 %v9571_v24, %v2857_v44  ;;  %vm2875_vm7 = vweird.f32 %v14833_v60  ;;  %v9695_v7 = vor.u32 1.1754944e-38, %v2881_v22  ;;  %vm9731_vm11 = vmor %vm2845_vm4, %vm2846_vm6 }
 0x47e   : > { %v2894_v9 = vand.u32 2147483647, %v14836_v49  ;;  %v2902_v46 = vsub.f32 1.0, %v2901_v47  ;;  %vm9698_vm8 = vcmp.eq.f32.partialorder %v2849_v4, 8.507059e+37  ;;  %vm2890_vm13 = vweird.f32 %v14836_v49 }
 0x47f   : > { %v2909_v58 = vand.u32 2147483647, %v14839_v41  ;;  %v2917_v2 = vsub.f32 1.0, %v2916_v20  ;;  %v2931_v56 = vmul.f32 %v9680_v28, %v14850_v48  ;;  %5936 = vrcp.f32 %v14864_v23  ;;  %v9707_v36 = vpop.eup %5934 }
 0x480   : > { %v2844_v44 = vadd.f32 %v9541_v33, %v2843_v12  ;;  %vm2861_vm9 = vweird.f32 %v9571_v24  ;;  %vm9711_vm15 = vcmp.eq.f32.partialorder %v2864_v30, 8.507059e+37  ;;  %v9715_v22 = vor.u32 1.1754944e-38, %v2896_v29  ;;  %v14867_v29 = vld [vmem:[#allocation144_spill] sm:$0xff] }
 0x481   : > { %vm2905_vm10 = vweird.f32 %v14839_v41  ;;  %v2911_v47 = vand.u32 2147483648, %v14839_v41  ;;  %v2873_v20 = vmul.f32 %v9598_v25, %v2872_v14  ;;  %v2888_v42 = vmul.f32 %v9608_v43, %v2887_v40  ;;  %vm9758_vm2 = vmor %vm2860_vm5, %vm2861_vm9 }
 0x482   : > { %v2924_v39 = vand.u32 2147483647, %v14844_v27  ;;  %v2926_v12 = vand.u32 2147483648, %v14844_v27  ;;  %v2859_v3 = vadd.f32 %v9571_v24, %v2858_v32  ;;  %vm2876_vm1 = vweird.f32 %v9598_v25 }
 0x483   : > { %v2903_v30 = vmul.f32 %v9623_v0, %v2902_v46  ;;  %5938 = vrcp.f32 %v14867_v29  ;;  %vm9735_vm12 = vcmp.eq.f32.partialorder %v2879_v38, 8.507059e+37  ;;  %v2918_v32 = vmul.f32 %v9646_v8, %v2917_v2  ;;  %vm9783_vm9 = vmor %vm2875_vm7, %vm2876_vm1 }
 0x484   : > { %v2932_v13 = vsub.f32 1.0, %v2931_v56  ;;  %v2946_v46 = vmul.f32 %v9707_v36, %v14859_v16  ;;  %5940 = vrcp.f32 %v14872_v61  ;;  %v2848_v26 = vsel %vm9731_vm11, %v9541_v33, %v2844_v44 }
 0x485   : > { %vm2891_vm3 = vweird.f32 %v9608_v43  ;;  %vm9747_vm14 = vcmp.eq.f32.partialorder %v2894_v9, 8.507059e+37  ;;  %v2912_v38 = vor.u32 1.1754944e-38, %v2911_v47  ;;  %vm2920_vm0 = vweird.f32 %v14844_v27  ;;  %v9752_v2 = vpop.eup %5936 }
 0x486   : > { %v2874_v33 = vadd.f32 %v9598_v25, %v2873_v20  ;;  %v2889_v9 = vadd.f32 %v9608_v43, %v2888_v42  ;;  %vm2906_vm4 = vweird.f32 %v9623_v0  ;;  %vm9765_vm6 = vcmp.eq.f32.partialorder %v2909_v58, 8.507059e+37  ;;  %vm9801_vm7 = vmor %vm2890_vm13, %vm2891_vm3 }
 0x487   : > { %vm9769_vm11 = vcmp.eq.f32.partialorder %v2924_v39, 8.507059e+37  ;;  %v2927_v14 = vor.u32 1.1754944e-38, %v2926_v12  ;;  %v2863_v15 = vsel %vm9758_vm2, %v9571_v24, %v2859_v3  ;;  %v2904_v34 = vadd.f32 %v9623_v0, %v2903_v30  ;;  %v14883_v24 = vld [vmem:[#allocation146_spill] sm:$0xff] }
 0x488   : > { %vm2921_vm5 = vweird.f32 %v9646_v8  ;;  %v2939_v42 = vand.u32 2147483647, %v14850_v48  ;;  %v2919_v58 = vadd.f32 %v9646_v8, %v2918_v32  ;;  %v2933_v20 = vmul.f32 %v9680_v28, %v2932_v13  ;;  %v14886_v32 = vld [vmem:[#allocation147_spill] sm:$0xff] }
 0x489   : > { %v2947_v12 = vsub.f32 1.0, %v2946_v46  ;;  %5942 = vrcp.f32 %v14883_v24  ;;  %v9790_v3 = vpop.eup %5938  ;;  %v9795_v30 = vsel %vm9698_vm8, %v9675_v62, %v2848_v26  ;;  %vm2935_vm1 = vweird.f32 %v14850_v48  ;;  %vm9826_vm8 = vmor %vm2905_vm10, %vm2906_vm4  ;;  %v14900_v26 = vld [vmem:[#allocation149_spill] sm:$0xff] }
 0x48a   : > { %v2961_v13 = vmul.f32 %v9752_v2, %v14864_v23  ;;  %5944 = vrcp.f32 %v14886_v32  ;;  %v9809_v46 = vpop.eup %5940  ;;  %v9814_v62 = vsel %vm9711_vm15, %v9691_v1, %v2863_v15  ;;  %v2878_v49 = vsel %vm9783_vm9, %v9598_v25, %v2874_v33  ;;  %vm9838_vm13 = vmor %vm2920_vm0, %vm2921_vm5 }
 0x48b   : > { %v2893_v57 = vsel %vm9801_vm7, %v9608_v43, %v2889_v9  ;;  %v2941_v4 = vand.u32 2147483648, %v14850_v48  ;;  %v2908_v1 = vsel %vm9826_vm8, %v9623_v0, %v2904_v34  ;;  %vm2936_vm15 = vweird.f32 %v9680_v28 }
 0x48c   : > { %vm9843_vm10 = vcmp.eq.f32.partialorder %v2939_v42, 8.507059e+37  ;;  %v2954_v43 = vand.u32 2147483647, %v14859_v16  ;;  %v2956_v56 = vand.u32 2147483648, %v14859_v16  ;;  %v2923_v34 = vsel %vm9838_vm13, %v9646_v8, %v2919_v58 }
 0x48d   : > { %v2934_v27 = vadd.f32 %v9680_v28, %v2933_v20  ;;  %v2948_v0 = vmul.f32 %v9707_v36, %v2947_v12  ;;  %v2976_v33 = vmul.f32 %v9790_v3, %v14867_v29  ;;  %v9859_v9 = vsel %vm9735_vm12, %v9695_v7, %v2878_v49  ;;  %v14893_v12 = vld [vmem:[#allocation148_spill] sm:$0xff]  ;;  %vm9887_vm12 = vmor %vm2935_vm1, %vm2936_vm15 }
 0x48e   : > { %vm2950_vm3 = vweird.f32 %v14859_v16  ;;  %v2962_v15 = vsub.f32 1.0, %v2961_v13  ;;  %v2991_v42 = vmul.f32 %v9809_v46, %v14872_v61  ;;  %v9869_v8 = vsel %vm9747_vm14, %v9715_v22, %v2893_v57 }
 0x48f   : > { %v9864_v39 = vpop.eup %5942  ;;  %v2942_v58 = vor.u32 1.1754944e-38, %v2941_v4  ;;  %v2969_v20 = vand.u32 2147483647, %v14864_v23  ;;  %5946 = vrcp.f32 %v14893_v12  ;;  %v9877_v40 = vsel %vm9765_vm6, %v2912_v38, %v2908_v1  ;;  %v14901_v1 = vld [vmem:[#allocation150_spill] sm:$0xff] }
 0x490   : > { %v9873_v7 = vpop.eup %5944  ;;  %14894 = vst [vmem:[#allocation142_spill] sm:$0xff] %v9877_v40  ;;  %v9881_v60 = vsel %vm9769_vm11, %v2927_v14, %v2923_v34  ;;  %vm9891_vm14 = vcmp.eq.f32.partialorder %v2954_v43, 8.507059e+37  ;;  %v2957_v13 = vor.u32 1.1754944e-38, %v2956_v56  ;;  %vm2965_vm0 = vweird.f32 %v14864_v23 }
 0x491   : > { %14895 = vst [vmem:[#allocation143_spill] sm:$0xff] %v9881_v60  ;;  %v2971_v38 = vand.u32 2147483648, %v14864_v23  ;;  %v2938_v44 = vsel %vm9887_vm12, %v9680_v28, %v2934_v27  ;;  %v2949_v47 = vadd.f32 %v9707_v36, %v2948_v0  ;;  %vm2951_vm2 = vweird.f32 %v9707_v36 }
 0x492   : > { %v2977_v48 = vsub.f32 1.0, %v2976_v33  ;;  %v2963_v14 = vmul.f32 %v9752_v2, %v2962_v15  ;;  %v2992_v49 = vsub.f32 1.0, %v2991_v42  ;;  %v3006_v57 = vmul.f32 %v9864_v39, %v14883_v24  ;;  %vm9928_vm5 = vmor %vm2950_vm3, %vm2951_vm2  ;;  %v14915_v33 = vld [vmem:[#allocation152_spill] sm:$0xff] }
 0x493   : > { %5948 = vrcp.f32 %v14900_v26  ;;  %vm2980_vm4 = vweird.f32 %v14867_v29  ;;  %v2986_v4 = vand.u32 2147483648, %v14867_v29  ;;  %v3021_v28 = vmul.f32 %v9873_v7, %v14886_v32 }
 0x494   : > { %5950 = vrcp.f32 %v14901_v1  ;;  %vm9911_vm6 = vcmp.eq.f32.partialorder %v2969_v20, 8.507059e+37  ;;  %v2972_v43 = vor.u32 1.1754944e-38, %v2971_v38  ;;  %v2984_v56 = vand.u32 2147483647, %v14867_v29 }
 0x495   : > { %vm2995_vm11 = vweird.f32 %v14872_v61  ;;  %v3001_v34 = vand.u32 2147483648, %v14872_v61  ;;  %v9918_v27 = vpop.eup %5946  ;;  %v9922_v0 = vsel %vm9843_vm10, %v2942_v58, %v2938_v44  ;;  %vm2966_vm9 = vweird.f32 %v9752_v2 }
 0x496   : > { %14904 = vst [vmem:[#allocation144_spill] sm:$0xff] %v9922_v0  ;;  %v2978_v15 = vmul.f32 %v9790_v3, %v2977_v48  ;;  %v2999_v42 = vand.u32 2147483647, %v14872_v61  ;;  %v2953_v41 = vsel %vm9928_vm5, %v9707_v36, %v2949_v47  ;;  %v2964_v58 = vadd.f32 %v9752_v2, %v2963_v14  ;;  %v14909_v14 = vld [vmem:[#allocation151_spill] sm:$0xff]  ;;  %vm9963_vm13 = vmor %vm2965_vm0, %vm2966_vm9 }
 0x497   : > { %v2993_v20 = vmul.f32 %v9809_v46, %v2992_v49  ;;  %v3007_v21 = vsub.f32 1.0, %v3006_v57  ;;  %v2987_v16 = vor.u32 1.1754944e-38, %v2986_v4  ;;  %v3014_v38 = vand.u32 2147483647, %v14883_v24 }
 0x498   : > { %v3016_v44 = vand.u32 2147483648, %v14883_v24  ;;  %v3022_v0 = vsub.f32 1.0, %v3021_v28  ;;  %vm2981_vm7 = vweird.f32 %v9790_v3  ;;  %vm9945_vm1 = vcmp.eq.f32.partialorder %v2984_v56, 8.507059e+37 }
 0x499   : > { %v9942_v60 = vpop.eup %5948  ;;  %v3002_v36 = vor.u32 1.1754944e-38, %v3001_v34  ;;  %vm3010_vm8 = vweird.f32 %v14883_v24  ;;  %v3036_v47 = vmul.f32 %v9918_v27, %v14893_v12  ;;  %5952 = vrcp.f32 %v14909_v14  ;;  %vm9988_vm12 = vmor %vm2980_vm4, %vm2981_vm7 }
 0x49a   : > { %v9953_v49 = vpop.eup %5950  ;;  %v9957_v57 = vsel %vm9891_vm14, %v2957_v13, %v2953_v41  ;;  %v2979_v28 = vadd.f32 %v9790_v3, %v2978_v15  ;;  %vm2996_vm15 = vweird.f32 %v9809_v46  ;;  %vm9969_vm10 = vcmp.eq.f32.partialorder %v2999_v42, 8.507059e+37 }
 0x49b   : > { %14910 = vst [vmem:[#allocation145_spill] sm:$0xff] %v9957_v57  ;;  %v3029_v22 = vand.u32 2147483647, %v14886_v32  ;;  %v2968_v13 = vsel %vm9963_vm13, %v9752_v2, %v2964_v58  ;;  %v2994_v23 = vadd.f32 %v9809_v46, %v2993_v20  ;;  %v3008_v34 = vmul.f32 %v9864_v39, %v3007_v21  ;;  %vm10011_vm0 = vmor %vm2995_vm11, %vm2996_vm15  ;;  %v14925_v2 = vld [vmem:[#allocation153_spill] sm:$0xff] }
 0x49c   : > { %5954 = vrcp.f32 %v14915_v33  ;;  %v3017_v41 = vor.u32 1.1754944e-38, %v3016_v44  ;;  %v3023_v15 = vmul.f32 %v9873_v7, %v3022_v0  ;;  %vm3025_vm3 = vweird.f32 %v14886_v32 }
 0x49d   : > { %v3051_v42 = vmul.f32 %v9942_v60, %v14900_v26  ;;  %vm9992_vm14 = vcmp.eq.f32.partialorder %v3014_v38, 8.507059e+37  ;;  %v3031_v20 = vand.u32 2147483648, %v14886_v32  ;;  %v3037_v0 = vsub.f32 1.0, %v3036_v47 }
 0x49e   : > { %v3044_v21 = vand.u32 2147483647, %v14893_v12  ;;  %v3066_v44 = vmul.f32 %v9953_v49, %v14901_v1  ;;  %v10002_v4 = vsel %vm9911_vm6, %v2972_v43, %v2968_v13  ;;  %v2983_v29 = vsel %vm9988_vm12, %v9790_v3, %v2979_v28 }
 0x49f   : > { %14920 = vst [vmem:[#allocation146_spill] sm:$0xff] %v10002_v4  ;;  %vm3011_vm2 = vweird.f32 %v9864_v39  ;;  %vm10016_vm4 = vcmp.eq.f32.partialorder %v3029_v22, 8.507059e+37  ;;  %v10020_v25 = vpop.eup %5952  ;;  %v2998_v3 = vsel %vm10011_vm0, %v9809_v46, %v2994_v23  ;;  %v3009_v43 = vadd.f32 %v9864_v39, %v3008_v34  ;;  %v14926_v34 = vld [vmem:[#allocation154_spill] sm:$0xff] }
 0x4a0   : > { %vm3026_vm6 = vweird.f32 %v9873_v7  ;;  %vm3040_vm11 = vweird.f32 %v14893_v12  ;;  %v3046_v61 = vand.u32 2147483648, %v14893_v12  ;;  %v3024_v28 = vadd.f32 %v9873_v7, %v3023_v15  ;;  %vm10044_vm5 = vmor %vm3010_vm8, %vm3011_vm2 }
 0x4a1   : > { %v3052_v22 = vsub.f32 1.0, %v3051_v42  ;;  %v3061_v13 = vand.u32 2147483648, %v14900_v26  ;;  %5956 = vrcp.f32 %v14925_v2  ;;  %v3032_v57 = vor.u32 1.1754944e-38, %v3031_v20  ;;  %vm10063_vm7 = vmor %vm3025_vm3, %vm3026_vm6 }
 0x4a2   : > { %v10032_v4 = vpop.eup %5954  ;;  %v3038_v46 = vmul.f32 %v9918_v27, %v3037_v0  ;;  %v3067_v23 = vsub.f32 1.0, %v3066_v44  ;;  %5958 = vrcp.f32 %v14926_v34  ;;  %v10038_v38 = vsel %vm9945_vm1, %v2987_v16, %v2983_v29 }
 0x4a3   : > { %14927 = vst [vmem:[#allocation147_spill] sm:$0xff] %v10038_v38  ;;  %vm3055_vm9 = vweird.f32 %v14900_v26  ;;  %v3059_v42 = vand.u32 2147483647, %v14900_v26  ;;  %v3081_v20 = vmul.f32 %v10020_v25, %v14909_v14  ;;  %v10054_v48 = vsel %vm9969_vm10, %v3002_v36, %v2998_v3 }
 0x4a4   : > { %14930 = vst [vmem:[#allocation148_spill] sm:$0xff] %v10054_v48  ;;  %v3013_v16 = vsel %vm10044_vm5, %v9864_v39, %v3009_v43  ;;  %vm3041_vm1 = vweird.f32 %v9918_v27  ;;  %vm10068_vm8 = vcmp.eq.f32.partialorder %v3044_v21, 8.507059e+37  ;;  %v3047_v36 = vor.u32 1.1754944e-38, %v3046_v61  ;;  %v14935_v21 = vld [vmem:[#allocation155_spill] sm:$0xff] }
 0x4a5   : > { %v3028_v56 = vsel %vm10063_vm7, %v9873_v7, %v3024_v28  ;;  %v3053_v39 = vmul.f32 %v9942_v60, %v3052_v22  ;;  %v3062_v44 = vor.u32 1.1754944e-38, %v3061_v13  ;;  %v3096_v32 = vmul.f32 %v10032_v4, %v14915_v33  ;;  %v14939_v13 = vld [vmem:[#allocation156_spill] sm:$0xff]  ;;  %vm10107_vm3 = vmor %vm3040_vm11, %vm3041_vm1  ;;  %v14957_v7 = vld [vmem:[#allocation159_spill] sm:$0xff] }
 0x4a6   : > { %v3039_v29 = vadd.f32 %v9918_v27, %v3038_v46  ;;  %v3068_v3 = vmul.f32 %v9953_v49, %v3067_v23  ;;  %vm3070_vm13 = vweird.f32 %v14901_v1  ;;  %5960 = vrcp.f32 %v14935_v21 }
 0x4a7   : > { %v10082_v43 = vpop.eup %5956  ;;  %v10086_v61 = vsel %vm9992_vm14, %v3017_v41, %v3013_v16  ;;  %vm10088_vm15 = vcmp.eq.f32.partialorder %v3059_v42, 8.507059e+37  ;;  %v3074_v28 = vand.u32 2147483647, %v14901_v1  ;;  %v3082_v22 = vsub.f32 1.0, %v3081_v20 }
 0x4a8   : > { %14936 = vst [vmem:[#allocation149_spill] sm:$0xff] %v10086_v61  ;;  %5962 = vrcp.f32 %v14939_v13  ;;  %v10094_v46 = vpop.eup %5958  ;;  %v10098_v23 = vsel %vm10016_vm4, %v3032_v57, %v3028_v56  ;;  %vm3056_vm10 = vweird.f32 %v9942_v60  ;;  %v3076_v41 = vand.u32 2147483648, %v14901_v1 }
 0x4a9   : > { %14940 = vst [vmem:[#allocation150_spill] sm:$0xff] %v10098_v23  ;;  %v3089_v58 = vand.u32 2147483647, %v14909_v14  ;;  %v3054_v42 = vadd.f32 %v9942_v60, %v3053_v39  ;;  %vm3085_vm12 = vweird.f32 %v14909_v14  ;;  %v3091_v57 = vand.u32 2147483648, %v14909_v14  ;;  %v14943_v23 = vld [vmem:[#allocation157_spill] sm:$0xff]  ;;  %vm10133_vm0 = vmor %vm3055_vm9, %vm3056_vm10 }
 0x4aa   : > { %v3097_v47 = vsub.f32 1.0, %v3096_v32  ;;  %v3104_v20 = vand.u32 2147483647, %v14915_v33  ;;  %v3043_v16 = vsel %vm10107_vm3, %v9918_v27, %v3039_v29  ;;  %v3069_v24 = vadd.f32 %v9953_v49, %v3068_v3  ;;  %v14969_v14 = vld [vmem:[#allocation161_spill] sm:$0xff] }
 0x4ab   : > { %vm3071_vm14 = vweird.f32 %v9953_v49  ;;  %v3106_v12 = vand.u32 2147483648, %v14915_v33  ;;  %v3083_v56 = vmul.f32 %v10020_v25, %v3082_v22  ;;  %v3111_v39 = vmul.f32 %v10082_v43, %v14925_v2  ;;  %v14948_v22 = vld [vmem:[#allocation158_spill] sm:$0xff] }
 0x4ac   : > { %v3126_v32 = vmul.f32 %v10094_v46, %v14926_v34  ;;  %5964 = vrcp.f32 %v14943_v23  ;;  %v10127_v61 = vpop.eup %5960  ;;  %vm10137_vm2 = vcmp.eq.f32.partialorder %v3074_v28, 8.507059e+37  ;;  %v3077_v3 = vor.u32 1.1754944e-38, %v3076_v41  ;;  %vm10156_vm6 = vmor %vm3070_vm13, %vm3071_vm14 }
 0x4ad   : > { %vm3100_vm4 = vweird.f32 %v14915_v33  ;;  %5966 = vrcp.f32 %v14948_v22  ;;  %v10147_v48 = vsel %vm10068_vm8, %v3047_v36, %v3043_v16  ;;  %v3058_v26 = vsel %vm10133_vm0, %v9942_v60, %v3054_v42  ;;  %v14973_v16 = vld [vmem:[#allocation162_spill] sm:$0xff] }
 0x4ae   : > { %v10143_v15 = vpop.eup %5962  ;;  %14949 = vst [vmem:[#allocation151_spill] sm:$0xff] %v10147_v48  ;;  %vm10160_vm11 = vcmp.eq.f32.partialorder %v3089_v58, 8.507059e+37  ;;  %v3092_v38 = vor.u32 1.1754944e-38, %v3091_v57  ;;  %v3098_v0 = vmul.f32 %v10032_v4, %v3097_v47  ;;  %v3073_v36 = vsel %vm10156_vm6, %v9953_v49, %v3069_v24  ;;  %v14963_v48 = vld [vmem:[#allocation160_spill] sm:$0xff] }
 0x4af   : > { %vm3086_vm5 = vweird.f32 %v10020_v25  ;;  %v3107_v60 = vor.u32 1.1754944e-38, %v3106_v12  ;;  %v3121_v1 = vand.u32 2147483648, %v14925_v2  ;;  %v3084_v42 = vadd.f32 %v10020_v25, %v3083_v56 }
 0x4b0   : > { %vm10171_vm9 = vcmp.eq.f32.partialorder %v3104_v20, 8.507059e+37  ;;  %v3112_v58 = vsub.f32 1.0, %v3111_v39  ;;  %v3127_v27 = vsub.f32 1.0, %v3126_v32  ;;  %v3141_v57 = vmul.f32 %v10127_v61, %v14935_v21  ;;  %vm10202_vm8 = vmor %vm3085_vm12, %vm3086_vm5 }
 0x4b1   : > { %v10179_v47 = vsel %vm10088_vm15, %v3062_v44, %v3058_v26  ;;  %vm3115_vm7 = vweird.f32 %v14925_v2  ;;  %v3119_v49 = vand.u32 2147483647, %v14925_v2  ;;  %v3136_v24 = vand.u32 2147483648, %v14926_v34 }
 0x4b2   : > { %14956 = vst [vmem:[#allocation152_spill] sm:$0xff] %v10179_v47  ;;  %v3156_v20 = vmul.f32 %v10143_v15, %v14939_v13  ;;  %v10186_v12 = vpop.eup %5964  ;;  %v3099_v56 = vadd.f32 %v10032_v4, %v3098_v0  ;;  %vm3101_vm1 = vweird.f32 %v10032_v4  ;;  %v3134_v39 = vand.u32 2147483647, %v14926_v34 }
 0x4b3   : > { %5968 = vrcp.f32 %v14957_v7  ;;  %v10192_v44 = vpop.eup %5966  ;;  %v10196_v32 = vsel %vm10137_vm2, %v3077_v3, %v3073_v36  ;;  %v3122_v28 = vor.u32 1.1754944e-38, %v3121_v1  ;;  %vm3130_vm13 = vweird.f32 %v14926_v34  ;;  %vm10215_vm15 = vmor %vm3100_vm4, %vm3101_vm1 }
 0x4b4   : > { %14958 = vst [vmem:[#allocation153_spill] sm:$0xff] %v10196_v32  ;;  %v3149_v0 = vand.u32 2147483647, %v14935_v21  ;;  %v3088_v47 = vsel %vm10202_vm8, %v10020_v25, %v3084_v42  ;;  %v3113_v29 = vmul.f32 %v10082_v43, %v3112_v58  ;;  %v3128_v3 = vmul.f32 %v10094_v46, %v3127_v27  ;;  %v15003_v42 = vld [vmem:[#allocation166_spill] sm:$0xff] }
 0x4b5   : > { %v3142_v36 = vsub.f32 1.0, %v3141_v57  ;;  %vm3116_vm10 = vweird.f32 %v10082_v43  ;;  %v3137_v1 = vor.u32 1.1754944e-38, %v3136_v24  ;;  %v3157_v32 = vsub.f32 1.0, %v3156_v20 }
 0x4b6   : > { %5970 = vrcp.f32 %v14963_v48  ;;  %v3103_v25 = vsel %vm10215_vm15, %v10032_v4, %v3099_v56  ;;  %vm10224_vm3 = vcmp.eq.f32.partialorder %v3119_v49, 8.507059e+37  ;;  %vm10228_vm12 = vcmp.eq.f32.partialorder %v3134_v39, 8.507059e+37  ;;  %vm10262_vm6 = vmor %vm3115_vm7, %vm3116_vm10 }
 0x4b7   : > { %vm3145_vm14 = vweird.f32 %v14935_v21  ;;  %v3151_v58 = vand.u32 2147483648, %v14935_v21  ;;  %v3171_v27 = vmul.f32 %v10186_v12, %v14943_v23  ;;  %v3186_v57 = vmul.f32 %v10192_v44, %v14948_v22 }
 0x4b8   : > { %v10240_v4 = vsel %vm10160_vm11, %v3092_v38, %v3088_v47  ;;  %vm3131_vm0 = vweird.f32 %v10094_v46  ;;  %v3164_v49 = vand.u32 2147483647, %v14939_v13  ;;  %v3166_v24 = vand.u32 2147483648, %v14939_v13 }
 0x4b9   : > { %14968 = vst [vmem:[#allocation154_spill] sm:$0xff] %v10240_v4  ;;  %v10245_v20 = vpop.eup %5968  ;;  %v3114_v56 = vadd.f32 %v10082_v43, %v3113_v29  ;;  %v3129_v39 = vadd.f32 %v10094_v46, %v3128_v3  ;;  %v3143_v26 = vmul.f32 %v10127_v61, %v3142_v36  ;;  %5972 = vrcp.f32 %v14969_v14  ;;  %vm10273_vm11 = vmor %vm3130_vm13, %vm3131_vm0 }
 0x4ba   : > { %v10253_v38 = vsel %vm10171_vm9, %v3107_v60, %v3103_v25  ;;  %vm3146_vm2 = vweird.f32 %v10127_v61  ;;  %v3158_v41 = vmul.f32 %v10143_v15, %v3157_v32  ;;  %vm3160_vm4 = vweird.f32 %v14939_v13 }
 0x4bb   : > { %14970 = vst [vmem:[#allocation155_spill] sm:$0xff] %v10253_v38  ;;  %v3152_v29 = vor.u32 1.1754944e-38, %v3151_v58  ;;  %v3172_v3 = vsub.f32 1.0, %v3171_v27  ;;  %v3187_v36 = vsub.f32 1.0, %v3186_v57  ;;  %5974 = vrcp.f32 %v14973_v16  ;;  %vm10320_vm13 = vmor %vm3145_vm14, %vm3146_vm2 }
 0x4bc   : > { %v10267_v60 = vpop.eup %5970  ;;  %vm10277_vm5 = vcmp.eq.f32.partialorder %v3149_v0, 8.507059e+37  ;;  %v3167_v25 = vor.u32 1.1754944e-38, %v3166_v24  ;;  %v3179_v58 = vand.u32 2147483647, %v14943_v23  ;;  %v3181_v27 = vand.u32 2147483648, %v14943_v23 }
 0x4bd   : > { %v3201_v57 = vmul.f32 %v10245_v20, %v14957_v7  ;;  %v3118_v34 = vsel %vm10262_vm6, %v10082_v43, %v3114_v56  ;;  %v3133_v38 = vsel %vm10273_vm11, %v10094_v46, %v3129_v39  ;;  %v3144_v0 = vadd.f32 %v10127_v61, %v3143_v26  ;;  %v14980_v39 = vld [vmem:[#allocation163_spill] sm:$0xff] }
 0x4be   : > { %vm10292_vm9 = vcmp.eq.f32.partialorder %v3164_v49, 8.507059e+37  ;;  %v3194_v24 = vand.u32 2147483647, %v14948_v22  ;;  %v3159_v40 = vadd.f32 %v10143_v15, %v3158_v41  ;;  %vm3161_vm7 = vweird.f32 %v10143_v15 }
 0x4bf   : > { %vm3175_vm1 = vweird.f32 %v14943_v23  ;;  %vm3190_vm8 = vweird.f32 %v14948_v22  ;;  %v10301_v43 = vpop.eup %5972  ;;  %v3173_v46 = vmul.f32 %v10186_v12, %v3172_v3  ;;  %v3188_v56 = vmul.f32 %v10192_v44, %v3187_v36  ;;  %vm10333_vm15 = vmor %vm3160_vm4, %vm3161_vm7 }
 0x4c0   : > { %v3216_v49 = vmul.f32 %v10267_v60, %v14963_v48  ;;  %5976 = vrcp.f32 %v14980_v39  ;;  %v10310_v26 = vsel %vm10224_vm3, %v3122_v28, %v3118_v34  ;;  %v10314_v41 = vsel %vm10228_vm12, %v3137_v1, %v3133_v38 }
 0x4c1   : > { %14981 = vst [vmem:[#allocation156_spill] sm:$0xff] %v10314_v41  ;;  %v3182_v3 = vor.u32 1.1754944e-38, %v3181_v27  ;;  %v3202_v36 = vsub.f32 1.0, %v3201_v57  ;;  %v10324_v32 = vpop.eup %5974  ;;  %v3148_v28 = vsel %vm10320_vm13, %v10127_v61, %v3144_v0  ;;  %vm10337_vm10 = vcmp.eq.f32.partialorder %v3179_v58, 8.507059e+37  ;;  %v14990_v0 = vld [vmem:[#allocation164_spill] sm:$0xff] }
 0x4c2   : > { %vm10341_vm3 = vcmp.eq.f32.partialorder %v3194_v24, 8.507059e+37  ;;  %v3196_v33 = vand.u32 2147483648, %v14948_v22  ;;  %v3209_v61 = vand.u32 2147483647, %v14957_v7  ;;  %v3211_v38 = vand.u32 2147483648, %v14957_v7 }
 0x4c3   : > { %v3163_v13 = vsel %vm10333_vm15, %v10143_v15, %v3159_v40  ;;  %vm3176_vm12 = vweird.f32 %v10186_v12  ;;  %vm3191_vm14 = vweird.f32 %v10192_v44  ;;  %v3231_v58 = vmul.f32 %v10301_v43, %v14969_v14  ;;  %v14991_v15 = vld [vmem:[#allocation165_spill] sm:$0xff] }
 0x4c4   : > { %v3174_v27 = vadd.f32 %v10186_v12, %v3173_v46  ;;  %v3189_v57 = vadd.f32 %v10192_v44, %v3188_v56  ;;  %v3217_v34 = vsub.f32 1.0, %v3216_v49  ;;  %5978 = vrcp.f32 %v14990_v0  ;;  %vm10371_vm2 = vmor %vm3175_vm1, %vm3176_vm12 }
 0x4c5   : > { %v3203_v24 = vmul.f32 %v10245_v20, %v3202_v36  ;;  %vm3205_vm0 = vweird.f32 %v14957_v7  ;;  %v3246_v40 = vmul.f32 %v10324_v32, %v14973_v16  ;;  %5980 = vrcp.f32 %v14991_v15  ;;  %vm10385_vm4 = vmor %vm3190_vm8, %vm3191_vm14 }
 0x4c6   : > { %v10363_v47 = vpop.eup %5976  ;;  %v10367_v1 = vsel %vm10277_vm5, %v3152_v29, %v3148_v28  ;;  %v3197_v56 = vor.u32 1.1754944e-38, %v3196_v33  ;;  %v3224_v49 = vand.u32 2147483647, %v14963_v48  ;;  %v3226_v36 = vand.u32 2147483648, %v14963_v48 }
 0x4c7   : > { %v10379_v41 = vsel %vm10292_vm9, %v3167_v25, %v3163_v13  ;;  %vm10389_vm6 = vcmp.eq.f32.partialorder %v3209_v61, 8.507059e+37  ;;  %v3212_v2 = vor.u32 1.1754944e-38, %v3211_v38  ;;  %vm3220_vm11 = vweird.f32 %v14963_v48 }
 0x4c8   : > { %v3232_v28 = vsub.f32 1.0, %v3231_v58  ;;  %v3178_v4 = vsel %vm10371_vm2, %v10186_v12, %v3174_v27  ;;  %v3193_v22 = vsel %vm10385_vm4, %v10192_v44, %v3189_v57  ;;  %v3218_v25 = vmul.f32 %v10267_v60, %v3217_v34 }
 0x4c9   : > { %v3241_v33 = vand.u32 2147483648, %v14969_v14  ;;  %v3204_v61 = vadd.f32 %v10245_v20, %v3203_v24  ;;  %vm3206_vm5 = vweird.f32 %v10245_v20  ;;  %vm3235_vm9 = vweird.f32 %v14969_v14 }
 0x4ca   : > { %v3247_v38 = vsub.f32 1.0, %v3246_v40  ;;  %v3261_v13 = vmul.f32 %v10363_v47, %v14980_v39  ;;  %v10407_v58 = vpop.eup %5978  ;;  %vm10409_vm7 = vcmp.eq.f32.partialorder %v3224_v49, 8.507059e+37  ;;  %v3227_v44 = vor.u32 1.1754944e-38, %v3226_v36  ;;  %vm10432_vm8 = vmor %vm3205_vm0, %vm3206_vm5 }
 0x4cb   : > { %v3239_v27 = vand.u32 2147483647, %v14969_v14  ;;  %v3254_v57 = vand.u32 2147483647, %v14973_v16  ;;  %v10415_v34 = vpop.eup %5980  ;;  %v10419_v24 = vsel %vm10337_vm10, %v3182_v3, %v3178_v4  ;;  %v10423_v40 = vsel %vm10341_vm3, %v3197_v56, %v3193_v22 }
 0x4cc   : > { %15000 = vst [vmem:[#allocation157_spill] sm:$0xff] %v10423_v40  ;;  %v3233_v46 = vmul.f32 %v10301_v43, %v3232_v28  ;;  %vm3250_vm1 = vweird.f32 %v14973_v16  ;;  %5982 = vrcp.f32 %v9125_v10  ;;  %v3219_v3 = vadd.f32 %v10267_v60, %v3218_v25  ;;  %v15004_v28 = vld [vmem:[#allocation167_spill] sm:$0xff] }
 0x4cd   : > { %vm3221_vm13 = vweird.f32 %v10267_v60  ;;  %v3242_v21 = vor.u32 1.1754944e-38, %v3241_v33  ;;  %5984 = vrcp.f32 %v15003_v42  ;;  %v3208_v56 = vsel %vm10432_vm8, %v10245_v20, %v3204_v61 }
 0x4ce   : > { %v3248_v36 = vmul.f32 %v10324_v32, %v3247_v38  ;;  %v3262_v29 = vsub.f32 1.0, %v3261_v13  ;;  %5986 = vrcp.f32 %v15004_v28  ;;  %vm10444_vm15 = vcmp.eq.f32.partialorder %v3239_v27, 8.507059e+37  ;;  %vm10456_vm10 = vmor %vm3220_vm11, %vm3221_vm13 }
 0x4cf   : > { %v3256_v4 = vand.u32 2147483648, %v14973_v16  ;;  %v3271_v22 = vand.u32 2147483648, %v14980_v39  ;;  %v3276_v25 = vmul.f32 %v10407_v58, %v14990_v0  ;;  %v3291_v33 = vmul.f32 %v10415_v34, %v14991_v15 }
 0x4d0   : > { %v3234_v61 = vadd.f32 %v10301_v43, %v3233_v46  ;;  %vm3236_vm3 = vweird.f32 %v10301_v43  ;;  %vm10462_vm12 = vcmp.eq.f32.partialorder %v3254_v57, 8.507059e+37  ;;  %vm3265_vm14 = vweird.f32 %v14980_v39 }
 0x4d1   : > { %v10469_v13 = vsel %vm10389_vm6, %v3212_v2, %v3208_v56  ;;  %v3223_v48 = vsel %vm10456_vm10, %v10267_v60, %v3219_v3  ;;  %vm3251_vm0 = vweird.f32 %v10324_v32  ;;  %v3269_v27 = vand.u32 2147483647, %v14980_v39  ;;  %vm10486_vm2 = vmor %vm3235_vm9, %vm3236_vm3 }
 0x4d2   : > { %15011 = vst [vmem:[#allocation158_spill] sm:$0xff] %v10469_v13  ;;  %v10476_v46 = vpop.eup %5982  ;;  %v3249_v57 = vadd.f32 %v10324_v32, %v3248_v36  ;;  %v3263_v49 = vmul.f32 %v10363_v47, %v3262_v29  ;;  %v3286_v40 = vand.u32 2147483648, %v14990_v0  ;;  %5988 = vrcp.f32 %v9137_v6  ;;  %vm10505_vm6 = vmor %vm3250_vm1, %vm3251_vm0 }
 0x4d3   : > { %v10482_v23 = vpop.eup %5984  ;;  %v3257_v2 = vor.u32 1.1754944e-38, %v3256_v4  ;;  %v3272_v3 = vor.u32 1.1754944e-38, %v3271_v22  ;;  %v3277_v56 = vsub.f32 1.0, %v3276_v25  ;;  %v3292_v20 = vsub.f32 1.0, %v3291_v33 }
 0x4d4   : > { %v10490_v13 = vpop.eup %5986  ;;  %v10494_v36 = vsel %vm10409_vm7, %v3227_v44, %v3223_v48  ;;  %v3238_v29 = vsel %vm10486_vm2, %v10301_v43, %v3234_v61  ;;  %vm3280_vm4 = vweird.f32 %v14990_v0  ;;  %v3284_v14 = vand.u32 2147483647, %v14990_v0 }
 0x4d5   : > { %15014 = vst [vmem:[#allocation159_spill] sm:$0xff] %v10494_v36  ;;  %vm3266_vm11 = vweird.f32 %v10363_v47  ;;  %vm10510_vm5 = vcmp.eq.f32.partialorder %v3269_v27, 8.507059e+37  ;;  %vm3295_vm9 = vweird.f32 %v14991_v15  ;;  %v3299_v43 = vand.u32 2147483647, %v14991_v15 }
 0x4d6   : > { %v3301_v44 = vand.u32 2147483648, %v14991_v15  ;;  %v3306_v22 = vmul.f32 %v10476_v46, %v9125_v10  ;;  %v3253_v16 = vsel %vm10505_vm6, %v10324_v32, %v3249_v57  ;;  %v3264_v25 = vadd.f32 %v10363_v47, %v3263_v49  ;;  %vm10547_vm7 = vmor %vm3265_vm14, %vm3266_vm11 }
 0x4d7   : > { %v3287_v33 = vor.u32 1.1754944e-38, %v3286_v40  ;;  %v3321_v61 = vmul.f32 %v10482_v23, %v15003_v42  ;;  %v3278_v48 = vmul.f32 %v10407_v58, %v3277_v56  ;;  %v3293_v27 = vmul.f32 %v10415_v34, %v3292_v20 }
 0x4d8   : > { %v3336_v60 = vmul.f32 %v10490_v13, %v15004_v28  ;;  %5990 = vrcp.f32 %v9140_v50  ;;  %v10530_v36 = vpop.eup %5988  ;;  %v10534_v32 = vsel %vm10444_vm15, %v3242_v21, %v3238_v29  ;;  %v3314_v40 = vand.u32 2147483647, %v9125_v10 }
 0x4d9   : > { %v3316_v57 = vand.u32 2147483648, %v9125_v10  ;;  %5992 = vrcp.f32 %v9143_v54  ;;  %v10541_v49 = vsel %vm10462_vm12, %v3257_v2, %v3253_v16  ;;  %vm10551_vm1 = vcmp.eq.f32.partialorder %v3284_v14, 8.507059e+37 }
 0x4da   : > { %vm10555_vm8 = vcmp.eq.f32.partialorder %v3299_v43, 8.507059e+37  ;;  %v3302_v20 = vor.u32 1.1754944e-38, %v3301_v44  ;;  %v3307_v38 = vsub.f32 1.0, %v3306_v22  ;;  %v3268_v2 = vsel %vm10547_vm7, %v10363_v47, %v3264_v25 }
 0x4db   : > { %vm3281_vm13 = vweird.f32 %v10407_v58  ;;  %vm3296_vm15 = vweird.f32 %v10415_v34  ;;  %v3322_v39 = vsub.f32 1.0, %v3321_v61  ;;  %v3279_v29 = vadd.f32 %v10407_v58, %v3278_v48 }
 0x4dc   : > { %v3294_v14 = vadd.f32 %v10415_v34, %v3293_v27  ;;  %vm3310_vm10 = vweird.f32 %v9125_v10  ;;  %v3337_v4 = vsub.f32 1.0, %v3336_v60  ;;  %v3351_v43 = vmul.f32 %v10530_v36, %v9137_v6  ;;  %vm10578_vm3 = vmor %vm3280_vm4, %vm3281_vm13 }
 0x4dd   : > { %v10569_v44 = vor.u32 1.1754944e-38, %v3316_v57  ;;  %v3329_v22 = vand.u32 2147483647, %v15003_v42  ;;  %v3331_v47 = vand.u32 2147483648, %v15003_v42  ;;  %5994 = vrcp.f32 %v9149_v5  ;;  %vm10596_vm0 = vmor %vm3295_vm9, %vm3296_vm15 }
 0x4de   : > { %v10574_v16 = vpop.eup %5990  ;;  %v3308_v61 = vmul.f32 %v10476_v46, %v3307_v38  ;;  %vm3325_vm12 = vweird.f32 %v15003_v42  ;;  %vm3340_vm14 = vweird.f32 %v15004_v28  ;;  %v3344_v48 = vand.u32 2147483647, %v15004_v28 }
 0x4df   : > { %v10586_v27 = vpop.eup %5992  ;;  %v10590_v60 = vsel %vm10510_vm5, %v3272_v3, %v3268_v2  ;;  %vm3311_vm2 = vweird.f32 %v10476_v46  ;;  %v3323_v57 = vmul.f32 %v10482_v23, %v3322_v39  ;;  %5996 = vrcp.f32 %v9152_v18 }
 0x4e0   : > { %15027 = vst [vmem:[#allocation160_spill] sm:$0xff] %v10590_v60  ;;  %v3283_v12 = vsel %vm10578_vm3, %v10407_v58, %v3279_v29  ;;  %v3298_v3 = vsel %vm10596_vm0, %v10415_v34, %v3294_v14  ;;  %vm10609_vm4 = vcmp.eq.f32.partialorder %v3314_v40, 8.507059e+37  ;;  %v3338_v56 = vmul.f32 %v10490_v13, %v3337_v4 }
 0x4e1   : > { %v3352_v38 = vsub.f32 1.0, %v3351_v43  ;;  %vm10614_vm6 = vcmp.eq.f32.partialorder %v3329_v22, 8.507059e+37  ;;  %v3332_v39 = vor.u32 1.1754944e-38, %v3331_v47  ;;  %v3346_v60 = vand.u32 2147483648, %v15004_v28 }
 0x4e2   : > { %v3361_v58 = vand.u32 2147483648, %v9137_v6  ;;  %v3366_v29 = vmul.f32 %v10574_v16, %v9140_v50  ;;  %v3309_v34 = vadd.f32 %v10476_v46, %v3308_v61  ;;  %vm10623_vm11 = vcmp.eq.f32.partialorder %v3344_v48, 8.507059e+37 }
 0x4e3   : > { %vm3355_vm5 = vweird.f32 %v9137_v6  ;;  %v3359_v14 = vand.u32 2147483647, %v9137_v6  ;;  %v3381_v4 = vmul.f32 %v10586_v27, %v9143_v54  ;;  %5998 = vrcp.f32 %v9155_v19  ;;  %v10632_v43 = vpop.eup %5994 }
 0x4e4   : > { %v10636_v22 = vsel %vm10551_vm1, %v3287_v33, %v3283_v12  ;;  %v10640_v47 = vsel %vm10555_vm8, %v3302_v20, %v3298_v3  ;;  %v3324_v25 = vadd.f32 %v10482_v23, %v3323_v57  ;;  %vm3326_vm9 = vweird.f32 %v10482_v23  ;;  %vm10654_vm1 = vmor %vm3310_vm10, %vm3311_vm2 }
 0x4e5   : > { %v3339_v61 = vadd.f32 %v10490_v13, %v3338_v56  ;;  %vm3341_vm7 = vweird.f32 %v10490_v13  ;;  %v3353_v48 = vmul.f32 %v10530_v36, %v3352_v38  ;;  %6000 = vrcp.f32 %v9161_v53  ;;  %v10648_v0 = vpop.eup %5996  ;;  %vm10664_vm8 = vmor %vm3325_vm12, %vm3326_vm9 }
 0x4e6   : > { %v3347_v21 = vor.u32 1.1754944e-38, %v3346_v60  ;;  %v3362_v7 = vor.u32 1.1754944e-38, %v3361_v58  ;;  %v3367_v20 = vsub.f32 1.0, %v3366_v29  ;;  %v3376_v57 = vand.u32 2147483648, %v9140_v50  ;;  %vm10682_vm15 = vmor %vm3340_vm14, %vm3341_vm7 }
 0x4e7   : > { %v3313_v12 = vsel %vm10654_vm1, %v10476_v46, %v3309_v34  ;;  %vm10668_vm13 = vcmp.eq.f32.partialorder %v3359_v14, 8.507059e+37  ;;  %v3374_v60 = vand.u32 2147483647, %v9140_v50  ;;  %v3382_v56 = vsub.f32 1.0, %v3381_v4 }
 0x4e8   : > { %v3396_v38 = vmul.f32 %v10632_v43, %v9149_v5  ;;  %v3328_v46 = vsel %vm10664_vm8, %v10482_v23, %v3324_v25  ;;  %vm3356_vm10 = vweird.f32 %v10530_v36  ;;  %vm3370_vm3 = vweird.f32 %v9140_v50 }
 0x4e9   : > { %v3389_v58 = vand.u32 2147483647, %v9143_v54  ;;  %v3391_v29 = vand.u32 2147483648, %v9143_v54  ;;  %v10690_v34 = vpop.eup %5998  ;;  %v3343_v23 = vsel %vm10682_vm15, %v10490_v13, %v3339_v61  ;;  %v3354_v28 = vadd.f32 %v10530_v36, %v3353_v48  ;;  %vm10722_vm14 = vmor %vm3355_vm5, %vm3356_vm10 }
 0x4ea   : > { %v3411_v14 = vmul.f32 %v10648_v0, %v9152_v18  ;;  %6002 = vrcp.f32 %v9164_v51  ;;  %v10702_v4 = vsel %vm10609_vm4, %v10569_v44, %v3313_v12  ;;  %v3368_v25 = vmul.f32 %v10574_v16, %v3367_v20 }
 0x4eb   : > { %v3377_v33 = vor.u32 1.1754944e-38, %v3376_v57  ;;  %vm3385_vm12 = vweird.f32 %v9143_v54  ;;  %v10706_v3 = vpop.eup %6000  ;;  %v10710_v13 = vsel %vm10614_vm6, %v3332_v39, %v3328_v46  ;;  %v3383_v61 = vmul.f32 %v10586_v27, %v3382_v56 }
 0x4ec   : > { %v3397_v48 = vsub.f32 1.0, %v3396_v38  ;;  %6004 = vrcp.f32 %v9167_v63  ;;  %v10716_v44 = vsel %vm10623_vm11, %v3347_v21, %v3343_v23  ;;  %vm3371_vm0 = vweird.f32 %v10574_v16 }
 0x4ed   : > { %vm10727_vm2 = vcmp.eq.f32.partialorder %v3374_v60, 8.507059e+37  ;;  %v3406_v39 = vand.u32 2147483648, %v9149_v5  ;;  %v3426_v40 = vmul.f32 %v10690_v34, %v9155_v19  ;;  %v3358_v21 = vsel %vm10722_vm14, %v10530_v36, %v3354_v28  ;;  %vm10766_vm7 = vmor %vm3370_vm3, %vm3371_vm0 }
 0x4ee   : > { %vm10737_vm4 = vcmp.eq.f32.partialorder %v3389_v58, 8.507059e+37  ;;  %v3392_v20 = vor.u32 1.1754944e-38, %v3391_v29  ;;  %vm3400_vm6 = vweird.f32 %v9149_v5  ;;  %v3412_v57 = vsub.f32 1.0, %v3411_v14 }
 0x4ef   : > { %v3421_v12 = vand.u32 2147483648, %v9152_v18  ;;  %v3369_v60 = vadd.f32 %v10574_v16, %v3368_v25  ;;  %v3404_v56 = vand.u32 2147483647, %v9149_v5  ;;  %v3419_v38 = vand.u32 2147483647, %v9152_v18 }
 0x4f0   : > { %v3441_v46 = vmul.f32 %v10706_v3, %v9161_v53  ;;  %v10748_v36 = vpop.eup %6002  ;;  %v3384_v42 = vadd.f32 %v10586_v27, %v3383_v61  ;;  %vm3386_vm11 = vweird.f32 %v10586_v27  ;;  %v3398_v58 = vmul.f32 %v10632_v43, %v3397_v48 }
 0x4f1   : > { %vm3415_vm5 = vweird.f32 %v9152_v18  ;;  %6006 = vrcp.f32 %v9173_v11  ;;  %v10757_v29 = vsel %vm10668_vm13, %v3362_v7, %v3358_v21  ;;  %vm3401_vm9 = vweird.f32 %v10632_v43  ;;  %vm10780_vm1 = vmor %vm3385_vm12, %vm3386_vm11 }
 0x4f2   : > { %v3407_v23 = vor.u32 1.1754944e-38, %v3406_v39  ;;  %v3427_v28 = vsub.f32 1.0, %v3426_v40  ;;  %v10760_v14 = vpop.eup %6004  ;;  %v3413_v61 = vmul.f32 %v10648_v0, %v3412_v57  ;;  %v3422_v48 = vor.u32 1.1754944e-38, %v3421_v12  ;;  %vm10822_vm3 = vmor %vm3400_vm6, %vm3401_vm9 }
 0x4f3   : > { %v3436_v7 = vand.u32 2147483648, %v9155_v19  ;;  %6008 = vrcp.f32 %v9176_v37  ;;  %v3373_v10 = vsel %vm10766_vm7, %v10574_v16, %v3369_v60  ;;  %vm10784_vm8 = vcmp.eq.f32.partialorder %v3404_v56, 8.507059e+37 }
 0x4f4   : > { %v3434_v39 = vand.u32 2147483647, %v9155_v19  ;;  %v3442_v40 = vsub.f32 1.0, %v3441_v46  ;;  %v3456_v21 = vmul.f32 %v10748_v36, %v9164_v51  ;;  %v3388_v16 = vsel %vm10780_vm1, %v10586_v27, %v3384_v42 }
 0x4f5   : > { %v3399_v54 = vadd.f32 %v10632_v43, %v3398_v58  ;;  %vm10795_vm13 = vcmp.eq.f32.partialorder %v3419_v38, 8.507059e+37  ;;  %vm3430_vm15 = vweird.f32 %v9155_v19  ;;  %v3451_v12 = vand.u32 2147483648, %v9161_v53 }
 0x4f6   : > { %vm3416_vm10 = vweird.f32 %v10648_v0  ;;  %v3428_v60 = vmul.f32 %v10690_v34, %v3427_v28  ;;  %v3449_v56 = vand.u32 2147483647, %v9161_v53  ;;  %v3471_v46 = vmul.f32 %v10760_v14, %v9167_v63 }
 0x4f7   : > { %v10806_v27 = vpop.eup %6006  ;;  %v10810_v38 = vsel %vm10727_vm2, %v3377_v33, %v3373_v10  ;;  %v3414_v42 = vadd.f32 %v10648_v0, %v3413_v61  ;;  %v3437_v58 = vor.u32 1.1754944e-38, %v3436_v7  ;;  %6010 = vrcp.f32 %v9179_v45  ;;  %vm10843_vm2 = vmor %vm3415_vm5, %vm3416_vm10 }
 0x4f8   : > { %v10816_v25 = vsel %vm10737_vm4, %v3392_v20, %v3388_v16  ;;  %vm10826_vm12 = vcmp.eq.f32.partialorder %v3434_v39, 8.507059e+37  ;;  %v3443_v2 = vmul.f32 %v10706_v3, %v3442_v40  ;;  %vm3445_vm14 = vweird.f32 %v9161_v53 }
 0x4f9   : > { %v3457_v61 = vsub.f32 1.0, %v3456_v21  ;;  %v10832_v6 = vpop.eup %6008  ;;  %v3403_v20 = vsel %vm10822_vm3, %v10632_v43, %v3399_v54  ;;  %vm3431_vm0 = vweird.f32 %v10690_v34  ;;  %v3452_v5 = vor.u32 1.1754944e-38, %v3451_v12 }
 0x4fa   : > { %v3464_v7 = vand.u32 2147483647, %v9164_v51  ;;  %v3429_v50 = vadd.f32 %v10690_v34, %v3428_v60  ;;  %vm3446_vm4 = vweird.f32 %v10706_v3  ;;  %vm10849_vm6 = vcmp.eq.f32.partialorder %v3449_v56, 8.507059e+37  ;;  %vm10877_vm5 = vmor %vm3430_vm15, %vm3431_vm0 }
 0x4fb   : > { %vm3460_vm11 = vweird.f32 %v9164_v51  ;;  %v3472_v43 = vsub.f32 1.0, %v3471_v46  ;;  %v3486_v40 = vmul.f32 %v10806_v27, %v9173_v11  ;;  %v3418_v18 = vsel %vm10843_vm2, %v10648_v0, %v3414_v42  ;;  %vm10900_vm1 = vmor %vm3445_vm14, %vm3446_vm4 }
 0x4fc   : > { %v3466_v21 = vand.u32 2147483648, %v9164_v51  ;;  %v3479_v16 = vand.u32 2147483647, %v9167_v63  ;;  %6012 = vrcp.f32 %v9185_v59  ;;  %v3444_v54 = vadd.f32 %v10706_v3, %v3443_v2 }
 0x4fd   : > { %v3458_v12 = vmul.f32 %v10748_v36, %v3457_v61  ;;  %v3501_v60 = vmul.f32 %v10832_v6, %v9176_v37  ;;  %6014 = vrcp.f32 %v9188_v35  ;;  %v10867_v56 = vpop.eup %6010  ;;  %v10871_v0 = vsel %vm10784_vm8, %v3407_v23, %v3403_v20 }
 0x4fe   : > { %vm3475_vm9 = vweird.f32 %v9167_v63  ;;  %v3481_v42 = vand.u32 2147483648, %v9167_v63  ;;  %6016 = vrcp.f32 %v9191_v55  ;;  %v10886_v28 = vsel %vm10795_vm13, %v3422_v48, %v3418_v18 }
 0x4ff   : > { %15068 = vst [vmem:[#allocation161_spill] sm:$0xff] %v10886_v28  ;;  %v3433_v23 = vsel %vm10877_vm5, %v10690_v34, %v3429_v50  ;;  %vm10891_vm7 = vcmp.eq.f32.partialorder %v3464_v7, 8.507059e+37  ;;  %v3473_v15 = vmul.f32 %v10760_v14, %v3472_v43  ;;  %v3487_v2 = vsub.f32 1.0, %v3486_v40 }
 0x500   : > { %vm3461_vm8 = vweird.f32 %v10748_v36  ;;  %v3467_v48 = vor.u32 1.1754944e-38, %v3466_v21  ;;  %v3494_v34 = vand.u32 2147483647, %v9173_v11  ;;  %v3496_v57 = vand.u32 2147483648, %v9173_v11 }
 0x501   : > { %v3448_v20 = vsel %vm10900_vm1, %v10706_v3, %v3444_v54  ;;  %v3459_v7 = vadd.f32 %v10748_v36, %v3458_v12  ;;  %vm10911_vm13 = vcmp.eq.f32.partialorder %v3479_v16, 8.507059e+37  ;;  %v3502_v53 = vsub.f32 1.0, %v3501_v60 }
 0x502   : > { %v3516_v50 = vmul.f32 %v10867_v56, %v9179_v45  ;;  %v10917_v43 = vpop.eup %6012  ;;  %v10921_v40 = vsel %vm10826_vm12, %v3437_v58, %v3433_v23  ;;  %v3482_v18 = vor.u32 1.1754944e-38, %v3481_v42  ;;  %vm3490_vm15 = vweird.f32 %v9173_v11  ;;  %vm10942_vm12 = vmor %vm3460_vm11, %vm3461_vm8 }
 0x503   : > { %15075 = vst [vmem:[#allocation162_spill] sm:$0xff] %v10921_v40  ;;  %v3509_v3 = vand.u32 2147483647, %v9176_v37  ;;  %v10925_v21 = vpop.eup %6014  ;;  %v3474_v16 = vadd.f32 %v10760_v14, %v3473_v15  ;;  %vm3476_vm10 = vweird.f32 %v10760_v14  ;;  %v3488_v54 = vmul.f32 %v10806_v27, %v3487_v2  ;;  %v15093_v2 = vld [vmem:[#allocation168_spill] sm:$0xff] }
 0x504   : > { %vm3505_vm3 = vweird.f32 %v9176_v37  ;;  %6018 = vrcp.f32 %v9197_v17  ;;  %v10932_v33 = vpop.eup %6016  ;;  %v10936_v58 = vsel %vm10849_vm6, %v3452_v5, %v3448_v20  ;;  %v3497_v60 = vor.u32 1.1754944e-38, %v3496_v57  ;;  %vm10961_vm0 = vmor %vm3475_vm9, %vm3476_vm10 }
 0x505   : > { %15076 = vst [vmem:[#allocation163_spill] sm:$0xff] %v10936_v58  ;;  %v3511_v46 = vand.u32 2147483648, %v9176_v37  ;;  %v3524_v42 = vand.u32 2147483647, %v9179_v45  ;;  %v3463_v23 = vsel %vm10942_vm12, %v10748_v36, %v3459_v7  ;;  %vm10951_vm14 = vcmp.eq.f32.partialorder %v3494_v34, 8.507059e+37  ;;  %v15168_v58 = vld [vmem:[#allocation208_spill] sm:$0xff] }
 0x506   : > { %v3503_v39 = vmul.f32 %v10832_v6, %v3502_v53  ;;  %v3517_v51 = vsub.f32 1.0, %v3516_v50  ;;  %v3526_v15 = vand.u32 2147483648, %v9179_v45  ;;  %vm3491_vm2 = vweird.f32 %v10806_v27 }
 0x507   : > { %v3531_v36 = vmul.f32 %v10917_v43, %v9185_v59  ;;  %v3541_v61 = vand.u32 2147483648, %v9185_v59  ;;  %v3546_v34 = vmul.f32 %v10925_v21, %v9188_v35  ;;  %v3478_v57 = vsel %vm10961_vm0, %v10760_v14, %v3474_v16  ;;  %vm11001_vm5 = vmor %vm3490_vm15, %vm3491_vm2 }
 0x508   : > { %v3489_v63 = vadd.f32 %v10806_v27, %v3488_v54  ;;  %vm10975_vm4 = vcmp.eq.f32.partialorder %v3509_v3, 8.507059e+37  ;;  %v3561_v7 = vmul.f32 %v10932_v33, %v9191_v55  ;;  %6020 = vrcp.f32 %v9200_v31 }
 0x509   : > { %v10984_v53 = vsel %vm10891_vm7, %v3467_v48, %v3463_v23  ;;  %v3512_v50 = vor.u32 1.1754944e-38, %v3511_v46  ;;  %vm3520_vm6 = vweird.f32 %v9179_v45  ;;  %6022 = vrcp.f32 %v9203_v52 }
 0x50a   : > { %15085 = vst [vmem:[#allocation164_spill] sm:$0xff] %v10984_v53  ;;  %v10988_v14 = vpop.eup %6018  ;;  %v3504_v3 = vadd.f32 %v10832_v6, %v3503_v39  ;;  %vm3506_vm11 = vweird.f32 %v10832_v6  ;;  %v3518_v16 = vmul.f32 %v10867_v56, %v3517_v51  ;;  %v3527_v54 = vor.u32 1.1754944e-38, %v3526_v15 }
 0x50b   : > { %v10995_v12 = vsel %vm10911_vm13, %v3482_v18, %v3478_v57  ;;  %v3532_v48 = vsub.f32 1.0, %v3531_v36  ;;  %v3539_v46 = vand.u32 2147483647, %v9185_v59  ;;  %v3547_v23 = vsub.f32 1.0, %v3546_v34  ;;  %vm11019_vm1 = vmor %vm3505_vm3, %vm3506_vm11 }
 0x50c   : > { %15086 = vst [vmem:[#allocation165_spill] sm:$0xff] %v10995_v12  ;;  %v3493_v39 = vsel %vm11001_vm5, %v10806_v27, %v3489_v63  ;;  %vm11009_vm9 = vcmp.eq.f32.partialorder %v3524_v42, 8.507059e+37  ;;  %vm3535_vm7 = vweird.f32 %v9185_v59  ;;  %v11014_v18 = vor.u32 1.1754944e-38, %v3541_v61 }
 0x50d   : > { %v3556_v11 = vand.u32 2147483648, %v9188_v35  ;;  %v3562_v51 = vsub.f32 1.0, %v3561_v7  ;;  %vm3550_vm8 = vweird.f32 %v9188_v35  ;;  %v3554_v27 = vand.u32 2147483647, %v9188_v35 }
 0x50e   : > { %v3576_v42 = vmul.f32 %v10988_v14, %v9197_v17  ;;  %6024 = vrcp.f32 %v15093_v2  ;;  %v11028_v36 = vpop.eup %6020  ;;  %v3508_v61 = vsel %vm11019_vm1, %v10832_v6, %v3504_v3  ;;  %v3519_v37 = vadd.f32 %v10867_v56, %v3518_v16  ;;  %v15095_v16 = vld [vmem:[#allocation169_spill] sm:$0xff] }
 0x50f   : > { %vm3521_vm13 = vweird.f32 %v10867_v56  ;;  %vm3565_vm15 = vweird.f32 %v9191_v55  ;;  %v11036_v34 = vpop.eup %6022  ;;  %v11040_v57 = vsel %vm10951_vm14, %v3497_v60, %v3493_v39  ;;  %v3533_v63 = vmul.f32 %v10917_v43, %v3532_v48  ;;  %v15103_v39 = vld [vmem:[#allocation170_spill] sm:$0xff] }
 0x510   : > { %15094 = vst [vmem:[#allocation166_spill] sm:$0xff] %v11040_v57  ;;  %v3548_v7 = vmul.f32 %v10925_v21, %v3547_v23  ;;  %v3569_v19 = vand.u32 2147483647, %v9191_v55  ;;  %v3557_v15 = vor.u32 1.1754944e-38, %v3556_v11  ;;  %v3563_v6 = vmul.f32 %v10932_v33, %v3562_v51  ;;  %vm11054_vm10 = vmor %vm3520_vm6, %vm3521_vm13 }
 0x511   : > { %v3571_v3 = vand.u32 2147483648, %v9191_v55  ;;  %6026 = vrcp.f32 %v15095_v16  ;;  %v11050_v12 = vsel %vm10975_vm4, %v3512_v50, %v3508_v61  ;;  %vm3536_vm3 = vweird.f32 %v10917_v43 }
 0x512   : > { %15096 = vst [vmem:[#allocation167_spill] sm:$0xff] %v11050_v12  ;;  %vm11059_vm12 = vcmp.eq.f32.partialorder %v3539_v46, 8.507059e+37  ;;  %vm11063_vm14 = vcmp.eq.f32.partialorder %v3554_v27, 8.507059e+37  ;;  %v3577_v23 = vsub.f32 1.0, %v3576_v42  ;;  %v3591_v20 = vmul.f32 %v11028_v36, %v9200_v31  ;;  %vm11096_vm6 = vmor %vm3535_vm7, %vm3536_vm3 }
 0x513   : > { %v3523_v45 = vsel %vm11054_vm10, %v10867_v56, %v3519_v37  ;;  %v3586_v50 = vand.u32 2147483648, %v9197_v17  ;;  %v3606_v46 = vmul.f32 %v11036_v34, %v9203_v52  ;;  %6028 = vrcp.f32 %v15103_v39 }
 0x514   : > { %v11076_v11 = vpop.eup %6024  ;;  %v3534_v51 = vadd.f32 %v10917_v43, %v3533_v63  ;;  %v3549_v27 = vadd.f32 %v10925_v21, %v3548_v7  ;;  %vm3551_vm0 = vweird.f32 %v10925_v21  ;;  %v3584_v42 = vand.u32 2147483647, %v9197_v17 }
 0x515   : > { %v3564_v61 = vadd.f32 %v10932_v33, %v3563_v6  ;;  %vm3566_vm2 = vweird.f32 %v10932_v33  ;;  %vm11084_vm4 = vcmp.eq.f32.partialorder %v3569_v19, 8.507059e+37  ;;  %v3572_v37 = vor.u32 1.1754944e-38, %v3571_v3  ;;  %vm11106_vm5 = vmor %vm3550_vm8, %vm3551_vm0 }
 0x516   : > { %v11090_v60 = vsel %vm11009_vm9, %v3527_v54, %v3523_v45  ;;  %v3578_v7 = vmul.f32 %v10988_v14, %v3577_v23  ;;  %vm3580_vm11 = vweird.f32 %v9197_v17  ;;  %v3592_v19 = vsub.f32 1.0, %v3591_v20  ;;  %vm11123_vm9 = vmor %vm3565_vm15, %vm3566_vm2  ;;  %v15116_v54 = vld [vmem:[#allocation172_spill] sm:$0xff] }
 0x517   : > { %15106 = vst [vmem:[#allocation168_spill] sm:$0xff] %v11090_v60  ;;  %v11102_v6 = vpop.eup %6026  ;;  %v3587_v10 = vor.u32 1.1754944e-38, %v3586_v50  ;;  %v3599_v59 = vand.u32 2147483647, %v9200_v31  ;;  %v3607_v3 = vsub.f32 1.0, %v3606_v46  ;;  %v3621_v45 = vmul.f32 %v11076_v11, %v15093_v2  ;;  %v15115_v46 = vld [vmem:[#allocation171_spill] sm:$0xff] }
 0x518   : > { %v3538_v23 = vsel %vm11096_vm6, %v10917_v43, %v3534_v51  ;;  %v3553_v20 = vsel %vm11106_vm5, %v10925_v21, %v3549_v27  ;;  %vm11127_vm7 = vcmp.eq.f32.partialorder %v3584_v42, 8.507059e+37  ;;  %vm3595_vm1 = vweird.f32 %v9200_v31 }
 0x519   : > { %v3601_v43 = vand.u32 2147483648, %v9200_v31  ;;  %6030 = vrcp.f32 %v15115_v46  ;;  %v11134_v51 = vpop.eup %6028  ;;  %v3568_v55 = vsel %vm11123_vm9, %v10932_v33, %v3564_v61  ;;  %vm3581_vm8 = vweird.f32 %v10988_v14 }
 0x51a   : > { %vm3610_vm13 = vweird.f32 %v9203_v52  ;;  %v3614_v21 = vand.u32 2147483647, %v9203_v52  ;;  %v3579_v27 = vadd.f32 %v10988_v14, %v3578_v7  ;;  %v3593_v42 = vmul.f32 %v11028_v36, %v3592_v19  ;;  %vm11172_vm10 = vmor %vm3580_vm11, %vm3581_vm8 }
 0x51b   : > { %v3636_v63 = vmul.f32 %v11102_v6, %v15095_v16  ;;  %6032 = vrcp.f32 %v15116_v54  ;;  %v11150_v35 = vsel %vm11059_vm12, %v11014_v18, %v3538_v23  ;;  %v11154_v33 = vsel %vm11063_vm14, %v3557_v15, %v3553_v20 }
 0x51c   : > { %15117 = vst [vmem:[#allocation169_spill] sm:$0xff] %v11150_v35  ;;  %v3608_v61 = vmul.f32 %v11036_v34, %v3607_v3  ;;  %v3622_v60 = vsub.f32 1.0, %v3621_v45  ;;  %vm11157_vm15 = vcmp.eq.f32.partialorder %v3599_v59, 8.507059e+37  ;;  %v3602_v19 = vor.u32 1.1754944e-38, %v3601_v43  ;;  %v15126_v45 = vld [vmem:[#allocation173_spill] sm:$0xff] }
 0x51d   : > { %15118 = vst [vmem:[#allocation170_spill] sm:$0xff] %v11154_v33  ;;  %v3616_v12 = vand.u32 2147483648, %v9203_v52  ;;  %v3651_v57 = vmul.f32 %v11134_v51, %v15103_v39  ;;  %v11166_v18 = vsel %vm11084_vm4, %v3572_v37, %v3568_v55  ;;  %vm3596_vm3 = vweird.f32 %v11028_v36  ;;  %v15127_v43 = vld [vmem:[#allocation201_spill] sm:$0xff] }
 0x51e   : > { %15121 = vst [vmem:[#allocation171_spill] sm:$0xff] %v11166_v18  ;;  %vm11177_vm12 = vcmp.eq.f32.partialorder %v3614_v21, 8.507059e+37  ;;  %vm3625_vm14 = vweird.f32 %v15093_v2  ;;  %v3629_v48 = vand.u32 2147483647, %v15093_v2  ;;  %v3631_v56 = vand.u32 2147483648, %v15093_v2  ;;  %vm11207_vm2 = vmor %vm3595_vm1, %vm3596_vm3 }
 0x51f   : > { %v11184_v37 = vpop.eup %6030  ;;  %v3583_v17 = vsel %vm11172_vm10, %v10988_v14, %v3579_v27  ;;  %v3594_v59 = vadd.f32 %v11028_v36, %v3593_v42  ;;  %v3637_v3 = vsub.f32 1.0, %v3636_v63  ;;  %6034 = vrcp.f32 %v15126_v45 }
 0x520   : > { %v3609_v23 = vadd.f32 %v11036_v34, %v3608_v61  ;;  %vm3611_vm0 = vweird.f32 %v11036_v34  ;;  %v3623_v20 = vmul.f32 %v11076_v11, %v3622_v60  ;;  %6036 = vrcp.f32 %v15127_v43 }
 0x521   : > { %v11195_v55 = vpop.eup %6032  ;;  %v3617_v21 = vor.u32 1.1754944e-38, %v3616_v12  ;;  %v3644_v18 = vand.u32 2147483647, %v15095_v16  ;;  %v3646_v14 = vand.u32 2147483648, %v15095_v16  ;;  %v3652_v27 = vsub.f32 1.0, %v3651_v57  ;;  %vm11225_vm11 = vmor %vm3610_vm13, %vm3611_vm0 }
 0x522   : > { %v11201_v42 = vsel %vm11127_vm7, %v3587_v10, %v3583_v17  ;;  %vm11211_vm4 = vcmp.eq.f32.partialorder %v3629_v48, 8.507059e+37  ;;  %v3632_v12 = vor.u32 1.1754944e-38, %v3631_v56  ;;  %vm3640_vm6 = vweird.f32 %v15095_v16  ;;  %v15135_v48 = vld [vmem:[#allocation202_spill] sm:$0xff] }
 0x523   : > { %15128 = vst [vmem:[#allocation172_spill] sm:$0xff] %v11201_v42  ;;  %v3666_v57 = vmul.f32 %v11184_v37, %v15115_v46  ;;  %v3598_v10 = vsel %vm11207_vm2, %v11028_v36, %v3594_v59  ;;  %vm3626_vm5 = vweird.f32 %v11076_v11  ;;  %v3638_v50 = vmul.f32 %v11102_v6, %v3637_v3  ;;  %v15139_v42 = vld [vmem:[#allocation203_spill] sm:$0xff] }
 0x524   : > { %vm3655_vm9 = vweird.f32 %v15103_v39  ;;  %v3659_v61 = vand.u32 2147483647, %v15103_v39  ;;  %v3613_v36 = vsel %vm11225_vm11, %v11036_v34, %v3609_v23  ;;  %v3624_v15 = vadd.f32 %v11076_v11, %v3623_v20  ;;  %vm11264_vm1 = vmor %vm3625_vm14, %vm3626_vm5 }
 0x525   : > { %v3681_v52 = vmul.f32 %v11195_v55, %v15116_v54  ;;  %6038 = vrcp.f32 %v15135_v48  ;;  %v11240_v56 = vpop.eup %6034  ;;  %vm11242_vm7 = vcmp.eq.f32.partialorder %v3644_v18, 8.507059e+37  ;;  %v3647_v59 = vor.u32 1.1754944e-38, %v3646_v14 }
 0x526   : > { %v3653_v3 = vmul.f32 %v11134_v51, %v3652_v27  ;;  %v3661_v60 = vand.u32 2147483648, %v15103_v39  ;;  %v11248_v31 = vpop.eup %6036  ;;  %v11252_v34 = vsel %vm11157_vm15, %v3602_v19, %v3598_v10  ;;  %v3667_v23 = vsub.f32 1.0, %v3666_v57  ;;  %v15145_v27 = vld [vmem:[#allocation204_spill] sm:$0xff] }
 0x527   : > { %15138 = vst [vmem:[#allocation173_spill] sm:$0xff] %v11252_v34  ;;  %v3674_v20 = vand.u32 2147483647, %v15115_v46  ;;  %6040 = vrcp.f32 %v15139_v42  ;;  %v11258_v18 = vsel %vm11177_vm12, %v3617_v21, %v3613_v36  ;;  %v3639_v7 = vadd.f32 %v11102_v6, %v3638_v50 }
 0x528   : > { %15140 = vst [vmem:[#allocation201_spill] sm:$0xff] %v11258_v18  ;;  %vm3641_vm8 = vweird.f32 %v11102_v6  ;;  %vm11270_vm13 = vcmp.eq.f32.partialorder %v3659_v61, 8.507059e+37  ;;  %6042 = vrcp.f32 %v15145_v27  ;;  %v3628_v5 = vsel %vm11264_vm1, %v11076_v11, %v3624_v15 }
 0x529   : > { %vm3670_vm15 = vweird.f32 %v15115_v46  ;;  %v3676_v2 = vand.u32 2147483648, %v15115_v46  ;;  %v3682_v21 = vsub.f32 1.0, %v3681_v52  ;;  %v3696_v57 = vmul.f32 %v11240_v56, %v15126_v45  ;;  %vm11291_vm3 = vmor %vm3640_vm6, %vm3641_vm8 }
 0x52a   : > { %v3654_v10 = vadd.f32 %v11134_v51, %v3653_v3  ;;  %vm3656_vm10 = vweird.f32 %v11134_v51  ;;  %v3691_v50 = vand.u32 2147483648, %v15116_v54  ;;  %v3711_v61 = vmul.f32 %v11248_v31, %v15127_v43 }
 0x52b   : > { %v11287_v36 = vpop.eup %6038  ;;  %v3662_v15 = vor.u32 1.1754944e-38, %v3661_v60  ;;  %v3668_v52 = vmul.f32 %v11184_v37, %v3667_v23  ;;  %vm3685_vm12 = vweird.f32 %v15116_v54  ;;  %v3689_v3 = vand.u32 2147483647, %v15116_v54  ;;  %vm11311_vm0 = vmor %vm3655_vm9, %vm3656_vm10  ;;  %v15160_v60 = vld [vmem:[#allocation206_spill] sm:$0xff] }
 0x52c   : > { %v11300_v14 = vsel %vm11211_vm4, %v3632_v12, %v3628_v5  ;;  %v3643_v18 = vsel %vm11291_vm3, %v11102_v6, %v3639_v7  ;;  %vm3671_vm14 = vweird.f32 %v11184_v37  ;;  %v3706_v16 = vand.u32 2147483648, %v15126_v45  ;;  %v15151_v5 = vld [vmem:[#allocation205_spill] sm:$0xff] }
 0x52d   : > { %15148 = vst [vmem:[#allocation202_spill] sm:$0xff] %v11300_v14  ;;  %v11307_v34 = vpop.eup %6040  ;;  %v3677_v23 = vor.u32 1.1754944e-38, %v3676_v2  ;;  %v3683_v63 = vmul.f32 %v11195_v55, %v3682_v21  ;;  %v3697_v12 = vsub.f32 1.0, %v3696_v57  ;;  %6044 = vrcp.f32 %v15151_v5  ;;  %vm11359_vm9 = vmor %vm3670_vm15, %vm3671_vm14 }
 0x52e   : > { %v11317_v11 = vpop.eup %6042  ;;  %v3658_v6 = vsel %vm11311_vm0, %v11134_v51, %v3654_v10  ;;  %vm11322_vm2 = vcmp.eq.f32.partialorder %v3674_v20, 8.507059e+37  ;;  %v3692_v39 = vor.u32 1.1754944e-38, %v3691_v50  ;;  %v3712_v14 = vsub.f32 1.0, %v3711_v61 }
 0x52f   : > { %v3726_v2 = vmul.f32 %v11287_v36, %v15135_v48  ;;  %v11330_v21 = vsel %vm11242_vm7, %v3647_v59, %v3643_v18  ;;  %v3669_v57 = vadd.f32 %v11184_v37, %v3668_v52  ;;  %vm11333_vm4 = vcmp.eq.f32.partialorder %v3689_v3, 8.507059e+37 }
 0x530   : > { %15154 = vst [vmem:[#allocation203_spill] sm:$0xff] %v11330_v21  ;;  %vm3700_vm6 = vweird.f32 %v15126_v45  ;;  %v3704_v51 = vand.u32 2147483647, %v15126_v45  ;;  %v3721_v20 = vand.u32 2147483648, %v15127_v43  ;;  %vm3686_vm11 = vweird.f32 %v11195_v55 }
 0x531   : > { %v11341_v10 = vor.u32 1.1754944e-38, %v3706_v16  ;;  %vm3715_vm5 = vweird.f32 %v15127_v43  ;;  %v3719_v17 = vand.u32 2147483647, %v15127_v43  ;;  %v3741_v59 = vmul.f32 %v11307_v34, %v15139_v42  ;;  %vm11377_vm7 = vmor %vm3685_vm12, %vm3686_vm11 }
 0x532   : > { %v11349_v18 = vsel %vm11270_vm13, %v3662_v15, %v3658_v6  ;;  %v3684_v50 = vadd.f32 %v11195_v55, %v3683_v63  ;;  %v3698_v61 = vmul.f32 %v11240_v56, %v3697_v12  ;;  %v3756_v52 = vmul.f32 %v11317_v11, %v15145_v27 }
 0x533   : > { %15157 = vst [vmem:[#allocation204_spill] sm:$0xff] %v11349_v18  ;;  %v3713_v16 = vmul.f32 %v11248_v31, %v3712_v14  ;;  %v3727_v19 = vsub.f32 1.0, %v3726_v2  ;;  %v3734_v15 = vand.u32 2147483647, %v15135_v48  ;;  %6046 = vrcp.f32 %v15160_v60  ;;  %v11366_v63 = vpop.eup %6044  ;;  %v15161_v18 = vld [vmem:[#allocation207_spill] sm:$0xff] }
 0x534   : > { %v3673_v12 = vsel %vm11359_vm9, %v11184_v37, %v3669_v57  ;;  %v3722_v6 = vor.u32 1.1754944e-38, %v3721_v20  ;;  %v3736_v46 = vand.u32 2147483648, %v15135_v48  ;;  %6048 = vrcp.f32 %v15161_v18 }
 0x535   : > { %vm3701_vm1 = vweird.f32 %v11240_v56  ;;  %vm11382_vm8 = vcmp.eq.f32.partialorder %v3704_v51, 8.507059e+37  ;;  %vm3716_vm13 = vweird.f32 %v11248_v31  ;;  %vm11387_vm15 = vcmp.eq.f32.partialorder %v3719_v17, 8.507059e+37 }
 0x536   : > { %vm3730_vm10 = vweird.f32 %v15135_v48  ;;  %v3742_v57 = vsub.f32 1.0, %v3741_v59  ;;  %v3749_v54 = vand.u32 2147483647, %v15139_v42  ;;  %v3688_v20 = vsel %vm11377_vm7, %v11195_v55, %v3684_v50  ;;  %v15170_v50 = vld [vmem:[#allocation176_spill] sm:$0xff]  ;;  %vm11419_vm3 = vmor %vm3700_vm6, %vm3701_vm1 }
 0x537   : > { %v3699_v51 = vadd.f32 %v11240_v56, %v3698_v61  ;;  %v3751_v3 = vand.u32 2147483648, %v15139_v42  ;;  %v3757_v21 = vsub.f32 1.0, %v3756_v52  ;;  %v3714_v35 = vadd.f32 %v11248_v31, %v3713_v16 }
 0x538   : > { %v3728_v17 = vmul.f32 %v11287_v36, %v3727_v19  ;;  %v3771_v53 = vmul.f32 %v11366_v63, %v15151_v5  ;;  %6050 = vrcp.f32 %v15168_v58  ;;  %v11405_v59 = vsel %vm11322_vm2, %v3677_v23, %v3673_v12  ;;  %vm11436_vm2 = vmor %vm3715_vm5, %vm3716_vm13 }
 0x539   : > { %15169 = vst [vmem:[#allocation205_spill] sm:$0xff] %v11405_v59  ;;  %v3737_v14 = vor.u32 1.1754944e-38, %v3736_v46  ;;  %v3764_v55 = vand.u32 2147483647, %v15145_v27  ;;  %6052 = vrcp.f32 %v15170_v50  ;;  %v11409_v61 = vpop.eup %6046  ;;  %v11413_v52 = vsel %vm11333_vm4, %v3692_v39, %v3688_v20 }
 0x53a   : > { %15171 = vst [vmem:[#allocation206_spill] sm:$0xff] %v11413_v52  ;;  %vm11423_vm12 = vcmp.eq.f32.partialorder %v3734_v15, 8.507059e+37  ;;  %v3743_v7 = vmul.f32 %v11307_v34, %v3742_v57  ;;  %vm3745_vm14 = vweird.f32 %v15139_v42  ;;  %vm3760_vm0 = vweird.f32 %v15145_v27  ;;  %v11430_v33 = vpop.eup %6048 }
 0x53b   : > { %vm3731_vm4 = vweird.f32 %v11287_v36  ;;  %v3752_v39 = vor.u32 1.1754944e-38, %v3751_v3  ;;  %v3758_v19 = vmul.f32 %v11317_v11, %v3757_v21  ;;  %v3766_v15 = vand.u32 2147483648, %v15145_v27 }
 0x53c   : > { %v3703_v12 = vsel %vm11419_vm3, %v11240_v56, %v3699_v51  ;;  %v3718_v46 = vsel %vm11436_vm2, %v11248_v31, %v3714_v35  ;;  %v3729_v43 = vadd.f32 %v11287_v36, %v3728_v17  ;;  %vm11450_vm6 = vcmp.eq.f32.partialorder %v3749_v54, 8.507059e+37  ;;  %v15182_v31 = vld [vmem:[#allocation197_spill] sm:$0xff]  ;;  %vm11485_vm7 = vmor %vm3730_vm10, %vm3731_vm4 }
 0x53d   : > { %v3772_v20 = vsub.f32 1.0, %v3771_v53  ;;  %vm11454_vm11 = vcmp.eq.f32.partialorder %v3764_v55, 8.507059e+37  ;;  %v3779_v21 = vand.u32 2147483647, %v15151_v5  ;;  %v3781_v16 = vand.u32 2147483648, %v15151_v5 }
 0x53e   : > { %v3786_v56 = vmul.f32 %v11409_v61, %v15160_v60  ;;  %v11462_v51 = vpop.eup %6050  ;;  %v3744_v35 = vadd.f32 %v11307_v34, %v3743_v7  ;;  %vm3746_vm5 = vweird.f32 %v11307_v34  ;;  %vm3775_vm9 = vweird.f32 %v15151_v5 }
 0x53f   : > { %v3801_v53 = vmul.f32 %v11430_v33, %v15161_v18  ;;  %6054 = vrcp.f32 %v15182_v31  ;;  %v11470_v54 = vpop.eup %6052  ;;  %v11475_v17 = vsel %vm11382_vm8, %v11341_v10, %v3703_v12  ;;  %v11479_v55 = vsel %vm11387_vm15, %v3722_v6, %v3718_v46  ;;  %vm11498_vm8 = vmor %vm3745_vm14, %vm3746_vm5 }
 0x540   : > { %15183 = vst [vmem:[#allocation207_spill] sm:$0xff] %v11475_v17  ;;  %v3759_v45 = vadd.f32 %v11317_v11, %v3758_v19  ;;  %vm3761_vm1 = vweird.f32 %v11317_v11  ;;  %v3733_v10 = vsel %vm11485_vm7, %v11287_v36, %v3729_v43  ;;  %v3767_v2 = vor.u32 1.1754944e-38, %v3766_v15  ;;  %v15198_v15 = vld [vmem:[#allocation179_spill] sm:$0xff] }
 0x541   : > { %15184 = vst [vmem:[#allocation208_spill] sm:$0xff] %v11479_v55  ;;  %v3773_v6 = vmul.f32 %v11366_v63, %v3772_v20  ;;  %v3796_v37 = vand.u32 2147483648, %v15160_v60  ;;  %v3782_v12 = vor.u32 1.1754944e-38, %v3781_v16  ;;  %v3787_v46 = vsub.f32 1.0, %v3786_v56  ;;  %v15189_v55 = vld [vmem:[#allocation177_spill] sm:$0xff]  ;;  %vm11510_vm13 = vmor %vm3760_vm0, %vm3761_vm1  ;;  %v15194_v16 = vld [vmem:[#allocation178_spill] sm:$0xff] }
 0x542   : > { %v3816_v19 = vmul.f32 %v11462_v51, %v15168_v58  ;;  %6056 = vrcp.f32 %v15189_v55  ;;  %v3748_v36 = vsel %vm11498_vm8, %v11307_v34, %v3744_v35  ;;  %vm11514_vm15 = vcmp.eq.f32.partialorder %v3779_v21, 8.507059e+37 }
 0x543   : > { %v3802_v43 = vsub.f32 1.0, %v3801_v53  ;;  %v3831_v20 = vmul.f32 %v11470_v54, %v15170_v50  ;;  %6058 = vrcp.f32 %v15194_v16  ;;  %v11523_v56 = vsel %vm11423_vm12, %v3737_v14, %v3733_v10 }
 0x544   : > { %15195 = vst [vmem:[#allocation176_spill] sm:$0xff] %v11523_v56  ;;  %v3763_v34 = vsel %vm11510_vm13, %v11317_v11, %v3759_v45  ;;  %vm3790_vm10 = vweird.f32 %v15160_v60  ;;  %v3794_v27 = vand.u32 2147483647, %v15160_v60  ;;  %v3811_v21 = vand.u32 2147483648, %v15161_v18 }
 0x545   : > { %v11531_v35 = vpop.eup %6054  ;;  %v3774_v53 = vadd.f32 %v11366_v63, %v3773_v6  ;;  %vm3776_vm3 = vweird.f32 %v11366_v63  ;;  %v3797_v7 = vor.u32 1.1754944e-38, %v3796_v37  ;;  %v3809_v14 = vand.u32 2147483647, %v15161_v18 }
 0x546   : > { %v11538_v23 = vsel %vm11450_vm6, %v3752_v39, %v3748_v36  ;;  %v3788_v11 = vmul.f32 %v11409_v61, %v3787_v46  ;;  %vm3805_vm12 = vweird.f32 %v15161_v18  ;;  %v3817_v45 = vsub.f32 1.0, %v3816_v19  ;;  %vm11552_vm14 = vmor %vm3775_vm9, %vm3776_vm3  ;;  %v15205_v39 = vld [vmem:[#allocation198_spill] sm:$0xff] }
 0x547   : > { %15196 = vst [vmem:[#allocation197_spill] sm:$0xff] %v11538_v23  ;;  %v11544_v10 = vsel %vm11454_vm11, %v3767_v2, %v3763_v34  ;;  %v3803_v6 = vmul.f32 %v11430_v33, %v3802_v43  ;;  %v3832_v48 = vsub.f32 1.0, %v3831_v20  ;;  %6060 = vrcp.f32 %v15198_v15 }
 0x548   : > { %15197 = vst [vmem:[#allocation177_spill] sm:$0xff] %v11544_v10  ;;  %v11548_v37 = vpop.eup %6056  ;;  %vm3791_vm0 = vweird.f32 %v11409_v61  ;;  %vm11557_vm2 = vcmp.eq.f32.partialorder %v3794_v27, 8.507059e+37  ;;  %v3812_v3 = vor.u32 1.1754944e-38, %v3811_v21  ;;  %vm3820_vm4 = vweird.f32 %v15168_v58 }
 0x549   : > { %v3824_v2 = vand.u32 2147483647, %v15168_v58  ;;  %v3846_v46 = vmul.f32 %v11531_v35, %v15182_v31  ;;  %v11565_v19 = vpop.eup %6058  ;;  %v3778_v5 = vsel %vm11552_vm14, %v11366_v63, %v3774_v53  ;;  %vm11570_vm6 = vcmp.eq.f32.partialorder %v3809_v14, 8.507059e+37  ;;  %vm11599_vm9 = vmor %vm3790_vm10, %vm3791_vm0 }
 0x54a   : > { %v3826_v43 = vand.u32 2147483648, %v15168_v58  ;;  %vm3835_vm11 = vweird.f32 %v15170_v50  ;;  %v3841_v20 = vand.u32 2147483648, %v15170_v50  ;;  %v3789_v34 = vadd.f32 %v11409_v61, %v3788_v11 }
 0x54b   : > { %vm3806_vm5 = vweird.f32 %v11430_v33  ;;  %v3818_v27 = vmul.f32 %v11462_v51, %v3817_v45  ;;  %v3839_v21 = vand.u32 2147483647, %v15170_v50  ;;  %v3804_v63 = vadd.f32 %v11430_v33, %v3803_v6  ;;  %v15207_v45 = vld [vmem:[#allocation180_spill] sm:$0xff] }
 0x54c   : > { %v3833_v53 = vmul.f32 %v11470_v54, %v3832_v48  ;;  %v3861_v14 = vmul.f32 %v11548_v37, %v15189_v55  ;;  %6062 = vrcp.f32 %v15205_v39  ;;  %v11588_v10 = vsel %vm11514_vm15, %v3782_v12, %v3778_v5  ;;  %vm11616_vm8 = vmor %vm3805_vm12, %vm3806_vm5 }
 0x54d   : > { %15206 = vst [vmem:[#allocation178_spill] sm:$0xff] %v11588_v10  ;;  %v3847_v11 = vsub.f32 1.0, %v3846_v46  ;;  %v3876_v23 = vmul.f32 %v11565_v19, %v15194_v16  ;;  %6064 = vrcp.f32 %v15207_v45  ;;  %v11593_v56 = vpop.eup %6060  ;;  %vm3821_vm7 = vweird.f32 %v11462_v51 }
 0x54e   : > { %vm11604_vm1 = vcmp.eq.f32.partialorder %v3824_v2, 8.507059e+37  ;;  %v3827_v42 = vor.u32 1.1754944e-38, %v3826_v43  ;;  %v3842_v48 = vor.u32 1.1754944e-38, %v3841_v20  ;;  %v3856_v46 = vand.u32 2147483648, %v15182_v31  ;;  %vm11646_vm3 = vmor %vm3820_vm4, %vm3821_vm7 }
 0x54f   : > { %v3793_v5 = vsel %vm11599_vm9, %v11409_v61, %v3789_v34  ;;  %v3819_v2 = vadd.f32 %v11462_v51, %v3818_v27  ;;  %vm11621_vm13 = vcmp.eq.f32.partialorder %v3839_v21, 8.507059e+37  ;;  %v3854_v43 = vand.u32 2147483647, %v15182_v31 }
 0x550   : > { %v3871_v20 = vand.u32 2147483648, %v15189_v55  ;;  %v3808_v61 = vsel %vm11616_vm8, %v11430_v33, %v3804_v63  ;;  %v3834_v18 = vadd.f32 %v11470_v54, %v3833_v53  ;;  %vm3836_vm15 = vweird.f32 %v11470_v54 }
 0x551   : > { %v3862_v34 = vsub.f32 1.0, %v3861_v14  ;;  %v3848_v6 = vmul.f32 %v11531_v35, %v3847_v11  ;;  %vm3850_vm10 = vweird.f32 %v15182_v31  ;;  %v3877_v27 = vsub.f32 1.0, %v3876_v23  ;;  %vm11665_vm14 = vmor %vm3835_vm11, %vm3836_vm15  ;;  %v15224_v11 = vld [vmem:[#allocation181_spill] sm:$0xff] }
 0x552   : > { %v3891_v21 = vmul.f32 %v11593_v56, %v15198_v15  ;;  %v11636_v17 = vpop.eup %6062  ;;  %v11640_v52 = vsel %vm11557_vm2, %v3797_v7, %v3793_v5  ;;  %v3857_v63 = vor.u32 1.1754944e-38, %v3856_v46  ;;  %vm3865_vm12 = vweird.f32 %v15189_v55 }
 0x553   : > { %15216 = vst [vmem:[#allocation179_spill] sm:$0xff] %v11640_v52  ;;  %v3869_v23 = vand.u32 2147483647, %v15189_v55  ;;  %v11652_v53 = vpop.eup %6064  ;;  %v11656_v57 = vsel %vm11570_vm6, %v3812_v3, %v3808_v61  ;;  %v3823_v7 = vsel %vm11646_vm3, %v11462_v51, %v3819_v2  ;;  %vm3851_vm0 = vweird.f32 %v11531_v35  ;;  %v15225_v2 = vld [vmem:[#allocation182_spill] sm:$0xff] }
 0x554   : > { %15219 = vst [vmem:[#allocation198_spill] sm:$0xff] %v11656_v57  ;;  %vm11670_vm2 = vcmp.eq.f32.partialorder %v3854_v43, 8.507059e+37  ;;  %v3872_v3 = vor.u32 1.1754944e-38, %v3871_v20  ;;  %vm3880_vm4 = vweird.f32 %v15194_v16  ;;  %v3838_v51 = vsel %vm11665_vm14, %v11470_v54, %v3834_v18  ;;  %v15228_v18 = vld [vmem:[#allocation183_spill] sm:$0xff]  ;;  %vm11709_vm5 = vmor %vm3850_vm10, %vm3851_vm0 }
 0x555   : > { %v3863_v36 = vmul.f32 %v11548_v37, %v3862_v34  ;;  %v3884_v50 = vand.u32 2147483647, %v15194_v16  ;;  %6066 = vrcp.f32 %v15224_v11  ;;  %v3849_v46 = vadd.f32 %v11531_v35, %v3848_v6 }
 0x556   : > { %v3878_v5 = vmul.f32 %v11565_v19, %v3877_v27  ;;  %v3892_v60 = vsub.f32 1.0, %v3891_v21  ;;  %6068 = vrcp.f32 %v15225_v2  ;;  %vm11684_vm6 = vcmp.eq.f32.partialorder %v3869_v23, 8.507059e+37 }
 0x557   : > { %v3886_v20 = vand.u32 2147483648, %v15194_v16  ;;  %v3906_v54 = vmul.f32 %v11636_v17, %v15205_v39  ;;  %v3921_v61 = vmul.f32 %v11652_v53, %v15207_v45  ;;  %6070 = vrcp.f32 %v15228_v18 }
 0x558   : > { %v11696_v34 = vsel %vm11604_vm1, %v3827_v42, %v3823_v7  ;;  %vm3866_vm11 = vweird.f32 %v11548_v37  ;;  %v3899_v6 = vand.u32 2147483647, %v15198_v15  ;;  %v3901_v27 = vand.u32 2147483648, %v15198_v15 }
 0x559   : > { %15229 = vst [vmem:[#allocation180_spill] sm:$0xff] %v11696_v34  ;;  %v11703_v21 = vsel %vm11621_vm13, %v3842_v48, %v3838_v51  ;;  %v3864_v12 = vadd.f32 %v11548_v37, %v3863_v36  ;;  %vm11714_vm9 = vcmp.eq.f32.partialorder %v3884_v50, 8.507059e+37  ;;  %vm3895_vm7 = vweird.f32 %v15198_v15  ;;  %v15235_v36 = vld [vmem:[#allocation184_spill] sm:$0xff]  ;;  %vm11734_vm8 = vmor %vm3865_vm12, %vm3866_vm11 }
 0x55a   : > { %15230 = vst [vmem:[#allocation181_spill] sm:$0xff] %v11703_v21  ;;  %v3853_v10 = vsel %vm11709_vm5, %v11531_v35, %v3849_v46  ;;  %v3879_v48 = vadd.f32 %v11565_v19, %v3878_v5  ;;  %vm3881_vm1 = vweird.f32 %v11565_v19  ;;  %v3893_v31 = vmul.f32 %v11593_v56, %v3892_v60 }
 0x55b   : > { %v11725_v23 = vpop.eup %6066  ;;  %v3887_v7 = vor.u32 1.1754944e-38, %v3886_v20  ;;  %v3907_v58 = vsub.f32 1.0, %v3906_v54  ;;  %v3922_v51 = vsub.f32 1.0, %v3921_v61  ;;  %6072 = vrcp.f32 %v15235_v36  ;;  %vm11758_vm10 = vmor %vm3880_vm4, %vm3881_vm1 }
 0x55c   : > { %v11728_v50 = vpop.eup %6068  ;;  %vm11738_vm13 = vcmp.eq.f32.partialorder %v3899_v6, 8.507059e+37  ;;  %v3902_v5 = vor.u32 1.1754944e-38, %v3901_v27  ;;  %vm3910_vm15 = vweird.f32 %v15205_v39  ;;  %v3914_v60 = vand.u32 2147483647, %v15205_v39 }
 0x55d   : > { %v3916_v20 = vand.u32 2147483648, %v15205_v39  ;;  %v11745_v54 = vpop.eup %6070  ;;  %v11749_v55 = vsel %vm11670_vm2, %v3857_v63, %v3853_v10  ;;  %v3868_v61 = vsel %vm11734_vm8, %v11548_v37, %v3864_v12  ;;  %vm3925_vm3 = vweird.f32 %v15207_v45  ;;  %v15243_v10 = vld [vmem:[#allocation185_spill] sm:$0xff] }
 0x55e   : > { %15240 = vst [vmem:[#allocation182_spill] sm:$0xff] %v11749_v55  ;;  %v3929_v27 = vand.u32 2147483647, %v15207_v45  ;;  %v3883_v63 = vsel %vm11758_vm10, %v11565_v19, %v3879_v48  ;;  %v3894_v14 = vadd.f32 %v11593_v56, %v3893_v31  ;;  %vm3896_vm12 = vweird.f32 %v11593_v56 }
 0x55f   : > { %v3936_v37 = vmul.f32 %v11725_v23, %v15224_v11  ;;  %v3908_v16 = vmul.f32 %v11636_v17, %v3907_v58  ;;  %v3923_v33 = vmul.f32 %v11652_v53, %v3922_v51  ;;  %v3951_v12 = vmul.f32 %v11728_v50, %v15225_v2  ;;  %vm11787_vm14 = vmor %vm3895_vm7, %vm3896_vm12 }
 0x560   : > { %6074 = vrcp.f32 %v15243_v10  ;;  %v11778_v35 = vsel %vm11684_vm6, %v3872_v3, %v3868_v61  ;;  %v3917_v19 = vor.u32 1.1754944e-38, %v3916_v20  ;;  %v3931_v48 = vand.u32 2147483648, %v15207_v45  ;;  %v15249_v20 = vld [vmem:[#allocation186_spill] sm:$0xff] }
 0x561   : > { %15244 = vst [vmem:[#allocation183_spill] sm:$0xff] %v11778_v35  ;;  %v3966_v31 = vmul.f32 %v11745_v54, %v15228_v18  ;;  %v11783_v6 = vpop.eup %6072  ;;  %vm3911_vm0 = vweird.f32 %v11636_v17  ;;  %vm11792_vm2 = vcmp.eq.f32.partialorder %v3914_v60, 8.507059e+37  ;;  %v3944_v3 = vand.u32 2147483647, %v15224_v11 }
 0x562   : > { %v3946_v51 = vand.u32 2147483648, %v15224_v11  ;;  %6076 = vrcp.f32 %v15249_v20  ;;  %v11801_v61 = vsel %vm11714_vm9, %v3887_v7, %v3883_v63  ;;  %v3898_v15 = vsel %vm11787_vm14, %v11593_v56, %v3894_v14  ;;  %vm11828_vm5 = vmor %vm3910_vm15, %vm3911_vm0 }
 0x563   : > { %15250 = vst [vmem:[#allocation184_spill] sm:$0xff] %v11801_v61  ;;  %vm11806_vm4 = vcmp.eq.f32.partialorder %v3929_v27, 8.507059e+37  ;;  %v3937_v60 = vsub.f32 1.0, %v3936_v37  ;;  %v3961_v55 = vand.u32 2147483648, %v15225_v2  ;;  %v3909_v21 = vadd.f32 %v11636_v17, %v3908_v16  ;;  %v15253_v27 = vld [vmem:[#allocation187_spill] sm:$0xff]  ;;  %v15261_v16 = vld [vmem:[#allocation188_spill] sm:$0xff] }
 0x564   : > { %v3924_v34 = vadd.f32 %v11652_v53, %v3923_v33  ;;  %vm3926_vm6 = vweird.f32 %v11652_v53  ;;  %v3952_v42 = vsub.f32 1.0, %v3951_v12  ;;  %v3932_v7 = vor.u32 1.1754944e-38, %v3931_v48 }
 0x565   : > { %vm3940_vm11 = vweird.f32 %v15224_v11  ;;  %v3967_v63 = vsub.f32 1.0, %v3966_v31  ;;  %v3981_v56 = vmul.f32 %v11783_v6, %v15235_v36  ;;  %6078 = vrcp.f32 %v15253_v27  ;;  %vm11836_vm7 = vmor %vm3925_vm3, %vm3926_vm6 }
 0x566   : > { %v11818_v14 = vpop.eup %6074  ;;  %v11822_v37 = vsel %vm11738_vm13, %v3902_v5, %v3898_v15  ;;  %v3947_v33 = vor.u32 1.1754944e-38, %v3946_v51  ;;  %vm3955_vm9 = vweird.f32 %v15225_v2  ;;  %v3959_v12 = vand.u32 2147483647, %v15225_v2 }
 0x567   : > { %15254 = vst [vmem:[#allocation185_spill] sm:$0xff] %v11822_v37  ;;  %v3938_v46 = vmul.f32 %v11725_v23, %v3937_v60  ;;  %v11841_v5 = vor.u32 1.1754944e-38, %v3961_v55  ;;  %vm3970_vm1 = vweird.f32 %v15228_v18  ;;  %v3974_v39 = vand.u32 2147483647, %v15228_v18 }
 0x568   : > { %v11845_v31 = vpop.eup %6076  ;;  %v3913_v58 = vsel %vm11828_vm5, %v11636_v17, %v3909_v21  ;;  %v3928_v45 = vsel %vm11836_vm7, %v11652_v53, %v3924_v34  ;;  %v3953_v51 = vmul.f32 %v11728_v50, %v3952_v42  ;;  %v3976_v15 = vand.u32 2147483648, %v15228_v18  ;;  %v15262_v34 = vld [vmem:[#allocation33_spill] sm:$0xff] }
 0x569   : > { %vm11855_vm8 = vcmp.eq.f32.partialorder %v3944_v3, 8.507059e+37  ;;  %v3968_v60 = vmul.f32 %v11745_v54, %v3967_v63  ;;  %v3982_v37 = vsub.f32 1.0, %v3981_v56  ;;  %v3996_v61 = vmul.f32 %v11818_v14, %v15243_v10 }
 0x56a   : > { %6080 = vrcp.f32 %v15261_v16  ;;  %vm3941_vm13 = vweird.f32 %v11725_v23  ;;  %v3989_v17 = vand.u32 2147483647, %v15235_v36  ;;  %v3991_v53 = vand.u32 2147483648, %v15235_v36 }
 0x56b   : > { %6082 = vrcp.f32 %v15262_v34  ;;  %v11867_v21 = vpop.eup %6078  ;;  %v11871_v3 = vsel %vm11792_vm2, %v3917_v19, %v3913_v58  ;;  %v3939_v42 = vadd.f32 %v11725_v23, %v3938_v46  ;;  %vm11874_vm15 = vcmp.eq.f32.partialorder %v3959_v12, 8.507059e+37  ;;  %vm11898_vm0 = vmor %vm3940_vm11, %vm3941_vm13 }
 0x56c   : > { %15263 = vst [vmem:[#allocation186_spill] sm:$0xff] %v11871_v3  ;;  %vm11878_vm10 = vcmp.eq.f32.partialorder %v3974_v39, 8.507059e+37  ;;  %vm3985_vm3 = vweird.f32 %v15235_v36  ;;  %v4011_v48 = vmul.f32 %v11845_v31, %v15249_v20  ;;  %v11887_v43 = vsel %vm11806_vm4, %v3932_v7, %v3928_v45  ;;  %v15276_v3 = vld [vmem:[#allocation190_spill] sm:$0xff] }
 0x56d   : > { %15268 = vst [vmem:[#allocation187_spill] sm:$0xff] %v11887_v43  ;;  %vm3956_vm12 = vweird.f32 %v11728_v50  ;;  %vm3971_vm14 = vweird.f32 %v11745_v54  ;;  %v3977_v19 = vor.u32 1.1754944e-38, %v3976_v15  ;;  %v3954_v12 = vadd.f32 %v11728_v50, %v3953_v51  ;;  %v15271_v51 = vld [vmem:[#allocation189_spill] sm:$0xff] }
 0x56e   : > { %v3969_v46 = vadd.f32 %v11745_v54, %v3968_v60  ;;  %v3983_v39 = vmul.f32 %v11783_v6, %v3982_v37  ;;  %v3997_v58 = vsub.f32 1.0, %v3996_v61  ;;  %v3992_v7 = vor.u32 1.1754944e-38, %v3991_v53  ;;  %vm11913_vm2 = vmor %vm3955_vm9, %vm3956_vm12 }
 0x56f   : > { %v4006_v45 = vand.u32 2147483648, %v15243_v10  ;;  %v4026_v15 = vmul.f32 %v11867_v21, %v15253_v27  ;;  %6084 = vrcp.f32 %v15271_v51  ;;  %v3943_v61 = vsel %vm11898_vm0, %v11725_v23, %v3939_v42  ;;  %vm11929_vm6 = vmor %vm3970_vm1, %vm3971_vm14 }
 0x570   : > { %v11906_v60 = vpop.eup %6080  ;;  %vm11917_vm4 = vcmp.eq.f32.partialorder %v3989_v17, 8.507059e+37  ;;  %v4004_v53 = vand.u32 2147483647, %v15243_v10  ;;  %v4012_v43 = vsub.f32 1.0, %v4011_v48  ;;  %6086 = vrcp.f32 %v15276_v3 }
 0x571   : > { %v11923_v57 = vpop.eup %6082  ;;  %vm3986_vm11 = vweird.f32 %v11783_v6  ;;  %vm4000_vm5 = vweird.f32 %v15243_v10  ;;  %v4019_v23 = vand.u32 2147483647, %v15249_v20  ;;  %v4021_v17 = vand.u32 2147483648, %v15249_v20 }
 0x572   : > { %v3958_v42 = vsel %vm11913_vm2, %v11728_v50, %v3954_v12  ;;  %v3973_v18 = vsel %vm11929_vm6, %v11745_v54, %v3969_v46  ;;  %v3984_v48 = vadd.f32 %v11783_v6, %v3983_v39  ;;  %v3998_v35 = vmul.f32 %v11818_v14, %v3997_v58  ;;  %v15281_v12 = vld [vmem:[#allocation191_spill] sm:$0xff]  ;;  %vm11975_vm1 = vmor %vm3985_vm3, %vm3986_vm11 }
 0x573   : > { %v11947_v52 = vsel %vm11855_vm8, %v3947_v33, %v3943_v61  ;;  %v4007_v59 = vor.u32 1.1754944e-38, %v4006_v45  ;;  %v4027_v40 = vsub.f32 1.0, %v4026_v15  ;;  %v4041_v28 = vmul.f32 %v11906_v60, %v15261_v16 }
 0x574   : > { %vm11951_vm9 = vcmp.eq.f32.partialorder %v4004_v53, 8.507059e+37  ;;  %v4013_v50 = vmul.f32 %v11845_v31, %v4012_v43  ;;  %vm4015_vm7 = vweird.f32 %v15249_v20  ;;  %v4056_v54 = vmul.f32 %v11923_v57, %v15262_v34 }
 0x575   : > { %6088 = vrcp.f32 %v15281_v12  ;;  %v11960_v33 = vpop.eup %6084  ;;  %v11965_v55 = vsel %vm11874_vm15, %v11841_v5, %v3958_v42  ;;  %v11969_v46 = vsel %vm11878_vm10, %v3977_v19, %v3973_v18  ;;  %vm4001_vm8 = vweird.f32 %v11818_v14 }
 0x576   : > { %15282 = vst [vmem:[#allocation188_spill] sm:$0xff] %v11965_v55  ;;  %vm4030_vm13 = vweird.f32 %v15253_v27  ;;  %v4034_v63 = vand.u32 2147483647, %v15253_v27  ;;  %v11982_v5 = vpop.eup %6086  ;;  %v3988_v56 = vsel %vm11975_vm1, %v11783_v6, %v3984_v48  ;;  %v3999_v19 = vadd.f32 %v11818_v14, %v3998_v35  ;;  %vm12008_vm3 = vmor %vm4000_vm5, %vm4001_vm8 }
 0x577   : > { %15283 = vst [vmem:[#allocation33_spill] sm:$0xff] %v11969_v46  ;;  %vm11988_vm15 = vcmp.eq.f32.partialorder %v4019_v23, 8.507059e+37  ;;  %v4022_v39 = vor.u32 1.1754944e-38, %v4021_v17  ;;  %v4036_v58 = vand.u32 2147483648, %v15253_v27  ;;  %vm4016_vm10 = vweird.f32 %v11845_v31  ;;  %v15288_v23 = vld [vmem:[#allocation35_spill] sm:$0xff] }
 0x578   : > { %v4028_v45 = vmul.f32 %v11867_v21, %v4027_v40  ;;  %v4042_v15 = vsub.f32 1.0, %v4041_v28  ;;  %v4051_v61 = vand.u32 2147483648, %v15261_v16  ;;  %v4014_v53 = vadd.f32 %v11845_v31, %v4013_v50  ;;  %vm12032_vm2 = vmor %vm4015_vm7, %vm4016_vm10  ;;  %v15306_v50 = vld [vmem:[#allocation194_spill] sm:$0xff] }
 0x579   : > { %v4057_v2 = vsub.f32 1.0, %v4056_v54  ;;  %v4071_v6 = vmul.f32 %v11960_v33, %v15271_v51  ;;  %6090 = vrcp.f32 %v15288_v23  ;;  %v12002_v17 = vsel %vm11917_vm4, %v3992_v7, %v3988_v56  ;;  %v15296_v56 = vld [vmem:[#allocation192_spill] sm:$0xff] }
 0x57a   : > { %15289 = vst [vmem:[#allocation189_spill] sm:$0xff] %v12002_v17  ;;  %vm4031_vm12 = vweird.f32 %v11867_v21  ;;  %vm12013_vm14 = vcmp.eq.f32.partialorder %v4034_v63, 8.507059e+37  ;;  %vm4045_vm0 = vweird.f32 %v15261_v16  ;;  %v4049_v37 = vand.u32 2147483647, %v15261_v16 }
 0x57b   : > { %v4086_v7 = vmul.f32 %v11982_v5, %v15276_v3  ;;  %v12021_v42 = vpop.eup %6088  ;;  %v4003_v10 = vsel %vm12008_vm3, %v11818_v14, %v3999_v19  ;;  %v4037_v18 = vor.u32 1.1754944e-38, %v4036_v58  ;;  %v4064_v48 = vand.u32 2147483647, %v15262_v34  ;;  %vm12061_vm5 = vmor %vm4030_vm13, %vm4031_vm12 }
 0x57c   : > { %v4066_v35 = vand.u32 2147483648, %v15262_v34  ;;  %v4029_v54 = vadd.f32 %v11867_v21, %v4028_v45  ;;  %v4043_v43 = vmul.f32 %v11906_v60, %v4042_v15  ;;  %v4052_v63 = vor.u32 1.1754944e-38, %v4051_v61 }
 0x57d   : > { %6092 = vrcp.f32 %v15296_v56  ;;  %v4018_v14 = vsel %vm12032_vm2, %v11845_v31, %v4014_v53  ;;  %v4058_v19 = vmul.f32 %v11923_v57, %v4057_v2  ;;  %vm4060_vm4 = vweird.f32 %v15262_v34 }
 0x57e   : > { %v4072_v20 = vsub.f32 1.0, %v4071_v6  ;;  %v12046_v58 = vsel %vm11951_vm9, %v4007_v59, %v4003_v10  ;;  %vm4046_vm6 = vweird.f32 %v11906_v60  ;;  %vm12049_vm11 = vcmp.eq.f32.partialorder %v4049_v37, 8.507059e+37  ;;  %v15305_v10 = vld [vmem:[#allocation193_spill] sm:$0xff] }
 0x57f   : > { %15297 = vst [vmem:[#allocation190_spill] sm:$0xff] %v12046_v58  ;;  %v4087_v15 = vsub.f32 1.0, %v4086_v7  ;;  %v4101_v61 = vmul.f32 %v12021_v42, %v15281_v12  ;;  %v12055_v31 = vpop.eup %6090  ;;  %vm12065_vm9 = vcmp.eq.f32.partialorder %v4064_v48, 8.507059e+37  ;;  %v4067_v53 = vor.u32 1.1754944e-38, %v4066_v35  ;;  %vm12101_vm13 = vmor %vm4045_vm0, %vm4046_vm6 }
 0x580   : > { %vm4075_vm7 = vweird.f32 %v15271_v51  ;;  %v4079_v2 = vand.u32 2147483647, %v15271_v51  ;;  %v4081_v6 = vand.u32 2147483648, %v15271_v51  ;;  %v4094_v28 = vand.u32 2147483647, %v15276_v3 }
 0x581   : > { %v12075_v27 = vsel %vm11988_vm15, %v4022_v39, %v4018_v14  ;;  %v4033_v37 = vsel %vm12061_vm5, %v11867_v21, %v4029_v54  ;;  %v4044_v7 = vadd.f32 %v11906_v60, %v4043_v43  ;;  %vm4090_vm1 = vweird.f32 %v15276_v3  ;;  %v15307_v54 = vld [vmem:[#allocation195_spill] sm:$0xff] }
 0x582   : > { %15304 = vst [vmem:[#allocation191_spill] sm:$0xff] %v12075_v27  ;;  %6094 = vrcp.f32 %v15305_v10  ;;  %v4059_v48 = vadd.f32 %v11923_v57, %v4058_v19  ;;  %vm4061_vm8 = vweird.f32 %v11923_v57  ;;  %v4073_v35 = vmul.f32 %v11960_v33, %v4072_v20  ;;  %v15315_v27 = vld [vmem:[#allocation196_spill] sm:$0xff] }
 0x583   : > { %6096 = vrcp.f32 %v15306_v50  ;;  %v12087_v36 = vpop.eup %6092  ;;  %v4088_v39 = vmul.f32 %v11982_v5, %v4087_v15  ;;  %v4102_v14 = vsub.f32 1.0, %v4101_v61  ;;  %v4116_v21 = vmul.f32 %v12055_v31, %v15288_v23  ;;  %vm12118_vm3 = vmor %vm4060_vm4, %vm4061_vm8 }
 0x584   : > { %6098 = vrcp.f32 %v15307_v54  ;;  %v12095_v43 = vsel %vm12013_vm14, %v4037_v18, %v4033_v37  ;;  %vm4076_vm15 = vweird.f32 %v11960_v33  ;;  %vm12106_vm10 = vcmp.eq.f32.partialorder %v4079_v2, 8.507059e+37 }
 0x585   : > { %15308 = vst [vmem:[#allocation35_spill] sm:$0xff] %v12095_v43  ;;  %v4082_v15 = vor.u32 1.1754944e-38, %v4081_v6  ;;  %v4096_v61 = vand.u32 2147483648, %v15276_v3  ;;  %v4048_v40 = vsel %vm12101_vm13, %v11906_v60, %v4044_v7  ;;  %vm4091_vm12 = vweird.f32 %v11982_v5  ;;  %vm12158_vm2 = vmor %vm4075_vm7, %vm4076_vm15 }
 0x586   : > { %v4109_v18 = vand.u32 2147483647, %v15281_v12  ;;  %v4111_v11 = vand.u32 2147483648, %v15281_v12  ;;  %v4063_v2 = vsel %vm12118_vm3, %v11923_v57, %v4059_v48  ;;  %v4074_v60 = vadd.f32 %v11960_v33, %v4073_v35  ;;  %vm12171_vm4 = vmor %vm4090_vm1, %vm4091_vm12 }
 0x587   : > { %v4126_v6 = vand.u32 2147483648, %v15288_v23  ;;  %v4131_v34 = vmul.f32 %v12087_v36, %v15296_v56  ;;  %v4089_v7 = vadd.f32 %v11982_v5, %v4088_v39  ;;  %v4103_v19 = vmul.f32 %v12021_v42, %v4102_v14 }
 0x588   : > { %v12132_v37 = vpop.eup %6094  ;;  %v4117_v43 = vsub.f32 1.0, %v4116_v21  ;;  %6100 = vrcp.f32 %v15315_v27  ;;  %v12141_v57 = vsel %vm12049_vm11, %v4052_v63, %v4048_v40  ;;  %vm12143_vm14 = vcmp.eq.f32.partialorder %v4094_v28, 8.507059e+37 }
 0x589   : > { %v12137_v58 = vpop.eup %6096  ;;  %15316 = vst [vmem:[#allocation192_spill] sm:$0xff] %v12141_v57  ;;  %v4097_v35 = vor.u32 1.1754944e-38, %v4096_v61  ;;  %vm4105_vm0 = vweird.f32 %v15281_v12  ;;  %v12152_v39 = vsel %vm12065_vm9, %v4067_v53, %v4063_v2  ;;  %v4112_v45 = vor.u32 1.1754944e-38, %v4111_v11 }
 0x58a   : > { %v12148_v16 = vpop.eup %6098  ;;  %15319 = vst [vmem:[#allocation193_spill] sm:$0xff] %v12152_v39  ;;  %v4124_v28 = vand.u32 2147483647, %v15288_v23  ;;  %v4141_v14 = vand.u32 2147483648, %v15296_v56  ;;  %v4078_v21 = vsel %vm12158_vm2, %v11960_v33, %v4074_v60  ;;  %vm4106_vm6 = vweird.f32 %v12021_v42  ;;  %v15348_v39 = vld [vmem:[#allocation209_spill] sm:$0xff] }
 0x58b   : > { %vm12176_vm11 = vcmp.eq.f32.partialorder %v4109_v18, 8.507059e+37  ;;  %vm4120_vm5 = vweird.f32 %v15288_v23  ;;  %v4132_v53 = vsub.f32 1.0, %v4131_v34  ;;  %v4146_v33 = vmul.f32 %v12132_v37, %v15305_v10  ;;  %v15326_v34 = vld [vmem:[#allocation199_spill] sm:$0xff]  ;;  %vm12211_vm7 = vmor %vm4105_vm0, %vm4106_vm6 }
 0x58c   : > { %v4093_v3 = vsel %vm12171_vm4, %v11982_v5, %v4089_v7  ;;  %v4104_v61 = vadd.f32 %v12021_v42, %v4103_v19  ;;  %v4118_v40 = vmul.f32 %v12055_v31, %v4117_v43  ;;  %v4127_v11 = vor.u32 1.1754944e-38, %v4126_v6 }
 0x58d   : > { %vm4135_vm9 = vweird.f32 %v15296_v56  ;;  %v4139_v18 = vand.u32 2147483647, %v15296_v56  ;;  %v4161_v2 = vmul.f32 %v12137_v58, %v15306_v50  ;;  %v4176_v60 = vmul.f32 %v12148_v16, %v15307_v54 }
 0x58e   : > { %6102 = vrcp.f32 %v15326_v34  ;;  %v12195_v63 = vpop.eup %6100  ;;  %v12199_v5 = vsel %vm12106_vm10, %v4082_v15, %v4078_v21  ;;  %v4142_v43 = vor.u32 1.1754944e-38, %v4141_v14  ;;  %v4154_v6 = vand.u32 2147483647, %v15305_v10 }
 0x58f   : > { %15327 = vst [vmem:[#allocation194_spill] sm:$0xff] %v12199_v5  ;;  %v4156_v7 = vand.u32 2147483648, %v15305_v10  ;;  %v12205_v19 = vsel %vm12143_vm14, %v4097_v35, %v4093_v3  ;;  %vm4121_vm1 = vweird.f32 %v12055_v31  ;;  %vm12216_vm8 = vcmp.eq.f32.partialorder %v4124_v28, 8.507059e+37 }
 0x590   : > { %15328 = vst [vmem:[#allocation195_spill] sm:$0xff] %v12205_v19  ;;  %v4133_v15 = vmul.f32 %v12087_v36, %v4132_v53  ;;  %v4147_v14 = vsub.f32 1.0, %v4146_v33  ;;  %v4108_v48 = vsel %vm12211_vm7, %v12021_v42, %v4104_v61  ;;  %v4119_v35 = vadd.f32 %v12055_v31, %v4118_v40  ;;  %v15335_v33 = vld [vmem:[#allocation130_spill] sm:$0xff]  ;;  %v15336_v40 = vld [vmem:[#allocation200_spill] sm:$0xff]  ;;  %vm12254_vm14 = vmor %vm4120_vm5, %vm4121_vm1 }
 0x591   : > { %vm4136_vm13 = vweird.f32 %v12087_v36  ;;  %v4171_v12 = vand.u32 2147483648, %v15306_v50  ;;  %vm12227_vm15 = vcmp.eq.f32.partialorder %v4139_v18, 8.507059e+37  ;;  %vm4150_vm10 = vweird.f32 %v15305_v10 }
 0x592   : > { %v4162_v28 = vsub.f32 1.0, %v4161_v2  ;;  %v4177_v3 = vsub.f32 1.0, %v4176_v60  ;;  %v4191_v53 = vmul.f32 %v12195_v63, %v15315_v27  ;;  %6104 = vrcp.f32 %v15335_v33  ;;  %v15337_v60 = vld [vmem:[#allocation132_spill] sm:$0xff]  ;;  %vm12273_vm4 = vmor %vm4135_vm9, %vm4136_vm13 }
 0x593   : > { %v12235_v42 = vor.u32 1.1754944e-38, %v4156_v7  ;;  %vm4165_vm3 = vweird.f32 %v15306_v50  ;;  %v4169_v61 = vand.u32 2147483647, %v15306_v50  ;;  %6106 = vrcp.f32 %v15336_v40 }
 0x594   : > { %v12240_v18 = vpop.eup %6102  ;;  %v4134_v59 = vadd.f32 %v12087_v36, %v4133_v15  ;;  %v4148_v2 = vmul.f32 %v12132_v37, %v4147_v14  ;;  %vm4180_vm12 = vweird.f32 %v15307_v54  ;;  %6108 = vrcp.f32 %v15337_v60 }
 0x595   : > { %v12248_v7 = vsel %vm12176_vm11, %v4112_v45, %v4108_v48  ;;  %vm4151_vm0 = vweird.f32 %v12132_v37  ;;  %v4172_v15 = vor.u32 1.1754944e-38, %v4171_v12  ;;  %v4184_v14 = vand.u32 2147483647, %v15307_v54 }
 0x596   : > { %15338 = vst [vmem:[#allocation196_spill] sm:$0xff] %v12248_v7  ;;  %v4123_v5 = vsel %vm12254_vm14, %v12055_v31, %v4119_v35  ;;  %vm12263_vm2 = vcmp.eq.f32.partialorder %v4154_v6, 8.507059e+37  ;;  %v4163_v51 = vmul.f32 %v12137_v58, %v4162_v28  ;;  %v4178_v23 = vmul.f32 %v12148_v16, %v4177_v3  ;;  %v15345_v35 = vld [vmem:[#allocation131_spill] sm:$0xff]  ;;  %vm12320_vm1 = vmor %vm4150_vm10, %vm4151_vm0 }
 0x597   : > { %v4192_v48 = vsub.f32 1.0, %v4191_v53  ;;  %v4186_v19 = vand.u32 2147483648, %v15307_v54  ;;  %v4199_v31 = vand.u32 2147483647, %v15315_v27  ;;  %v4206_v6 = vmul.f32 %v12240_v18, %v15326_v34 }
 0x598   : > { %6110 = vrcp.f32 %v15345_v35  ;;  %v12282_v28 = vpop.eup %6104  ;;  %v4138_v3 = vsel %vm12273_vm4, %v12087_v36, %v4134_v59  ;;  %v4149_v56 = vadd.f32 %v12132_v37, %v4148_v2  ;;  %vm12288_vm6 = vcmp.eq.f32.partialorder %v4169_v61, 8.507059e+37 }
 0x599   : > { %v4201_v7 = vand.u32 2147483648, %v15315_v27  ;;  %6112 = vrcp.f32 %v15348_v39  ;;  %v12294_v57 = vpop.eup %6106  ;;  %v12298_v17 = vsel %vm12216_vm8, %v4127_v11, %v4123_v5  ;;  %vm4166_vm11 = vweird.f32 %v12137_v58  ;;  %v15361_v5 = vld [vmem:[#allocation210_spill] sm:$0xff] }
 0x59a   : > { %15349 = vst [vmem:[#allocation199_spill] sm:$0xff] %v12298_v17  ;;  %vm12301_vm5 = vcmp.eq.f32.partialorder %v4184_v14, 8.507059e+37  ;;  %vm4195_vm9 = vweird.f32 %v15315_v27  ;;  %v12306_v61 = vpop.eup %6108  ;;  %v4164_v59 = vadd.f32 %v12137_v58, %v4163_v51  ;;  %v4179_v2 = vadd.f32 %v12148_v16, %v4178_v23  ;;  %vm12331_vm8 = vmor %vm4165_vm3, %vm4166_vm11 }
 0x59b   : > { %vm4181_vm7 = vweird.f32 %v12148_v16  ;;  %v4193_v20 = vmul.f32 %v12195_v63, %v4192_v48  ;;  %v12314_v11 = vsel %vm12227_vm15, %v4142_v43, %v4138_v3  ;;  %v4187_v14 = vor.u32 1.1754944e-38, %v4186_v19 }
 0x59c   : > { %15352 = vst [vmem:[#allocation130_spill] sm:$0xff] %v12314_v11  ;;  %v4207_v51 = vsub.f32 1.0, %v4206_v6  ;;  %v4221_v23 = vmul.f32 %v12282_v28, %v15335_v33  ;;  %v4153_v48 = vsel %vm12320_vm1, %v12132_v37, %v4149_v56  ;;  %vm12335_vm13 = vcmp.eq.f32.partialorder %v4199_v31, 8.507059e+37  ;;  %vm12346_vm15 = vmor %vm4180_vm12, %vm4181_vm7 }
 0x59d   : > { %v4202_v21 = vor.u32 1.1754944e-38, %v4201_v7  ;;  %v4216_v12 = vand.u32 2147483648, %v15326_v34  ;;  %v4236_v19 = vmul.f32 %v12294_v57, %v15336_v40  ;;  %vm4196_vm10 = vweird.f32 %v12195_v63 }
 0x59e   : > { %v12342_v6 = vpop.eup %6110  ;;  %vm4210_vm3 = vweird.f32 %v15326_v34  ;;  %v4214_v37 = vand.u32 2147483647, %v15326_v34  ;;  %v4251_v7 = vmul.f32 %v12306_v61, %v15337_v60  ;;  %v4168_v3 = vsel %vm12331_vm8, %v12137_v58, %v4164_v59  ;;  %vm12387_vm12 = vmor %vm4195_vm9, %vm4196_vm10 }
 0x59f   : > { %v12355_v31 = vpop.eup %6112  ;;  %v4183_v54 = vsel %vm12346_vm15, %v12148_v16, %v4179_v2  ;;  %v4194_v56 = vadd.f32 %v12195_v63, %v4193_v20  ;;  %6114 = vrcp.f32 %v15361_v5  ;;  %v12368_v11 = vsel %vm12263_vm2, %v12235_v42, %v4153_v48 }
 0x5a0   : > { %v4208_v17 = vmul.f32 %v12240_v18, %v4207_v51  ;;  %v4222_v46 = vsub.f32 1.0, %v4221_v23  ;;  %v4231_v55 = vand.u32 2147483648, %v15335_v33  ;;  %v4217_v43 = vor.u32 1.1754944e-38, %v4216_v12 }
 0x5a1   : > { %v4229_v58 = vand.u32 2147483647, %v15335_v33  ;;  %v4237_v59 = vsub.f32 1.0, %v4236_v19  ;;  %v4266_v16 = vmul.f32 %v12342_v6, %v15345_v35  ;;  %v12377_v2 = vsel %vm12288_vm6, %v4172_v15, %v4168_v3 }
 0x5a2   : > { %v12381_v42 = vsel %vm12301_vm5, %v4187_v14, %v4183_v54  ;;  %vm12391_vm14 = vcmp.eq.f32.partialorder %v4214_v37, 8.507059e+37  ;;  %vm4225_vm0 = vweird.f32 %v15335_v33  ;;  %v4252_v15 = vsub.f32 1.0, %v4251_v7 }
 0x5a3   : > { %v4281_v53 = vmul.f32 %v12355_v31, %v15348_v39  ;;  %v4198_v36 = vsel %vm12387_vm12, %v12195_v63, %v4194_v56  ;;  %vm4211_vm2 = vweird.f32 %v12240_v18  ;;  %vm4240_vm4 = vweird.f32 %v15336_v40 }
 0x5a4   : > { %v4244_v27 = vand.u32 2147483647, %v15336_v40  ;;  %v4246_v14 = vand.u32 2147483648, %v15336_v40  ;;  %v4209_v51 = vadd.f32 %v12240_v18, %v4208_v17  ;;  %v4223_v23 = vmul.f32 %v12282_v28, %v4222_v46  ;;  %vm12427_vm9 = vmor %vm4210_vm3, %vm4211_vm2  ;;  %v15398_v40 = vld [vmem:[#allocation136_spill] sm:$0xff] }
 0x5a5   : > { %v4232_v48 = vor.u32 1.1754944e-38, %v4231_v55  ;;  %v4259_v12 = vand.u32 2147483647, %v15337_v60  ;;  %v12408_v19 = vpop.eup %6114  ;;  %v4238_v50 = vmul.f32 %v12294_v57, %v4237_v59  ;;  %vm4255_vm6 = vweird.f32 %v15337_v60 }
 0x5a6   : > { %v4261_v63 = vand.u32 2147483648, %v15337_v60  ;;  %v4267_v37 = vsub.f32 1.0, %v4266_v16  ;;  %v12415_v7 = vsel %vm12335_vm13, %v4202_v21, %v4198_v36  ;;  %vm4226_vm11 = vweird.f32 %v12282_v28 }
 0x5a7   : > { %vm12418_vm5 = vcmp.eq.f32.partialorder %v4229_v58, 8.507059e+37  ;;  %v4253_v55 = vmul.f32 %v12306_v61, %v4252_v15  ;;  %v4282_v17 = vsub.f32 1.0, %v4281_v53  ;;  %vm12431_vm7 = vcmp.eq.f32.partialorder %v4244_v27, 8.507059e+37  ;;  %v15372_v58 = vld [vmem:[#allocation211_spill] sm:$0xff]  ;;  %vm12463_vm10 = vmor %vm4225_vm0, %vm4226_vm11 }
 0x5a8   : > { %v4247_v21 = vor.u32 1.1754944e-38, %v4246_v14  ;;  %v4274_v54 = vand.u32 2147483647, %v15345_v35  ;;  %v4276_v56 = vand.u32 2147483648, %v15345_v35  ;;  %6116 = vrcp.f32 %v15372_v58 }
 0x5a9   : > { %v4213_v59 = vsel %vm12427_vm9, %v12240_v18, %v4209_v51  ;;  %v4224_v34 = vadd.f32 %v12282_v28, %v4223_v23  ;;  %vm12442_vm1 = vcmp.eq.f32.partialorder %v4259_v12, 8.507059e+37  ;;  %v4296_v45 = vmul.f32 %v12408_v19, %v15361_v5 }
 0x5aa   : > { %v4239_v15 = vadd.f32 %v12294_v57, %v4238_v50  ;;  %vm4241_vm8 = vweird.f32 %v12294_v57  ;;  %v4262_v53 = vor.u32 1.1754944e-38, %v4261_v63  ;;  %v4268_v36 = vmul.f32 %v12342_v6, %v4267_v37  ;;  %v15381_v37 = vld [vmem:[#allocation212_spill] sm:$0xff] }
 0x5ab   : > { %v4254_v27 = vadd.f32 %v12306_v61, %v4253_v55  ;;  %vm4256_vm13 = vweird.f32 %v12306_v61  ;;  %vm4270_vm15 = vweird.f32 %v15345_v35  ;;  %v4283_v18 = vmul.f32 %v12355_v31, %v4282_v17  ;;  %vm12478_vm12 = vmor %vm4240_vm4, %vm4241_vm8 }
 0x5ac   : > { %v12457_v14 = vsel %vm12391_vm14, %v4217_v43, %v4213_v59  ;;  %vm12467_vm3 = vcmp.eq.f32.partialorder %v4274_v54, 8.507059e+37  ;;  %v4277_v12 = vor.u32 1.1754944e-38, %v4276_v56  ;;  %v4289_v50 = vand.u32 2147483647, %v15348_v39  ;;  %vm12493_vm0 = vmor %vm4255_vm6, %vm4256_vm13 }
 0x5ad   : > { %v4291_v63 = vand.u32 2147483648, %v15348_v39  ;;  %v4228_v43 = vsel %vm12463_vm10, %v12282_v28, %v4224_v34  ;;  %vm4285_vm14 = vweird.f32 %v15348_v39  ;;  %v4297_v20 = vsub.f32 1.0, %v4296_v45 }
 0x5ae   : > { %6118 = vrcp.f32 %v15381_v37  ;;  %v12484_v55 = vpop.eup %6116  ;;  %v4243_v17 = vsel %vm12478_vm12, %v12294_v57, %v4239_v15  ;;  %v4269_v28 = vadd.f32 %v12342_v6, %v4268_v36  ;;  %vm4271_vm2 = vweird.f32 %v12342_v6 }
 0x5af   : > { %v4306_v3 = vand.u32 2147483648, %v15361_v5  ;;  %v4258_v54 = vsel %vm12493_vm0, %v12306_v61, %v4254_v27  ;;  %v4284_v57 = vadd.f32 %v12355_v31, %v4283_v18  ;;  %vm4286_vm4 = vweird.f32 %v12355_v31  ;;  %vm12522_vm9 = vmor %vm4270_vm15, %vm4271_vm2  ;;  %v15392_v18 = vld [vmem:[#allocation213_spill] sm:$0xff] }
 0x5b0   : > { %vm4300_vm11 = vweird.f32 %v15361_v5  ;;  %v4304_v60 = vand.u32 2147483647, %v15361_v5  ;;  %v12509_v56 = vsel %vm12418_vm5, %v4232_v48, %v4228_v43  ;;  %vm12511_vm6 = vcmp.eq.f32.partialorder %v4289_v50, 8.507059e+37  ;;  %vm12539_vm5 = vmor %vm4285_vm14, %vm4286_vm4  ;;  %v15396_v50 = vld [vmem:[#allocation135_spill] sm:$0xff]  ;;  %v15412_v5 = vld [vmem:[#allocation25_spill] sm:$0xff] }
 0x5b1   : > { %v4292_v34 = vor.u32 1.1754944e-38, %v4291_v63  ;;  %v4321_v45 = vand.u32 2147483648, %v15372_v58  ;;  %v12518_v61 = vsel %vm12431_vm7, %v4247_v21, %v4243_v17  ;;  %v4298_v48 = vmul.f32 %v12408_v19, %v4297_v20  ;;  %v15397_v17 = vld [vmem:[#allocation16_spill] sm:$0xff] }
 0x5b2   : > { %15386 = vst [vmem:[#allocation200_spill] sm:$0xff] %v12518_v61  ;;  %v4311_v46 = vmul.f32 %v12484_v55, %v15372_v58  ;;  %v4319_v36 = vand.u32 2147483647, %v15372_v58  ;;  %v12532_v27 = vsel %vm12442_vm1, %v4262_v53, %v4258_v54  ;;  %v4273_v10 = vsel %vm12522_vm9, %v12342_v6, %v4269_v28  ;;  %v15395_v6 = vld [vmem:[#allocation17_spill] sm:$0xff] }
 0x5b3   : > { %15389 = vst [vmem:[#allocation132_spill] sm:$0xff] %v12532_v27  ;;  %v4307_v21 = vor.u32 1.1754944e-38, %v4306_v3  ;;  %6120 = vrcp.f32 %v15392_v18  ;;  %v4288_v16 = vsel %vm12539_vm5, %v12355_v31, %v4284_v57  ;;  %vm4301_vm7 = vweird.f32 %v12408_v19  ;;  %v15400_v57 = vld [vmem:[#allocation19_spill] sm:$0xff]  ;;  %v15414_v27 = vld [vmem:[#allocation26_spill] sm:$0xff] }
 0x5b4   : > { %v12544_v51 = vpop.eup %6118  ;;  %vm12550_vm1 = vcmp.eq.f32.partialorder %v4304_v60, 8.507059e+37  ;;  %v4336_v39 = vand.u32 2147483648, %v15381_v37  ;;  %v4655_v63 = vmul.f32 %v15396_v50, %v15395_v6  ;;  %v12557_v43 = vor.u32 1.1754944e-38, %v4321_v45  ;;  %v15401_v60 = vld [vmem:[#allocation137_spill] sm:$0xff]  ;;  %v15403_v6 = vld [vmem:[#allocation20_spill] sm:$0xff]  ;;  %v15404_v50 = vld [vmem:[#allocation138_spill] sm:$0xff] }
 0x5b5   : > { %v4334_v33 = vand.u32 2147483647, %v15381_v37  ;;  %v4656_v31 = vmul.f32 %v15398_v40, %v15397_v17  ;;  %v12565_v28 = vsel %vm12467_vm3, %v4277_v12, %v4273_v10  ;;  %v4299_v3 = vadd.f32 %v12408_v19, %v4298_v48  ;;  %v15406_v10 = vld [vmem:[#allocation139_spill] sm:$0xff]  ;;  %vm12598_vm15 = vmor %vm4300_vm11, %vm4301_vm7 }
 0x5b6   : > { %15399 = vst [vmem:[#allocation131_spill] sm:$0xff] %v12565_v28  ;;  %v4312_v54 = vsub.f32 1.0, %v4311_v46  ;;  %v4657_v15 = vmul.f32 %v15401_v60, %v15400_v57  ;;  %v12572_v45 = vsel %vm12511_vm6, %v4292_v34, %v4288_v16  ;;  %vm4316_vm8 = vweird.f32 %v12484_v55  ;;  %v15405_v46 = vld [vmem:[#allocation22_spill] sm:$0xff]  ;;  %v15410_v40 = vld [vmem:[#allocation23_spill] sm:$0xff]  ;;  %v15411_v57 = vld [vmem:[#allocation140_spill] sm:$0xff] }
 0x5b7   : > { %15402 = vst [vmem:[#allocation209_spill] sm:$0xff] %v12572_v45  ;;  %v4326_v35 = vmul.f32 %v12544_v51, %v15381_v37  ;;  %v4658_v23 = vmul.f32 %v15404_v50, %v15403_v6  ;;  %vm4315_vm13 = vweird.f32 %v15372_v58  ;;  %v12580_v12 = vor.u32 1.1754944e-38, %v4336_v39  ;;  %v15409_v39 = vld [vmem:[#allocation214_spill] sm:$0xff] }
 0x5b8   : > { %v4351_v48 = vand.u32 2147483648, %v15392_v18  ;;  %v4659_v17 = vmul.f32 %v15406_v10, %v15405_v46  ;;  %v4783_v59 = vpack.c.bf16 %v4655_v63, %v4655_v63  ;;  %6122 = vrcp.f32 %v15409_v39  ;;  %v15413_v10 = vld [vmem:[#allocation141_spill] sm:$0xff]  ;;  %vm12659_vm0 = vmor %vm4315_vm13, %vm4316_vm8 }
 0x5b9   : > { %v12585_v34 = vpop.eup %6120  ;;  %v4660_v60 = vmul.f32 %v15411_v57, %v15410_v40  ;;  %v4784_v6 = vpack.c.bf16 %v4656_v31, %v4656_v31  ;;  %v4303_v50 = vsel %vm12598_vm15, %v12408_v19, %v4299_v3  ;;  %v4313_v46 = vmul.f32 %v12484_v55, %v4312_v54  ;;  %v15417_v3 = vld [vmem:[#allocation27_spill] sm:$0xff] }
 0x5ba   : > { %v4661_v20 = vmul.f32 %v15413_v10, %v15412_v5  ;;  %v4785_v45 = vpack.c.bf16 %v4657_v15, %v4657_v15  ;;  %v4327_v28 = vsub.f32 1.0, %v4326_v35  ;;  %v4662_v63 = vmul.f32 %v9795_v30, %v15414_v27  ;;  %v15420_v57 = vld [vmem:[#allocation215_spill] sm:$0xff] }
 0x5bb   : > { %v4786_v61 = vpack.c.bf16 %v4658_v23, %v4658_v23  ;;  %vm4911_vm10 = vcmask 519168   ;;  %vm12614_vm3 = vcmp.eq.f32.partialorder %v4319_v36, 8.507059e+37  ;;  %v4341_v19 = vmul.f32 %v12585_v34, %v15392_v18  ;;  %v15418_v36 = vld [vmem:[#allocation28_spill] sm:$0xff] }
 0x5bc   : > { %v4366_v31 = vand.u32 2147483648, %v15409_v39  ;;  %v4663_v54 = vmul.f32 %v9814_v62, %v15417_v3  ;;  %v4787_v15 = vpack.c.bf16 %v4659_v17, %v4659_v17  ;;  %4912 = vst.msk [vmem:[%s12592_s14] sm:$0xf] %vm4911_vm10, %v4783_v59  ;;  %v12627_v30 = vsel %vm12550_vm1, %v4307_v21, %v4303_v50  ;;  %v15419_v17 = vld [vmem:[#allocation29_spill] sm:$0xff]  ;;  %v15431_v3 = vld [vmem:[#allocation144_spill] sm:$0xff] }
 0x5bd   : > { %vm4330_vm12 = vweird.f32 %v15381_v37  ;;  %vm4331_vm14 = vweird.f32 %v12544_v51  ;;  %v4664_v27 = vmul.f32 %v9859_v9, %v15418_v36  ;;  %v4788_v35 = vpack.c.bf16 %v4660_v60, %v4660_v60  ;;  %4913 = vst.msk [vmem:[%s12592_s14 + $0x4] sm:$0xf] %vm4911_vm10, %v4784_v6  ;;  %v15421_v9 = vld [vmem:[#allocation30_spill] sm:$0xff] }
 0x5be   : > { %v4314_v62 = vadd.f32 %v12484_v55, %v4313_v46  ;;  %v12636_v23 = vor.u32 1.1754944e-38, %v4351_v48  ;;  %v4665_v21 = vmul.f32 %v9869_v8, %v15419_v17  ;;  %v4789_v53 = vpack.c.bf16 %v4661_v20, %v4661_v20  ;;  %4914 = vst.msk [vmem:[%s12592_s14 + $0x8] sm:$0xf] %vm4911_vm10, %v4785_v45  ;;  %v12642_v59 = vpop.eup %6122  ;;  %v15422_v60 = vld [vmem:[#allocation142_spill] sm:$0xff]  ;;  %v15423_v46 = vld [vmem:[#allocation216_spill] sm:$0xff]  ;;  %v15424_v8 = vld [vmem:[#allocation31_spill] sm:$0xff] }
 0x5bf   : > { %v4328_v16 = vmul.f32 %v12544_v51, %v4327_v28  ;;  %6124 = vrcp.f32 %v15420_v57  ;;  %v4666_v6 = vmul.f32 %v15422_v60, %v15421_v9  ;;  %v4790_v50 = vpack.c.bf16 %v4662_v63, %v4662_v63  ;;  %4915 = vst.msk [vmem:[%s12592_s14 + $0xc] sm:$0xf] %vm4911_vm10, %v4786_v61  ;;  %v15425_v20 = vld [vmem:[#allocation143_spill] sm:$0xff]  ;;  %v15434_v9 = vld [vmem:[#allocation36_spill] sm:$0xff]  ;;  %v15435_v60 = vld [vmem:[#allocation146_spill] sm:$0xff] }
 0x5c0   : > { %v4342_v48 = vsub.f32 1.0, %v4341_v19  ;;  %6126 = vrcp.f32 %v15423_v46  ;;  %v4667_v45 = vmul.f32 %v15425_v20, %v15424_v8  ;;  %v4791_v5 = vpack.c.bf16 %v4663_v54, %v4663_v54  ;;  %4916 = vst.msk [vmem:[%s12592_s14 + $0x10] sm:$0xf] %vm4911_vm10, %v4787_v15  ;;  %v15430_v19 = vld [vmem:[#allocation32_spill] sm:$0xff]  ;;  %v15436_v28 = vld [vmem:[#allocation37_spill] sm:$0xff]  ;;  %vm12715_vm6 = vmor %vm4330_vm12, %vm4331_vm14 }
 0x5c1   : > { %vm12663_vm2 = vcmp.eq.f32.partialorder %v4334_v33, 8.507059e+37  ;;  %v12667_v63 = vor.u32 1.1754944e-38, %v4366_v31  ;;  %v4381_v10 = vand.u32 2147483648, %v15420_v57  ;;  %v4668_v54 = vmul.f32 %v15431_v3, %v15430_v19  ;;  %4917 = vst.msk [vmem:[%s12592_s14 + $0x14] sm:$0xf] %vm4911_vm10, %v4788_v35  ;;  %v15432_v33 = vld [vmem:[#allocation34_spill] sm:$0xff] }
 0x5c2   : > { %v4792_v15 = vpack.c.bf16 %v4664_v27, %v4664_v27  ;;  %v4318_v58 = vsel %vm12659_vm0, %v12484_v55, %v4314_v62  ;;  %vm4345_vm4 = vweird.f32 %v15392_v18  ;;  %vm4346_vm11 = vweird.f32 %v12585_v34  ;;  %v15433_v31 = vld [vmem:[#allocation145_spill] sm:$0xff]  ;;  %4918 = vst.msk [vmem:[%s12592_s14 + $0x18] sm:$0xf] %vm4911_vm10, %v4789_v53 }
 0x5c3   : > { %v4669_v36 = vmul.f32 %v15433_v31, %v15432_v33  ;;  %v4793_v17 = vpack.c.bf16 %v4665_v21, %v4665_v21  ;;  %v4329_v27 = vadd.f32 %v12544_v51, %v4328_v16  ;;  %v4356_v35 = vmul.f32 %v12642_v59, %v15409_v39  ;;  %4919 = vst.msk [vmem:[%s12592_s14 + $0x1c] sm:$0xf] %vm4911_vm10, %v4790_v50  ;;  %v15437_v21 = vld [vmem:[#allocation147_spill] sm:$0xff]  ;;  %v15438_v50 = vld [vmem:[#allocation38_spill] sm:$0xff]  ;;  %vm12768_vm1 = vmor %vm4345_vm4, %vm4346_vm11 }
 0x5c4   : > { %v4670_v8 = vmul.f32 %v15435_v60, %v15434_v9  ;;  %v4794_v55 = vpack.c.bf16 %v4666_v6, %v4666_v6  ;;  %v4343_v62 = vmul.f32 %v12585_v34, %v4342_v48  ;;  %v4671_v19 = vmul.f32 %v15437_v21, %v15436_v28  ;;  %4920 = vst.msk [vmem:[%s12592_s14 + $0x20] sm:$0xf] %vm4911_vm10, %v4791_v5  ;;  %v15439_v48 = vld [vmem:[#allocation148_spill] sm:$0xff] }
 0x5c5   : > { %v4795_v53 = vpack.c.bf16 %v4667_v45, %v4667_v45  ;;  %v12696_v16 = vpop.eup %6124  ;;  %v12701_v3 = vsel %vm12614_vm3, %v12557_v43, %v4318_v58  ;;  %v12703_v6 = vor.u32 1.1754944e-38, %v4381_v10  ;;  %v4672_v33 = vmul.f32 %v15439_v48, %v15438_v50  ;;  %4921 = vst.msk [vmem:[%s12592_s14 + $0x24] sm:$0xf] %vm4911_vm10, %v4792_v15  ;;  %v15445_v10 = vld [vmem:[#allocation217_spill] sm:$0xff]  ;;  %v15448_v21 = vld [vmem:[#allocation40_spill] sm:$0xff]  ;;  %v15449_v50 = vld [vmem:[#allocation150_spill] sm:$0xff] }
 0x5c6   : > { %v4796_v31 = vpack.c.bf16 %v4668_v54, %v4668_v54  ;;  %v12709_v9 = vpop.eup %6126  ;;  %v15442_v43 = vand.u32 2147483647, %v15392_v18  ;;  %v4396_v5 = vand.u32 2147483648, %v15423_v46  ;;  %6128 = vrcp.f32 %v15445_v10  ;;  %v15446_v54 = vld [vmem:[#allocation39_spill] sm:$0xff]  ;;  %v15447_v15 = vld [vmem:[#allocation149_spill] sm:$0xff] }
 0x5c7   : > { %v4673_v58 = vmul.f32 %v15447_v15, %v15446_v54  ;;  %v4797_v60 = vpack.c.bf16 %v4669_v36, %v4669_v36  ;;  %4922 = vst.msk [vmem:[%s12592_s14 + $0x28] sm:$0xf] %vm4911_vm10, %v4793_v17  ;;  %v4333_v37 = vsel %vm12715_vm6, %v12544_v51, %v4329_v27  ;;  %v4357_v28 = vsub.f32 1.0, %v4356_v35  ;;  %v15450_v17 = vld [vmem:[#allocation41_spill] sm:$0xff]  ;;  %v15451_v15 = vld [vmem:[#allocation151_spill] sm:$0xff]  ;;  %v15462_v35 = vld [vmem:[#allocation218_spill] sm:$0xff] }
 0x5c8   : > { %vm12721_vm9 = vcmp.eq.f32.partialorder %v15442_v43, 8.507059e+37  ;;  %vm4361_vm5 = vweird.f32 %v12642_v59  ;;  %v4674_v48 = vmul.f32 %v15449_v50, %v15448_v21  ;;  %v4798_v43 = vpack.c.bf16 %v4670_v8, %v4670_v8  ;;  %4923 = vst.msk [vmem:[%s12592_s14 + $0x2c] sm:$0xf] %vm4911_vm10, %v4794_v55  ;;  %v15452_v8 = vld [vmem:[#allocation42_spill] sm:$0xff]  ;;  %v15453_v55 = vld [vmem:[#allocation152_spill] sm:$0xff]  ;;  %v15454_v50 = vld [vmem:[#allocation43_spill] sm:$0xff] }
 0x5c9   : > { %v4344_v54 = vadd.f32 %v12585_v34, %v4343_v62  ;;  %v4371_v36 = vmul.f32 %v12696_v16, %v15420_v57  ;;  %v4675_v45 = vmul.f32 %v15451_v15, %v15450_v17  ;;  %v4799_v51 = vpack.c.bf16 %v4671_v19, %v4671_v19  ;;  %4924 = vst.msk [vmem:[%s12592_s14 + $0x30] sm:$0xf] %vm4911_vm10, %v4795_v53  ;;  %v15455_v17 = vld [vmem:[#allocation153_spill] sm:$0xff] }
 0x5ca   : > { %vm4360_vm7 = vweird.f32 %v15409_v39  ;;  %v4386_v27 = vmul.f32 %v12709_v9, %v15423_v46  ;;  %v4676_v62 = vmul.f32 %v15453_v55, %v15452_v8  ;;  %v4800_v21 = vpack.c.bf16 %v4672_v33, %v4672_v33  ;;  %4925 = vst.msk [vmem:[%s12592_s14 + $0x34] sm:$0xf] %vm4911_vm10, %v4796_v31  ;;  %v15458_v31 = vld [vmem:[#allocation44_spill] sm:$0xff] }
 0x5cb   : > { %v12757_v19 = vsel %vm12663_vm2, %v12580_v12, %v4333_v37  ;;  %v4677_v15 = vmul.f32 %v15455_v17, %v15454_v50  ;;  %v4801_v20 = vpack.c.bf16 %v4673_v58, %v4673_v58  ;;  %4926 = vst.msk [vmem:[%s12592_s14 + $0x38] sm:$0xf] %vm4911_vm10, %v4797_v60  ;;  %v4358_v12 = vmul.f32 %v12642_v59, %v4357_v28  ;;  %v15459_v37 = vld [vmem:[#allocation154_spill] sm:$0xff]  ;;  %v15460_v50 = vld [vmem:[#allocation45_spill] sm:$0xff]  ;;  %v15461_v17 = vld [vmem:[#allocation155_spill] sm:$0xff] }
 0x5cc   : > { %v12773_v61 = vor.u32 1.1754944e-38, %v4396_v5  ;;  %v4678_v8 = vmul.f32 %v15459_v37, %v15458_v31  ;;  %v4802_v55 = vpack.c.bf16 %v4674_v48, %v4674_v48  ;;  %4927 = vst.msk [vmem:[%s12592_s14 + $0x3c] sm:$0xf] %vm4911_vm10, %v4798_v43  ;;  %v12779_v58 = vpop.eup %6128  ;;  %v4348_v18 = vsel %vm12768_vm1, %v12585_v34, %v4344_v54  ;;  %v15463_v48 = vld [vmem:[#allocation46_spill] sm:$0xff]  ;;  %vm12834_vm14 = vmor %vm4360_vm7, %vm4361_vm5 }
 0x5cd   : > { %v4372_v60 = vsub.f32 1.0, %v4371_v36  ;;  %v4679_v53 = vmul.f32 %v15461_v17, %v15460_v50  ;;  %v4803_v28 = vpack.c.bf16 %v4675_v45, %v4675_v45  ;;  %4928 = vst.msk [vmem:[%s12592_s14 + $0x40] sm:$0xf] %vm4911_vm10, %v4799_v51  ;;  %v4387_v5 = vsub.f32 1.0, %v4386_v27  ;;  %v15467_v36 = vld [vmem:[#allocation47_spill] sm:$0xff]  ;;  %v15468_v45 = vld [vmem:[#allocation156_spill] sm:$0xff] }
 0x5ce   : > { %6130 = vrcp.f32 %v15462_v35  ;;  %v4680_v43 = vmul.f32 %v10310_v26, %v15463_v48  ;;  %v4804_v31 = vpack.c.bf16 %v4676_v62, %v4676_v62  ;;  %4929 = vst.msk [vmem:[%s12592_s14 + $0x44] sm:$0xf] %vm4911_vm10, %v4800_v21  ;;  %v15464_v33 = vand.u32 2147483647, %v15409_v39  ;;  %v15469_v21 = vld [vmem:[#allocation48_spill] sm:$0xff]  ;;  %v15474_v17 = vld [vmem:[#allocation51_spill] sm:$0xff] }
 0x5cf   : > { %vm4376_vm13 = vweird.f32 %v12696_v16  ;;  %v4411_v54 = vand.u32 2147483648, %v15445_v10  ;;  %v4681_v51 = vmul.f32 %v15468_v45, %v15467_v36  ;;  %v4805_v27 = vpack.c.bf16 %v4677_v15, %v4677_v15  ;;  %4930 = vst.msk [vmem:[%s12592_s14 + $0x48] sm:$0xf] %vm4911_vm10, %v4801_v20  ;;  %v15470_v20 = vld [vmem:[#allocation49_spill] sm:$0xff]  ;;  %v15480_v36 = vld [vmem:[#allocation158_spill] sm:$0xff] }
 0x5d0   : > { %vm12795_vm8 = vcmp.eq.f32.partialorder %v15464_v33, 8.507059e+37  ;;  %v12808_v26 = vsel %vm12721_vm9, %v12636_v23, %v4348_v18  ;;  %v4359_v62 = vadd.f32 %v12642_v59, %v4358_v12  ;;  %vm4375_vm15 = vweird.f32 %v15420_v57  ;;  %4931 = vst.msk [vmem:[%s12592_s14 + $0x4c] sm:$0xf] %vm4911_vm10, %v4802_v55 }
 0x5d1   : > { %v4682_v37 = vmul.f32 %v10367_v1, %v15469_v21  ;;  %v4806_v50 = vpack.c.bf16 %v4678_v8, %v4678_v8  ;;  %v4373_v15 = vmul.f32 %v12696_v16, %v4372_v60  ;;  %vm4390_vm3 = vweird.f32 %v15423_v46  ;;  %4932 = vst.msk [vmem:[%s12592_s14 + $0x50] sm:$0xf] %vm4911_vm10, %v4803_v28  ;;  %v15471_v1 = vld [vmem:[#allocation50_spill] sm:$0xff]  ;;  %v15475_v28 = vld [vmem:[#allocation157_spill] sm:$0xff]  ;;  %vm12900_vm6 = vmor %vm4375_vm15, %vm4376_vm13 }
 0x5d2   : > { %v4401_v23 = vmul.f32 %v12779_v58, %v15445_v10  ;;  %v4683_v40 = vmul.f32 %v10379_v41, %v15470_v20  ;;  %v4807_v12 = vpack.c.bf16 %v4679_v53, %v4679_v53  ;;  %v4388_v18 = vmul.f32 %v12709_v9, %v4387_v5  ;;  %4933 = vst.msk [vmem:[%s12592_s14 + $0x54] sm:$0xf] %vm4911_vm10, %v4804_v31  ;;  %v15484_v20 = vld [vmem:[#allocation52_spill] sm:$0xff] }
 0x5d3   : > { %vm4391_vm12 = vweird.f32 %v12709_v9  ;;  %v4684_v8 = vmul.f32 %v10419_v24, %v15471_v1  ;;  %v4808_v55 = vpack.c.bf16 %v4680_v43, %v4680_v43  ;;  %v12838_v53 = vor.u32 1.1754944e-38, %v4411_v54  ;;  %4934 = vst.msk [vmem:[%s12592_s14 + $0x58] sm:$0xf] %vm4911_vm10, %v4805_v27  ;;  %v15479_v54 = vld [vmem:[#allocation54_spill] sm:$0xff]  ;;  %v15485_v1 = vld [vmem:[#allocation159_spill] sm:$0xff] }
 0x5d4   : > { %v4424_v60 = vand.u32 2147483647, %v15462_v35  ;;  %v4685_v5 = vmul.f32 %v15475_v28, %v15474_v17  ;;  %v4809_v24 = vpack.c.bf16 %v4681_v51, %v4681_v51  ;;  %v12845_v48 = vpop.eup %6130  ;;  %v4363_v39 = vsel %vm12834_vm14, %v12642_v59, %v4359_v62  ;;  %4935 = vst.msk [vmem:[%s12592_s14 + $0x5c] sm:$0xf] %vm4911_vm10, %v4806_v50  ;;  %v15486_v50 = vld [vmem:[#allocation133_spill] sm:$0xff]  ;;  %vm12918_vm9 = vmor %vm4390_vm3, %vm4391_vm12 }
 0x5d5   : > { %v15476_v43 = vand.u32 2147483647, %v15420_v57  ;;  %v4426_v33 = vand.u32 2147483648, %v15462_v35  ;;  %v4686_v45 = vmul.f32 %v15480_v36, %v15479_v54  ;;  %v4810_v51 = vpack.c.bf16 %v4682_v37, %v4682_v37  ;;  %4936 = vst.msk [vmem:[%s12592_s14 + $0x60] sm:$0xf] %vm4911_vm10, %v4807_v12  ;;  %v15487_v28 = vld [vmem:[#allocation53_spill] sm:$0xff] }
 0x5d6   : > { %v4374_v27 = vadd.f32 %v12696_v16, %v4373_v15  ;;  %v15481_v59 = vand.u32 2147483647, %v15423_v46  ;;  %v4402_v21 = vsub.f32 1.0, %v4401_v23  ;;  %v4687_v41 = vmul.f32 %v15485_v1, %v15484_v20  ;;  %4937 = vst.msk [vmem:[%s12592_s14 + $0x64] sm:$0xf] %vm4911_vm10, %v4808_v55  ;;  %v15488_v54 = vld [vmem:[#allocation219_spill] sm:$0xff] }
 0x5d7   : > { %vm12852_vm0 = vcmp.eq.f32.partialorder %v15476_v43, 8.507059e+37  ;;  %v4811_v17 = vpack.c.bf16 %v4683_v40, %v4683_v40  ;;  %v4389_v37 = vadd.f32 %v12709_v9, %v4388_v18  ;;  %6132 = vrcp.f32 %v15486_v50  ;;  %v15489_v40 = vld [vmem:[#allocation55_spill] sm:$0xff]  ;;  %4938 = vst.msk [vmem:[%s12592_s14 + $0x68] sm:$0xf] %vm4911_vm10, %v4809_v24 }
 0x5d8   : > { %vm12864_vm2 = vcmp.eq.f32.partialorder %v15481_v59, 8.507059e+37  ;;  %v4688_v15 = vmul.f32 %v10534_v32, %v15487_v28  ;;  %v4812_v43 = vpack.c.bf16 %v4684_v8, %v4684_v8  ;;  %v4416_v23 = vmul.f32 %v12845_v48, %v15462_v35  ;;  %v15490_v32 = vld [vmem:[#allocation56_spill] sm:$0xff]  ;;  %4939 = vst.msk [vmem:[%s12592_s14 + $0x6c] sm:$0xf] %vm4911_vm10, %v4810_v51  ;;  %v15497_v51 = vld [vmem:[#allocation58_spill] sm:$0xff]  ;;  %v15498_v1 = vld [vmem:[#allocation59_spill] sm:$0xff] }
 0x5d9   : > { %6134 = vrcp.f32 %v15488_v54  ;;  %v4689_v12 = vmul.f32 %v10541_v49, %v15489_v40  ;;  %v4813_v36 = vpack.c.bf16 %v4685_v5, %v4685_v5  ;;  %v12888_v18 = vsel %vm12795_vm8, %v12667_v63, %v4363_v39  ;;  %v15491_v8 = vld [vmem:[#allocation160_spill] sm:$0xff]  ;;  %v15494_v5 = vld [vmem:[#allocation57_spill] sm:$0xff]  ;;  %4940 = vst.msk [vmem:[%s12592_s14 + $0x70] sm:$0xf] %vm4911_vm10, %v4811_v17 }
 0x5da   : > { %vm4405_vm4 = vweird.f32 %v15445_v10  ;;  %vm4406_vm11 = vweird.f32 %v12779_v58  ;;  %v4690_v55 = vmul.f32 %v15491_v8, %v15490_v32  ;;  %v4814_v59 = vpack.c.bf16 %v4686_v45, %v4686_v45  ;;  %4941 = vst.msk [vmem:[%s12592_s14 + $0x74] sm:$0xf] %vm4911_vm10, %v4812_v43  ;;  %v15503_v40 = vld [vmem:[#allocation61_spill] sm:$0xff] }
 0x5db   : > { %v12904_v63 = vor.u32 1.1754944e-38, %v4426_v33  ;;  %v4439_v34 = vand.u32 2147483647, %v15486_v50  ;;  %v4691_v24 = vmul.f32 %v10636_v22, %v15494_v5  ;;  %v4815_v39 = vpack.c.bf16 %v4687_v41, %v4687_v41  ;;  %4942 = vst.msk [vmem:[%s12592_s14 + $0x78] sm:$0xf] %vm4911_vm10, %v4813_v36  ;;  %v15506_v5 = vld [vmem:[#allocation220_spill] sm:$0xff]  ;;  %vm12989_vm8 = vmor %vm4405_vm4, %vm4406_vm11 }
 0x5dc   : > { %v4378_v45 = vsel %vm12900_vm6, %v12696_v16, %v4374_v27  ;;  %v4403_v33 = vmul.f32 %v12779_v58, %v4402_v21  ;;  %v4692_v22 = vmul.f32 %v10640_v47, %v15497_v51  ;;  %v4816_v20 = vpack.c.bf16 %v4688_v15, %v4688_v15  ;;  %4943 = vst.msk [vmem:[%s12592_s14 + $0x7c] sm:$0xf] %vm4911_vm10, %v4814_v59  ;;  %v15505_v59 = vld [vmem:[#allocation63_spill] sm:$0xff]  ;;  %v15524_v47 = vld [vmem:[#allocation70_spill] sm:$0xff] }
 0x5dd   : > { %v4393_v16 = vsel %vm12918_vm9, %v12709_v9, %v4389_v37  ;;  %v4417_v27 = vsub.f32 1.0, %v4416_v23  ;;  %v4693_v46 = vmul.f32 %v10702_v4, %v15498_v1  ;;  %v4817_v41 = vpack.c.bf16 %v4689_v12, %v4689_v12  ;;  %v12934_v17 = vpop.eup %6132  ;;  %v15502_v37 = vld [vmem:[#allocation60_spill] sm:$0xff]  ;;  %4944 = vst.msk [vmem:[%s12592_s14 + $0x80] sm:$0xf] %vm4911_vm10, %v4815_v39 }
 0x5de   : > { %v15499_v21 = vand.u32 2147483647, %v15445_v10  ;;  %v4441_v28 = vand.u32 2147483648, %v15486_v50  ;;  %v4454_v9 = vand.u32 2147483647, %v15488_v54  ;;  %v4694_v4 = vmul.f32 %v10710_v13, %v15502_v37 }
 0x5df   : > { %v4818_v15 = vpack.c.bf16 %v4690_v55, %v4690_v55  ;;  %v12948_v43 = vpop.eup %6134  ;;  %v12953_v23 = vsel %vm12852_vm0, %v12703_v6, %v4378_v45  ;;  %vm4420_vm7 = vweird.f32 %v15462_v35  ;;  %vm4421_vm1 = vweird.f32 %v12845_v48  ;;  %v15504_v6 = vld [vmem:[#allocation62_spill] sm:$0xff]  ;;  %4945 = vst.msk [vmem:[%s12592_s14 + $0x84] sm:$0xf] %vm4911_vm10, %v4816_v20 }
 0x5e0   : > { %vm12938_vm5 = vcmp.eq.f32.partialorder %v15499_v21, 8.507059e+37  ;;  %v4695_v12 = vmul.f32 %v10716_v44, %v15503_v40  ;;  %v4819_v36 = vpack.c.bf16 %v4691_v24, %v4691_v24  ;;  %v12964_v13 = vsel %vm12864_vm2, %v12773_v61, %v4393_v16  ;;  %4946 = vst.msk [vmem:[%s12592_s14 + $0x88] sm:$0xf] %vm4911_vm10, %v4817_v41  ;;  %v15513_v16 = vld [vmem:[#allocation66_spill] sm:$0xff]  ;;  %v15515_v21 = vld [vmem:[#allocation67_spill] sm:$0xff]  ;;  %vm13041_vm3 = vmor %vm4420_vm7, %vm4421_vm1 }
 0x5e1   : > { %v4404_v31 = vadd.f32 %v12779_v58, %v4403_v33  ;;  %v4696_v32 = vmul.f32 %v10757_v29, %v15504_v6  ;;  %v4820_v8 = vpack.c.bf16 %v4692_v22, %v4692_v22  ;;  %v4418_v44 = vmul.f32 %v12845_v48, %v4417_v27  ;;  %v15507_v29 = vld [vmem:[#allocation64_spill] sm:$0xff]  ;;  %4947 = vst.msk [vmem:[%s12592_s14 + $0x8c] sm:$0xf] %vm4911_vm10, %v4818_v15  ;;  %v15510_v33 = vld [vmem:[#allocation65_spill] sm:$0xff]  ;;  %v15518_v40 = vld [vmem:[#allocation163_spill] sm:$0xff] }
 0x5e2   : > { %v4431_v55 = vmul.f32 %v12934_v17, %v15486_v50  ;;  %v4697_v49 = vmul.f32 %v10810_v38, %v15505_v59  ;;  %v4821_v62 = vpack.c.bf16 %v4693_v46, %v4693_v46  ;;  %v4446_v61 = vmul.f32 %v12948_v43, %v15488_v54  ;;  %4948 = vst.msk [vmem:[%s12592_s14 + $0x90] sm:$0xf] %vm4911_vm10, %v4819_v36  ;;  %v15514_v27 = vld [vmem:[#allocation161_spill] sm:$0xff]  ;;  %v15517_v15 = vld [vmem:[#allocation68_spill] sm:$0xff]  ;;  %v15519_v6 = vld [vmem:[#allocation134_spill] sm:$0xff] }
 0x5e3   : > { %6136 = vrcp.f32 %v15506_v5  ;;  %v4698_v24 = vmul.f32 %v10816_v25, %v15507_v29  ;;  %v4822_v39 = vpack.c.bf16 %v4694_v4, %v4694_v4  ;;  %v12993_v45 = vor.u32 1.1754944e-38, %v4441_v28  ;;  %4949 = vst.msk [vmem:[%s12592_s14 + $0x94] sm:$0xf] %vm4911_vm10, %v4820_v8  ;;  %v15521_v8 = vld [vmem:[#allocation164_spill] sm:$0xff] }
 0x5e4   : > { %v4456_v57 = vand.u32 2147483648, %v15488_v54  ;;  %v4699_v51 = vmul.f32 %v10871_v0, %v15510_v33  ;;  %v4823_v25 = vpack.c.bf16 %v4695_v12, %v4695_v12  ;;  %v4408_v10 = vsel %vm12989_vm8, %v12779_v58, %v4404_v31  ;;  %v15516_v58 = vld [vmem:[#allocation162_spill] sm:$0xff]  ;;  %4950 = vst.msk [vmem:[%s12592_s14 + $0x98] sm:$0xf] %vm4911_vm10, %v4821_v62  ;;  %v15541_v22 = vld [vmem:[#allocation76_spill] sm:$0xff] }
 0x5e5   : > { %vm13005_vm13 = vcmp.eq.f32.partialorder %v4424_v60, 8.507059e+37  ;;  %v4469_v20 = vand.u32 2147483647, %v15506_v5  ;;  %v4700_v1 = vmul.f32 %v15514_v27, %v15513_v16  ;;  %v4824_v0 = vpack.c.bf16 %v4696_v32, %v4696_v32  ;;  %4951 = vst.msk [vmem:[%s12592_s14 + $0x9c] sm:$0xf] %vm4911_vm10, %v4822_v39  ;;  %v15520_v32 = vld [vmem:[#allocation69_spill] sm:$0xff] }
 0x5e6   : > { %v4419_v46 = vadd.f32 %v12845_v48, %v4418_v44  ;;  %v4432_v41 = vsub.f32 1.0, %v4431_v55  ;;  %v4701_v28 = vmul.f32 %v15516_v58, %v15515_v21  ;;  %v4825_v37 = vpack.c.bf16 %v4697_v49, %v4697_v49  ;;  %4952 = vst.msk [vmem:[%s12592_s14 + $0xa0] sm:$0xf] %vm4911_vm10, %v4823_v25  ;;  %v15525_v49 = vld [vmem:[#allocation165_spill] sm:$0xff]  ;;  %v15527_v39 = vld [vmem:[#allocation166_spill] sm:$0xff]  ;;  %v15530_v16 = vld [vmem:[#allocation167_spill] sm:$0xff] }
 0x5e7   : > { %v4447_v60 = vsub.f32 1.0, %v4446_v61  ;;  %v4471_v4 = vand.u32 2147483648, %v15506_v5  ;;  %v4702_v12 = vmul.f32 %v15518_v40, %v15517_v15  ;;  %v4826_v36 = vpack.c.bf16 %v4698_v24, %v4698_v24  ;;  %4953 = vst.msk [vmem:[%s12592_s14 + $0xa4] sm:$0xf] %vm4911_vm10, %v4824_v0  ;;  %v15526_v24 = vld [vmem:[#allocation71_spill] sm:$0xff]  ;;  %v15528_v25 = vld [vmem:[#allocation221_spill] sm:$0xff] }
 0x5e8   : > { %v13027_v31 = vsel %vm12938_vm5, %v12838_v53, %v4408_v10  ;;  %vm4435_vm15 = vweird.f32 %v15486_v50  ;;  %6138 = vrcp.f32 %v15519_v6  ;;  %v4703_v44 = vmul.f32 %v15521_v8, %v15520_v32  ;;  %4954 = vst.msk [vmem:[%s12592_s14 + $0xa8] sm:$0xf] %vm4911_vm10, %v4825_v37  ;;  %v15529_v10 = vld [vmem:[#allocation72_spill] sm:$0xff]  ;;  %v15536_v15 = vld [vmem:[#allocation169_spill] sm:$0xff]  ;;  %v15539_v8 = vld [vmem:[#allocation75_spill] sm:$0xff] }
 0x5e9   : > { %v4827_v55 = vpack.c.bf16 %v4699_v51, %v4699_v51  ;;  %v13035_v59 = vpop.eup %6136  ;;  %vm4436_vm12 = vweird.f32 %v12934_v17  ;;  %vm4450_vm14 = vweird.f32 %v15488_v54  ;;  %vm4451_vm0 = vweird.f32 %v12948_v43  ;;  %4955 = vst.msk [vmem:[%s12592_s14 + $0xac] sm:$0xf] %vm4911_vm10, %v4826_v36 }
 0x5ea   : > { %v4704_v62 = vmul.f32 %v15525_v49, %v15524_v47  ;;  %v4828_v61 = vpack.c.bf16 %v4700_v1, %v4700_v1  ;;  %v4423_v35 = vsel %vm13041_vm3, %v12845_v48, %v4419_v46  ;;  %v4433_v29 = vmul.f32 %v12934_v17, %v4432_v41  ;;  %v15531_v46 = vld [vmem:[#allocation73_spill] sm:$0xff]  ;;  %v15532_v41 = vld [vmem:[#allocation168_spill] sm:$0xff]  ;;  %v15542_v49 = vld [vmem:[#allocation171_spill] sm:$0xff] }
 0x5eb   : > { %v4705_v38 = vmul.f32 %v15527_v39, %v15526_v24  ;;  %v4829_v33 = vpack.c.bf16 %v4701_v28, %v4701_v28  ;;  %v4448_v51 = vmul.f32 %v12948_v43, %v4447_v60  ;;  %6140 = vrcp.f32 %v15528_v25  ;;  %4956 = vst.msk [vmem:[%s12592_s14 + $0xb0] sm:$0xf] %vm4911_vm10, %v4827_v55  ;;  %v15535_v60 = vld [vmem:[#allocation74_spill] sm:$0xff]  ;;  %v15544_v24 = vld [vmem:[#allocation172_spill] sm:$0xff]  ;;  %vm13122_vm6 = vmor %vm4435_vm15, %vm4436_vm12 }
 0x5ec   : > { %v4706_v27 = vmul.f32 %v15530_v16, %v15529_v10  ;;  %v4830_v1 = vpack.c.bf16 %v4702_v12, %v4702_v12  ;;  %v13066_v48 = vor.u32 1.1754944e-38, %v4456_v57  ;;  %v4461_v0 = vmul.f32 %v13035_v59, %v15506_v5  ;;  %4957 = vst.msk [vmem:[%s12592_s14 + $0xb4] sm:$0xf] %vm4911_vm10, %v4828_v61  ;;  %v15547_v10 = vld [vmem:[#allocation222_spill] sm:$0xff]  ;;  %vm13137_vm9 = vmor %vm4450_vm14, %vm4451_vm0 }
 0x5ed   : > { %v4707_v21 = vmul.f32 %v15532_v41, %v15531_v46  ;;  %v4831_v58 = vpack.c.bf16 %v4703_v44, %v4703_v44  ;;  %vm13076_vm2 = vcmp.eq.f32.partialorder %v4439_v34, 8.507059e+37  ;;  %v13080_v37 = vor.u32 1.1754944e-38, %v4471_v4  ;;  %v15540_v44 = vld [vmem:[#allocation170_spill] sm:$0xff]  ;;  %4958 = vst.msk [vmem:[%s12592_s14 + $0xb8] sm:$0xf] %vm4911_vm10, %v4829_v33  ;;  %v15562_v33 = vld [vmem:[#allocation175_spill] sm:$0xff] }
 0x5ee   : > { %v4484_v57 = vand.u32 2147483647, %v15519_v6  ;;  %v4708_v40 = vmul.f32 %v15536_v15, %v15535_v60  ;;  %v4832_v12 = vpack.c.bf16 %v4704_v62, %v4704_v62  ;;  %v13087_v36 = vpop.eup %6138  ;;  %v13092_v34 = vsel %vm13005_vm13, %v12904_v63, %v4423_v35  ;;  %4959 = vst.msk [vmem:[%s12592_s14 + $0xbc] sm:$0xf] %vm4911_vm10, %v4830_v1  ;;  %v15543_v35 = vld [vmem:[#allocation77_spill] sm:$0xff]  ;;  %v15548_v16 = vld [vmem:[#allocation78_spill] sm:$0xff] }
 0x5ef   : > { %vm13096_vm4 = vcmp.eq.f32.partialorder %v4454_v9, 8.507059e+37  ;;  %v4486_v32 = vand.u32 2147483648, %v15519_v6  ;;  %v4709_v55 = vmul.f32 %v15540_v44, %v15539_v8  ;;  %v4833_v53 = vpack.c.bf16 %v4705_v38, %v4705_v38  ;;  %4960 = vst.msk [vmem:[%s12592_s14 + $0xc0] sm:$0xf] %vm4911_vm10, %v4831_v58  ;;  %v15553_v58 = vld [vmem:[#allocation201_spill] sm:$0xff]  ;;  %v15565_v28 = vld [vmem:[#allocation206_spill] sm:$0xff] }
 0x5f0   : > { %v4434_v47 = vadd.f32 %v12934_v17, %v4433_v29  ;;  %v4449_v63 = vadd.f32 %v12948_v43, %v4448_v51  ;;  %v4710_v62 = vmul.f32 %v15542_v49, %v15541_v22  ;;  %v4834_v9 = vpack.c.bf16 %v4706_v27, %v4706_v27  ;;  %v15549_v27 = vld [vmem:[#allocation173_spill] sm:$0xff]  ;;  %4961 = vst.msk [vmem:[%s12592_s14 + $0xc4] sm:$0xf] %vm4911_vm10, %v4832_v12  ;;  %v15554_v12 = vld [vmem:[#allocation80_spill] sm:$0xff]  ;;  %v15557_v49 = vld [vmem:[#allocation203_spill] sm:$0xff] }
 0x5f1   : > { %v4462_v61 = vsub.f32 1.0, %v4461_v0  ;;  %vm4466_vm11 = vweird.f32 %v13035_v59  ;;  %v4711_v39 = vmul.f32 %v15544_v24, %v15543_v35  ;;  %v4835_v38 = vpack.c.bf16 %v4707_v21, %v4707_v21  ;;  %v13116_v29 = vpop.eup %6140  ;;  %v15552_v21 = vld [vmem:[#allocation79_spill] sm:$0xff]  ;;  %4962 = vst.msk [vmem:[%s12592_s14 + $0xc8] sm:$0xf] %vm4911_vm10, %v4833_v53  ;;  %v15556_v22 = vld [vmem:[#allocation81_spill] sm:$0xff]  ;;  %v15559_v24 = vld [vmem:[#allocation204_spill] sm:$0xff] }
 0x5f2   : > { %v4476_v51 = vmul.f32 %v13087_v36, %v15519_v6  ;;  %6142 = vrcp.f32 %v15547_v10  ;;  %v4712_v1 = vmul.f32 %v15549_v27, %v15548_v16  ;;  %v4836_v0 = vpack.c.bf16 %v4708_v40, %v4708_v40  ;;  %4963 = vst.msk [vmem:[%s12592_s14 + $0xcc] sm:$0xf] %vm4911_vm10, %v4834_v9 }
 0x5f3   : > { %vm4465_vm5 = vweird.f32 %v15506_v5  ;;  %v13142_v46 = vor.u32 1.1754944e-38, %v4486_v32  ;;  %v4499_v41 = vand.u32 2147483647, %v15528_v25  ;;  %v4713_v60 = vmul.f32 %v15553_v58, %v15552_v21  ;;  %v15555_v32 = vld [vmem:[#allocation202_spill] sm:$0xff]  ;;  %4964 = vst.msk [vmem:[%s12592_s14 + $0xd0] sm:$0xf] %vm4911_vm10, %v4835_v38 }
 0x5f4   : > { %v4837_v15 = vpack.c.bf16 %v4709_v55, %v4709_v55  ;;  %v4438_v54 = vsel %vm13122_vm6, %v12934_v17, %v4434_v47  ;;  %v4453_v40 = vsel %vm13137_vm9, %v12948_v43, %v4449_v63  ;;  %v4714_v8 = vmul.f32 %v15555_v32, %v15554_v12  ;;  %v15558_v63 = vld [vmem:[#allocation174_spill] sm:$0xff]  ;;  %4965 = vst.msk [vmem:[%s12592_s14 + $0xd4] sm:$0xf] %vm4911_vm10, %v4836_v0  ;;  %v15570_v32 = vld [vmem:[#allocation208_spill] sm:$0xff]  ;;  %vm13224_vm15 = vmor %vm4465_vm5, %vm4466_vm11 }
 0x5f5   : > { %v4838_v44 = vpack.c.bf16 %v4710_v62, %v4710_v62  ;;  %v4463_v55 = vmul.f32 %v13035_v59, %v4462_v61  ;;  %v4491_v53 = vmul.f32 %v13116_v29, %v15528_v25  ;;  %v4715_v35 = vmul.f32 %v15557_v49, %v15556_v22  ;;  %v15569_v12 = vld [vmem:[#allocation6_spill] sm:$0xff]  ;;  %v15572_v49 = vld [vmem:[#allocation176_spill] sm:$0xff] }
 0x5f6   : > { %v4839_v17 = vpack.c.bf16 %v4711_v39, %v4711_v39  ;;  %v4477_v47 = vsub.f32 1.0, %v4476_v51  ;;  %v4501_v43 = vand.u32 2147483648, %v15528_v25  ;;  %v4716_v62 = vmul.f32 %v15559_v24, %v15558_v63  ;;  %v15563_v51 = vld [vmem:[#allocation205_spill] sm:$0xff]  ;;  %4966 = vst.msk [vmem:[%s12592_s14 + $0xd8] sm:$0xf] %vm4911_vm10, %v4837_v15  ;;  %v15567_v15 = vld [vmem:[#allocation207_spill] sm:$0xff] }
 0x5f7   : > { %v4840_v9 = vpack.c.bf16 %v4712_v1, %v4712_v1  ;;  %v13174_v61 = vsel %vm13076_vm2, %v12993_v45, %v4438_v54  ;;  %vm13178_vm7 = vcmp.eq.f32.partialorder %v4469_v20, 8.507059e+37  ;;  %v4514_v38 = vand.u32 2147483647, %v15547_v10  ;;  %v15564_v20 = vld [vmem:[#allocation21_spill] sm:$0xff]  ;;  %4967 = vst.msk [vmem:[%s12592_s14 + $0xdc] sm:$0xf] %vm4911_vm10, %v4838_v44 }
 0x5f8   : > { %v4717_v16 = vmul.f32 %v15563_v51, %v15562_v33  ;;  %v4841_v27 = vpack.c.bf16 %v4713_v60, %v4713_v60  ;;  %v13187_v1 = vpop.eup %6142  ;;  %v13192_v45 = vsel %vm13096_vm4, %v13066_v48, %v4453_v40  ;;  %vm4480_vm1 = vweird.f32 %v15519_v6  ;;  %v15566_v60 = vld [vmem:[#allocation4_spill] sm:$0xff]  ;;  %4968 = vst.msk [vmem:[%s12592_s14 + $0xe0] sm:$0xf] %vm4911_vm10, %v4839_v17  ;;  %v15568_v40 = vld [vmem:[#allocation223_spill] sm:$0xff]  ;;  %v15575_v63 = vld [vmem:[#allocation10_spill] sm:$0xff] }
 0x5f9   : > { %vm4481_vm8 = vweird.f32 %v13087_v36  ;;  %v4718_v0 = vmul.f32 %v15565_v28, %v15564_v20  ;;  %v4842_v50 = vpack.c.bf16 %v4714_v8, %v4714_v8  ;;  %v4464_v21 = vadd.f32 %v13035_v59, %v4463_v55  ;;  %4969 = vst.msk [vmem:[%s12592_s14 + $0xe4] sm:$0xf] %vm4911_vm10, %v4840_v9  ;;  %v15576_v24 = vld [vmem:[#allocation197_spill] sm:$0xff]  ;;  %v15591_v39 = vld [vmem:[#allocation224_spill] sm:$0xff] }
 0x5fa   : > { %v4492_v58 = vsub.f32 1.0, %v4491_v53  ;;  %v4719_v4 = vmul.f32 %v15567_v15, %v15566_v60  ;;  %v4843_v54 = vpack.c.bf16 %v4715_v35, %v4715_v35  ;;  %v4478_v48 = vmul.f32 %v13087_v36, %v4477_v47  ;;  %v15571_v53 = vld [vmem:[#allocation8_spill] sm:$0xff]  ;;  %4970 = vst.msk [vmem:[%s12592_s14 + $0xe8] sm:$0xf] %vm4911_vm10, %v4841_v27  ;;  %v15580_v27 = vld [vmem:[#allocation177_spill] sm:$0xff]  ;;  %vm13281_vm2 = vmor %vm4480_vm1, %vm4481_vm8 }
 0x5fb   : > { %6144 = vrcp.f32 %v15568_v40  ;;  %v4720_v8 = vmul.f32 %v15570_v32, %v15569_v12  ;;  %v4844_v22 = vpack.c.bf16 %v4716_v62, %v4716_v62  ;;  %vm4495_vm13 = vweird.f32 %v15528_v25  ;;  %4971 = vst.msk [vmem:[%s12592_s14 + $0xec] sm:$0xf] %vm4911_vm10, %v4842_v50  ;;  %v15581_v50 = vld [vmem:[#allocation14_spill] sm:$0xff]  ;;  %v15593_v47 = vld [vmem:[#allocation180_spill] sm:$0xff] }
 0x5fc   : > { %v13212_v44 = vor.u32 1.1754944e-38, %v4501_v43  ;;  %v4506_v55 = vmul.f32 %v13187_v1, %v15547_v10  ;;  %v4721_v35 = vmul.f32 %v15572_v49, %v15571_v53  ;;  %v4845_v17 = vpack.c.bf16 %v4717_v16, %v4717_v16  ;;  %v15579_v16 = vld [vmem:[#allocation12_spill] sm:$0xff]  ;;  %4972 = vst.msk [vmem:[%s12592_s14 + $0xf0] sm:$0xf] %vm4911_vm10, %v4843_v54  ;;  %v15585_v54 = vld [vmem:[#allocation18_spill] sm:$0xff] }
 0x5fd   : > { %vm4496_vm3 = vweird.f32 %v13116_v29  ;;  %v4516_v43 = vand.u32 2147483648, %v15547_v10  ;;  %v4722_v62 = vmul.f32 %v15576_v24, %v15575_v63  ;;  %v4846_v9 = vpack.c.bf16 %v4718_v0, %v4718_v0  ;;  %4973 = vst.msk [vmem:[%s12592_s14 + $0xf4] sm:$0xf] %vm4911_vm10, %v4844_v22  ;;  %v15588_v22 = vld [vmem:[#allocation198_spill] sm:$0xff]  ;;  %v15609_v5 = vld [vmem:[#allocation88_spill] sm:$0xff] }
 0x5fe   : > { %v4468_v33 = vsel %vm13224_vm15, %v13035_v59, %v4464_v21  ;;  %vm13239_vm12 = vcmp.eq.f32.partialorder %v4484_v57, 8.507059e+37  ;;  %v4493_v51 = vmul.f32 %v13116_v29, %v4492_v58  ;;  %v4723_v20 = vmul.f32 %v15580_v27, %v15579_v16  ;;  %v15582_v21 = vld [vmem:[#allocation178_spill] sm:$0xff]  ;;  %4974 = vst.msk [vmem:[%s12592_s14 + $0xf8] sm:$0xf] %vm4911_vm10, %v4845_v17  ;;  %vm13311_vm11 = vmor %vm4495_vm13, %vm4496_vm3 }
 0x5ff   : > { %v4847_v28 = vpack.c.bf16 %v4719_v4, %v4719_v4  ;;  %v4479_v0 = vadd.f32 %v13087_v36, %v4478_v48  ;;  %v4529_v59 = vand.u32 2147483647, %v15568_v40  ;;  %v4724_v60 = vmul.f32 %v15582_v21, %v15581_v50  ;;  %v15586_v48 = vld [vmem:[#allocation179_spill] sm:$0xff]  ;;  %4975 = vst.msk [vmem:[%s12592_s14 + $0xfc] sm:$0xf] %vm4911_vm10, %v4846_v9  ;;  %v15592_v17 = vld [vmem:[#allocation82_spill] sm:$0xff] }
 0x600   : > { %v4848_v57 = vpack.c.bf16 %v4720_v8, %v4720_v8  ;;  %vm13256_vm14 = vcmp.eq.f32.partialorder %v4499_v41, 8.507059e+37  ;;  %v4507_v15 = vsub.f32 1.0, %v4506_v55  ;;  %v4531_v4 = vand.u32 2147483648, %v15568_v40  ;;  %v15587_v41 = vld [vmem:[#allocation24_spill] sm:$0xff]  ;;  %v15595_v9 = vld [vmem:[#allocation83_spill] sm:$0xff]  ;;  %v15598_v50 = vld [vmem:[#allocation182_spill] sm:$0xff] }
 0x601   : > { %v4725_v12 = vmul.f32 %v15586_v48, %v15585_v54  ;;  %v4849_v32 = vpack.c.bf16 %v4721_v35, %v4721_v35  ;;  %v13265_v53 = vpop.eup %6144  ;;  %v13270_v8 = vsel %vm13178_vm7, %v13080_v37, %v4468_v33  ;;  %vm4511_vm0 = vweird.f32 %v13187_v1  ;;  %4976 = vst.msk [vmem:[%s12592_s14 + $0x100] sm:$0xf] %vm4911_vm10, %v4847_v28  ;;  %v15596_v33 = vld [vmem:[#allocation181_spill] sm:$0xff]  ;;  %v15597_v28 = vld [vmem:[#allocation84_spill] sm:$0xff] }
 0x602   : > { %v4726_v55 = vmul.f32 %v15588_v22, %v15587_v41  ;;  %v4850_v49 = vpack.c.bf16 %v4722_v62, %v4722_v62  ;;  %v4494_v37 = vadd.f32 %v13116_v29, %v4493_v51  ;;  %vm4510_vm4 = vweird.f32 %v15547_v10  ;;  %v15594_v62 = vld [vmem:[#allocation225_spill] sm:$0xff]  ;;  %4977 = vst.msk [vmem:[%s12592_s14 + $0x104] sm:$0xf] %vm4911_vm10, %v4848_v57  ;;  %v15606_v22 = vld [vmem:[#allocation184_spill] sm:$0xff] }
 0x603   : > { %6146 = vrcp.f32 %v15591_v39  ;;  %v4727_v63 = vmul.f32 %v15593_v47, %v15592_v17  ;;  %v4851_v24 = vpack.c.bf16 %v4723_v20, %v4723_v20  ;;  %v4483_v6 = vsel %vm13281_vm2, %v13087_v36, %v4479_v0  ;;  %4978 = vst.msk [vmem:[%s12592_s14 + $0x108] sm:$0xf] %vm4911_vm10, %v4849_v32  ;;  %v15601_v57 = vld [vmem:[#allocation85_spill] sm:$0xff]  ;;  %v15605_v32 = vld [vmem:[#allocation86_spill] sm:$0xff]  ;;  %vm13377_vm7 = vmor %vm4510_vm4, %vm4511_vm0 }
 0x604   : > { %6148 = vrcp.f32 %v15594_v62  ;;  %v4728_v51 = vmul.f32 %v15596_v33, %v15595_v9  ;;  %v4852_v16 = vpack.c.bf16 %v4724_v60, %v4724_v60  ;;  %v4508_v27 = vmul.f32 %v13187_v1, %v4507_v15  ;;  %v15602_v15 = vld [vmem:[#allocation183_spill] sm:$0xff]  ;;  %4979 = vst.msk [vmem:[%s12592_s14 + $0x10c] sm:$0xf] %vm4911_vm10, %v4850_v49  ;;  %v15608_v49 = vld [vmem:[#allocation185_spill] sm:$0xff]  ;;  %v15613_v36 = vld [vmem:[#allocation90_spill] sm:$0xff] }
 0x605   : > { %v4521_v20 = vmul.f32 %v13265_v53, %v15568_v40  ;;  %v4729_v21 = vmul.f32 %v15598_v50, %v15597_v28  ;;  %v4853_v54 = vpack.c.bf16 %v4725_v12, %v4725_v12  ;;  %v4517_v0 = vor.u32 1.1754944e-38, %v4516_v43  ;;  %4980 = vst.msk [vmem:[%s12592_s14 + $0x110] sm:$0xf] %vm4911_vm10, %v4851_v24 }
 0x606   : > { %v4546_v60 = vand.u32 2147483648, %v15591_v39  ;;  %v4730_v48 = vmul.f32 %v15602_v15, %v15601_v57  ;;  %v4854_v41 = vpack.c.bf16 %v4726_v55, %v4726_v55  ;;  %v4498_v12 = vsel %vm13311_vm11, %v13116_v29, %v4494_v37  ;;  %4981 = vst.msk [vmem:[%s12592_s14 + $0x114] sm:$0xf] %vm4911_vm10, %v4852_v16  ;;  %v15616_v15 = vld [vmem:[#allocation226_spill] sm:$0xff] }
 0x607   : > { %vm13325_vm6 = vcmp.eq.f32.partialorder %v4514_v38, 8.507059e+37  ;;  %v13329_v43 = vor.u32 1.1754944e-38, %v4531_v4  ;;  %v4731_v35 = vmul.f32 %v15606_v22, %v15605_v32  ;;  %v4855_v17 = vpack.c.bf16 %v4727_v63, %v4727_v63  ;;  %v15607_v38 = vld [vmem:[#allocation87_spill] sm:$0xff]  ;;  %4982 = vst.msk [vmem:[%s12592_s14 + $0x118] sm:$0xf] %vm4911_vm10, %v4853_v54  ;;  %v15619_v22 = vld [vmem:[#allocation92_spill] sm:$0xff] }
 0x608   : > { %v13338_v55 = vsel %vm13239_vm12, %v13142_v46, %v4483_v6  ;;  %v4544_v29 = vand.u32 2147483647, %v15591_v39  ;;  %v4732_v37 = vmul.f32 %v15608_v49, %v15607_v38  ;;  %v4856_v47 = vpack.c.bf16 %v4728_v51, %v4728_v51  ;;  %v15610_v46 = vld [vmem:[#allocation186_spill] sm:$0xff]  ;;  %4983 = vst.msk [vmem:[%s12592_s14 + $0x11c] sm:$0xf] %vm4911_vm10, %v4854_v41  ;;  %v15618_v41 = vld [vmem:[#allocation188_spill] sm:$0xff] }
 0x609   : > { %v13345_v4 = vpop.eup %6146  ;;  %v4509_v63 = vadd.f32 %v13187_v1, %v4508_v27  ;;  %v4522_v9 = vsub.f32 1.0, %v4521_v20  ;;  %vm4526_vm9 = vweird.f32 %v13265_v53  ;;  %v4733_v24 = vmul.f32 %v15610_v46, %v15609_v5  ;;  %v15611_v27 = vld [vmem:[#allocation89_spill] sm:$0xff]  ;;  %v15612_v20 = vld [vmem:[#allocation187_spill] sm:$0xff]  ;;  %4984 = vst.msk [vmem:[%s12592_s14 + $0x120] sm:$0xf] %vm4911_vm10, %v4855_v17 }
 0x60a   : > { %v4857_v6 = vpack.c.bf16 %v4729_v21, %v4729_v21  ;;  %v13353_v33 = vpop.eup %6148  ;;  %v13358_v51 = vsel %vm13256_vm14, %v13212_v44, %v4498_v12  ;;  %v13360_v16 = vor.u32 1.1754944e-38, %v4546_v60  ;;  %v4734_v28 = vmul.f32 %v15612_v20, %v15611_v27  ;;  %4985 = vst.msk [vmem:[%s12592_s14 + $0x124] sm:$0xf] %vm4911_vm10, %v4856_v47  ;;  %v15621_v47 = vld [vmem:[#allocation93_spill] sm:$0xff]  ;;  %v15628_v60 = vld [vmem:[#allocation191_spill] sm:$0xff] }
 0x60b   : > { %v4858_v50 = vpack.c.bf16 %v4730_v48, %v4730_v48  ;;  %vm4525_vm5 = vweird.f32 %v15568_v40  ;;  %v4559_v21 = vand.u32 2147483647, %v15594_v62  ;;  %v4561_v54 = vand.u32 2147483648, %v15594_v62  ;;  %v15617_v48 = vld [vmem:[#allocation91_spill] sm:$0xff]  ;;  %v15622_v5 = vld [vmem:[#allocation189_spill] sm:$0xff] }
 0x60c   : > { %v4735_v44 = vmul.f32 %v11947_v52, %v15613_v36  ;;  %v4859_v58 = vpack.c.bf16 %v4731_v35, %v4731_v35  ;;  %v4536_v57 = vmul.f32 %v13345_v4, %v15591_v39  ;;  %6150 = vrcp.f32 %v15616_v15  ;;  %v15620_v35 = vld [vmem:[#allocation33_spill] sm:$0xff]  ;;  %4986 = vst.msk [vmem:[%s12592_s14 + $0x128] sm:$0xf] %vm4911_vm10, %v4857_v6  ;;  %v15626_v6 = vld [vmem:[#allocation190_spill] sm:$0xff]  ;;  %vm13449_vm3 = vmor %vm4525_vm5, %vm4526_vm9 }
 0x60d   : > { %v4736_v52 = vmul.f32 %v15618_v41, %v15617_v48  ;;  %v4860_v12 = vpack.c.bf16 %v4732_v37, %v4732_v37  ;;  %v4513_v10 = vsel %vm13377_vm7, %v13187_v1, %v4509_v63  ;;  %v4523_v32 = vmul.f32 %v13265_v53, %v4522_v9  ;;  %4987 = vst.msk [vmem:[%s12592_s14 + $0x12c] sm:$0xf] %vm4911_vm10, %v4858_v50  ;;  %v15653_v1 = vld [vmem:[#allocation229_spill] sm:$0xff] }
 0x60e   : > { %v4737_v17 = vmul.f32 %v15620_v35, %v15619_v22  ;;  %v4861_v38 = vpack.c.bf16 %v4733_v24, %v4733_v24  ;;  %v4551_v49 = vmul.f32 %v13353_v33, %v15594_v62  ;;  %v4574_v37 = vand.u32 2147483647, %v15616_v15  ;;  %v15625_v24 = vld [vmem:[#allocation94_spill] sm:$0xff]  ;;  %4988 = vst.msk [vmem:[%s12592_s14 + $0x130] sm:$0xf] %vm4911_vm10, %v4859_v58  ;;  %v15630_v22 = vld [vmem:[#allocation35_spill] sm:$0xff] }
 0x60f   : > { %v4738_v46 = vmul.f32 %v15622_v5, %v15621_v47  ;;  %v4862_v27 = vpack.c.bf16 %v4734_v28, %v4734_v28  ;;  %vm13405_vm1 = vcmp.eq.f32.partialorder %v4529_v59, 8.507059e+37  ;;  %v13409_v63 = vor.u32 1.1754944e-38, %v4561_v54  ;;  %v15627_v59 = vld [vmem:[#allocation95_spill] sm:$0xff]  ;;  %4989 = vst.msk [vmem:[%s12592_s14 + $0x134] sm:$0xf] %vm4911_vm10, %v4860_v12 }
 0x610   : > { %v4576_v9 = vand.u32 2147483648, %v15616_v15  ;;  %v4739_v20 = vmul.f32 %v15626_v6, %v15625_v24  ;;  %v4863_v36 = vpack.c.bf16 %v4735_v44, %v4735_v44  ;;  %v13418_v28 = vsel %vm13325_vm6, %v4517_v0, %v4513_v10  ;;  %v15629_v44 = vld [vmem:[#allocation96_spill] sm:$0xff]  ;;  %4990 = vst.msk [vmem:[%s12592_s14 + $0x138] sm:$0xf] %vm4911_vm10, %v4861_v38  ;;  %v15633_v47 = vld [vmem:[#allocation227_spill] sm:$0xff]  ;;  %v15635_v38 = vld [vmem:[#allocation193_spill] sm:$0xff] }
 0x611   : > { %v4537_v50 = vsub.f32 1.0, %v4536_v57  ;;  %v4740_v48 = vmul.f32 %v15628_v60, %v15627_v59  ;;  %v4864_v41 = vpack.c.bf16 %v4736_v52, %v4736_v52  ;;  %v4524_v54 = vadd.f32 %v13265_v53, %v4523_v32  ;;  %v15631_v57 = vld [vmem:[#allocation97_spill] sm:$0xff]  ;;  %v15632_v52 = vld [vmem:[#allocation192_spill] sm:$0xff]  ;;  %4991 = vst.msk [vmem:[%s12592_s14 + $0x13c] sm:$0xf] %vm4911_vm10, %v4862_v27  ;;  %v15638_v24 = vld [vmem:[#allocation99_spill] sm:$0xff] }
 0x612   : > { %vm4541_vm8 = vweird.f32 %v13345_v4  ;;  %v4741_v58 = vmul.f32 %v15630_v22, %v15629_v44  ;;  %v4865_v35 = vpack.c.bf16 %v4737_v17, %v4737_v17  ;;  %v13430_v0 = vpop.eup %6150  ;;  %v4552_v25 = vsub.f32 1.0, %v4551_v49  ;;  %v15634_v17 = vld [vmem:[#allocation98_spill] sm:$0xff]  ;;  %4992 = vst.msk [vmem:[%s12592_s14 + $0x140] sm:$0xf] %vm4911_vm10, %v4863_v36  ;;  %v15640_v60 = vld [vmem:[#allocation100_spill] sm:$0xff] }
 0x613   : > { %vm4556_vm13 = vweird.f32 %v13353_v33  ;;  %v4742_v12 = vmul.f32 %v15632_v52, %v15631_v57  ;;  %v4866_v10 = vpack.c.bf16 %v4738_v46, %v4738_v46  ;;  %vm4540_vm15 = vweird.f32 %v15591_v39  ;;  %v15639_v6 = vld [vmem:[#allocation194_spill] sm:$0xff]  ;;  %4993 = vst.msk [vmem:[%s12592_s14 + $0x144] sm:$0xf] %vm4911_vm10, %v4864_v41  ;;  %v15642_v41 = vld [vmem:[#allocation101_spill] sm:$0xff]  ;;  %v15643_v52 = vld [vmem:[#allocation196_spill] sm:$0xff] }
 0x614   : > { %v13438_v32 = vor.u32 1.1754944e-38, %v4576_v9  ;;  %6152 = vrcp.f32 %v15633_v47  ;;  %v4743_v5 = vmul.f32 %v15635_v38, %v15634_v17  ;;  %v4867_v49 = vpack.c.bf16 %v4739_v20, %v4739_v20  ;;  %4994 = vst.msk [vmem:[%s12592_s14 + $0x148] sm:$0xf] %vm4911_vm10, %v4865_v35  ;;  %v15647_v35 = vld [vmem:[#allocation102_spill] sm:$0xff]  ;;  %vm13527_vm11 = vmor %vm4540_vm15, %vm4541_vm8 }
 0x615   : > { %v4538_v27 = vmul.f32 %v13345_v4, %v4537_v50  ;;  %vm4555_vm12 = vweird.f32 %v15594_v62  ;;  %v4589_v9 = vand.u32 2147483647, %v15633_v47  ;;  %v4744_v20 = vmul.f32 %v15639_v6, %v15638_v24  ;;  %v15641_v50 = vld [vmem:[#allocation195_spill] sm:$0xff]  ;;  %4995 = vst.msk [vmem:[%s12592_s14 + $0x14c] sm:$0xf] %vm4911_vm10, %v4866_v10  ;;  %v15675_v10 = vld [vmem:[#allocation209_spill] sm:$0xff] }
 0x616   : > { %v4868_v59 = vpack.c.bf16 %v4740_v48, %v4740_v48  ;;  %v4528_v40 = vsel %vm13449_vm3, %v13265_v53, %v4524_v54  ;;  %v4566_v36 = vmul.f32 %v13430_v0, %v15616_v15  ;;  %v4745_v44 = vmul.f32 %v15641_v50, %v15640_v60  ;;  %v15646_v54 = vld [vmem:[#allocation228_spill] sm:$0xff]  ;;  %4996 = vst.msk [vmem:[%s12592_s14 + $0x150] sm:$0xf] %vm4911_vm10, %v4867_v49  ;;  %v15651_v6 = vld [vmem:[#allocation103_spill] sm:$0xff]  ;;  %v15652_v60 = vld [vmem:[#allocation130_spill] sm:$0xff] }
 0x617   : > { %v4869_v22 = vpack.c.bf16 %v4741_v58, %v4741_v58  ;;  %v4553_v57 = vmul.f32 %v13353_v33, %v4552_v25  ;;  %v4591_v48 = vand.u32 2147483648, %v15633_v47  ;;  %v4746_v17 = vmul.f32 %v15643_v52, %v15642_v41  ;;  %v15648_v25 = vld [vmem:[#allocation199_spill] sm:$0xff]  ;;  %v15655_v52 = vld [vmem:[#allocation230_spill] sm:$0xff]  ;;  %vm13547_vm6 = vmor %vm4555_vm12, %vm4556_vm13 }
 0x618   : > { %v4870_v38 = vpack.c.bf16 %v4742_v12, %v4742_v12  ;;  %vm13477_vm14 = vcmp.eq.f32.partialorder %v4544_v29, 8.507059e+37  ;;  %6154 = vrcp.f32 %v15646_v54  ;;  %v4604_v58 = vand.u32 2147483647, %v15646_v54  ;;  %4997 = vst.msk [vmem:[%s12592_s14 + $0x154] sm:$0xf] %vm4911_vm10, %v4868_v59  ;;  %v15672_v53 = vld [vmem:[#allocation112_spill] sm:$0xff] }
 0x619   : > { %v4747_v46 = vmul.f32 %v15648_v25, %v15647_v35  ;;  %v4871_v24 = vpack.c.bf16 %v4743_v5, %v4743_v5  ;;  %v13490_v12 = vsel %vm13405_vm1, %v13329_v43, %v4528_v40  ;;  %v4539_v29 = vadd.f32 %v13345_v4, %v4538_v27  ;;  %v15654_v40 = vld [vmem:[#allocation104_spill] sm:$0xff]  ;;  %4998 = vst.msk [vmem:[%s12592_s14 + $0x158] sm:$0xf] %vm4911_vm10, %v4869_v22 }
 0x61a   : > { %vm13495_vm0 = vcmp.eq.f32.partialorder %v4559_v21, 8.507059e+37  ;;  %v4748_v50 = vmul.f32 %v15652_v60, %v15651_v6  ;;  %v4872_v5 = vpack.c.bf16 %v4744_v20, %v4744_v20  ;;  %v13503_v49 = vpop.eup %6152  ;;  %v4567_v43 = vsub.f32 1.0, %v4566_v36  ;;  %v15656_v20 = vld [vmem:[#allocation105_spill] sm:$0xff]  ;;  %4999 = vst.msk [vmem:[%s12592_s14 + $0x15c] sm:$0xf] %vm4911_vm10, %v4870_v38  ;;  %v15657_v36 = vld [vmem:[#allocation231_spill] sm:$0xff] }
 0x61b   : > { %6156 = vrcp.f32 %v15653_v1  ;;  %v4749_v27 = vmul.f32 %v12368_v11, %v15654_v40  ;;  %v4873_v41 = vpack.c.bf16 %v4745_v44, %v4745_v44  ;;  %v4554_v21 = vadd.f32 %v13353_v33, %v4553_v57  ;;  %v15658_v11 = vld [vmem:[#allocation106_spill] sm:$0xff]  ;;  %5000 = vst.msk [vmem:[%s12592_s14 + $0x160] sm:$0xf] %vm4911_vm10, %v4871_v24  ;;  %v15661_v38 = vld [vmem:[#allocation107_spill] sm:$0xff]  ;;  %v15664_v24 = vld [vmem:[#allocation108_spill] sm:$0xff] }
 0x61c   : > { %6158 = vrcp.f32 %v15655_v52  ;;  %v4750_v59 = vmul.f32 %v12377_v2, %v15656_v20  ;;  %v4874_v35 = vpack.c.bf16 %v4746_v17, %v4746_v17  ;;  %vm4570_vm2 = vweird.f32 %v15616_v15  ;;  %5001 = vst.msk [vmem:[%s12592_s14 + $0x164] sm:$0xf] %vm4911_vm10, %v4872_v5 }
 0x61d   : > { %vm4571_vm4 = vweird.f32 %v13430_v0  ;;  %6160 = vrcp.f32 %v15657_v36  ;;  %v4751_v44 = vmul.f32 %v12381_v42, %v15658_v11  ;;  %v4875_v22 = vpack.c.bf16 %v4747_v46, %v4747_v46  ;;  %5002 = vst.msk [vmem:[%s12592_s14 + $0x168] sm:$0xf] %vm4911_vm10, %v4873_v41  ;;  %v15667_v41 = vld [vmem:[#allocation200_spill] sm:$0xff]  ;;  %v15670_v11 = vld [vmem:[#allocation111_spill] sm:$0xff] }
 0x61e   : > { %v13531_v57 = vor.u32 1.1754944e-38, %v4591_v48  ;;  %v4606_v17 = vand.u32 2147483648, %v15646_v54  ;;  %v4752_v25 = vmul.f32 %v12415_v7, %v15661_v38  ;;  %v4876_v42 = vpack.c.bf16 %v4748_v50, %v4748_v50  ;;  %v13538_v46 = vpop.eup %6154  ;;  %5003 = vst.msk [vmem:[%s12592_s14 + $0x16c] sm:$0xf] %vm4911_vm10, %v4874_v35  ;;  %vm13623_vm7 = vmor %vm4570_vm2, %vm4571_vm4 }
 0x61f   : > { %v4543_v39 = vsel %vm13527_vm11, %v13345_v4, %v4539_v29  ;;  %v4568_v7 = vmul.f32 %v13430_v0, %v4567_v43  ;;  %v4753_v6 = vmul.f32 %v12457_v14, %v15664_v24  ;;  %v4877_v60 = vpack.c.bf16 %v4749_v27, %v4749_v27  ;;  %v15665_v29 = vld [vmem:[#allocation109_spill] sm:$0xff]  ;;  %v15666_v27 = vld [vmem:[#allocation110_spill] sm:$0xff]  ;;  %5004 = vst.msk [vmem:[%s12592_s14 + $0x170] sm:$0xf] %vm4911_vm10, %v4875_v22 }
 0x620   : > { %v4558_v4 = vsel %vm13547_vm6, %v13353_v33, %v4554_v21  ;;  %v4581_v62 = vmul.f32 %v13503_v49, %v15633_v47  ;;  %v4754_v50 = vmul.f32 %v12509_v56, %v15665_v29  ;;  %v4878_v5 = vpack.c.bf16 %v4750_v59, %v4750_v59  ;;  %5005 = vst.msk [vmem:[%s12592_s14 + $0x174] sm:$0xf] %vm4911_vm10, %v4876_v42  ;;  %v15674_v42 = vld [vmem:[#allocation113_spill] sm:$0xff]  ;;  %v15687_v59 = vld [vmem:[#allocation120_spill] sm:$0xff] }
 0x621   : > { %v13565_v43 = vpop.eup %6156  ;;  %v4619_v14 = vand.u32 2147483647, %v15653_v1  ;;  %v4621_v40 = vand.u32 2147483648, %v15653_v1  ;;  %v4755_v33 = vmul.f32 %v15667_v41, %v15666_v27  ;;  %v4879_v21 = vpack.c.bf16 %v4751_v44, %v4751_v44  ;;  %v15671_v44 = vld [vmem:[#allocation132_spill] sm:$0xff]  ;;  %5006 = vst.msk [vmem:[%s12592_s14 + $0x178] sm:$0xf] %vm4911_vm10, %v4877_v60 }
 0x622   : > { %v13573_v20 = vpop.eup %6158  ;;  %v13578_v56 = vsel %vm13477_vm14, %v13360_v16, %v4543_v39  ;;  %vm13582_vm9 = vcmp.eq.f32.partialorder %v4574_v37, 8.507059e+37  ;;  %v4596_v35 = vmul.f32 %v13538_v46, %v15646_v54  ;;  %v4756_v22 = vmul.f32 %v15671_v44, %v15670_v11  ;;  %v15673_v39 = vld [vmem:[#allocation131_spill] sm:$0xff]  ;;  %5007 = vst.msk [vmem:[%s12592_s14 + $0x17c] sm:$0xf] %vm4911_vm10, %v4878_v5  ;;  %v15680_v11 = vld [vmem:[#allocation116_spill] sm:$0xff] }
 0x623   : > { %v4880_v2 = vpack.c.bf16 %v4752_v25, %v4752_v25  ;;  %v13592_v38 = vpop.eup %6160  ;;  %v13597_v16 = vsel %vm13495_vm0, %v13409_v63, %v4558_v4  ;;  %v4569_v37 = vadd.f32 %v13430_v0, %v4568_v7  ;;  %v4757_v48 = vmul.f32 %v15673_v39, %v15672_v53  ;;  %v15676_v4 = vld [vmem:[#allocation114_spill] sm:$0xff]  ;;  %5008 = vst.msk [vmem:[%s12592_s14 + $0x180] sm:$0xf] %vm4911_vm10, %v4879_v21  ;;  %v15679_v41 = vld [vmem:[#allocation115_spill] sm:$0xff] }
 0x624   : > { %v4881_v24 = vpack.c.bf16 %v4753_v6, %v4753_v6  ;;  %v4582_v29 = vsub.f32 1.0, %v4581_v62  ;;  %vm4586_vm5 = vweird.f32 %v13503_v49  ;;  %v4611_v25 = vmul.f32 %v13565_v43, %v15653_v1 }
 0x625   : > { %v4758_v27 = vmul.f32 %v15675_v10, %v15674_v42  ;;  %v4882_v63 = vpack.c.bf16 %v4754_v50, %v4754_v50  ;;  %v13611_v7 = vor.u32 1.1754944e-38, %v4606_v17  ;;  %v4626_v6 = vmul.f32 %v13573_v20, %v15655_v52  ;;  %5009 = vst.msk [vmem:[%s12592_s14 + $0x184] sm:$0xf] %vm4911_vm10, %v4880_v2  ;;  %v15681_v2 = vld [vmem:[#allocation117_spill] sm:$0xff] }
 0x626   : > { %v4759_v60 = vmul.f32 %v12627_v30, %v15676_v4  ;;  %v4883_v62 = vpack.c.bf16 %v4755_v33, %v4755_v33  ;;  %vm4585_vm1 = vweird.f32 %v15633_v47  ;;  %v4597_v17 = vsub.f32 1.0, %v4596_v35  ;;  %5010 = vst.msk [vmem:[%s12592_s14 + $0x188] sm:$0xf] %vm4911_vm10, %v4881_v24  ;;  %v15690_v50 = vld [vmem:[#allocation121_spill] sm:$0xff] }
 0x627   : > { %v4641_v5 = vmul.f32 %v13592_v38, %v15657_v36  ;;  %v4760_v30 = vmul.f32 %v12701_v3, %v15679_v41  ;;  %v4884_v33 = vpack.c.bf16 %v4756_v22, %v4756_v22  ;;  %v4573_v15 = vsel %vm13623_vm7, %v13430_v0, %v4569_v37  ;;  %5011 = vst.msk [vmem:[%s12592_s14 + $0x18c] sm:$0xf] %vm4911_vm10, %v4882_v63  ;;  %vm13711_vm4 = vmor %vm4585_vm1, %vm4586_vm5 }
 0x628   : > { %vm4601_vm8 = vweird.f32 %v13538_v46  ;;  %v13638_v21 = vor.u32 1.1754944e-38, %v4621_v40  ;;  %v4761_v35 = vmul.f32 %v12757_v19, %v15680_v11  ;;  %v4885_v44 = vpack.c.bf16 %v4757_v48, %v4757_v48  ;;  %v15682_v19 = vld [vmem:[#allocation2_spill] sm:$0xff]  ;;  %5012 = vst.msk [vmem:[%s12592_s14 + $0x190] sm:$0xf] %vm4911_vm10, %v4883_v62 }
 0x629   : > { %v4583_v3 = vmul.f32 %v13503_v49, %v4582_v29  ;;  %v4612_v22 = vsub.f32 1.0, %v4611_v25  ;;  %v4762_v53 = vmul.f32 %v12808_v26, %v15681_v2  ;;  %v4886_v39 = vpack.c.bf16 %v4758_v27, %v4758_v27  ;;  %v15683_v29 = vld [vmem:[#allocation118_spill] sm:$0xff]  ;;  %5013 = vst.msk [vmem:[%s12592_s14 + $0x194] sm:$0xf] %vm4911_vm10, %v4884_v33  ;;  %v15684_v27 = vld [vmem:[#allocation119_spill] sm:$0xff] }
 0x62a   : > { %vm4600_vm13 = vweird.f32 %v15646_v54  ;;  %v4627_v0 = vsub.f32 1.0, %v4626_v6  ;;  %v4634_v40 = vand.u32 2147483647, %v15655_v52  ;;  %v4763_v37 = vmul.f32 %v12888_v18, %v15682_v19  ;;  %5014 = vst.msk [vmem:[%s12592_s14 + $0x198] sm:$0xf] %vm4911_vm10, %v4885_v44  ;;  %v15703_v19 = vld [vmem:[#allocation7_spill] sm:$0xff] }
 0x62b   : > { %v4887_v48 = vpack.c.bf16 %v4759_v60, %v4759_v60  ;;  %vm4615_vm15 = vweird.f32 %v15653_v1  ;;  %v4636_v24 = vand.u32 2147483648, %v15655_v52  ;;  %v4642_v26 = vsub.f32 1.0, %v4641_v5  ;;  %5015 = vst.msk [vmem:[%s12592_s14 + $0x19c] sm:$0xf] %vm4911_vm10, %v4886_v39  ;;  %vm13743_vm5 = vmor %vm4600_vm13, %vm4601_vm8 }
 0x62c   : > { %v4764_v25 = vmul.f32 %v12953_v23, %v15683_v29  ;;  %v4888_v42 = vpack.c.bf16 %v4760_v30, %v4760_v30  ;;  %v13664_v10 = vsel %vm13582_vm9, %v13438_v32, %v4573_v15  ;;  %v4598_v18 = vmul.f32 %v13538_v46, %v4597_v17  ;;  %v15693_v30 = vld [vmem:[#allocation122_spill] sm:$0xff] }
 0x62d   : > { %vm4630_vm3 = vweird.f32 %v15655_v52  ;;  %v4765_v63 = vmul.f32 %v12964_v13, %v15684_v27  ;;  %v4889_v6 = vpack.c.bf16 %v4761_v35, %v4761_v35  ;;  %v4584_v23 = vadd.f32 %v13503_v49, %v4583_v3  ;;  %5016 = vst.msk [vmem:[%s12592_s14 + $0x1a0] sm:$0xf] %vm4911_vm10, %v4887_v48 }
 0x62e   : > { %vm13675_vm12 = vcmp.eq.f32.partialorder %v4589_v9, 8.507059e+37  ;;  %v4613_v32 = vmul.f32 %v13565_v43, %v4612_v22  ;;  %v4766_v60 = vmul.f32 %v13027_v31, %v15687_v59  ;;  %v4890_v62 = vpack.c.bf16 %v4762_v53, %v4762_v53  ;;  %5017 = vst.msk [vmem:[%s12592_s14 + $0x1a4] sm:$0xf] %vm4911_vm10, %v4888_v42  ;;  %v15699_v22 = vld [vmem:[#allocation3_spill] sm:$0xff]  ;;  %v15714_v59 = vld [vmem:[#allocation124_spill] sm:$0xff] }
 0x62f   : > { %vm13686_vm14 = vcmp.eq.f32.partialorder %v4604_v58, 8.507059e+37  ;;  %vm4616_vm0 = vweird.f32 %v13565_v43  ;;  %v4628_v9 = vmul.f32 %v13573_v20, %v4627_v0  ;;  %v4767_v17 = vmul.f32 %v13092_v34, %v15690_v50  ;;  %5018 = vst.msk [vmem:[%s12592_s14 + $0x1a8] sm:$0xf] %vm4911_vm10, %v4889_v6  ;;  %v15709_v42 = vld [vmem:[#allocation11_spill] sm:$0xff] }
 0x630   : > { %v4891_v5 = vpack.c.bf16 %v4763_v37, %v4763_v37  ;;  %vm13698_vm2 = vcmp.eq.f32.partialorder %v4619_v14, 8.507059e+37  ;;  %v4637_v58 = vor.u32 1.1754944e-38, %v4636_v24  ;;  %v4643_v41 = vmul.f32 %v13592_v38, %v4642_v26  ;;  %5019 = vst.msk [vmem:[%s12592_s14 + $0x1ac] sm:$0xf] %vm4911_vm10, %v4890_v62  ;;  %vm13760_vm1 = vmor %vm4615_vm15, %vm4616_vm0  ;;  %v15706_v26 = vld [vmem:[#allocation9_spill] sm:$0xff] }
 0x631   : > { %v4768_v33 = vmul.f32 %v13174_v61, %v15693_v30  ;;  %v4892_v15 = vpack.c.bf16 %v4764_v25, %v4764_v25  ;;  %v4599_v14 = vadd.f32 %v13538_v46, %v4598_v18  ;;  %vm13716_vm11 = vcmp.eq.f32.partialorder %v4634_v40, 8.507059e+37  ;;  %v15698_v61 = vld [vmem:[#allocation123_spill] sm:$0xff] }
 0x632   : > { %vm4645_vm6 = vweird.f32 %v15657_v36  ;;  %v4769_v35 = vmul.f32 %v13192_v45, %v15698_v61  ;;  %v4893_v44 = vpack.c.bf16 %v4765_v63, %v4765_v63  ;;  %v4588_v47 = vsel %vm13711_vm4, %v13503_v49, %v4584_v23  ;;  %v15700_v45 = vld [vmem:[#allocation5_spill] sm:$0xff]  ;;  %5020 = vst.msk [vmem:[%s12592_s14 + $0x1b0] sm:$0xf] %vm4911_vm10, %v4891_v5 }
 0x633   : > { %v4614_v3 = vadd.f32 %v13565_v43, %v4613_v32  ;;  %v4770_v2 = vmul.f32 %v13270_v8, %v15699_v22  ;;  %v4894_v53 = vpack.c.bf16 %v4766_v60, %v4766_v60  ;;  %v4629_v39 = vadd.f32 %v13573_v20, %v4628_v9  ;;  %5021 = vst.msk [vmem:[%s12592_s14 + $0x1b4] sm:$0xf] %vm4911_vm10, %v4892_v15  ;;  %v15716_v9 = vld [vmem:[#allocation126_spill] sm:$0xff] }
 0x634   : > { %vm4631_vm9 = vweird.f32 %v13573_v20  ;;  %v4771_v0 = vmul.f32 %v13338_v55, %v15700_v45  ;;  %v4895_v40 = vpack.c.bf16 %v4767_v17, %v4767_v17  ;;  %v4644_v49 = vadd.f32 %v13592_v38, %v4643_v41  ;;  %5022 = vst.msk [vmem:[%s12592_s14 + $0x1b8] sm:$0xf] %vm4911_vm10, %v4893_v44  ;;  %v15717_v17 = vld [vmem:[#allocation127_spill] sm:$0xff] }
 0x635   : > { %vm4646_vm7 = vweird.f32 %v13592_v38  ;;  %v4772_v37 = vmul.f32 %v13358_v51, %v15703_v19  ;;  %v4896_v55 = vpack.c.bf16 %v4768_v33, %v4768_v33  ;;  %v4603_v48 = vsel %vm13743_vm5, %v13538_v46, %v4599_v14  ;;  %vm13776_vm8 = vmor %vm4630_vm3, %vm4631_vm9  ;;  %5023 = vst.msk [vmem:[%s12592_s14 + $0x1bc] sm:$0xf] %vm4911_vm10, %v4894_v53  ;;  %v15719_v33 = vld [vmem:[#allocation129_spill] sm:$0xff] }
 0x636   : > { %v4651_v24 = vand.u32 2147483648, %v15657_v36  ;;  %v4773_v51 = vmul.f32 %v13418_v28, %v15706_v26  ;;  %v4897_v29 = vpack.c.bf16 %v4769_v35, %v4769_v35  ;;  %v4618_v46 = vsel %vm13760_vm1, %v13565_v43, %v4614_v3  ;;  %vm13795_vm13 = vmor %vm4645_vm6, %vm4646_vm7  ;;  %5024 = vst.msk [vmem:[%s12592_s14 + $0x1c0] sm:$0xf] %vm4911_vm10, %v4895_v40 }
 0x637   : > { %v4649_v25 = vand.u32 2147483647, %v15657_v36  ;;  %v4774_v28 = vmul.f32 %v13490_v12, %v15709_v42  ;;  %v4898_v18 = vpack.c.bf16 %v4770_v2, %v4770_v2  ;;  %v4593_v43 = vsel %vm13675_vm12, %v13531_v57, %v4588_v47  ;;  %v15712_v12 = vld [vmem:[#allocation13_spill] sm:$0xff]  ;;  %v15713_v36 = vld [vmem:[#allocation15_spill] sm:$0xff]  ;;  %5025 = vst.msk [vmem:[%s12592_s14 + $0x1c4] sm:$0xf] %vm4911_vm10, %v4896_v55 }
 0x638   : > { %v4633_v52 = vsel %vm13776_vm8, %v13573_v20, %v4629_v39  ;;  %v4775_v63 = vmul.f32 %v13578_v56, %v15712_v12  ;;  %v4899_v6 = vpack.c.bf16 %v4771_v0, %v4771_v0  ;;  %v4608_v57 = vsel %vm13686_vm14, %v13611_v7, %v4603_v48  ;;  %5026 = vst.msk [vmem:[%s12592_s14 + $0x1c8] sm:$0xf] %vm4911_vm10, %v4897_v29 }
 0x639   : > { %v4648_v20 = vsel %vm13795_vm13, %v13592_v38, %v4644_v49  ;;  %v4776_v23 = vmul.f32 %v13597_v16, %v15713_v36  ;;  %v4900_v4 = vpack.c.bf16 %v4772_v37, %v4772_v37  ;;  %v4623_v56 = vsel %vm13698_vm2, %v13638_v21, %v4618_v46  ;;  %v15715_v16 = vld [vmem:[#allocation125_spill] sm:$0xff]  ;;  %5027 = vst.msk [vmem:[%s12592_s14 + $0x1cc] sm:$0xf] %vm4911_vm10, %v4898_v18 }
 0x63a   : > { %v4652_v32 = vor.u32 1.1754944e-38, %v4651_v24  ;;  %v4777_v7 = vmul.f32 %v13664_v10, %v15714_v59  ;;  %v4901_v60 = vpack.c.bf16 %v4773_v51, %v4773_v51  ;;  %v4638_v38 = vsel %vm13716_vm11, %v4637_v58, %v4633_v52  ;;  %5028 = vst.msk [vmem:[%s12592_s14 + $0x1d0] sm:$0xf] %vm4911_vm10, %v4899_v6  ;;  %v15718_v58 = vld [vmem:[#allocation128_spill] sm:$0xff] }
 0x63b   : > { %vm4650_vm15 = vcmp.eq.f32.partialorder %v4649_v25, 8.507059e+37  ;;  %v4778_v62 = vmul.f32 %v4593_v43, %v15715_v16  ;;  %v4902_v13 = vpack.c.bf16 %v4774_v28, %v4774_v28  ;;  %v4779_v50 = vmul.f32 %v4608_v57, %v15716_v9  ;;  %5029 = vst.msk [vmem:[%s12592_s14 + $0x1d4] sm:$0xf] %vm4911_vm10, %v4900_v4 }
 0x63c   : > { %v4653_v21 = vsel %vm4650_vm15, %v4652_v32, %v4648_v20  ;;  %v4903_v10 = vpack.c.bf16 %v4775_v63, %v4775_v63  ;;  %v4780_v5 = vmul.f32 %v4623_v56, %v15717_v17  ;;  %v4904_v31 = vpack.c.bf16 %v4776_v23, %v4776_v23  ;;  %5030 = vst.msk [vmem:[%s12592_s14 + $0x1d8] sm:$0xf] %vm4911_vm10, %v4901_v60 }
 0x63d   : > { %v4781_v41 = vmul.f32 %v4638_v38, %v15718_v58  ;;  %v4905_v30 = vpack.c.bf16 %v4777_v7, %v4777_v7  ;;  %v4782_v15 = vmul.f32 %v4653_v21, %v15719_v33  ;;  %v4906_v34 = vpack.c.bf16 %v4778_v62, %v4778_v62  ;;  %5031 = vst.msk [vmem:[%s12592_s14 + $0x1dc] sm:$0xf] %vm4911_vm10, %v4902_v13 }
 0x63e   : > { %v4907_v14 = vpack.c.bf16 %v4779_v50, %v4779_v50  ;;  %5032 = vst.msk [vmem:[%s12592_s14 + $0x1e0] sm:$0xf] %vm4911_vm10, %v4903_v10  ;;  %v4908_v11 = vpack.c.bf16 %v4780_v5, %v4780_v5 }
 0x63f   : > { %5033 = vst.msk [vmem:[%s12592_s14 + $0x1e4] sm:$0xf] %vm4911_vm10, %v4904_v31  ;;  %v4909_v61 = vpack.c.bf16 %v4781_v41, %v4781_v41  ;;  %v4910_v35 = vpack.c.bf16 %v4782_v15, %v4782_v15 }
 0x640   : > { %5034 = vst.msk [vmem:[%s12592_s14 + $0x1e8] sm:$0xf] %vm4911_vm10, %v4905_v30 }
 0x641   : > { %5035 = vst.msk [vmem:[%s12592_s14 + $0x1ec] sm:$0xf] %vm4911_vm10, %v4906_v34 }
 0x642   : > { %5036 = vst.msk [vmem:[%s12592_s14 + $0x1f0] sm:$0xf] %vm4911_vm10, %v4907_v14 }
 0x643   : > { %5037 = vst.msk [vmem:[%s12592_s14 + $0x1f4] sm:$0xf] %vm4911_vm10, %v4908_v11 }
 0x644   : > { %5038 = vst.msk [vmem:[%s12592_s14 + $0x1f8] sm:$0xf] %vm4911_vm10, %v4909_v61 }
 0x645   : > { %5039 = vst.msk [vmem:[%s12592_s14 + $0x1fc] sm:$0xf] %vm4911_vm10, %v4910_v35 }
 0x646 PF: > { %s16_s21 = sadd.s32 1, %s6169_s21  }
 0x647   : > { %p13_p4 = scmp.ge.s32.totalorder %s16_s21, 4  }
 0x649   :  { %15 = sbr.rel (!%p13_p4) target bundleno = 1 (0x1), region = 74 }

</bundles_post_ra>
